<compile_context>
chip_gen: v7x
topology: tpu7x:2x2x1
jax: 0.10.0
libtpu: 0.0.40
codegen_flags: <defaults>
</compile_context>

<pallas_src>
import functools
import math

import jax
import jax.numpy as jnp
from jax.experimental import pallas as pl
from jax.experimental.pallas import tpu as pltpu

_VMEM_LIMIT = 32 * 1024 * 1024     # raises v5e's 16MiB scoped default; == v6e/v7x default
_NEG_INF = -1e30                   # finite "−inf": avoids inf−inf NaNs in online softmax


def _cparams(semantics):
    return pltpu.CompilerParams(dimension_semantics=semantics,
                                vmem_limit_bytes=_VMEM_LIMIT)


def _pick_tile(dim, candidates):
    for c in candidates:
        if dim % c == 0:
            return c
    # TODO(synk): pad + mask awkward production shapes instead of full-extent fallback.
    return dim


# --------------------------------------------------------------------------
# Linear (x @ W + b), N-outer grid so the weight streams from HBM once.
# --------------------------------------------------------------------------

def _linear_kernel(x_ref, w_ref, b_ref, o_ref, *, activation):
    y = jnp.dot(x_ref[...], w_ref[...], preferred_element_type=jnp.float32)
    y = y + b_ref[...].astype(jnp.float32)
    if activation == "relu":
        y = jnp.maximum(y, 0.0)
    o_ref[...] = y.astype(o_ref.dtype)


def linear(x, w, b, activation=None, out_dtype=None):
    lead = x.shape[:-1]
    K = x.shape[-1]
    N = w.shape[1]
    M = int(math.prod(lead))
    out_dtype = out_dtype or x.dtype
    x2 = x.reshape(M, K)
    b2 = b.reshape(1, N).astype(jnp.float32)
    tm = _pick_tile(M, (512, 256, 128))
    tn = _pick_tile(N, (512, 256, 128))
    # N (weight columns) is the OUTER grid axis -> each (K, tn) weight block is
    # fetched once and stays resident while the small activation block cycles.
    out = pl.pallas_call(
        functools.partial(_linear_kernel, activation=activation),
        out_shape=jax.ShapeDtypeStruct((M, N), out_dtype),
        grid=(N // tn, M // tm),
        in_specs=[
            pl.BlockSpec((tm, K), lambda n, m: (m, 0)),
            pl.BlockSpec((K, tn), lambda n, m: (0, n)),
            pl.BlockSpec((1, tn), lambda n, m: (0, n)),
        ],
        out_specs=pl.BlockSpec((tm, tn), lambda n, m: (m, n)),
        compiler_params=_cparams(("parallel", "parallel")),
    )(x2, w, b2)
    return out.reshape(*lead, N)


# --------------------------------------------------------------------------
# Flash-style multi-head attention over a fused QKV / KV tensor.
# --------------------------------------------------------------------------

def _mha_kernel(*refs, num_heads, head_dim, scale, causal, has_kbias, tq, tk):
    if has_kbias:
        q_ref, k_ref, v_ref, kb_ref, o_ref, m_sc, l_sc, acc_sc = refs
    else:
        q_ref, k_ref, v_ref, o_ref, m_sc, l_sc, acc_sc = refs
    ki = pl.program_id(2)

    @pl.when(ki == 0)
    def _():
        m_sc[...] = jnp.full(m_sc.shape, _NEG_INF, m_sc.dtype)
        l_sc[...] = jnp.zeros(l_sc.shape, l_sc.dtype)
        acc_sc[...] = jnp.zeros(acc_sc.shape, acc_sc.dtype)

    q = q_ref[0]            # (tq, D) bf16
    k = k_ref[0]            # (tk, D) bf16
    v = v_ref[0]            # (tk, D) bf16

    # Additive bias built in-kernel: causal via iota compares, key padding from
    # a tiny (1, tk) streamed row.  No dense (B,1,Tq,Tk) mask in HBM.
    bias = None
    if causal:
        q0 = pl.program_id(1) * tq
        k0 = ki * tk
        rows = q0 + jax.lax.broadcasted_iota(jnp.int32, (tq, tk), 0)
        cols = k0 + jax.lax.broadcasted_iota(jnp.int32, (tq, tk), 1)
        bias = jnp.where(cols > rows, _NEG_INF, 0.0).astype(jnp.float32)
    if has_kbias:
        kb = kb_ref[0].astype(jnp.float32)        # (1, tk)
        bias = kb if bias is None else bias + kb

    nt = (((1,), (1,)), ((), ()))   # contract last dims: Q @ K^T
    nn = (((1,), (0,)), ((), ()))   # plain matmul:       P @ V

    for h in range(num_heads):                     # static, small H
        sl = slice(h * head_dim, (h + 1) * head_dim)
        qh, kh, vh = q[:, sl], k[:, sl], v[:, sl]
        s = jax.lax.dot_general(qh, kh, nt,
                                preferred_element_type=jnp.float32) * scale
        if bias is not None:
            s = s + bias
        m_prev = m_sc[h]                           # (tq, 1) f32
        m_new = jnp.maximum(m_prev, jnp.max(s, axis=-1, keepdims=True))
        alpha = jnp.exp(m_prev - m_new)
        p = jnp.exp(s - m_new)
        l_sc[h] = alpha * l_sc[h] + jnp.sum(p, axis=-1, keepdims=True)
        pv = jax.lax.dot_general(p.astype(v.dtype), vh, nn,
                                 preferred_element_type=jnp.float32)
        acc_sc[h] = alpha * acc_sc[h] + pv
        m_sc[h] = m_new

    @pl.when(ki == pl.num_programs(2) - 1)
    def _():
        parts = []
        for h in range(num_heads):
            inv = pl.reciprocal(l_sc[h], approx=True)
            parts.append(acc_sc[h] * inv)
        # merged, lane-dense (tq, D) store
        o_ref[0] = jnp.concatenate(parts, axis=-1).astype(o_ref.dtype)


def _q_spec(tq, d, col):
    def imap(b, qi, ki):
        return (b, qi, col)
    return pl.BlockSpec((1, tq, d), imap)


def _kv_spec(tk, d, col):
    def imap(b, qi, ki):
        return (b, ki, col)
    return pl.BlockSpec((1, tk, d), imap)


def mha_core(q_arr, q_col, kv_arr, k_col, v_col, *, seq_q, seq_kv, d_model,
             num_heads, causal=False, kbias=None, out_dtype):
    """q_arr last dim is a multiple of d_model; (q_col,k_col,v_col) pick the
    d_model-wide column block holding Q / K / V (fused projections)."""
    assert d_model % 128 == 0, "fused-column BlockSpecs require lane-aligned d_model"
    B = q_arr.shape[0]
    head_dim = d_model // num_heads
    tq = _pick_tile(seq_q, (256, 128))
    tk = _pick_tile(seq_kv, (256, 128))
    scale = 1.0 / math.sqrt(head_dim)

    in_specs = [_q_spec(tq, d_model, q_col),
                _kv_spec(tk, d_model, k_col),
                _kv_spec(tk, d_model, v_col)]
    args = [q_arr, kv_arr, kv_arr]
    if kbias is not None:                         # (B, 1, seq_kv) f32 additive
        in_specs.append(pl.BlockSpec((1, 1, tk), lambda b, qi, ki: (b, 0, ki)))
        args.append(kbias)

    kern = functools.partial(_mha_kernel, num_heads=num_heads, head_dim=head_dim,
                             scale=scale, causal=causal,
                             has_kbias=kbias is not None, tq=tq, tk=tk)
    return pl.pallas_call(
        kern,
        out_shape=jax.ShapeDtypeStruct((B, seq_q, d_model), out_dtype),
        grid=(B, seq_q // tq, seq_kv // tk),
        in_specs=in_specs,
        out_specs=pl.BlockSpec((1, tq, d_model), lambda b, qi, ki: (b, qi, 0)),
        scratch_shapes=[
            pltpu.VMEM((num_heads, tq, 1), jnp.float32),        # m
            pltpu.VMEM((num_heads, tq, 1), jnp.float32),        # l
            pltpu.VMEM((num_heads, tq, head_dim), jnp.float32), # acc
        ],
        compiler_params=_cparams(("parallel", "parallel", "arbitrary")),
    )(*args)


# --------------------------------------------------------------------------
# Fused  out-proj + residual + LayerNorm
# --------------------------------------------------------------------------

def _proj_res_ln_kernel(a_ref, r_ref, w_ref, b_ref, g_ref, bt_ref, o_ref):
    y = jnp.dot(a_ref[...], w_ref[...], preferred_element_type=jnp.float32)
    y = y + r_ref[...].astype(jnp.float32) + b_ref[...].astype(jnp.float32)
    mu = jnp.mean(y, axis=-1, keepdims=True)
    var = jnp.mean(jnp.square(y - mu), axis=-1, keepdims=True)
    yn = (y - mu) * jax.lax.rsqrt(var + 1e-5)
    o_ref[...] = (yn * g_ref[...].astype(jnp.float32)
                  + bt_ref[...].astype(jnp.float32)).astype(o_ref.dtype)


def proj_residual_layernorm(attn, residual, wo, bo, ln_g, ln_b):
    B, T, D = residual.shape
    M = B * T
    tm = _pick_tile(M, (512, 256, 128))
    out = pl.pallas_call(
        _proj_res_ln_kernel,
        out_shape=jax.ShapeDtypeStruct((M, D), residual.dtype),
        grid=(M // tm,),
        in_specs=[
            pl.BlockSpec((tm, D), lambda i: (i, 0)),
            pl.BlockSpec((tm, D), lambda i: (i, 0)),
            pl.BlockSpec((D, D), lambda i: (0, 0)),
            pl.BlockSpec((1, D), lambda i: (0, 0)),
            pl.BlockSpec((1, D), lambda i: (0, 0)),
            pl.BlockSpec((1, D), lambda i: (0, 0)),
        ],
        out_specs=pl.BlockSpec((tm, D), lambda i: (i, 0)),
        compiler_params=_cparams(("parallel",)),
    )(attn.reshape(M, D), residual.reshape(M, D), wo, bo.reshape(1, D),
      ln_g.reshape(1, D), ln_b.reshape(1, D))
    return out.reshape(B, T, D)


# --------------------------------------------------------------------------
# Fused FFN (W1 + b1 + ReLU + W2 + b2 + residual + LayerNorm), F tiled.
# --------------------------------------------------------------------------

def _ffn_res_ln_kernel(x_ref, w1_ref, b1_ref, w2_ref, b2_ref, g_ref, bt_ref,
                       o_ref, acc_ref):
    fi = pl.program_id(1)
    x = x_ref[...]                                        # (tm, D) bf16

    @pl.when(fi == 0)
    def _():
        acc_ref[...] = x.astype(jnp.float32) + b2_ref[...].astype(jnp.float32)

    h = jnp.dot(x, w1_ref[...], preferred_element_type=jnp.float32)
    h = jnp.maximum(h + b1_ref[...].astype(jnp.float32), 0.0)
    acc_ref[...] += jnp.dot(h.astype(x.dtype), w2_ref[...],
                            preferred_element_type=jnp.float32)

    @pl.when(fi == pl.num_programs(1) - 1)
    def _():
        y = acc_ref[...]
        mu = jnp.mean(y, axis=-1, keepdims=True)
        var = jnp.mean(jnp.square(y - mu), axis=-1, keepdims=True)
        yn = (y - mu) * jax.lax.rsqrt(var + 1e-5)
        o_ref[...] = (yn * g_ref[...].astype(jnp.float32)
                      + bt_ref[...].astype(jnp.float32)).astype(o_ref.dtype)


def ffn_residual_layernorm(x, w1, b1, w2, b2, ln_g, ln_b):
    B, T, D = x.shape
    F = w1.shape[1]
    M = B * T
    tm = _pick_tile(M, (512, 256, 128))
    tf = _pick_tile(F, (512, 256, 128))
    out = pl.pallas_call(
        _ffn_res_ln_kernel,
        out_shape=jax.ShapeDtypeStruct((M, D), x.dtype),
        grid=(M // tm, F // tf),
        in_specs=[
            pl.BlockSpec((tm, D), lambda i, f: (i, 0)),
            pl.BlockSpec((D, tf), lambda i, f: (0, f)),
            pl.BlockSpec((1, tf), lambda i, f: (0, f)),
            pl.BlockSpec((tf, D), lambda i, f: (f, 0)),
            pl.BlockSpec((1, D), lambda i, f: (0, 0)),
            pl.BlockSpec((1, D), lambda i, f: (0, 0)),
            pl.BlockSpec((1, D), lambda i, f: (0, 0)),
        ],
        out_specs=pl.BlockSpec((tm, D), lambda i, f: (i, 0)),
        scratch_shapes=[pltpu.VMEM((tm, D), jnp.float32)],
        compiler_params=_cparams(("parallel", "arbitrary")),
    )(x.reshape(M, D), w1, b1.reshape(1, F), w2, b2.reshape(1, D),
      ln_g.reshape(1, D), ln_b.reshape(1, D))
    return out.reshape(B, T, D)


# --------------------------------------------------------------------------
# Model components
# --------------------------------------------------------------------------

def self_attention_block(x, p, num_heads, ln_g, ln_b, *, causal=False, kbias=None):
    B, T, D = x.shape
    qkv = linear(x, p["w_qkv"], p["b_qkv"])           # fused (B, T, 3D), no split
    attn = mha_core(qkv, 0, qkv, 1, 2, seq_q=T, seq_kv=T, d_model=D,
                    num_heads=num_heads, causal=causal, kbias=kbias,
                    out_dtype=x.dtype)
    return proj_residual_layernorm(attn, x, p["wo"], p["bo"], ln_g, ln_b)


def cross_attention_block(x, memory, p, num_heads, ln_g, ln_b):
    B, Tq, D = x.shape
    Tk = memory.shape[1]
    q = linear(x, p["wq"], p["bq"])                   # (B, Tq, D)
    kv = linear(memory, p["w_kv"], p["b_kv"])         # fused (B, Tk, 2D)
    attn = mha_core(q, 0, kv, 0, 1, seq_q=Tq, seq_kv=Tk, d_model=D,
                    num_heads=num_heads, causal=False, kbias=None,
                    out_dtype=x.dtype)
    return proj_residual_layernorm(attn, x, p["wo"], p["bo"], ln_g, ln_b)


def encoder_layer(x, p, num_heads):
    # post-LN encoder layer (PyTorch norm_first=False), no src mask
    x = self_attention_block(x, p["self_attn"], num_heads, p["ln1_g"], p["ln1_b"])
    return ffn_residual_layernorm(x, p["ff_w1"], p["ff_b1"], p["ff_w2"], p["ff_b2"],
                                  p["ln2_g"], p["ln2_b"])


def decoder_layer(x, memory, p, kbias, num_heads):
    x = self_attention_block(x, p["self_attn"], num_heads, p["ln1_g"], p["ln1_b"],
                             causal=True, kbias=kbias)
    x = cross_attention_block(x, memory, p["cross_attn"], num_heads,
                              p["ln2_g"], p["ln2_b"])
    return ffn_residual_layernorm(x, p["ff_w1"], p["ff_b1"], p["ff_w2"], p["ff_b2"],
                                  p["ln3_g"], p["ln3_b"])


def backbone_forward(src_nchw, p, patch):
    # TODO(synk): patch im2col (reshape/transpose) stays in XLA glue.
    B, C, H, W = src_nchw.shape
    x = src_nchw.transpose(0, 2, 3, 1)
    hp, wp = H // patch, W // patch
    x = x.reshape(B, hp, patch, wp, patch, C).transpose(0, 1, 3, 2, 4, 5)
    x = x.reshape(B, hp * wp, patch * patch * C).astype(jnp.bfloat16)
    return linear(x, p["w"], p["b"])                  # (B, S, D) bf16


def encoder_decoder_forward(params, src, tgt, tgt_mask, tgt_padding_mask,
                            *, num_heads, d_model, patch):
    # ---- encode ----
    feat = backbone_forward(src, params["backbone"], patch)
    feat = feat + params["pos_table"][: feat.shape[1]].astype(feat.dtype)[None]
    memory = encoder_layer(feat, params["encoder"], num_heads)

    # ---- decode ----
    T = tgt.shape[1]
    # TODO(synk): token-embedding gather stays in plain JAX (no clean tiny-shape Pallas gather).
    tok = jnp.take(params["token_embed"], tgt, axis=0) * math.sqrt(d_model)
    tok = tok + params["pos_table"][:T].astype(tok.dtype)[None]
    # Causal structure of tgt_mask is rebuilt in-kernel (iota compares); only the
    # tiny key-padding additive bias (B,1,T) is streamed to the attention kernel.
    del tgt_mask
    kbias = jnp.where(tgt_padding_mask[:, None, :], _NEG_INF, 0.0).astype(jnp.float32)
    dec = decoder_layer(tok, memory, params["decoder"], kbias, num_heads)

    # ---- generator ----
    return linear(dec, params["generator"]["w"], params["generator"]["b"],
                  out_dtype=jnp.float32)              # (B, T, vocab)


# --------------------------------------------------------------------------
# Deterministic parameter init (weights bf16, biases / LN / pos table f32)
# --------------------------------------------------------------------------

def _sinusoid_table(max_len, d_model):
    pos = jnp.arange(max_len, dtype=jnp.float32)[:, None]
    i = jnp.arange(0, d_model, 2, dtype=jnp.float32)
    div = jnp.exp(-math.log(10000.0) * i / d_model)
    pe = jnp.zeros((max_len, d_model), jnp.float32)
    pe = pe.at[:, 0::2].set(jnp.sin(pos * div))
    pe = pe.at[:, 1::2].set(jnp.cos(pos * div))
    return pe


def init_params(key, *, d_model, dim_ff, vocab_size, patch_dim, max_seq_len, padding_idx):
    keys = iter(jax.random.split(key, 64))

    def xav(shape):
        std = math.sqrt(2.0 / (shape[0] + shape[-1]))
        return (std * jax.random.normal(next(keys), shape, jnp.float32)).astype(jnp.bfloat16)

    def self_attn_p():
        return dict(
            w_qkv=jnp.concatenate([xav((d_model, d_model)) for _ in range(3)], axis=1),
            b_qkv=jnp.zeros((3 * d_model,), jnp.float32),
            wo=xav((d_model, d_model)), bo=jnp.zeros((d_model,), jnp.float32))

    def cross_attn_p():
        return dict(
            wq=xav((d_model, d_model)), bq=jnp.zeros((d_model,), jnp.float32),
            w_kv=jnp.concatenate([xav((d_model, d_model)) for _ in range(2)], axis=1),
            b_kv=jnp.zeros((2 * d_model,), jnp.float32),
            wo=xav((d_model, d_model)), bo=jnp.zeros((d_model,), jnp.float32))

    def ln():
        return jnp.ones((d_model,), jnp.float32), jnp.zeros((d_model,), jnp.float32)

    enc = dict(self_attn=self_attn_p(),
               ff_w1=xav((d_model, dim_ff)), ff_b1=jnp.zeros((dim_ff,), jnp.float32),
               ff_w2=xav((dim_ff, d_model)), ff_b2=jnp.zeros((d_model,), jnp.float32))
    enc["ln1_g"], enc["ln1_b"] = ln()
    enc["ln2_g"], enc["ln2_b"] = ln()

    dec = dict(self_attn=self_attn_p(), cross_attn=cross_attn_p(),
               ff_w1=xav((d_model, dim_ff)), ff_b1=jnp.zeros((dim_ff,), jnp.float32),
               ff_w2=xav((dim_ff, d_model)), ff_b2=jnp.zeros((d_model,), jnp.float32))
    dec["ln1_g"], dec["ln1_b"] = ln()
    dec["ln2_g"], dec["ln2_b"] = ln()
    dec["ln3_g"], dec["ln3_b"] = ln()

    tok = xav((vocab_size, d_model)).at[padding_idx].set(0)

    return dict(
        backbone=dict(w=xav((patch_dim, d_model)), b=jnp.zeros((d_model,), jnp.float32)),
        token_embed=tok,
        pos_table=_sinusoid_table(max_seq_len, d_model),
        encoder=enc,
        decoder=dec,
        generator=dict(w=xav((d_model, vocab_size)),
                       b=jnp.zeros((vocab_size,), jnp.float32)),
    )


# --------------------------------------------------------------------------
# Main
# --------------------------------------------------------------------------

if __name__ == "__main__":
    B, C, H, W = 2, 3, 16, 16
    patch = 4                       # backbone: Conv2d(C, d_model, k=4, s=4) -> S = 16
    d_model, num_heads, dim_ff = 128, 4, 256   # D lane-aligned for fused-column BlockSpecs
    vocab_size, padding_idx, max_seq_len = 16, 0, 32
    T = 8

    key = jax.random.PRNGKey(0)
    k_param, k_src, k_tgt = jax.random.split(key, 3)

    params = init_params(k_param, d_model=d_model, dim_ff=dim_ff,
                         vocab_size=vocab_size, patch_dim=patch * patch * C,
                         max_seq_len=max_seq_len, padding_idx=padding_idx)

    src = jax.random.normal(k_src, (B, C, H, W), dtype=jnp.float32)
    tgt = jax.random.randint(k_tgt, (B, T), 1, vocab_size, dtype=jnp.int32)
    tgt = tgt.at[1, -2:].set(padding_idx)

    # standard causal mask (kept for API parity; causal term is rebuilt in-kernel)
    tgt_mask = jnp.where(jnp.triu(jnp.ones((T, T), jnp.bool_), k=1),
                         _NEG_INF, 0.0).astype(jnp.float32)
    tgt_padding_mask = (tgt == padding_idx)

    fwd = jax.jit(functools.partial(encoder_decoder_forward,
                                    num_heads=num_heads, d_model=d_model, patch=patch))
    logits = fwd(params, src, tgt, tgt_mask, tgt_padding_mask)
    logits = jax.block_until_ready(logits)

    assert logits.shape == (B, T, vocab_size), logits.shape
    assert bool(jnp.all(jnp.isfinite(logits)))
    print("KERNEL_OK")
</pallas_src>

<mosaic_0001>
module attributes {stable_mosaic.version = 11 : i64} {
  func.func @_linear_kernel(%arg0: i32, %arg1: i32, %arg2: memref<16x128xbf16, #tpu.memory_space<vmem>>, %arg3: memref<128x128xbf16, #tpu.memory_space<vmem>>, %arg4: memref<1x128xf32, #tpu.memory_space<vmem>>, %arg5: memref<16x128xbf16, #tpu.memory_space<vmem>>) attributes {dimension_semantics = [#tpu.dimension_semantics<parallel>, #tpu.dimension_semantics<parallel>], iteration_bounds = array<i64: 3, 1>, scalar_prefetch = 0 : i64, scratch_operands = 0 : i64, tpu.core_type = #tpu.core_type<tc>, window_params = [{transform_indices = @transform_0, window_bounds = array<i64: 16, 128>}, {transform_indices = @transform_1, window_bounds = array<i64: 128, 128>}, {transform_indices = @transform_2, window_bounds = array<i64: 1, 128>}, {transform_indices = @transform_3, window_bounds = array<i64: 16, 128>}]} {
    %c0 = arith.constant 0 : index
    %c0_0 = arith.constant 0 : index
    %0 = vector.load %arg2[%c0, %c0_0] : memref<16x128xbf16, #tpu.memory_space<vmem>>, vector<16x128xbf16>
    %c0_1 = arith.constant 0 : index
    %c0_2 = arith.constant 0 : index
    %1 = vector.load %arg3[%c0_1, %c0_2] : memref<128x128xbf16, #tpu.memory_space<vmem>>, vector<128x128xbf16>
    %cst = arith.constant dense<0.000000e+00> : vector<16x128xf32>
    %2 = tpu.matmul %0, %1, %cst {dimension_numbers = #tpu.dot_dimension_numbers<[1], [0], [0], [1], [0, 0, 1, 1], [], []>} : vector<16x128xbf16>, vector<128x128xbf16>, vector<16x128xf32> -> vector<16x128xf32>
    %c0_3 = arith.constant 0 : index
    %c0_4 = arith.constant 0 : index
    %3 = vector.load %arg4[%c0_3, %c0_4] : memref<1x128xf32, #tpu.memory_space<vmem>>, vector<1x128xf32>
    %4 = vector.broadcast %3 : vector<1x128xf32> to vector<16x128xf32>
    %5 = arith.addf %2, %4 : vector<16x128xf32>
    %6 = arith.truncf %5 : vector<16x128xf32> to vector<16x128xbf16>
    %c0_5 = arith.constant 0 : index
    %c0_6 = arith.constant 0 : index
    %7 = vector.load %arg5[%c0_5, %c0_6] : memref<16x128xbf16, #tpu.memory_space<vmem>>, vector<16x128xbf16>
    tpu.vector_store %arg5[%c0_5, %c0_6], %6 {strides = array<i32>} : memref<16x128xbf16, #tpu.memory_space<vmem>>, vector<16x128xbf16>,
    return
  }
  func.func @transform_0(%arg0: i32, %arg1: i32) -> (i32, i32) {
    %c0_i32 = arith.constant 0 : i32
    %c0_i32_0 = arith.constant 0 : i32
    return %arg1, %c0_i32 : i32, i32
  }
  func.func @transform_1(%arg0: i32, %arg1: i32) -> (i32, i32) {
    %c0_i32 = arith.constant 0 : i32
    %c0_i32_0 = arith.constant 0 : i32
    return %c0_i32, %arg0 : i32, i32
  }
  func.func @transform_2(%arg0: i32, %arg1: i32) -> (i32, i32) {
    %c0_i32 = arith.constant 0 : i32
    %c0_i32_0 = arith.constant 0 : i32
    return %c0_i32, %arg0 : i32, i32
  }
  func.func @transform_3(%arg0: i32, %arg1: i32) -> (i32, i32) {
    %c0_i32 = arith.constant 0 : i32
    return %arg1, %arg0 : i32, i32
  }
}

module attributes {stable_mosaic.version = 11 : i64} {
  func.func @_linear_kernel(%arg0: i32, %arg1: i32, %arg2: memref<16x128xbf16, #tpu.memory_space<vmem>>, %arg3: memref<128x128xbf16, #tpu.memory_space<vmem>>, %arg4: memref<1x128xf32, #tpu.memory_space<vmem>>, %arg5: memref<16x128xbf16, #tpu.memory_space<vmem>>) attributes {dimension_semantics = [#tpu.dimension_semantics<parallel>, #tpu.dimension_semantics<parallel>], iteration_bounds = array<i64: 1, 1>, scalar_prefetch = 0 : i64, scratch_operands = 0 : i64, tpu.core_type = #tpu.core_type<tc>, window_params = [{transform_indices = @transform_0, window_bounds = array<i64: 16, 128>}, {transform_indices = @transform_1, window_bounds = array<i64: 128, 128>}, {transform_indices = @transform_2, window_bounds = array<i64: 1, 128>}, {transform_indices = @transform_3, window_bounds = array<i64: 16, 128>}]} {
    %c0 = arith.constant 0 : index
    %c0_0 = arith.constant 0 : index
    %0 = vector.load %arg2[%c0, %c0_0] : memref<16x128xbf16, #tpu.memory_space<vmem>>, vector<16x128xbf16>
    %c0_1 = arith.constant 0 : index
    %c0_2 = arith.constant 0 : index
    %1 = vector.load %arg3[%c0_1, %c0_2] : memref<128x128xbf16, #tpu.memory_space<vmem>>, vector<128x128xbf16>
    %cst = arith.constant dense<0.000000e+00> : vector<16x128xf32>
    %2 = tpu.matmul %0, %1, %cst {dimension_numbers = #tpu.dot_dimension_numbers<[1], [0], [0], [1], [0, 0, 1, 1], [], []>} : vector<16x128xbf16>, vector<128x128xbf16>, vector<16x128xf32> -> vector<16x128xf32>
    %c0_3 = arith.constant 0 : index
    %c0_4 = arith.constant 0 : index
    %3 = vector.load %arg4[%c0_3, %c0_4] : memref<1x128xf32, #tpu.memory_space<vmem>>, vector<1x128xf32>
    %4 = vector.broadcast %3 : vector<1x128xf32> to vector<16x128xf32>
    %5 = arith.addf %2, %4 : vector<16x128xf32>
    %6 = arith.truncf %5 : vector<16x128xf32> to vector<16x128xbf16>
    %c0_5 = arith.constant 0 : index
    %c0_6 = arith.constant 0 : index
    %7 = vector.load %arg5[%c0_5, %c0_6] : memref<16x128xbf16, #tpu.memory_space<vmem>>, vector<16x128xbf16>
    tpu.vector_store %arg5[%c0_5, %c0_6], %6 {strides = array<i32>} : memref<16x128xbf16, #tpu.memory_space<vmem>>, vector<16x128xbf16>,
    return
  }
  func.func @transform_0(%arg0: i32, %arg1: i32) -> (i32, i32) {
    %c0_i32 = arith.constant 0 : i32
    %c0_i32_0 = arith.constant 0 : i32
    return %arg1, %c0_i32 : i32, i32
  }
  func.func @transform_1(%arg0: i32, %arg1: i32) -> (i32, i32) {
    %c0_i32 = arith.constant 0 : i32
    %c0_i32_0 = arith.constant 0 : i32
    return %c0_i32, %arg0 : i32, i32
  }
  func.func @transform_2(%arg0: i32, %arg1: i32) -> (i32, i32) {
    %c0_i32 = arith.constant 0 : i32
    %c0_i32_0 = arith.constant 0 : i32
    return %c0_i32, %arg0 : i32, i32
  }
  func.func @transform_3(%arg0: i32, %arg1: i32) -> (i32, i32) {
    %c0_i32 = arith.constant 0 : i32
    return %arg1, %arg0 : i32, i32
  }
}

module attributes {stable_mosaic.version = 11 : i64} {
  func.func @_mha_kernel(%arg0: i32, %arg1: i32, %arg2: i32, %arg3: memref<1x8x128xbf16, #tpu.memory_space<vmem>>, %arg4: memref<1x8x128xbf16, #tpu.memory_space<vmem>>, %arg5: memref<1x8x128xbf16, #tpu.memory_space<vmem>>, %arg6: memref<1x1x8xf32, #tpu.memory_space<vmem>>, %arg7: memref<1x8x128xbf16, #tpu.memory_space<vmem>>, %arg8: memref<4x8x1xf32, #tpu.memory_space<vmem>>, %arg9: memref<4x8x1xf32, #tpu.memory_space<vmem>>, %arg10: memref<4x8x32xf32, #tpu.memory_space<vmem>>) attributes {dimension_semantics = [#tpu.dimension_semantics<parallel>, #tpu.dimension_semantics<parallel>, #tpu.dimension_semantics<arbitrary>], iteration_bounds = array<i64: 2, 1, 1>, scalar_prefetch = 0 : i64, scratch_operands = 3 : i64, tpu.core_type = #tpu.core_type<tc>, window_params = [{transform_indices = @transform_0, window_bounds = array<i64: 1, 8, 128>}, {transform_indices = @transform_1, window_bounds = array<i64: 1, 8, 128>}, {transform_indices = @transform_2, window_bounds = array<i64: 1, 8, 128>}, {transform_indices = @transform_3, window_bounds = array<i64: 1, 1, 8>}, {transform_indices = @transform_4, window_bounds = array<i64: 1, 8, 128>}]} {
    %c0_i32 = arith.constant 0 : i32
    %0 = arith.cmpi eq, %arg2, %c0_i32 : i32
    %1 = arith.extui %0 : i1 to i32
    %c0_i32_0 = arith.constant 0 : i32
    %2 = arith.cmpi ne, %1, %c0_i32_0 : i32
    scf.if %2 {
      %cst_105 = arith.constant -1.000000e+30 : f32
      %184 = vector.broadcast %cst_105 : f32 to vector<4x8x1xf32>
      %c0_106 = arith.constant 0 : index
      %c0_107 = arith.constant 0 : index
      %c0_108 = arith.constant 0 : index
      %185 = vector.load %arg8[%c0_106, %c0_107, %c0_108] : memref<4x8x1xf32, #tpu.memory_space<vmem>>, vector<4x8x1xf32>
      tpu.vector_store %arg8[%c0_106, %c0_107, %c0_108], %184 {strides = array<i32>} : memref<4x8x1xf32, #tpu.memory_space<vmem>>, vector<4x8x1xf32>,
      %cst_109 = arith.constant 0.000000e+00 : f32
      %186 = vector.broadcast %cst_109 : f32 to vector<4x8x1xf32>
      %c0_110 = arith.constant 0 : index
      %c0_111 = arith.constant 0 : index
      %c0_112 = arith.constant 0 : index
      %187 = vector.load %arg9[%c0_110, %c0_111, %c0_112] : memref<4x8x1xf32, #tpu.memory_space<vmem>>, vector<4x8x1xf32>
      tpu.vector_store %arg9[%c0_110, %c0_111, %c0_112], %186 {strides = array<i32>} : memref<4x8x1xf32, #tpu.memory_space<vmem>>, vector<4x8x1xf32>,
      %cst_113 = arith.constant 0.000000e+00 : f32
      %188 = vector.broadcast %cst_113 : f32 to vector<4x8x32xf32>
      %c0_114 = arith.constant 0 : index
      %c0_115 = arith.constant 0 : index
      %c0_116 = arith.constant 0 : index
      %189 = vector.load %arg10[%c0_114, %c0_115, %c0_116] : memref<4x8x32xf32, #tpu.memory_space<vmem>>, vector<4x8x32xf32>
      tpu.vector_store %arg10[%c0_114, %c0_115, %c0_116], %188 {strides = array<i32>} : memref<4x8x32xf32, #tpu.memory_space<vmem>>, vector<4x8x32xf32>,
    } else {
    }
    %c0 = arith.constant 0 : index
    %c0_1 = arith.constant 0 : index
    %c0_2 = arith.constant 0 : index
    %3 = vector.load %arg3[%c0, %c0_1, %c0_2] : memref<1x8x128xbf16, #tpu.memory_space<vmem>>, vector<1x8x128xbf16>
    %4 = vector.shape_cast %3 : vector<1x8x128xbf16> to vector<8x128xbf16>
    %c0_3 = arith.constant 0 : index
    %c0_4 = arith.constant 0 : index
    %c0_5 = arith.constant 0 : index
    %5 = vector.load %arg4[%c0_3, %c0_4, %c0_5] : memref<1x8x128xbf16, #tpu.memory_space<vmem>>, vector<1x8x128xbf16>
    %6 = vector.shape_cast %5 : vector<1x8x128xbf16> to vector<8x128xbf16>
    %c0_6 = arith.constant 0 : index
    %c0_7 = arith.constant 0 : index
    %c0_8 = arith.constant 0 : index
    %7 = vector.load %arg5[%c0_6, %c0_7, %c0_8] : memref<1x8x128xbf16, #tpu.memory_space<vmem>>, vector<1x8x128xbf16>
    %8 = vector.shape_cast %7 : vector<1x8x128xbf16> to vector<8x128xbf16>
    %c8_i32 = arith.constant 8 : i32
    %9 = arith.muli %arg1, %c8_i32 : i32
    %c8_i32_9 = arith.constant 8 : i32
    %10 = arith.muli %arg2, %c8_i32_9 : i32
    %11 = tpu.iota {dimensions = array<i32: 0>} : vector<8x8xi32>
    %12 = vector.broadcast %9 : i32 to vector<8x8xi32>
    %13 = arith.addi %12, %11 : vector<8x8xi32>
    %14 = tpu.iota {dimensions = array<i32: 1>} : vector<8x8xi32>
    %15 = vector.broadcast %10 : i32 to vector<8x8xi32>
    %16 = arith.addi %15, %14 : vector<8x8xi32>
    %17 = arith.cmpi sgt, %16, %13 : vector<8x8xi32>
    %cst = arith.constant -1.000000e+30 : f32
    %cst_10 = arith.constant 0.000000e+00 : f32
    %18 = vector.broadcast %cst : f32 to vector<8x8xf32>
    %19 = vector.broadcast %cst_10 : f32 to vector<8x8xf32>
    %20 = arith.select %17, %18, %19 : vector<8x8xi1>, vector<8x8xf32>
    %c0_11 = arith.constant 0 : index
    %c0_12 = arith.constant 0 : index
    %c0_13 = arith.constant 0 : index
    %21 = vector.load %arg6[%c0_11, %c0_12, %c0_13] : memref<1x1x8xf32, #tpu.memory_space<vmem>>, vector<1x1x8xf32>
    %22 = vector.shape_cast %21 : vector<1x1x8xf32> to vector<1x8xf32>
    %23 = vector.broadcast %22 : vector<1x8xf32> to vector<8x8xf32>
    %24 = arith.addf %20, %23 : vector<8x8xf32>
    %25 = vector.extract_strided_slice %4 {offsets = [0, 0], sizes = [8, 32], strides = [1, 1]} : vector<8x128xbf16> to vector<8x32xbf16>
    %26 = vector.extract_strided_slice %6 {offsets = [0, 0], sizes = [8, 32], strides = [1, 1]} : vector<8x128xbf16> to vector<8x32xbf16>
    %27 = vector.extract_strided_slice %8 {offsets = [0, 0], sizes = [8, 32], strides = [1, 1]} : vector<8x128xbf16> to vector<8x32xbf16>
    %cst_14 = arith.constant dense<0.000000e+00> : vector<8x8xf32>
    %28 = tpu.matmul %25, %26, %cst_14 {dimension_numbers = #tpu.dot_dimension_numbers<[1], [1], [0], [0], [0, 0, 1, 0], [], []>} : vector<8x32xbf16>, vector<8x32xbf16>, vector<8x8xf32> -> vector<8x8xf32>
    %cst_15 = arith.constant 0.176776692 : f32
    %29 = vector.broadcast %cst_15 : f32 to vector<8x8xf32>
    %30 = arith.mulf %28, %29 : vector<8x8xf32>
    %31 = arith.addf %30, %24 : vector<8x8xf32>
    %c0_16 = arith.constant 0 : index
    %c0_17 = arith.constant 0 : index
    %c0_18 = arith.constant 0 : index
    %32 = vector.load %arg8[%c0_16, %c0_17, %c0_18] : memref<4x8x1xf32, #tpu.memory_space<vmem>>, vector<1x8x1xf32>
    %33 = vector.shape_cast %32 : vector<1x8x1xf32> to vector<8x1xf32>
    %cst_19 = arith.constant dense<0xFF800000> : vector<8xf32>
    %34 = vector.multi_reduction <maximumf>, %31, %cst_19 [1] : vector<8x8xf32> to vector<8xf32>
    %35 = vector.shape_cast %34 : vector<8xf32> to vector<8x1xf32>
    %36 = arith.maximumf %33, %35 : vector<8x1xf32>
    %37 = arith.subf %33, %36 : vector<8x1xf32>
    %38 = math.exp %37 : vector<8x1xf32>
    %39 = vector.broadcast %36 : vector<8x1xf32> to vector<8x8xf32>
    %40 = arith.subf %31, %39 : vector<8x8xf32>
    %41 = math.exp %40 : vector<8x8xf32>
    %c0_20 = arith.constant 0 : index
    %c0_21 = arith.constant 0 : index
    %c0_22 = arith.constant 0 : index
    %42 = vector.load %arg9[%c0_20, %c0_21, %c0_22] : memref<4x8x1xf32, #tpu.memory_space<vmem>>, vector<1x8x1xf32>
    %43 = vector.shape_cast %42 : vector<1x8x1xf32> to vector<8x1xf32>
    %44 = arith.mulf %38, %43 : vector<8x1xf32>
    %cst_23 = arith.constant dense<0.000000e+00> : vector<8xf32>
    %45 = vector.multi_reduction <add>, %41, %cst_23 [1] : vector<8x8xf32> to vector<8xf32>
    %46 = vector.shape_cast %45 : vector<8xf32> to vector<8x1xf32>
    %47 = arith.addf %44, %46 : vector<8x1xf32>
    %c0_24 = arith.constant 0 : index
    %c0_25 = arith.constant 0 : index
    %c0_26 = arith.constant 0 : index
    %48 = vector.load %arg9[%c0_24, %c0_25, %c0_26] : memref<4x8x1xf32, #tpu.memory_space<vmem>>, vector<1x8x1xf32>
    %49 = vector.shape_cast %48 : vector<1x8x1xf32> to vector<8x1xf32>
    %50 = vector.shape_cast %47 : vector<8x1xf32> to vector<1x8x1xf32>
    tpu.vector_store %arg9[%c0_24, %c0_25, %c0_26], %50 {strides = array<i32>} : memref<4x8x1xf32, #tpu.memory_space<vmem>>, vector<1x8x1xf32>,
    %51 = arith.truncf %41 : vector<8x8xf32> to vector<8x8xbf16>
    %cst_27 = arith.constant dense<0.000000e+00> : vector<8x32xf32>
    %52 = tpu.matmul %51, %27, %cst_27 {dimension_numbers = #tpu.dot_dimension_numbers<[1], [0], [0], [1], [0, 0, 1, 1], [], []>} : vector<8x8xbf16>, vector<8x32xbf16>, vector<8x32xf32> -> vector<8x32xf32>
    %c0_28 = arith.constant 0 : index
    %c0_29 = arith.constant 0 : index
    %c0_30 = arith.constant 0 : index
    %53 = vector.load %arg10[%c0_28, %c0_29, %c0_30] : memref<4x8x32xf32, #tpu.memory_space<vmem>>, vector<1x8x32xf32>
    %54 = vector.shape_cast %53 : vector<1x8x32xf32> to vector<8x32xf32>
    %55 = vector.broadcast %38 : vector<8x1xf32> to vector<8x32xf32>
    %56 = arith.mulf %55, %54 : vector<8x32xf32>
    %57 = arith.addf %56, %52 : vector<8x32xf32>
    %c0_31 = arith.constant 0 : index
    %c0_32 = arith.constant 0 : index
    %c0_33 = arith.constant 0 : index
    %58 = vector.load %arg10[%c0_31, %c0_32, %c0_33] : memref<4x8x32xf32, #tpu.memory_space<vmem>>, vector<1x8x32xf32>
    %59 = vector.shape_cast %58 : vector<1x8x32xf32> to vector<8x32xf32>
    %60 = vector.shape_cast %57 : vector<8x32xf32> to vector<1x8x32xf32>
    tpu.vector_store %arg10[%c0_31, %c0_32, %c0_33], %60 {strides = array<i32>} : memref<4x8x32xf32, #tpu.memory_space<vmem>>, vector<1x8x32xf32>,
    %c0_34 = arith.constant 0 : index
    %c0_35 = arith.constant 0 : index
    %c0_36 = arith.constant 0 : index
    %61 = vector.load %arg8[%c0_34, %c0_35, %c0_36] : memref<4x8x1xf32, #tpu.memory_space<vmem>>, vector<1x8x1xf32>
    %62 = vector.shape_cast %61 : vector<1x8x1xf32> to vector<8x1xf32>
    %63 = vector.shape_cast %36 : vector<8x1xf32> to vector<1x8x1xf32>
    tpu.vector_store %arg8[%c0_34, %c0_35, %c0_36], %63 {strides = array<i32>} : memref<4x8x1xf32, #tpu.memory_space<vmem>>, vector<1x8x1xf32>,
    %64 = vector.extract_strided_slice %4 {offsets = [0, 32], sizes = [8, 32], strides = [1, 1]} : vector<8x128xbf16> to vector<8x32xbf16>
    %65 = vector.extract_strided_slice %6 {offsets = [0, 32], sizes = [8, 32], strides = [1, 1]} : vector<8x128xbf16> to vector<8x32xbf16>
    %66 = vector.extract_strided_slice %8 {offsets = [0, 32], sizes = [8, 32], strides = [1, 1]} : vector<8x128xbf16> to vector<8x32xbf16>
    %cst_37 = arith.constant dense<0.000000e+00> : vector<8x8xf32>
    %67 = tpu.matmul %64, %65, %cst_37 {dimension_numbers = #tpu.dot_dimension_numbers<[1], [1], [0], [0], [0, 0, 1, 0], [], []>} : vector<8x32xbf16>, vector<8x32xbf16>, vector<8x8xf32> -> vector<8x8xf32>
    %cst_38 = arith.constant 0.176776692 : f32
    %68 = vector.broadcast %cst_38 : f32 to vector<8x8xf32>
    %69 = arith.mulf %67, %68 : vector<8x8xf32>
    %70 = arith.addf %69, %24 : vector<8x8xf32>
    %c1 = arith.constant 1 : index
    %c0_39 = arith.constant 0 : index
    %c0_40 = arith.constant 0 : index
    %71 = vector.load %arg8[%c1, %c0_39, %c0_40] : memref<4x8x1xf32, #tpu.memory_space<vmem>>, vector<1x8x1xf32>
    %72 = vector.shape_cast %71 : vector<1x8x1xf32> to vector<8x1xf32>
    %cst_41 = arith.constant dense<0xFF800000> : vector<8xf32>
    %73 = vector.multi_reduction <maximumf>, %70, %cst_41 [1] : vector<8x8xf32> to vector<8xf32>
    %74 = vector.shape_cast %73 : vector<8xf32> to vector<8x1xf32>
    %75 = arith.maximumf %72, %74 : vector<8x1xf32>
    %76 = arith.subf %72, %75 : vector<8x1xf32>
    %77 = math.exp %76 : vector<8x1xf32>
    %78 = vector.broadcast %75 : vector<8x1xf32> to vector<8x8xf32>
    %79 = arith.subf %70, %78 : vector<8x8xf32>
    %80 = math.exp %79 : vector<8x8xf32>
    %c1_42 = arith.constant 1 : index
    %c0_43 = arith.constant 0 : index
    %c0_44 = arith.constant 0 : index
    %81 = vector.load %arg9[%c1_42, %c0_43, %c0_44] : memref<4x8x1xf32, #tpu.memory_space<vmem>>, vector<1x8x1xf32>
    %82 = vector.shape_cast %81 : vector<1x8x1xf32> to vector<8x1xf32>
    %83 = arith.mulf %77, %82 : vector<8x1xf32>
    %cst_45 = arith.constant dense<0.000000e+00> : vector<8xf32>
    %84 = vector.multi_reduction <add>, %80, %cst_45 [1] : vector<8x8xf32> to vector<8xf32>
    %85 = vector.shape_cast %84 : vector<8xf32> to vector<8x1xf32>
    %86 = arith.addf %83, %85 : vector<8x1xf32>
    %c1_46 = arith.constant 1 : index
    %c0_47 = arith.constant 0 : index
    %c0_48 = arith.constant 0 : index
    %87 = vector.load %arg9[%c1_46, %c0_47, %c0_48] : memref<4x8x1xf32, #tpu.memory_space<vmem>>, vector<1x8x1xf32>
    %88 = vector.shape_cast %87 : vector<1x8x1xf32> to vector<8x1xf32>
    %89 = vector.shape_cast %86 : vector<8x1xf32> to vector<1x8x1xf32>
    tpu.vector_store %arg9[%c1_46, %c0_47, %c0_48], %89 {strides = array<i32>} : memref<4x8x1xf32, #tpu.memory_space<vmem>>, vector<1x8x1xf32>,
    %90 = arith.truncf %80 : vector<8x8xf32> to vector<8x8xbf16>
    %cst_49 = arith.constant dense<0.000000e+00> : vector<8x32xf32>
    %91 = tpu.matmul %90, %66, %cst_49 {dimension_numbers = #tpu.dot_dimension_numbers<[1], [0], [0], [1], [0, 0, 1, 1], [], []>} : vector<8x8xbf16>, vector<8x32xbf16>, vector<8x32xf32> -> vector<8x32xf32>
    %c1_50 = arith.constant 1 : index
    %c0_51 = arith.constant 0 : index
    %c0_52 = arith.constant 0 : index
    %92 = vector.load %arg10[%c1_50, %c0_51, %c0_52] : memref<4x8x32xf32, #tpu.memory_space<vmem>>, vector<1x8x32xf32>
    %93 = vector.shape_cast %92 : vector<1x8x32xf32> to vector<8x32xf32>
    %94 = vector.broadcast %77 : vector<8x1xf32> to vector<8x32xf32>
    %95 = arith.mulf %94, %93 : vector<8x32xf32>
    %96 = arith.addf %95, %91 : vector<8x32xf32>
    %c1_53 = arith.constant 1 : index
    %c0_54 = arith.constant 0 : index
    %c0_55 = arith.constant 0 : index
    %97 = vector.load %arg10[%c1_53, %c0_54, %c0_55] : memref<4x8x32xf32, #tpu.memory_space<vmem>>, vector<1x8x32xf32>
    %98 = vector.shape_cast %97 : vector<1x8x32xf32> to vector<8x32xf32>
    %99 = vector.shape_cast %96 : vector<8x32xf32> to vector<1x8x32xf32>
    tpu.vector_store %arg10[%c1_53, %c0_54, %c0_55], %99 {strides = array<i32>} : memref<4x8x32xf32, #tpu.memory_space<vmem>>, vector<1x8x32xf32>,
    %c1_56 = arith.constant 1 : index
    %c0_57 = arith.constant 0 : index
    %c0_58 = arith.constant 0 : index
    %100 = vector.load %arg8[%c1_56, %c0_57, %c0_58] : memref<4x8x1xf32, #tpu.memory_space<vmem>>, vector<1x8x1xf32>
    %101 = vector.shape_cast %100 : vector<1x8x1xf32> to vector<8x1xf32>
    %102 = vector.shape_cast %75 : vector<8x1xf32> to vector<1x8x1xf32>
    tpu.vector_store %arg8[%c1_56, %c0_57, %c0_58], %102 {strides = array<i32>} : memref<4x8x1xf32, #tpu.memory_space<vmem>>, vector<1x8x1xf32>,
    %103 = vector.extract_strided_slice %4 {offsets = [0, 64], sizes = [8, 32], strides = [1, 1]} : vector<8x128xbf16> to vector<8x32xbf16>
    %104 = vector.extract_strided_slice %6 {offsets = [0, 64], sizes = [8, 32], strides = [1, 1]} : vector<8x128xbf16> to vector<8x32xbf16>
    %105 = vector.extract_strided_slice %8 {offsets = [0, 64], sizes = [8, 32], strides = [1, 1]} : vector<8x128xbf16> to vector<8x32xbf16>
    %cst_59 = arith.constant dense<0.000000e+00> : vector<8x8xf32>
    %106 = tpu.matmul %103, %104, %cst_59 {dimension_numbers = #tpu.dot_dimension_numbers<[1], [1], [0], [0], [0, 0, 1, 0], [], []>} : vector<8x32xbf16>, vector<8x32xbf16>, vector<8x8xf32> -> vector<8x8xf32>
    %cst_60 = arith.constant 0.176776692 : f32
    %107 = vector.broadcast %cst_60 : f32 to vector<8x8xf32>
    %108 = arith.mulf %106, %107 : vector<8x8xf32>
    %109 = arith.addf %108, %24 : vector<8x8xf32>
    %c2 = arith.constant 2 : index
    %c0_61 = arith.constant 0 : index
    %c0_62 = arith.constant 0 : index
    %110 = vector.load %arg8[%c2, %c0_61, %c0_62] : memref<4x8x1xf32, #tpu.memory_space<vmem>>, vector<1x8x1xf32>
    %111 = vector.shape_cast %110 : vector<1x8x1xf32> to vector<8x1xf32>
    %cst_63 = arith.constant dense<0xFF800000> : vector<8xf32>
    %112 = vector.multi_reduction <maximumf>, %109, %cst_63 [1] : vector<8x8xf32> to vector<8xf32>
    %113 = vector.shape_cast %112 : vector<8xf32> to vector<8x1xf32>
    %114 = arith.maximumf %111, %113 : vector<8x1xf32>
    %115 = arith.subf %111, %114 : vector<8x1xf32>
    %116 = math.exp %115 : vector<8x1xf32>
    %117 = vector.broadcast %114 : vector<8x1xf32> to vector<8x8xf32>
    %118 = arith.subf %109, %117 : vector<8x8xf32>
    %119 = math.exp %118 : vector<8x8xf32>
    %c2_64 = arith.constant 2 : index
    %c0_65 = arith.constant 0 : index
    %c0_66 = arith.constant 0 : index
    %120 = vector.load %arg9[%c2_64, %c0_65, %c0_66] : memref<4x8x1xf32, #tpu.memory_space<vmem>>, vector<1x8x1xf32>
    %121 = vector.shape_cast %120 : vector<1x8x1xf32> to vector<8x1xf32>
    %122 = arith.mulf %116, %121 : vector<8x1xf32>
    %cst_67 = arith.constant dense<0.000000e+00> : vector<8xf32>
    %123 = vector.multi_reduction <add>, %119, %cst_67 [1] : vector<8x8xf32> to vector<8xf32>
    %124 = vector.shape_cast %123 : vector<8xf32> to vector<8x1xf32>
    %125 = arith.addf %122, %124 : vector<8x1xf32>
    %c2_68 = arith.constant 2 : index
    %c0_69 = arith.constant 0 : index
    %c0_70 = arith.constant 0 : index
    %126 = vector.load %arg9[%c2_68, %c0_69, %c0_70] : memref<4x8x1xf32, #tpu.memory_space<vmem>>, vector<1x8x1xf32>
    %127 = vector.shape_cast %126 : vector<1x8x1xf32> to vector<8x1xf32>
    %128 = vector.shape_cast %125 : vector<8x1xf32> to vector<1x8x1xf32>
    tpu.vector_store %arg9[%c2_68, %c0_69, %c0_70], %128 {strides = array<i32>} : memref<4x8x1xf32, #tpu.memory_space<vmem>>, vector<1x8x1xf32>,
    %129 = arith.truncf %119 : vector<8x8xf32> to vector<8x8xbf16>
    %cst_71 = arith.constant dense<0.000000e+00> : vector<8x32xf32>
    %130 = tpu.matmul %129, %105, %cst_71 {dimension_numbers = #tpu.dot_dimension_numbers<[1], [0], [0], [1], [0, 0, 1, 1], [], []>} : vector<8x8xbf16>, vector<8x32xbf16>, vector<8x32xf32> -> vector<8x32xf32>
    %c2_72 = arith.constant 2 : index
    %c0_73 = arith.constant 0 : index
    %c0_74 = arith.constant 0 : index
    %131 = vector.load %arg10[%c2_72, %c0_73, %c0_74] : memref<4x8x32xf32, #tpu.memory_space<vmem>>, vector<1x8x32xf32>
    %132 = vector.shape_cast %131 : vector<1x8x32xf32> to vector<8x32xf32>
    %133 = vector.broadcast %116 : vector<8x1xf32> to vector<8x32xf32>
    %134 = arith.mulf %133, %132 : vector<8x32xf32>
    %135 = arith.addf %134, %130 : vector<8x32xf32>
    %c2_75 = arith.constant 2 : index
    %c0_76 = arith.constant 0 : index
    %c0_77 = arith.constant 0 : index
    %136 = vector.load %arg10[%c2_75, %c0_76, %c0_77] : memref<4x8x32xf32, #tpu.memory_space<vmem>>, vector<1x8x32xf32>
    %137 = vector.shape_cast %136 : vector<1x8x32xf32> to vector<8x32xf32>
    %138 = vector.shape_cast %135 : vector<8x32xf32> to vector<1x8x32xf32>
    tpu.vector_store %arg10[%c2_75, %c0_76, %c0_77], %138 {strides = array<i32>} : memref<4x8x32xf32, #tpu.memory_space<vmem>>, vector<1x8x32xf32>,
    %c2_78 = arith.constant 2 : index
    %c0_79 = arith.constant 0 : index
    %c0_80 = arith.constant 0 : index
    %139 = vector.load %arg8[%c2_78, %c0_79, %c0_80] : memref<4x8x1xf32, #tpu.memory_space<vmem>>, vector<1x8x1xf32>
    %140 = vector.shape_cast %139 : vector<1x8x1xf32> to vector<8x1xf32>
    %141 = vector.shape_cast %114 : vector<8x1xf32> to vector<1x8x1xf32>
    tpu.vector_store %arg8[%c2_78, %c0_79, %c0_80], %141 {strides = array<i32>} : memref<4x8x1xf32, #tpu.memory_space<vmem>>, vector<1x8x1xf32>,
    %142 = vector.extract_strided_slice %4 {offsets = [0, 96], sizes = [8, 32], strides = [1, 1]} : vector<8x128xbf16> to vector<8x32xbf16>
    %143 = vector.extract_strided_slice %6 {offsets = [0, 96], sizes = [8, 32], strides = [1, 1]} : vector<8x128xbf16> to vector<8x32xbf16>
    %144 = vector.extract_strided_slice %8 {offsets = [0, 96], sizes = [8, 32], strides = [1, 1]} : vector<8x128xbf16> to vector<8x32xbf16>
    %cst_81 = arith.constant dense<0.000000e+00> : vector<8x8xf32>
    %145 = tpu.matmul %142, %143, %cst_81 {dimension_numbers = #tpu.dot_dimension_numbers<[1], [1], [0], [0], [0, 0, 1, 0], [], []>} : vector<8x32xbf16>, vector<8x32xbf16>, vector<8x8xf32> -> vector<8x8xf32>
    %cst_82 = arith.constant 0.176776692 : f32
    %146 = vector.broadcast %cst_82 : f32 to vector<8x8xf32>
    %147 = arith.mulf %145, %146 : vector<8x8xf32>
    %148 = arith.addf %147, %24 : vector<8x8xf32>
    %c3 = arith.constant 3 : index
    %c0_83 = arith.constant 0 : index
    %c0_84 = arith.constant 0 : index
    %149 = vector.load %arg8[%c3, %c0_83, %c0_84] : memref<4x8x1xf32, #tpu.memory_space<vmem>>, vector<1x8x1xf32>
    %150 = vector.shape_cast %149 : vector<1x8x1xf32> to vector<8x1xf32>
    %cst_85 = arith.constant dense<0xFF800000> : vector<8xf32>
    %151 = vector.multi_reduction <maximumf>, %148, %cst_85 [1] : vector<8x8xf32> to vector<8xf32>
    %152 = vector.shape_cast %151 : vector<8xf32> to vector<8x1xf32>
    %153 = arith.maximumf %150, %152 : vector<8x1xf32>
    %154 = arith.subf %150, %153 : vector<8x1xf32>
    %155 = math.exp %154 : vector<8x1xf32>
    %156 = vector.broadcast %153 : vector<8x1xf32> to vector<8x8xf32>
    %157 = arith.subf %148, %156 : vector<8x8xf32>
    %158 = math.exp %157 : vector<8x8xf32>
    %c3_86 = arith.constant 3 : index
    %c0_87 = arith.constant 0 : index
    %c0_88 = arith.constant 0 : index
    %159 = vector.load %arg9[%c3_86, %c0_87, %c0_88] : memref<4x8x1xf32, #tpu.memory_space<vmem>>, vector<1x8x1xf32>
    %160 = vector.shape_cast %159 : vector<1x8x1xf32> to vector<8x1xf32>
    %161 = arith.mulf %155, %160 : vector<8x1xf32>
    %cst_89 = arith.constant dense<0.000000e+00> : vector<8xf32>
    %162 = vector.multi_reduction <add>, %158, %cst_89 [1] : vector<8x8xf32> to vector<8xf32>
    %163 = vector.shape_cast %162 : vector<8xf32> to vector<8x1xf32>
    %164 = arith.addf %161, %163 : vector<8x1xf32>
    %c3_90 = arith.constant 3 : index
    %c0_91 = arith.constant 0 : index
    %c0_92 = arith.constant 0 : index
    %165 = vector.load %arg9[%c3_90, %c0_91, %c0_92] : memref<4x8x1xf32, #tpu.memory_space<vmem>>, vector<1x8x1xf32>
    %166 = vector.shape_cast %165 : vector<1x8x1xf32> to vector<8x1xf32>
    %167 = vector.shape_cast %164 : vector<8x1xf32> to vector<1x8x1xf32>
    tpu.vector_store %arg9[%c3_90, %c0_91, %c0_92], %167 {strides = array<i32>} : memref<4x8x1xf32, #tpu.memory_space<vmem>>, vector<1x8x1xf32>,
    %168 = arith.truncf %158 : vector<8x8xf32> to vector<8x8xbf16>
    %cst_93 = arith.constant dense<0.000000e+00> : vector<8x32xf32>
    %169 = tpu.matmul %168, %144, %cst_93 {dimension_numbers = #tpu.dot_dimension_numbers<[1], [0], [0], [1], [0, 0, 1, 1], [], []>} : vector<8x8xbf16>, vector<8x32xbf16>, vector<8x32xf32> -> vector<8x32xf32>
    %c3_94 = arith.constant 3 : index
    %c0_95 = arith.constant 0 : index
    %c0_96 = arith.constant 0 : index
    %170 = vector.load %arg10[%c3_94, %c0_95, %c0_96] : memref<4x8x32xf32, #tpu.memory_space<vmem>>, vector<1x8x32xf32>
    %171 = vector.shape_cast %170 : vector<1x8x32xf32> to vector<8x32xf32>
    %172 = vector.broadcast %155 : vector<8x1xf32> to vector<8x32xf32>
    %173 = arith.mulf %172, %171 : vector<8x32xf32>
    %174 = arith.addf %173, %169 : vector<8x32xf32>
    %c3_97 = arith.constant 3 : index
    %c0_98 = arith.constant 0 : index
    %c0_99 = arith.constant 0 : index
    %175 = vector.load %arg10[%c3_97, %c0_98, %c0_99] : memref<4x8x32xf32, #tpu.memory_space<vmem>>, vector<1x8x32xf32>
    %176 = vector.shape_cast %175 : vector<1x8x32xf32> to vector<8x32xf32>
    %177 = vector.shape_cast %174 : vector<8x32xf32> to vector<1x8x32xf32>
    tpu.vector_store %arg10[%c3_97, %c0_98, %c0_99], %177 {strides = array<i32>} : memref<4x8x32xf32, #tpu.memory_space<vmem>>, vector<1x8x32xf32>,
    %c3_100 = arith.constant 3 : index
    %c0_101 = arith.constant 0 : index
    %c0_102 = arith.constant 0 : index
    %178 = vector.load %arg8[%c3_100, %c0_101, %c0_102] : memref<4x8x1xf32, #tpu.memory_space<vmem>>, vector<1x8x1xf32>
    %179 = vector.shape_cast %178 : vector<1x8x1xf32> to vector<8x1xf32>
    %180 = vector.shape_cast %153 : vector<8x1xf32> to vector<1x8x1xf32>
    tpu.vector_store %arg8[%c3_100, %c0_101, %c0_102], %180 {strides = array<i32>} : memref<4x8x1xf32, #tpu.memory_space<vmem>>, vector<1x8x1xf32>,
    %c0_i32_103 = arith.constant 0 : i32
    %181 = arith.cmpi eq, %arg2, %c0_i32_103 : i32
    %182 = arith.extui %181 : i1 to i32
    %c0_i32_104 = arith.constant 0 : i32
    %183 = arith.cmpi ne, %182, %c0_i32_104 : i32
    scf.if %183 {
      %c0_105 = arith.constant 0 : index
      %c0_106 = arith.constant 0 : index
      %c0_107 = arith.constant 0 : index
      %184 = vector.load %arg9[%c0_105, %c0_106, %c0_107] : memref<4x8x1xf32, #tpu.memory_space<vmem>>, vector<1x8x1xf32>
      %185 = vector.shape_cast %184 : vector<1x8x1xf32> to vector<8x1xf32>
      %186 = tpu.reciprocal %185 {approx = true} : vector<8x1xf32> -> vector<8x1xf32>
      %c0_108 = arith.constant 0 : index
      %c0_109 = arith.constant 0 : index
      %c0_110 = arith.constant 0 : index
      %187 = vector.load %arg10[%c0_108, %c0_109, %c0_110] : memref<4x8x32xf32, #tpu.memory_space<vmem>>, vector<1x8x32xf32>
      %188 = vector.shape_cast %187 : vector<1x8x32xf32> to vector<8x32xf32>
      %189 = vector.broadcast %186 : vector<8x1xf32> to vector<8x32xf32>
      %190 = arith.mulf %188, %189 : vector<8x32xf32>
      %c1_111 = arith.constant 1 : index
      %c0_112 = arith.constant 0 : index
      %c0_113 = arith.constant 0 : index
      %191 = vector.load %arg9[%c1_111, %c0_112, %c0_113] : memref<4x8x1xf32, #tpu.memory_space<vmem>>, vector<1x8x1xf32>
      %192 = vector.shape_cast %191 : vector<1x8x1xf32> to vector<8x1xf32>
      %193 = tpu.reciprocal %192 {approx = true} : vector<8x1xf32> -> vector<8x1xf32>
      %c1_114 = arith.constant 1 : index
      %c0_115 = arith.constant 0 : index
      %c0_116 = arith.constant 0 : index
      %194 = vector.load %arg10[%c1_114, %c0_115, %c0_116] : memref<4x8x32xf32, #tpu.memory_space<vmem>>, vector<1x8x32xf32>
      %195 = vector.shape_cast %194 : vector<1x8x32xf32> to vector<8x32xf32>
      %196 = vector.broadcast %193 : vector<8x1xf32> to vector<8x32xf32>
      %197 = arith.mulf %195, %196 : vector<8x32xf32>
      %c2_117 = arith.constant 2 : index
      %c0_118 = arith.constant 0 : index
      %c0_119 = arith.constant 0 : index
      %198 = vector.load %arg9[%c2_117, %c0_118, %c0_119] : memref<4x8x1xf32, #tpu.memory_space<vmem>>, vector<1x8x1xf32>
      %199 = vector.shape_cast %198 : vector<1x8x1xf32> to vector<8x1xf32>
      %200 = tpu.reciprocal %199 {approx = true} : vector<8x1xf32> -> vector<8x1xf32>
      %c2_120 = arith.constant 2 : index
      %c0_121 = arith.constant 0 : index
      %c0_122 = arith.constant 0 : index
      %201 = vector.load %arg10[%c2_120, %c0_121, %c0_122] : memref<4x8x32xf32, #tpu.memory_space<vmem>>, vector<1x8x32xf32>
      %202 = vector.shape_cast %201 : vector<1x8x32xf32> to vector<8x32xf32>
      %203 = vector.broadcast %200 : vector<8x1xf32> to vector<8x32xf32>
      %204 = arith.mulf %202, %203 : vector<8x32xf32>
      %c3_123 = arith.constant 3 : index
      %c0_124 = arith.constant 0 : index
      %c0_125 = arith.constant 0 : index
      %205 = vector.load %arg9[%c3_123, %c0_124, %c0_125] : memref<4x8x1xf32, #tpu.memory_space<vmem>>, vector<1x8x1xf32>
      %206 = vector.shape_cast %205 : vector<1x8x1xf32> to vector<8x1xf32>
      %207 = tpu.reciprocal %206 {approx = true} : vector<8x1xf32> -> vector<8x1xf32>
      %c3_126 = arith.constant 3 : index
      %c0_127 = arith.constant 0 : index
      %c0_128 = arith.constant 0 : index
      %208 = vector.load %arg10[%c3_126, %c0_127, %c0_128] : memref<4x8x32xf32, #tpu.memory_space<vmem>>, vector<1x8x32xf32>
      %209 = vector.shape_cast %208 : vector<1x8x32xf32> to vector<8x32xf32>
      %210 = vector.broadcast %207 : vector<8x1xf32> to vector<8x32xf32>
      %211 = arith.mulf %209, %210 : vector<8x32xf32>
      %212 = tpu.concatenate %190, %197, %204, %211 in 1 : vector<8x32xf32>, vector<8x32xf32>, vector<8x32xf32>, vector<8x32xf32> -> vector<8x128xf32>
      %213 = arith.truncf %212 : vector<8x128xf32> to vector<8x128xbf16>
      %c0_129 = arith.constant 0 : index
      %c0_130 = arith.constant 0 : index
      %c0_131 = arith.constant 0 : index
      %214 = vector.load %arg7[%c0_129, %c0_130, %c0_131] : memref<1x8x128xbf16, #tpu.memory_space<vmem>>, vector<1x8x128xbf16>
      %215 = vector.shape_cast %214 : vector<1x8x128xbf16> to vector<8x128xbf16>
      %216 = vector.shape_cast %213 : vector<8x128xbf16> to vector<1x8x128xbf16>
      tpu.vector_store %arg7[%c0_129, %c0_130, %c0_131], %216 {strides = array<i32>} : memref<1x8x128xbf16, #tpu.memory_space<vmem>>, vector<1x8x128xbf16>,
    } else {
    }
    return
  }
  func.func @transform_0(%arg0: i32, %arg1: i32, %arg2: i32) -> (i32, i32, i32) {
    %c0_i32 = arith.constant 0 : i32
    %c0_i32_0 = arith.constant 0 : i32
    return %arg0, %arg1, %c0_i32 : i32, i32, i32
  }
  func.func @transform_1(%arg0: i32, %arg1: i32, %arg2: i32) -> (i32, i32, i32) {
    %c1_i32 = arith.constant 1 : i32
    %c0_i32 = arith.constant 0 : i32
    return %arg0, %arg2, %c1_i32 : i32, i32, i32
  }
  func.func @transform_2(%arg0: i32, %arg1: i32, %arg2: i32) -> (i32, i32, i32) {
    %c2_i32 = arith.constant 2 : i32
    %c0_i32 = arith.constant 0 : i32
    return %arg0, %arg2, %c2_i32 : i32, i32, i32
  }
  func.func @transform_3(%arg0: i32, %arg1: i32, %arg2: i32) -> (i32, i32, i32) {
    %c0_i32 = arith.constant 0 : i32
    %c0_i32_0 = arith.constant 0 : i32
    return %arg0, %c0_i32, %arg2 : i32, i32, i32
  }
  func.func @transform_4(%arg0: i32, %arg1: i32, %arg2: i32) -> (i32, i32, i32) {
    %c0_i32 = arith.constant 0 : i32
    %c0_i32_0 = arith.constant 0 : i32
    return %arg0, %arg1, %c0_i32 : i32, i32, i32
  }
}

module attributes {stable_mosaic.version = 11 : i64} {
  func.func @_proj_res_ln_kernel(%arg0: i32, %arg1: memref<16x128xbf16, #tpu.memory_space<vmem>>, %arg2: memref<16x128xbf16, #tpu.memory_space<vmem>>, %arg3: memref<128x128xbf16, #tpu.memory_space<vmem>>, %arg4: memref<1x128xf32, #tpu.memory_space<vmem>>, %arg5: memref<1x128xf32, #tpu.memory_space<vmem>>, %arg6: memref<1x128xf32, #tpu.memory_space<vmem>>, %arg7: memref<16x128xbf16, #tpu.memory_space<vmem>>) attributes {dimension_semantics = [#tpu.dimension_semantics<parallel>], iteration_bounds = array<i64: 1>, scalar_prefetch = 0 : i64, scratch_operands = 0 : i64, tpu.core_type = #tpu.core_type<tc>, window_params = [{transform_indices = @transform_0, window_bounds = array<i64: 16, 128>}, {transform_indices = @transform_1, window_bounds = array<i64: 16, 128>}, {pipeline_mode = #tpu.pipeline_mode<synchronous>, transform_indices = @transform_2, window_bounds = array<i64: 128, 128>}, {pipeline_mode = #tpu.pipeline_mode<synchronous>, transform_indices = @transform_3, window_bounds = array<i64: 1, 128>}, {pipeline_mode = #tpu.pipeline_mode<synchronous>, transform_indices = @transform_4, window_bounds = array<i64: 1, 128>}, {pipeline_mode = #tpu.pipeline_mode<synchronous>, transform_indices = @transform_5, window_bounds = array<i64: 1, 128>}, {transform_indices = @transform_6, window_bounds = array<i64: 16, 128>}]} {
    %c0 = arith.constant 0 : index
    %c0_0 = arith.constant 0 : index
    %0 = vector.load %arg1[%c0, %c0_0] : memref<16x128xbf16, #tpu.memory_space<vmem>>, vector<16x128xbf16>
    %c0_1 = arith.constant 0 : index
    %c0_2 = arith.constant 0 : index
    %1 = vector.load %arg3[%c0_1, %c0_2] : memref<128x128xbf16, #tpu.memory_space<vmem>>, vector<128x128xbf16>
    %cst = arith.constant dense<0.000000e+00> : vector<16x128xf32>
    %2 = tpu.matmul %0, %1, %cst {dimension_numbers = #tpu.dot_dimension_numbers<[1], [0], [0], [1], [0, 0, 1, 1], [], []>} : vector<16x128xbf16>, vector<128x128xbf16>, vector<16x128xf32> -> vector<16x128xf32>
    %c0_3 = arith.constant 0 : index
    %c0_4 = arith.constant 0 : index
    %3 = vector.load %arg2[%c0_3, %c0_4] : memref<16x128xbf16, #tpu.memory_space<vmem>>, vector<16x128xbf16>
    %4 = arith.extf %3 : vector<16x128xbf16> to vector<16x128xf32>
    %5 = arith.addf %2, %4 : vector<16x128xf32>
    %c0_5 = arith.constant 0 : index
    %c0_6 = arith.constant 0 : index
    %6 = vector.load %arg4[%c0_5, %c0_6] : memref<1x128xf32, #tpu.memory_space<vmem>>, vector<1x128xf32>
    %7 = vector.broadcast %6 : vector<1x128xf32> to vector<16x128xf32>
    %8 = arith.addf %5, %7 : vector<16x128xf32>
    %cst_7 = arith.constant dense<0.000000e+00> : vector<16xf32>
    %9 = vector.multi_reduction <add>, %8, %cst_7 [1] : vector<16x128xf32> to vector<16xf32>
    %10 = vector.shape_cast %9 : vector<16xf32> to vector<16x1xf32>
    %cst_8 = arith.constant 1.280000e+02 : f32
    %11 = vector.broadcast %cst_8 : f32 to vector<16x1xf32>
    %12 = arith.divf %10, %11 : vector<16x1xf32>
    %13 = vector.broadcast %12 : vector<16x1xf32> to vector<16x128xf32>
    %14 = arith.subf %8, %13 : vector<16x128xf32>
    %15 = arith.mulf %14, %14 : vector<16x128xf32>
    %cst_9 = arith.constant dense<0.000000e+00> : vector<16xf32>
    %16 = vector.multi_reduction <add>, %15, %cst_9 [1] : vector<16x128xf32> to vector<16xf32>
    %17 = vector.shape_cast %16 : vector<16xf32> to vector<16x1xf32>
    %cst_10 = arith.constant 1.280000e+02 : f32
    %18 = vector.broadcast %cst_10 : f32 to vector<16x1xf32>
    %19 = arith.divf %17, %18 : vector<16x1xf32>
    %20 = vector.broadcast %12 : vector<16x1xf32> to vector<16x128xf32>
    %21 = arith.subf %8, %20 : vector<16x128xf32>
    %cst_11 = arith.constant 9.99999974E-6 : f32
    %22 = vector.broadcast %cst_11 : f32 to vector<16x1xf32>
    %23 = arith.addf %19, %22 : vector<16x1xf32>
    %24 = math.rsqrt %23 : vector<16x1xf32>
    %25 = vector.broadcast %24 : vector<16x1xf32> to vector<16x128xf32>
    %26 = arith.mulf %21, %25 : vector<16x128xf32>
    %c0_12 = arith.constant 0 : index
    %c0_13 = arith.constant 0 : index
    %27 = vector.load %arg5[%c0_12, %c0_13] : memref<1x128xf32, #tpu.memory_space<vmem>>, vector<1x128xf32>
    %28 = vector.broadcast %27 : vector<1x128xf32> to vector<16x128xf32>
    %29 = arith.mulf %26, %28 : vector<16x128xf32>
    %c0_14 = arith.constant 0 : index
    %c0_15 = arith.constant 0 : index
    %30 = vector.load %arg6[%c0_14, %c0_15] : memref<1x128xf32, #tpu.memory_space<vmem>>, vector<1x128xf32>
    %31 = vector.broadcast %30 : vector<1x128xf32> to vector<16x128xf32>
    %32 = arith.addf %29, %31 : vector<16x128xf32>
    %33 = arith.truncf %32 : vector<16x128xf32> to vector<16x128xbf16>
    %c0_16 = arith.constant 0 : index
    %c0_17 = arith.constant 0 : index
    %34 = vector.load %arg7[%c0_16, %c0_17] : memref<16x128xbf16, #tpu.memory_space<vmem>>, vector<16x128xbf16>
    tpu.vector_store %arg7[%c0_16, %c0_17], %33 {strides = array<i32>} : memref<16x128xbf16, #tpu.memory_space<vmem>>, vector<16x128xbf16>,
    return
  }
  func.func @transform_0(%arg0: i32) -> (i32, i32) {
    %c0_i32 = arith.constant 0 : i32
    %c0_i32_0 = arith.constant 0 : i32
    return %arg0, %c0_i32 : i32, i32
  }
  func.func @transform_1(%arg0: i32) -> (i32, i32) {
    %c0_i32 = arith.constant 0 : i32
    %c0_i32_0 = arith.constant 0 : i32
    return %arg0, %c0_i32 : i32, i32
  }
  func.func @transform_2(%arg0: i32) -> (i32, i32) {
    %c0_i32 = arith.constant 0 : i32
    %c0_i32_0 = arith.constant 0 : i32
    %c0_i32_1 = arith.constant 0 : i32
    return %c0_i32, %c0_i32_0 : i32, i32
  }
  func.func @transform_3(%arg0: i32) -> (i32, i32) {
    %c0_i32 = arith.constant 0 : i32
    %c0_i32_0 = arith.constant 0 : i32
    %c0_i32_1 = arith.constant 0 : i32
    return %c0_i32, %c0_i32_0 : i32, i32
  }
  func.func @transform_4(%arg0: i32) -> (i32, i32) {
    %c0_i32 = arith.constant 0 : i32
    %c0_i32_0 = arith.constant 0 : i32
    %c0_i32_1 = arith.constant 0 : i32
    return %c0_i32, %c0_i32_0 : i32, i32
  }
  func.func @transform_5(%arg0: i32) -> (i32, i32) {
    %c0_i32 = arith.constant 0 : i32
    %c0_i32_0 = arith.constant 0 : i32
    %c0_i32_1 = arith.constant 0 : i32
    return %c0_i32, %c0_i32_0 : i32, i32
  }
  func.func @transform_6(%arg0: i32) -> (i32, i32) {
    %c0_i32 = arith.constant 0 : i32
    %c0_i32_0 = arith.constant 0 : i32
    return %arg0, %c0_i32 : i32, i32
  }
}

module attributes {stable_mosaic.version = 11 : i64} {
  func.func @_linear_kernel(%arg0: i32, %arg1: i32, %arg2: memref<32x48xbf16, #tpu.memory_space<vmem>>, %arg3: memref<48x128xbf16, #tpu.memory_space<vmem>>, %arg4: memref<1x128xf32, #tpu.memory_space<vmem>>, %arg5: memref<32x128xbf16, #tpu.memory_space<vmem>>) attributes {dimension_semantics = [#tpu.dimension_semantics<parallel>, #tpu.dimension_semantics<parallel>], iteration_bounds = array<i64: 1, 1>, scalar_prefetch = 0 : i64, scratch_operands = 0 : i64, tpu.core_type = #tpu.core_type<tc>, window_params = [{transform_indices = @transform_0, window_bounds = array<i64: 32, 48>}, {transform_indices = @transform_1, window_bounds = array<i64: 48, 128>}, {transform_indices = @transform_2, window_bounds = array<i64: 1, 128>}, {transform_indices = @transform_3, window_bounds = array<i64: 32, 128>}]} {
    %c0 = arith.constant 0 : index
    %c0_0 = arith.constant 0 : index
    %0 = vector.load %arg2[%c0, %c0_0] : memref<32x48xbf16, #tpu.memory_space<vmem>>, vector<32x48xbf16>
    %c0_1 = arith.constant 0 : index
    %c0_2 = arith.constant 0 : index
    %1 = vector.load %arg3[%c0_1, %c0_2] : memref<48x128xbf16, #tpu.memory_space<vmem>>, vector<48x128xbf16>
    %cst = arith.constant dense<0.000000e+00> : vector<32x128xf32>
    %2 = tpu.matmul %0, %1, %cst {dimension_numbers = #tpu.dot_dimension_numbers<[1], [0], [0], [1], [0, 0, 1, 1], [], []>} : vector<32x48xbf16>, vector<48x128xbf16>, vector<32x128xf32> -> vector<32x128xf32>
    %c0_3 = arith.constant 0 : index
    %c0_4 = arith.constant 0 : index
    %3 = vector.load %arg4[%c0_3, %c0_4] : memref<1x128xf32, #tpu.memory_space<vmem>>, vector<1x128xf32>
    %4 = vector.broadcast %3 : vector<1x128xf32> to vector<32x128xf32>
    %5 = arith.addf %2, %4 : vector<32x128xf32>
    %6 = arith.truncf %5 : vector<32x128xf32> to vector<32x128xbf16>
    %c0_5 = arith.constant 0 : index
    %c0_6 = arith.constant 0 : index
    %7 = vector.load %arg5[%c0_5, %c0_6] : memref<32x128xbf16, #tpu.memory_space<vmem>>, vector<32x128xbf16>
    tpu.vector_store %arg5[%c0_5, %c0_6], %6 {strides = array<i32>} : memref<32x128xbf16, #tpu.memory_space<vmem>>, vector<32x128xbf16>,
    return
  }
  func.func @transform_0(%arg0: i32, %arg1: i32) -> (i32, i32) {
    %c0_i32 = arith.constant 0 : i32
    %c0_i32_0 = arith.constant 0 : i32
    return %arg1, %c0_i32 : i32, i32
  }
  func.func @transform_1(%arg0: i32, %arg1: i32) -> (i32, i32) {
    %c0_i32 = arith.constant 0 : i32
    %c0_i32_0 = arith.constant 0 : i32
    return %c0_i32, %arg0 : i32, i32
  }
  func.func @transform_2(%arg0: i32, %arg1: i32) -> (i32, i32) {
    %c0_i32 = arith.constant 0 : i32
    %c0_i32_0 = arith.constant 0 : i32
    return %c0_i32, %arg0 : i32, i32
  }
  func.func @transform_3(%arg0: i32, %arg1: i32) -> (i32, i32) {
    %c0_i32 = arith.constant 0 : i32
    return %arg1, %arg0 : i32, i32
  }
}

module attributes {stable_mosaic.version = 11 : i64} {
  func.func @_linear_kernel(%arg0: i32, %arg1: i32, %arg2: memref<32x128xbf16, #tpu.memory_space<vmem>>, %arg3: memref<128x128xbf16, #tpu.memory_space<vmem>>, %arg4: memref<1x128xf32, #tpu.memory_space<vmem>>, %arg5: memref<32x128xbf16, #tpu.memory_space<vmem>>) attributes {dimension_semantics = [#tpu.dimension_semantics<parallel>, #tpu.dimension_semantics<parallel>], iteration_bounds = array<i64: 3, 1>, scalar_prefetch = 0 : i64, scratch_operands = 0 : i64, tpu.core_type = #tpu.core_type<tc>, window_params = [{transform_indices = @transform_0, window_bounds = array<i64: 32, 128>}, {transform_indices = @transform_1, window_bounds = array<i64: 128, 128>}, {transform_indices = @transform_2, window_bounds = array<i64: 1, 128>}, {transform_indices = @transform_3, window_bounds = array<i64: 32, 128>}]} {
    %c0 = arith.constant 0 : index
    %c0_0 = arith.constant 0 : index
    %0 = vector.load %arg2[%c0, %c0_0] : memref<32x128xbf16, #tpu.memory_space<vmem>>, vector<32x128xbf16>
    %c0_1 = arith.constant 0 : index
    %c0_2 = arith.constant 0 : index
    %1 = vector.load %arg3[%c0_1, %c0_2] : memref<128x128xbf16, #tpu.memory_space<vmem>>, vector<128x128xbf16>
    %cst = arith.constant dense<0.000000e+00> : vector<32x128xf32>
    %2 = tpu.matmul %0, %1, %cst {dimension_numbers = #tpu.dot_dimension_numbers<[1], [0], [0], [1], [0, 0, 1, 1], [], []>} : vector<32x128xbf16>, vector<128x128xbf16>, vector<32x128xf32> -> vector<32x128xf32>
    %c0_3 = arith.constant 0 : index
    %c0_4 = arith.constant 0 : index
    %3 = vector.load %arg4[%c0_3, %c0_4] : memref<1x128xf32, #tpu.memory_space<vmem>>, vector<1x128xf32>
    %4 = vector.broadcast %3 : vector<1x128xf32> to vector<32x128xf32>
    %5 = arith.addf %2, %4 : vector<32x128xf32>
    %6 = arith.truncf %5 : vector<32x128xf32> to vector<32x128xbf16>
    %c0_5 = arith.constant 0 : index
    %c0_6 = arith.constant 0 : index
    %7 = vector.load %arg5[%c0_5, %c0_6] : memref<32x128xbf16, #tpu.memory_space<vmem>>, vector<32x128xbf16>
    tpu.vector_store %arg5[%c0_5, %c0_6], %6 {strides = array<i32>} : memref<32x128xbf16, #tpu.memory_space<vmem>>, vector<32x128xbf16>,
    return
  }
  func.func @transform_0(%arg0: i32, %arg1: i32) -> (i32, i32) {
    %c0_i32 = arith.constant 0 : i32
    %c0_i32_0 = arith.constant 0 : i32
    return %arg1, %c0_i32 : i32, i32
  }
  func.func @transform_1(%arg0: i32, %arg1: i32) -> (i32, i32) {
    %c0_i32 = arith.constant 0 : i32
    %c0_i32_0 = arith.constant 0 : i32
    return %c0_i32, %arg0 : i32, i32
  }
  func.func @transform_2(%arg0: i32, %arg1: i32) -> (i32, i32) {
    %c0_i32 = arith.constant 0 : i32
    %c0_i32_0 = arith.constant 0 : i32
    return %c0_i32, %arg0 : i32, i32
  }
  func.func @transform_3(%arg0: i32, %arg1: i32) -> (i32, i32) {
    %c0_i32 = arith.constant 0 : i32
    return %arg1, %arg0 : i32, i32
  }
}

module attributes {stable_mosaic.version = 11 : i64} {
  func.func @_mha_kernel(%arg0: i32, %arg1: i32, %arg2: i32, %arg3: memref<1x16x128xbf16, #tpu.memory_space<vmem>>, %arg4: memref<1x16x128xbf16, #tpu.memory_space<vmem>>, %arg5: memref<1x16x128xbf16, #tpu.memory_space<vmem>>, %arg6: memref<1x16x128xbf16, #tpu.memory_space<vmem>>, %arg7: memref<4x16x1xf32, #tpu.memory_space<vmem>>, %arg8: memref<4x16x1xf32, #tpu.memory_space<vmem>>, %arg9: memref<4x16x32xf32, #tpu.memory_space<vmem>>) attributes {dimension_semantics = [#tpu.dimension_semantics<parallel>, #tpu.dimension_semantics<parallel>, #tpu.dimension_semantics<arbitrary>], iteration_bounds = array<i64: 2, 1, 1>, scalar_prefetch = 0 : i64, scratch_operands = 3 : i64, tpu.core_type = #tpu.core_type<tc>, window_params = [{transform_indices = @transform_0, window_bounds = array<i64: 1, 16, 128>}, {transform_indices = @transform_1, window_bounds = array<i64: 1, 16, 128>}, {transform_indices = @transform_2, window_bounds = array<i64: 1, 16, 128>}, {transform_indices = @transform_3, window_bounds = array<i64: 1, 16, 128>}]} {
    %c0_i32 = arith.constant 0 : i32
    %0 = arith.cmpi eq, %arg2, %c0_i32 : i32
    %1 = arith.extui %0 : i1 to i32
    %c0_i32_0 = arith.constant 0 : i32
    %2 = arith.cmpi ne, %1, %c0_i32_0 : i32
    scf.if %2 {
      %cst_99 = arith.constant -1.000000e+30 : f32
      %164 = vector.broadcast %cst_99 : f32 to vector<4x16x1xf32>
      %c0_100 = arith.constant 0 : index
      %c0_101 = arith.constant 0 : index
      %c0_102 = arith.constant 0 : index
      %165 = vector.load %arg7[%c0_100, %c0_101, %c0_102] : memref<4x16x1xf32, #tpu.memory_space<vmem>>, vector<4x16x1xf32>
      tpu.vector_store %arg7[%c0_100, %c0_101, %c0_102], %164 {strides = array<i32>} : memref<4x16x1xf32, #tpu.memory_space<vmem>>, vector<4x16x1xf32>,
      %cst_103 = arith.constant 0.000000e+00 : f32
      %166 = vector.broadcast %cst_103 : f32 to vector<4x16x1xf32>
      %c0_104 = arith.constant 0 : index
      %c0_105 = arith.constant 0 : index
      %c0_106 = arith.constant 0 : index
      %167 = vector.load %arg8[%c0_104, %c0_105, %c0_106] : memref<4x16x1xf32, #tpu.memory_space<vmem>>, vector<4x16x1xf32>
      tpu.vector_store %arg8[%c0_104, %c0_105, %c0_106], %166 {strides = array<i32>} : memref<4x16x1xf32, #tpu.memory_space<vmem>>, vector<4x16x1xf32>,
      %cst_107 = arith.constant 0.000000e+00 : f32
      %168 = vector.broadcast %cst_107 : f32 to vector<4x16x32xf32>
      %c0_108 = arith.constant 0 : index
      %c0_109 = arith.constant 0 : index
      %c0_110 = arith.constant 0 : index
      %169 = vector.load %arg9[%c0_108, %c0_109, %c0_110] : memref<4x16x32xf32, #tpu.memory_space<vmem>>, vector<4x16x32xf32>
      tpu.vector_store %arg9[%c0_108, %c0_109, %c0_110], %168 {strides = array<i32>} : memref<4x16x32xf32, #tpu.memory_space<vmem>>, vector<4x16x32xf32>,
    } else {
    }
    %c0 = arith.constant 0 : index
    %c0_1 = arith.constant 0 : index
    %c0_2 = arith.constant 0 : index
    %3 = vector.load %arg3[%c0, %c0_1, %c0_2] : memref<1x16x128xbf16, #tpu.memory_space<vmem>>, vector<1x16x128xbf16>
    %4 = vector.shape_cast %3 : vector<1x16x128xbf16> to vector<16x128xbf16>
    %c0_3 = arith.constant 0 : index
    %c0_4 = arith.constant 0 : index
    %c0_5 = arith.constant 0 : index
    %5 = vector.load %arg4[%c0_3, %c0_4, %c0_5] : memref<1x16x128xbf16, #tpu.memory_space<vmem>>, vector<1x16x128xbf16>
    %6 = vector.shape_cast %5 : vector<1x16x128xbf16> to vector<16x128xbf16>
    %c0_6 = arith.constant 0 : index
    %c0_7 = arith.constant 0 : index
    %c0_8 = arith.constant 0 : index
    %7 = vector.load %arg5[%c0_6, %c0_7, %c0_8] : memref<1x16x128xbf16, #tpu.memory_space<vmem>>, vector<1x16x128xbf16>
    %8 = vector.shape_cast %7 : vector<1x16x128xbf16> to vector<16x128xbf16>
    %9 = vector.extract_strided_slice %4 {offsets = [0, 0], sizes = [16, 32], strides = [1, 1]} : vector<16x128xbf16> to vector<16x32xbf16>
    %10 = vector.extract_strided_slice %6 {offsets = [0, 0], sizes = [16, 32], strides = [1, 1]} : vector<16x128xbf16> to vector<16x32xbf16>
    %11 = vector.extract_strided_slice %8 {offsets = [0, 0], sizes = [16, 32], strides = [1, 1]} : vector<16x128xbf16> to vector<16x32xbf16>
    %cst = arith.constant dense<0.000000e+00> : vector<16x16xf32>
    %12 = tpu.matmul %9, %10, %cst {dimension_numbers = #tpu.dot_dimension_numbers<[1], [1], [0], [0], [0, 0, 1, 0], [], []>} : vector<16x32xbf16>, vector<16x32xbf16>, vector<16x16xf32> -> vector<16x16xf32>
    %cst_9 = arith.constant 0.176776692 : f32
    %13 = vector.broadcast %cst_9 : f32 to vector<16x16xf32>
    %14 = arith.mulf %12, %13 : vector<16x16xf32>
    %c0_10 = arith.constant 0 : index
    %c0_11 = arith.constant 0 : index
    %c0_12 = arith.constant 0 : index
    %15 = vector.load %arg7[%c0_10, %c0_11, %c0_12] : memref<4x16x1xf32, #tpu.memory_space<vmem>>, vector<1x16x1xf32>
    %16 = vector.shape_cast %15 : vector<1x16x1xf32> to vector<16x1xf32>
    %cst_13 = arith.constant dense<0xFF800000> : vector<16xf32>
    %17 = vector.multi_reduction <maximumf>, %14, %cst_13 [1] : vector<16x16xf32> to vector<16xf32>
    %18 = vector.shape_cast %17 : vector<16xf32> to vector<16x1xf32>
    %19 = arith.maximumf %16, %18 : vector<16x1xf32>
    %20 = arith.subf %16, %19 : vector<16x1xf32>
    %21 = math.exp %20 : vector<16x1xf32>
    %22 = vector.broadcast %19 : vector<16x1xf32> to vector<16x16xf32>
    %23 = arith.subf %14, %22 : vector<16x16xf32>
    %24 = math.exp %23 : vector<16x16xf32>
    %c0_14 = arith.constant 0 : index
    %c0_15 = arith.constant 0 : index
    %c0_16 = arith.constant 0 : index
    %25 = vector.load %arg8[%c0_14, %c0_15, %c0_16] : memref<4x16x1xf32, #tpu.memory_space<vmem>>, vector<1x16x1xf32>
    %26 = vector.shape_cast %25 : vector<1x16x1xf32> to vector<16x1xf32>
    %27 = arith.mulf %21, %26 : vector<16x1xf32>
    %cst_17 = arith.constant dense<0.000000e+00> : vector<16xf32>
    %28 = vector.multi_reduction <add>, %24, %cst_17 [1] : vector<16x16xf32> to vector<16xf32>
    %29 = vector.shape_cast %28 : vector<16xf32> to vector<16x1xf32>
    %30 = arith.addf %27, %29 : vector<16x1xf32>
    %c0_18 = arith.constant 0 : index
    %c0_19 = arith.constant 0 : index
    %c0_20 = arith.constant 0 : index
    %31 = vector.load %arg8[%c0_18, %c0_19, %c0_20] : memref<4x16x1xf32, #tpu.memory_space<vmem>>, vector<1x16x1xf32>
    %32 = vector.shape_cast %31 : vector<1x16x1xf32> to vector<16x1xf32>
    %33 = vector.shape_cast %30 : vector<16x1xf32> to vector<1x16x1xf32>
    tpu.vector_store %arg8[%c0_18, %c0_19, %c0_20], %33 {strides = array<i32>} : memref<4x16x1xf32, #tpu.memory_space<vmem>>, vector<1x16x1xf32>,
    %34 = arith.truncf %24 : vector<16x16xf32> to vector<16x16xbf16>
    %cst_21 = arith.constant dense<0.000000e+00> : vector<16x32xf32>
    %35 = tpu.matmul %34, %11, %cst_21 {dimension_numbers = #tpu.dot_dimension_numbers<[1], [0], [0], [1], [0, 0, 1, 1], [], []>} : vector<16x16xbf16>, vector<16x32xbf16>, vector<16x32xf32> -> vector<16x32xf32>
    %c0_22 = arith.constant 0 : index
    %c0_23 = arith.constant 0 : index
    %c0_24 = arith.constant 0 : index
    %36 = vector.load %arg9[%c0_22, %c0_23, %c0_24] : memref<4x16x32xf32, #tpu.memory_space<vmem>>, vector<1x16x32xf32>
    %37 = vector.shape_cast %36 : vector<1x16x32xf32> to vector<16x32xf32>
    %38 = vector.broadcast %21 : vector<16x1xf32> to vector<16x32xf32>
    %39 = arith.mulf %38, %37 : vector<16x32xf32>
    %40 = arith.addf %39, %35 : vector<16x32xf32>
    %c0_25 = arith.constant 0 : index
    %c0_26 = arith.constant 0 : index
    %c0_27 = arith.constant 0 : index
    %41 = vector.load %arg9[%c0_25, %c0_26, %c0_27] : memref<4x16x32xf32, #tpu.memory_space<vmem>>, vector<1x16x32xf32>
    %42 = vector.shape_cast %41 : vector<1x16x32xf32> to vector<16x32xf32>
    %43 = vector.shape_cast %40 : vector<16x32xf32> to vector<1x16x32xf32>
    tpu.vector_store %arg9[%c0_25, %c0_26, %c0_27], %43 {strides = array<i32>} : memref<4x16x32xf32, #tpu.memory_space<vmem>>, vector<1x16x32xf32>,
    %c0_28 = arith.constant 0 : index
    %c0_29 = arith.constant 0 : index
    %c0_30 = arith.constant 0 : index
    %44 = vector.load %arg7[%c0_28, %c0_29, %c0_30] : memref<4x16x1xf32, #tpu.memory_space<vmem>>, vector<1x16x1xf32>
    %45 = vector.shape_cast %44 : vector<1x16x1xf32> to vector<16x1xf32>
    %46 = vector.shape_cast %19 : vector<16x1xf32> to vector<1x16x1xf32>
    tpu.vector_store %arg7[%c0_28, %c0_29, %c0_30], %46 {strides = array<i32>} : memref<4x16x1xf32, #tpu.memory_space<vmem>>, vector<1x16x1xf32>,
    %47 = vector.extract_strided_slice %4 {offsets = [0, 32], sizes = [16, 32], strides = [1, 1]} : vector<16x128xbf16> to vector<16x32xbf16>
    %48 = vector.extract_strided_slice %6 {offsets = [0, 32], sizes = [16, 32], strides = [1, 1]} : vector<16x128xbf16> to vector<16x32xbf16>
    %49 = vector.extract_strided_slice %8 {offsets = [0, 32], sizes = [16, 32], strides = [1, 1]} : vector<16x128xbf16> to vector<16x32xbf16>
    %cst_31 = arith.constant dense<0.000000e+00> : vector<16x16xf32>
    %50 = tpu.matmul %47, %48, %cst_31 {dimension_numbers = #tpu.dot_dimension_numbers<[1], [1], [0], [0], [0, 0, 1, 0], [], []>} : vector<16x32xbf16>, vector<16x32xbf16>, vector<16x16xf32> -> vector<16x16xf32>
    %cst_32 = arith.constant 0.176776692 : f32
    %51 = vector.broadcast %cst_32 : f32 to vector<16x16xf32>
    %52 = arith.mulf %50, %51 : vector<16x16xf32>
    %c1 = arith.constant 1 : index
    %c0_33 = arith.constant 0 : index
    %c0_34 = arith.constant 0 : index
    %53 = vector.load %arg7[%c1, %c0_33, %c0_34] : memref<4x16x1xf32, #tpu.memory_space<vmem>>, vector<1x16x1xf32>
    %54 = vector.shape_cast %53 : vector<1x16x1xf32> to vector<16x1xf32>
    %cst_35 = arith.constant dense<0xFF800000> : vector<16xf32>
    %55 = vector.multi_reduction <maximumf>, %52, %cst_35 [1] : vector<16x16xf32> to vector<16xf32>
    %56 = vector.shape_cast %55 : vector<16xf32> to vector<16x1xf32>
    %57 = arith.maximumf %54, %56 : vector<16x1xf32>
    %58 = arith.subf %54, %57 : vector<16x1xf32>
    %59 = math.exp %58 : vector<16x1xf32>
    %60 = vector.broadcast %57 : vector<16x1xf32> to vector<16x16xf32>
    %61 = arith.subf %52, %60 : vector<16x16xf32>
    %62 = math.exp %61 : vector<16x16xf32>
    %c1_36 = arith.constant 1 : index
    %c0_37 = arith.constant 0 : index
    %c0_38 = arith.constant 0 : index
    %63 = vector.load %arg8[%c1_36, %c0_37, %c0_38] : memref<4x16x1xf32, #tpu.memory_space<vmem>>, vector<1x16x1xf32>
    %64 = vector.shape_cast %63 : vector<1x16x1xf32> to vector<16x1xf32>
    %65 = arith.mulf %59, %64 : vector<16x1xf32>
    %cst_39 = arith.constant dense<0.000000e+00> : vector<16xf32>
    %66 = vector.multi_reduction <add>, %62, %cst_39 [1] : vector<16x16xf32> to vector<16xf32>
    %67 = vector.shape_cast %66 : vector<16xf32> to vector<16x1xf32>
    %68 = arith.addf %65, %67 : vector<16x1xf32>
    %c1_40 = arith.constant 1 : index
    %c0_41 = arith.constant 0 : index
    %c0_42 = arith.constant 0 : index
    %69 = vector.load %arg8[%c1_40, %c0_41, %c0_42] : memref<4x16x1xf32, #tpu.memory_space<vmem>>, vector<1x16x1xf32>
    %70 = vector.shape_cast %69 : vector<1x16x1xf32> to vector<16x1xf32>
    %71 = vector.shape_cast %68 : vector<16x1xf32> to vector<1x16x1xf32>
    tpu.vector_store %arg8[%c1_40, %c0_41, %c0_42], %71 {strides = array<i32>} : memref<4x16x1xf32, #tpu.memory_space<vmem>>, vector<1x16x1xf32>,
    %72 = arith.truncf %62 : vector<16x16xf32> to vector<16x16xbf16>
    %cst_43 = arith.constant dense<0.000000e+00> : vector<16x32xf32>
    %73 = tpu.matmul %72, %49, %cst_43 {dimension_numbers = #tpu.dot_dimension_numbers<[1], [0], [0], [1], [0, 0, 1, 1], [], []>} : vector<16x16xbf16>, vector<16x32xbf16>, vector<16x32xf32> -> vector<16x32xf32>
    %c1_44 = arith.constant 1 : index
    %c0_45 = arith.constant 0 : index
    %c0_46 = arith.constant 0 : index
    %74 = vector.load %arg9[%c1_44, %c0_45, %c0_46] : memref<4x16x32xf32, #tpu.memory_space<vmem>>, vector<1x16x32xf32>
    %75 = vector.shape_cast %74 : vector<1x16x32xf32> to vector<16x32xf32>
    %76 = vector.broadcast %59 : vector<16x1xf32> to vector<16x32xf32>
    %77 = arith.mulf %76, %75 : vector<16x32xf32>
    %78 = arith.addf %77, %73 : vector<16x32xf32>
    %c1_47 = arith.constant 1 : index
    %c0_48 = arith.constant 0 : index
    %c0_49 = arith.constant 0 : index
    %79 = vector.load %arg9[%c1_47, %c0_48, %c0_49] : memref<4x16x32xf32, #tpu.memory_space<vmem>>, vector<1x16x32xf32>
    %80 = vector.shape_cast %79 : vector<1x16x32xf32> to vector<16x32xf32>
    %81 = vector.shape_cast %78 : vector<16x32xf32> to vector<1x16x32xf32>
    tpu.vector_store %arg9[%c1_47, %c0_48, %c0_49], %81 {strides = array<i32>} : memref<4x16x32xf32, #tpu.memory_space<vmem>>, vector<1x16x32xf32>,
    %c1_50 = arith.constant 1 : index
    %c0_51 = arith.constant 0 : index
    %c0_52 = arith.constant 0 : index
    %82 = vector.load %arg7[%c1_50, %c0_51, %c0_52] : memref<4x16x1xf32, #tpu.memory_space<vmem>>, vector<1x16x1xf32>
    %83 = vector.shape_cast %82 : vector<1x16x1xf32> to vector<16x1xf32>
    %84 = vector.shape_cast %57 : vector<16x1xf32> to vector<1x16x1xf32>
    tpu.vector_store %arg7[%c1_50, %c0_51, %c0_52], %84 {strides = array<i32>} : memref<4x16x1xf32, #tpu.memory_space<vmem>>, vector<1x16x1xf32>,
    %85 = vector.extract_strided_slice %4 {offsets = [0, 64], sizes = [16, 32], strides = [1, 1]} : vector<16x128xbf16> to vector<16x32xbf16>
    %86 = vector.extract_strided_slice %6 {offsets = [0, 64], sizes = [16, 32], strides = [1, 1]} : vector<16x128xbf16> to vector<16x32xbf16>
    %87 = vector.extract_strided_slice %8 {offsets = [0, 64], sizes = [16, 32], strides = [1, 1]} : vector<16x128xbf16> to vector<16x32xbf16>
    %cst_53 = arith.constant dense<0.000000e+00> : vector<16x16xf32>
    %88 = tpu.matmul %85, %86, %cst_53 {dimension_numbers = #tpu.dot_dimension_numbers<[1], [1], [0], [0], [0, 0, 1, 0], [], []>} : vector<16x32xbf16>, vector<16x32xbf16>, vector<16x16xf32> -> vector<16x16xf32>
    %cst_54 = arith.constant 0.176776692 : f32
    %89 = vector.broadcast %cst_54 : f32 to vector<16x16xf32>
    %90 = arith.mulf %88, %89 : vector<16x16xf32>
    %c2 = arith.constant 2 : index
    %c0_55 = arith.constant 0 : index
    %c0_56 = arith.constant 0 : index
    %91 = vector.load %arg7[%c2, %c0_55, %c0_56] : memref<4x16x1xf32, #tpu.memory_space<vmem>>, vector<1x16x1xf32>
    %92 = vector.shape_cast %91 : vector<1x16x1xf32> to vector<16x1xf32>
    %cst_57 = arith.constant dense<0xFF800000> : vector<16xf32>
    %93 = vector.multi_reduction <maximumf>, %90, %cst_57 [1] : vector<16x16xf32> to vector<16xf32>
    %94 = vector.shape_cast %93 : vector<16xf32> to vector<16x1xf32>
    %95 = arith.maximumf %92, %94 : vector<16x1xf32>
    %96 = arith.subf %92, %95 : vector<16x1xf32>
    %97 = math.exp %96 : vector<16x1xf32>
    %98 = vector.broadcast %95 : vector<16x1xf32> to vector<16x16xf32>
    %99 = arith.subf %90, %98 : vector<16x16xf32>
    %100 = math.exp %99 : vector<16x16xf32>
    %c2_58 = arith.constant 2 : index
    %c0_59 = arith.constant 0 : index
    %c0_60 = arith.constant 0 : index
    %101 = vector.load %arg8[%c2_58, %c0_59, %c0_60] : memref<4x16x1xf32, #tpu.memory_space<vmem>>, vector<1x16x1xf32>
    %102 = vector.shape_cast %101 : vector<1x16x1xf32> to vector<16x1xf32>
    %103 = arith.mulf %97, %102 : vector<16x1xf32>
    %cst_61 = arith.constant dense<0.000000e+00> : vector<16xf32>
    %104 = vector.multi_reduction <add>, %100, %cst_61 [1] : vector<16x16xf32> to vector<16xf32>
    %105 = vector.shape_cast %104 : vector<16xf32> to vector<16x1xf32>
    %106 = arith.addf %103, %105 : vector<16x1xf32>
    %c2_62 = arith.constant 2 : index
    %c0_63 = arith.constant 0 : index
    %c0_64 = arith.constant 0 : index
    %107 = vector.load %arg8[%c2_62, %c0_63, %c0_64] : memref<4x16x1xf32, #tpu.memory_space<vmem>>, vector<1x16x1xf32>
    %108 = vector.shape_cast %107 : vector<1x16x1xf32> to vector<16x1xf32>
    %109 = vector.shape_cast %106 : vector<16x1xf32> to vector<1x16x1xf32>
    tpu.vector_store %arg8[%c2_62, %c0_63, %c0_64], %109 {strides = array<i32>} : memref<4x16x1xf32, #tpu.memory_space<vmem>>, vector<1x16x1xf32>,
    %110 = arith.truncf %100 : vector<16x16xf32> to vector<16x16xbf16>
    %cst_65 = arith.constant dense<0.000000e+00> : vector<16x32xf32>
    %111 = tpu.matmul %110, %87, %cst_65 {dimension_numbers = #tpu.dot_dimension_numbers<[1], [0], [0], [1], [0, 0, 1, 1], [], []>} : vector<16x16xbf16>, vector<16x32xbf16>, vector<16x32xf32> -> vector<16x32xf32>
    %c2_66 = arith.constant 2 : index
    %c0_67 = arith.constant 0 : index
    %c0_68 = arith.constant 0 : index
    %112 = vector.load %arg9[%c2_66, %c0_67, %c0_68] : memref<4x16x32xf32, #tpu.memory_space<vmem>>, vector<1x16x32xf32>
    %113 = vector.shape_cast %112 : vector<1x16x32xf32> to vector<16x32xf32>
    %114 = vector.broadcast %97 : vector<16x1xf32> to vector<16x32xf32>
    %115 = arith.mulf %114, %113 : vector<16x32xf32>
    %116 = arith.addf %115, %111 : vector<16x32xf32>
    %c2_69 = arith.constant 2 : index
    %c0_70 = arith.constant 0 : index
    %c0_71 = arith.constant 0 : index
    %117 = vector.load %arg9[%c2_69, %c0_70, %c0_71] : memref<4x16x32xf32, #tpu.memory_space<vmem>>, vector<1x16x32xf32>
    %118 = vector.shape_cast %117 : vector<1x16x32xf32> to vector<16x32xf32>
    %119 = vector.shape_cast %116 : vector<16x32xf32> to vector<1x16x32xf32>
    tpu.vector_store %arg9[%c2_69, %c0_70, %c0_71], %119 {strides = array<i32>} : memref<4x16x32xf32, #tpu.memory_space<vmem>>, vector<1x16x32xf32>,
    %c2_72 = arith.constant 2 : index
    %c0_73 = arith.constant 0 : index
    %c0_74 = arith.constant 0 : index
    %120 = vector.load %arg7[%c2_72, %c0_73, %c0_74] : memref<4x16x1xf32, #tpu.memory_space<vmem>>, vector<1x16x1xf32>
    %121 = vector.shape_cast %120 : vector<1x16x1xf32> to vector<16x1xf32>
    %122 = vector.shape_cast %95 : vector<16x1xf32> to vector<1x16x1xf32>
    tpu.vector_store %arg7[%c2_72, %c0_73, %c0_74], %122 {strides = array<i32>} : memref<4x16x1xf32, #tpu.memory_space<vmem>>, vector<1x16x1xf32>,
    %123 = vector.extract_strided_slice %4 {offsets = [0, 96], sizes = [16, 32], strides = [1, 1]} : vector<16x128xbf16> to vector<16x32xbf16>
    %124 = vector.extract_strided_slice %6 {offsets = [0, 96], sizes = [16, 32], strides = [1, 1]} : vector<16x128xbf16> to vector<16x32xbf16>
    %125 = vector.extract_strided_slice %8 {offsets = [0, 96], sizes = [16, 32], strides = [1, 1]} : vector<16x128xbf16> to vector<16x32xbf16>
    %cst_75 = arith.constant dense<0.000000e+00> : vector<16x16xf32>
    %126 = tpu.matmul %123, %124, %cst_75 {dimension_numbers = #tpu.dot_dimension_numbers<[1], [1], [0], [0], [0, 0, 1, 0], [], []>} : vector<16x32xbf16>, vector<16x32xbf16>, vector<16x16xf32> -> vector<16x16xf32>
    %cst_76 = arith.constant 0.176776692 : f32
    %127 = vector.broadcast %cst_76 : f32 to vector<16x16xf32>
    %128 = arith.mulf %126, %127 : vector<16x16xf32>
    %c3 = arith.constant 3 : index
    %c0_77 = arith.constant 0 : index
    %c0_78 = arith.constant 0 : index
    %129 = vector.load %arg7[%c3, %c0_77, %c0_78] : memref<4x16x1xf32, #tpu.memory_space<vmem>>, vector<1x16x1xf32>
    %130 = vector.shape_cast %129 : vector<1x16x1xf32> to vector<16x1xf32>
    %cst_79 = arith.constant dense<0xFF800000> : vector<16xf32>
    %131 = vector.multi_reduction <maximumf>, %128, %cst_79 [1] : vector<16x16xf32> to vector<16xf32>
    %132 = vector.shape_cast %131 : vector<16xf32> to vector<16x1xf32>
    %133 = arith.maximumf %130, %132 : vector<16x1xf32>
    %134 = arith.subf %130, %133 : vector<16x1xf32>
    %135 = math.exp %134 : vector<16x1xf32>
    %136 = vector.broadcast %133 : vector<16x1xf32> to vector<16x16xf32>
    %137 = arith.subf %128, %136 : vector<16x16xf32>
    %138 = math.exp %137 : vector<16x16xf32>
    %c3_80 = arith.constant 3 : index
    %c0_81 = arith.constant 0 : index
    %c0_82 = arith.constant 0 : index
    %139 = vector.load %arg8[%c3_80, %c0_81, %c0_82] : memref<4x16x1xf32, #tpu.memory_space<vmem>>, vector<1x16x1xf32>
    %140 = vector.shape_cast %139 : vector<1x16x1xf32> to vector<16x1xf32>
    %141 = arith.mulf %135, %140 : vector<16x1xf32>
    %cst_83 = arith.constant dense<0.000000e+00> : vector<16xf32>
    %142 = vector.multi_reduction <add>, %138, %cst_83 [1] : vector<16x16xf32> to vector<16xf32>
    %143 = vector.shape_cast %142 : vector<16xf32> to vector<16x1xf32>
    %144 = arith.addf %141, %143 : vector<16x1xf32>
    %c3_84 = arith.constant 3 : index
    %c0_85 = arith.constant 0 : index
    %c0_86 = arith.constant 0 : index
    %145 = vector.load %arg8[%c3_84, %c0_85, %c0_86] : memref<4x16x1xf32, #tpu.memory_space<vmem>>, vector<1x16x1xf32>
    %146 = vector.shape_cast %145 : vector<1x16x1xf32> to vector<16x1xf32>
    %147 = vector.shape_cast %144 : vector<16x1xf32> to vector<1x16x1xf32>
    tpu.vector_store %arg8[%c3_84, %c0_85, %c0_86], %147 {strides = array<i32>} : memref<4x16x1xf32, #tpu.memory_space<vmem>>, vector<1x16x1xf32>,
    %148 = arith.truncf %138 : vector<16x16xf32> to vector<16x16xbf16>
    %cst_87 = arith.constant dense<0.000000e+00> : vector<16x32xf32>
    %149 = tpu.matmul %148, %125, %cst_87 {dimension_numbers = #tpu.dot_dimension_numbers<[1], [0], [0], [1], [0, 0, 1, 1], [], []>} : vector<16x16xbf16>, vector<16x32xbf16>, vector<16x32xf32> -> vector<16x32xf32>
    %c3_88 = arith.constant 3 : index
    %c0_89 = arith.constant 0 : index
    %c0_90 = arith.constant 0 : index
    %150 = vector.load %arg9[%c3_88, %c0_89, %c0_90] : memref<4x16x32xf32, #tpu.memory_space<vmem>>, vector<1x16x32xf32>
    %151 = vector.shape_cast %150 : vector<1x16x32xf32> to vector<16x32xf32>
    %152 = vector.broadcast %135 : vector<16x1xf32> to vector<16x32xf32>
    %153 = arith.mulf %152, %151 : vector<16x32xf32>
    %154 = arith.addf %153, %149 : vector<16x32xf32>
    %c3_91 = arith.constant 3 : index
    %c0_92 = arith.constant 0 : index
    %c0_93 = arith.constant 0 : index
    %155 = vector.load %arg9[%c3_91, %c0_92, %c0_93] : memref<4x16x32xf32, #tpu.memory_space<vmem>>, vector<1x16x32xf32>
    %156 = vector.shape_cast %155 : vector<1x16x32xf32> to vector<16x32xf32>
    %157 = vector.shape_cast %154 : vector<16x32xf32> to vector<1x16x32xf32>
    tpu.vector_store %arg9[%c3_91, %c0_92, %c0_93], %157 {strides = array<i32>} : memref<4x16x32xf32, #tpu.memory_space<vmem>>, vector<1x16x32xf32>,
    %c3_94 = arith.constant 3 : index
    %c0_95 = arith.constant 0 : index
    %c0_96 = arith.constant 0 : index
    %158 = vector.load %arg7[%c3_94, %c0_95, %c0_96] : memref<4x16x1xf32, #tpu.memory_space<vmem>>, vector<1x16x1xf32>
    %159 = vector.shape_cast %158 : vector<1x16x1xf32> to vector<16x1xf32>
    %160 = vector.shape_cast %133 : vector<16x1xf32> to vector<1x16x1xf32>
    tpu.vector_store %arg7[%c3_94, %c0_95, %c0_96], %160 {strides = array<i32>} : memref<4x16x1xf32, #tpu.memory_space<vmem>>, vector<1x16x1xf32>,
    %c0_i32_97 = arith.constant 0 : i32
    %161 = arith.cmpi eq, %arg2, %c0_i32_97 : i32
    %162 = arith.extui %161 : i1 to i32
    %c0_i32_98 = arith.constant 0 : i32
    %163 = arith.cmpi ne, %162, %c0_i32_98 : i32
    scf.if %163 {
      %c0_99 = arith.constant 0 : index
      %c0_100 = arith.constant 0 : index
      %c0_101 = arith.constant 0 : index
      %164 = vector.load %arg8[%c0_99, %c0_100, %c0_101] : memref<4x16x1xf32, #tpu.memory_space<vmem>>, vector<1x16x1xf32>
      %165 = vector.shape_cast %164 : vector<1x16x1xf32> to vector<16x1xf32>
      %166 = tpu.reciprocal %165 {approx = true} : vector<16x1xf32> -> vector<16x1xf32>
      %c0_102 = arith.constant 0 : index
      %c0_103 = arith.constant 0 : index
      %c0_104 = arith.constant 0 : index
      %167 = vector.load %arg9[%c0_102, %c0_103, %c0_104] : memref<4x16x32xf32, #tpu.memory_space<vmem>>, vector<1x16x32xf32>
      %168 = vector.shape_cast %167 : vector<1x16x32xf32> to vector<16x32xf32>
      %169 = vector.broadcast %166 : vector<16x1xf32> to vector<16x32xf32>
      %170 = arith.mulf %168, %169 : vector<16x32xf32>
      %c1_105 = arith.constant 1 : index
      %c0_106 = arith.constant 0 : index
      %c0_107 = arith.constant 0 : index
      %171 = vector.load %arg8[%c1_105, %c0_106, %c0_107] : memref<4x16x1xf32, #tpu.memory_space<vmem>>, vector<1x16x1xf32>
      %172 = vector.shape_cast %171 : vector<1x16x1xf32> to vector<16x1xf32>
      %173 = tpu.reciprocal %172 {approx = true} : vector<16x1xf32> -> vector<16x1xf32>
      %c1_108 = arith.constant 1 : index
      %c0_109 = arith.constant 0 : index
      %c0_110 = arith.constant 0 : index
      %174 = vector.load %arg9[%c1_108, %c0_109, %c0_110] : memref<4x16x32xf32, #tpu.memory_space<vmem>>, vector<1x16x32xf32>
      %175 = vector.shape_cast %174 : vector<1x16x32xf32> to vector<16x32xf32>
      %176 = vector.broadcast %173 : vector<16x1xf32> to vector<16x32xf32>
      %177 = arith.mulf %175, %176 : vector<16x32xf32>
      %c2_111 = arith.constant 2 : index
      %c0_112 = arith.constant 0 : index
      %c0_113 = arith.constant 0 : index
      %178 = vector.load %arg8[%c2_111, %c0_112, %c0_113] : memref<4x16x1xf32, #tpu.memory_space<vmem>>, vector<1x16x1xf32>
      %179 = vector.shape_cast %178 : vector<1x16x1xf32> to vector<16x1xf32>
      %180 = tpu.reciprocal %179 {approx = true} : vector<16x1xf32> -> vector<16x1xf32>
      %c2_114 = arith.constant 2 : index
      %c0_115 = arith.constant 0 : index
      %c0_116 = arith.constant 0 : index
      %181 = vector.load %arg9[%c2_114, %c0_115, %c0_116] : memref<4x16x32xf32, #tpu.memory_space<vmem>>, vector<1x16x32xf32>
      %182 = vector.shape_cast %181 : vector<1x16x32xf32> to vector<16x32xf32>
      %183 = vector.broadcast %180 : vector<16x1xf32> to vector<16x32xf32>
      %184 = arith.mulf %182, %183 : vector<16x32xf32>
      %c3_117 = arith.constant 3 : index
      %c0_118 = arith.constant 0 : index
      %c0_119 = arith.constant 0 : index
      %185 = vector.load %arg8[%c3_117, %c0_118, %c0_119] : memref<4x16x1xf32, #tpu.memory_space<vmem>>, vector<1x16x1xf32>
      %186 = vector.shape_cast %185 : vector<1x16x1xf32> to vector<16x1xf32>
      %187 = tpu.reciprocal %186 {approx = true} : vector<16x1xf32> -> vector<16x1xf32>
      %c3_120 = arith.constant 3 : index
      %c0_121 = arith.constant 0 : index
      %c0_122 = arith.constant 0 : index
      %188 = vector.load %arg9[%c3_120, %c0_121, %c0_122] : memref<4x16x32xf32, #tpu.memory_space<vmem>>, vector<1x16x32xf32>
      %189 = vector.shape_cast %188 : vector<1x16x32xf32> to vector<16x32xf32>
      %190 = vector.broadcast %187 : vector<16x1xf32> to vector<16x32xf32>
      %191 = arith.mulf %189, %190 : vector<16x32xf32>
      %192 = tpu.concatenate %170, %177, %184, %191 in 1 : vector<16x32xf32>, vector<16x32xf32>, vector<16x32xf32>, vector<16x32xf32> -> vector<16x128xf32>
      %193 = arith.truncf %192 : vector<16x128xf32> to vector<16x128xbf16>
      %c0_123 = arith.constant 0 : index
      %c0_124 = arith.constant 0 : index
      %c0_125 = arith.constant 0 : index
      %194 = vector.load %arg6[%c0_123, %c0_124, %c0_125] : memref<1x16x128xbf16, #tpu.memory_space<vmem>>, vector<1x16x128xbf16>
      %195 = vector.shape_cast %194 : vector<1x16x128xbf16> to vector<16x128xbf16>
      %196 = vector.shape_cast %193 : vector<16x128xbf16> to vector<1x16x128xbf16>
      tpu.vector_store %arg6[%c0_123, %c0_124, %c0_125], %196 {strides = array<i32>} : memref<1x16x128xbf16, #tpu.memory_space<vmem>>, vector<1x16x128xbf16>,
    } else {
    }
    return
  }
  func.func @transform_0(%arg0: i32, %arg1: i32, %arg2: i32) -> (i32, i32, i32) {
    %c0_i32 = arith.constant 0 : i32
    %c0_i32_0 = arith.constant 0 : i32
    return %arg0, %arg1, %c0_i32 : i32, i32, i32
  }
  func.func @transform_1(%arg0: i32, %arg1: i32, %arg2: i32) -> (i32, i32, i32) {
    %c1_i32 = arith.constant 1 : i32
    %c0_i32 = arith.constant 0 : i32
    return %arg0, %arg2, %c1_i32 : i32, i32, i32
  }
  func.func @transform_2(%arg0: i32, %arg1: i32, %arg2: i32) -> (i32, i32, i32) {
    %c2_i32 = arith.constant 2 : i32
    %c0_i32 = arith.constant 0 : i32
    return %arg0, %arg2, %c2_i32 : i32, i32, i32
  }
  func.func @transform_3(%arg0: i32, %arg1: i32, %arg2: i32) -> (i32, i32, i32) {
    %c0_i32 = arith.constant 0 : i32
    %c0_i32_0 = arith.constant 0 : i32
    return %arg0, %arg1, %c0_i32 : i32, i32, i32
  }
}

module attributes {stable_mosaic.version = 11 : i64} {
  func.func @_proj_res_ln_kernel(%arg0: i32, %arg1: memref<32x128xbf16, #tpu.memory_space<vmem>>, %arg2: memref<32x128xbf16, #tpu.memory_space<vmem>>, %arg3: memref<128x128xbf16, #tpu.memory_space<vmem>>, %arg4: memref<1x128xf32, #tpu.memory_space<vmem>>, %arg5: memref<1x128xf32, #tpu.memory_space<vmem>>, %arg6: memref<1x128xf32, #tpu.memory_space<vmem>>, %arg7: memref<32x128xbf16, #tpu.memory_space<vmem>>) attributes {dimension_semantics = [#tpu.dimension_semantics<parallel>], iteration_bounds = array<i64: 1>, scalar_prefetch = 0 : i64, scratch_operands = 0 : i64, tpu.core_type = #tpu.core_type<tc>, window_params = [{transform_indices = @transform_0, window_bounds = array<i64: 32, 128>}, {transform_indices = @transform_1, window_bounds = array<i64: 32, 128>}, {pipeline_mode = #tpu.pipeline_mode<synchronous>, transform_indices = @transform_2, window_bounds = array<i64: 128, 128>}, {pipeline_mode = #tpu.pipeline_mode<synchronous>, transform_indices = @transform_3, window_bounds = array<i64: 1, 128>}, {pipeline_mode = #tpu.pipeline_mode<synchronous>, transform_indices = @transform_4, window_bounds = array<i64: 1, 128>}, {pipeline_mode = #tpu.pipeline_mode<synchronous>, transform_indices = @transform_5, window_bounds = array<i64: 1, 128>}, {transform_indices = @transform_6, window_bounds = array<i64: 32, 128>}]} {
    %c0 = arith.constant 0 : index
    %c0_0 = arith.constant 0 : index
    %0 = vector.load %arg1[%c0, %c0_0] : memref<32x128xbf16, #tpu.memory_space<vmem>>, vector<32x128xbf16>
    %c0_1 = arith.constant 0 : index
    %c0_2 = arith.constant 0 : index
    %1 = vector.load %arg3[%c0_1, %c0_2] : memref<128x128xbf16, #tpu.memory_space<vmem>>, vector<128x128xbf16>
    %cst = arith.constant dense<0.000000e+00> : vector<32x128xf32>
    %2 = tpu.matmul %0, %1, %cst {dimension_numbers = #tpu.dot_dimension_numbers<[1], [0], [0], [1], [0, 0, 1, 1], [], []>} : vector<32x128xbf16>, vector<128x128xbf16>, vector<32x128xf32> -> vector<32x128xf32>
    %c0_3 = arith.constant 0 : index
    %c0_4 = arith.constant 0 : index
    %3 = vector.load %arg2[%c0_3, %c0_4] : memref<32x128xbf16, #tpu.memory_space<vmem>>, vector<32x128xbf16>
    %4 = arith.extf %3 : vector<32x128xbf16> to vector<32x128xf32>
    %5 = arith.addf %2, %4 : vector<32x128xf32>
    %c0_5 = arith.constant 0 : index
    %c0_6 = arith.constant 0 : index
    %6 = vector.load %arg4[%c0_5, %c0_6] : memref<1x128xf32, #tpu.memory_space<vmem>>, vector<1x128xf32>
    %7 = vector.broadcast %6 : vector<1x128xf32> to vector<32x128xf32>
    %8 = arith.addf %5, %7 : vector<32x128xf32>
    %cst_7 = arith.constant dense<0.000000e+00> : vector<32xf32>
    %9 = vector.multi_reduction <add>, %8, %cst_7 [1] : vector<32x128xf32> to vector<32xf32>
    %10 = vector.shape_cast %9 : vector<32xf32> to vector<32x1xf32>
    %cst_8 = arith.constant 1.280000e+02 : f32
    %11 = vector.broadcast %cst_8 : f32 to vector<32x1xf32>
    %12 = arith.divf %10, %11 : vector<32x1xf32>
    %13 = vector.broadcast %12 : vector<32x1xf32> to vector<32x128xf32>
    %14 = arith.subf %8, %13 : vector<32x128xf32>
    %15 = arith.mulf %14, %14 : vector<32x128xf32>
    %cst_9 = arith.constant dense<0.000000e+00> : vector<32xf32>
    %16 = vector.multi_reduction <add>, %15, %cst_9 [1] : vector<32x128xf32> to vector<32xf32>
    %17 = vector.shape_cast %16 : vector<32xf32> to vector<32x1xf32>
    %cst_10 = arith.constant 1.280000e+02 : f32
    %18 = vector.broadcast %cst_10 : f32 to vector<32x1xf32>
    %19 = arith.divf %17, %18 : vector<32x1xf32>
    %20 = vector.broadcast %12 : vector<32x1xf32> to vector<32x128xf32>
    %21 = arith.subf %8, %20 : vector<32x128xf32>
    %cst_11 = arith.constant 9.99999974E-6 : f32
    %22 = vector.broadcast %cst_11 : f32 to vector<32x1xf32>
    %23 = arith.addf %19, %22 : vector<32x1xf32>
    %24 = math.rsqrt %23 : vector<32x1xf32>
    %25 = vector.broadcast %24 : vector<32x1xf32> to vector<32x128xf32>
    %26 = arith.mulf %21, %25 : vector<32x128xf32>
    %c0_12 = arith.constant 0 : index
    %c0_13 = arith.constant 0 : index
    %27 = vector.load %arg5[%c0_12, %c0_13] : memref<1x128xf32, #tpu.memory_space<vmem>>, vector<1x128xf32>
    %28 = vector.broadcast %27 : vector<1x128xf32> to vector<32x128xf32>
    %29 = arith.mulf %26, %28 : vector<32x128xf32>
    %c0_14 = arith.constant 0 : index
    %c0_15 = arith.constant 0 : index
    %30 = vector.load %arg6[%c0_14, %c0_15] : memref<1x128xf32, #tpu.memory_space<vmem>>, vector<1x128xf32>
    %31 = vector.broadcast %30 : vector<1x128xf32> to vector<32x128xf32>
    %32 = arith.addf %29, %31 : vector<32x128xf32>
    %33 = arith.truncf %32 : vector<32x128xf32> to vector<32x128xbf16>
    %c0_16 = arith.constant 0 : index
    %c0_17 = arith.constant 0 : index
    %34 = vector.load %arg7[%c0_16, %c0_17] : memref<32x128xbf16, #tpu.memory_space<vmem>>, vector<32x128xbf16>
    tpu.vector_store %arg7[%c0_16, %c0_17], %33 {strides = array<i32>} : memref<32x128xbf16, #tpu.memory_space<vmem>>, vector<32x128xbf16>,
    return
  }
  func.func @transform_0(%arg0: i32) -> (i32, i32) {
    %c0_i32 = arith.constant 0 : i32
    %c0_i32_0 = arith.constant 0 : i32
    return %arg0, %c0_i32 : i32, i32
  }
  func.func @transform_1(%arg0: i32) -> (i32, i32) {
    %c0_i32 = arith.constant 0 : i32
    %c0_i32_0 = arith.constant 0 : i32
    return %arg0, %c0_i32 : i32, i32
  }
  func.func @transform_2(%arg0: i32) -> (i32, i32) {
    %c0_i32 = arith.constant 0 : i32
    %c0_i32_0 = arith.constant 0 : i32
    %c0_i32_1 = arith.constant 0 : i32
    return %c0_i32, %c0_i32_0 : i32, i32
  }
  func.func @transform_3(%arg0: i32) -> (i32, i32) {
    %c0_i32 = arith.constant 0 : i32
    %c0_i32_0 = arith.constant 0 : i32
    %c0_i32_1 = arith.constant 0 : i32
    return %c0_i32, %c0_i32_0 : i32, i32
  }
  func.func @transform_4(%arg0: i32) -> (i32, i32) {
    %c0_i32 = arith.constant 0 : i32
    %c0_i32_0 = arith.constant 0 : i32
    %c0_i32_1 = arith.constant 0 : i32
    return %c0_i32, %c0_i32_0 : i32, i32
  }
  func.func @transform_5(%arg0: i32) -> (i32, i32) {
    %c0_i32 = arith.constant 0 : i32
    %c0_i32_0 = arith.constant 0 : i32
    %c0_i32_1 = arith.constant 0 : i32
    return %c0_i32, %c0_i32_0 : i32, i32
  }
  func.func @transform_6(%arg0: i32) -> (i32, i32) {
    %c0_i32 = arith.constant 0 : i32
    %c0_i32_0 = arith.constant 0 : i32
    return %arg0, %c0_i32 : i32, i32
  }
}

module attributes {stable_mosaic.version = 11 : i64} {
  func.func @_ffn_res_ln_kernel(%arg0: i32, %arg1: i32, %arg2: memref<32x128xbf16, #tpu.memory_space<vmem>>, %arg3: memref<128x256xbf16, #tpu.memory_space<vmem>>, %arg4: memref<1x256xf32, #tpu.memory_space<vmem>>, %arg5: memref<256x128xbf16, #tpu.memory_space<vmem>>, %arg6: memref<1x128xf32, #tpu.memory_space<vmem>>, %arg7: memref<1x128xf32, #tpu.memory_space<vmem>>, %arg8: memref<1x128xf32, #tpu.memory_space<vmem>>, %arg9: memref<32x128xbf16, #tpu.memory_space<vmem>>, %arg10: memref<32x128xf32, #tpu.memory_space<vmem>>) attributes {dimension_semantics = [#tpu.dimension_semantics<parallel>, #tpu.dimension_semantics<arbitrary>], iteration_bounds = array<i64: 1, 1>, scalar_prefetch = 0 : i64, scratch_operands = 1 : i64, tpu.core_type = #tpu.core_type<tc>, window_params = [{transform_indices = @transform_0, window_bounds = array<i64: 32, 128>}, {transform_indices = @transform_1, window_bounds = array<i64: 128, 256>}, {transform_indices = @transform_2, window_bounds = array<i64: 1, 256>}, {transform_indices = @transform_3, window_bounds = array<i64: 256, 128>}, {pipeline_mode = #tpu.pipeline_mode<synchronous>, transform_indices = @transform_4, window_bounds = array<i64: 1, 128>}, {pipeline_mode = #tpu.pipeline_mode<synchronous>, transform_indices = @transform_5, window_bounds = array<i64: 1, 128>}, {pipeline_mode = #tpu.pipeline_mode<synchronous>, transform_indices = @transform_6, window_bounds = array<i64: 1, 128>}, {transform_indices = @transform_7, window_bounds = array<i64: 32, 128>}]} {
    %c0 = arith.constant 0 : index
    %c0_0 = arith.constant 0 : index
    %0 = vector.load %arg2[%c0, %c0_0] : memref<32x128xbf16, #tpu.memory_space<vmem>>, vector<32x128xbf16>
    %c0_i32 = arith.constant 0 : i32
    %1 = arith.cmpi eq, %arg1, %c0_i32 : i32
    %2 = arith.extui %1 : i1 to i32
    %c0_i32_1 = arith.constant 0 : i32
    %3 = arith.cmpi ne, %2, %c0_i32_1 : i32
    scf.if %3 {
      %20 = arith.extf %0 : vector<32x128xbf16> to vector<32x128xf32>
      %c0_16 = arith.constant 0 : index
      %c0_17 = arith.constant 0 : index
      %21 = vector.load %arg6[%c0_16, %c0_17] : memref<1x128xf32, #tpu.memory_space<vmem>>, vector<1x128xf32>
      %22 = vector.broadcast %21 : vector<1x128xf32> to vector<32x128xf32>
      %23 = arith.addf %20, %22 : vector<32x128xf32>
      %c0_18 = arith.constant 0 : index
      %c0_19 = arith.constant 0 : index
      %24 = vector.load %arg10[%c0_18, %c0_19] : memref<32x128xf32, #tpu.memory_space<vmem>>, vector<32x128xf32>
      tpu.vector_store %arg10[%c0_18, %c0_19], %23 {strides = array<i32>} : memref<32x128xf32, #tpu.memory_space<vmem>>, vector<32x128xf32>,
    } else {
    }
    %c0_2 = arith.constant 0 : index
    %c0_3 = arith.constant 0 : index
    %4 = vector.load %arg3[%c0_2, %c0_3] : memref<128x256xbf16, #tpu.memory_space<vmem>>, vector<128x256xbf16>
    %cst = arith.constant dense<0.000000e+00> : vector<32x256xf32>
    %5 = tpu.matmul %0, %4, %cst {dimension_numbers = #tpu.dot_dimension_numbers<[1], [0], [0], [1], [0, 0, 1, 1], [], []>} : vector<32x128xbf16>, vector<128x256xbf16>, vector<32x256xf32> -> vector<32x256xf32>
    %c0_4 = arith.constant 0 : index
    %c0_5 = arith.constant 0 : index
    %6 = vector.load %arg4[%c0_4, %c0_5] : memref<1x256xf32, #tpu.memory_space<vmem>>, vector<1x256xf32>
    %7 = vector.broadcast %6 : vector<1x256xf32> to vector<32x256xf32>
    %8 = arith.addf %5, %7 : vector<32x256xf32>
    %cst_6 = arith.constant 0.000000e+00 : f32
    %9 = vector.broadcast %cst_6 : f32 to vector<32x256xf32>
    %10 = arith.maximumf %8, %9 : vector<32x256xf32>
    %c0_7 = arith.constant 0 : index
    %c0_8 = arith.constant 0 : index
    %11 = vector.load %arg10[%c0_7, %c0_8] : memref<32x128xf32, #tpu.memory_space<vmem>>, vector<32x128xf32>
    %12 = arith.truncf %10 : vector<32x256xf32> to vector<32x256xbf16>
    %c0_9 = arith.constant 0 : index
    %c0_10 = arith.constant 0 : index
    %13 = vector.load %arg5[%c0_9, %c0_10] : memref<256x128xbf16, #tpu.memory_space<vmem>>, vector<256x128xbf16>
    %cst_11 = arith.constant dense<0.000000e+00> : vector<32x128xf32>
    %14 = tpu.matmul %12, %13, %cst_11 {dimension_numbers = #tpu.dot_dimension_numbers<[1], [0], [0], [1], [0, 0, 1, 1], [], []>} : vector<32x256xbf16>, vector<256x128xbf16>, vector<32x128xf32> -> vector<32x128xf32>
    %15 = arith.addf %11, %14 : vector<32x128xf32>
    %c0_12 = arith.constant 0 : index
    %c0_13 = arith.constant 0 : index
    %16 = vector.load %arg10[%c0_12, %c0_13] : memref<32x128xf32, #tpu.memory_space<vmem>>, vector<32x128xf32>
    tpu.vector_store %arg10[%c0_12, %c0_13], %15 {strides = array<i32>} : memref<32x128xf32, #tpu.memory_space<vmem>>, vector<32x128xf32>,
    %c0_i32_14 = arith.constant 0 : i32
    %17 = arith.cmpi eq, %arg1, %c0_i32_14 : i32
    %18 = arith.extui %17 : i1 to i32
    %c0_i32_15 = arith.constant 0 : i32
    %19 = arith.cmpi ne, %18, %c0_i32_15 : i32
    scf.if %19 {
      %c0_16 = arith.constant 0 : index
      %c0_17 = arith.constant 0 : index
      %20 = vector.load %arg10[%c0_16, %c0_17] : memref<32x128xf32, #tpu.memory_space<vmem>>, vector<32x128xf32>
      %cst_18 = arith.constant dense<0.000000e+00> : vector<32xf32>
      %21 = vector.multi_reduction <add>, %20, %cst_18 [1] : vector<32x128xf32> to vector<32xf32>
      %22 = vector.shape_cast %21 : vector<32xf32> to vector<32x1xf32>
      %cst_19 = arith.constant 1.280000e+02 : f32
      %23 = vector.broadcast %cst_19 : f32 to vector<32x1xf32>
      %24 = arith.divf %22, %23 : vector<32x1xf32>
      %25 = vector.broadcast %24 : vector<32x1xf32> to vector<32x128xf32>
      %26 = arith.subf %20, %25 : vector<32x128xf32>
      %27 = arith.mulf %26, %26 : vector<32x128xf32>
      %cst_20 = arith.constant dense<0.000000e+00> : vector<32xf32>
      %28 = vector.multi_reduction <add>, %27, %cst_20 [1] : vector<32x128xf32> to vector<32xf32>
      %29 = vector.shape_cast %28 : vector<32xf32> to vector<32x1xf32>
      %cst_21 = arith.constant 1.280000e+02 : f32
      %30 = vector.broadcast %cst_21 : f32 to vector<32x1xf32>
      %31 = arith.divf %29, %30 : vector<32x1xf32>
      %32 = vector.broadcast %24 : vector<32x1xf32> to vector<32x128xf32>
      %33 = arith.subf %20, %32 : vector<32x128xf32>
      %cst_22 = arith.constant 9.99999974E-6 : f32
      %34 = vector.broadcast %cst_22 : f32 to vector<32x1xf32>
      %35 = arith.addf %31, %34 : vector<32x1xf32>
      %36 = math.rsqrt %35 : vector<32x1xf32>
      %37 = vector.broadcast %36 : vector<32x1xf32> to vector<32x128xf32>
      %38 = arith.mulf %33, %37 : vector<32x128xf32>
      %c0_23 = arith.constant 0 : index
      %c0_24 = arith.constant 0 : index
      %39 = vector.load %arg7[%c0_23, %c0_24] : memref<1x128xf32, #tpu.memory_space<vmem>>, vector<1x128xf32>
      %40 = vector.broadcast %39 : vector<1x128xf32> to vector<32x128xf32>
      %41 = arith.mulf %38, %40 : vector<32x128xf32>
      %c0_25 = arith.constant 0 : index
      %c0_26 = arith.constant 0 : index
      %42 = vector.load %arg8[%c0_25, %c0_26] : memref<1x128xf32, #tpu.memory_space<vmem>>, vector<1x128xf32>
      %43 = vector.broadcast %42 : vector<1x128xf32> to vector<32x128xf32>
      %44 = arith.addf %41, %43 : vector<32x128xf32>
      %45 = arith.truncf %44 : vector<32x128xf32> to vector<32x128xbf16>
      %c0_27 = arith.constant 0 : index
      %c0_28 = arith.constant 0 : index
      %46 = vector.load %arg9[%c0_27, %c0_28] : memref<32x128xbf16, #tpu.memory_space<vmem>>, vector<32x128xbf16>
      tpu.vector_store %arg9[%c0_27, %c0_28], %45 {strides = array<i32>} : memref<32x128xbf16, #tpu.memory_space<vmem>>, vector<32x128xbf16>,
    } else {
    }
    return
  }
  func.func @transform_0(%arg0: i32, %arg1: i32) -> (i32, i32) {
    %c0_i32 = arith.constant 0 : i32
    %c0_i32_0 = arith.constant 0 : i32
    return %arg0, %c0_i32 : i32, i32
  }
  func.func @transform_1(%arg0: i32, %arg1: i32) -> (i32, i32) {
    %c0_i32 = arith.constant 0 : i32
    %c0_i32_0 = arith.constant 0 : i32
    return %c0_i32, %arg1 : i32, i32
  }
  func.func @transform_2(%arg0: i32, %arg1: i32) -> (i32, i32) {
    %c0_i32 = arith.constant 0 : i32
    %c0_i32_0 = arith.constant 0 : i32
    return %c0_i32, %arg1 : i32, i32
  }
  func.func @transform_3(%arg0: i32, %arg1: i32) -> (i32, i32) {
    %c0_i32 = arith.constant 0 : i32
    %c0_i32_0 = arith.constant 0 : i32
    return %arg1, %c0_i32 : i32, i32
  }
  func.func @transform_4(%arg0: i32, %arg1: i32) -> (i32, i32) {
    %c0_i32 = arith.constant 0 : i32
    %c0_i32_0 = arith.constant 0 : i32
    %c0_i32_1 = arith.constant 0 : i32
    return %c0_i32, %c0_i32_0 : i32, i32
  }
  func.func @transform_5(%arg0: i32, %arg1: i32) -> (i32, i32) {
    %c0_i32 = arith.constant 0 : i32
    %c0_i32_0 = arith.constant 0 : i32
    %c0_i32_1 = arith.constant 0 : i32
    return %c0_i32, %c0_i32_0 : i32, i32
  }
  func.func @transform_6(%arg0: i32, %arg1: i32) -> (i32, i32) {
    %c0_i32 = arith.constant 0 : i32
    %c0_i32_0 = arith.constant 0 : i32
    %c0_i32_1 = arith.constant 0 : i32
    return %c0_i32, %c0_i32_0 : i32, i32
  }
  func.func @transform_7(%arg0: i32, %arg1: i32) -> (i32, i32) {
    %c0_i32 = arith.constant 0 : i32
    %c0_i32_0 = arith.constant 0 : i32
    return %arg0, %c0_i32 : i32, i32
  }
}

module attributes {stable_mosaic.version = 11 : i64} {
  func.func @_linear_kernel(%arg0: i32, %arg1: i32, %arg2: memref<32x128xbf16, #tpu.memory_space<vmem>>, %arg3: memref<128x256xbf16, #tpu.memory_space<vmem>>, %arg4: memref<1x256xf32, #tpu.memory_space<vmem>>, %arg5: memref<32x256xbf16, #tpu.memory_space<vmem>>) attributes {dimension_semantics = [#tpu.dimension_semantics<parallel>, #tpu.dimension_semantics<parallel>], iteration_bounds = array<i64: 1, 1>, scalar_prefetch = 0 : i64, scratch_operands = 0 : i64, tpu.core_type = #tpu.core_type<tc>, window_params = [{transform_indices = @transform_0, window_bounds = array<i64: 32, 128>}, {transform_indices = @transform_1, window_bounds = array<i64: 128, 256>}, {transform_indices = @transform_2, window_bounds = array<i64: 1, 256>}, {transform_indices = @transform_3, window_bounds = array<i64: 32, 256>}]} {
    %c0 = arith.constant 0 : index
    %c0_0 = arith.constant 0 : index
    %0 = vector.load %arg2[%c0, %c0_0] : memref<32x128xbf16, #tpu.memory_space<vmem>>, vector<32x128xbf16>
    %c0_1 = arith.constant 0 : index
    %c0_2 = arith.constant 0 : index
    %1 = vector.load %arg3[%c0_1, %c0_2] : memref<128x256xbf16, #tpu.memory_space<vmem>>, vector<128x256xbf16>
    %cst = arith.constant dense<0.000000e+00> : vector<32x256xf32>
    %2 = tpu.matmul %0, %1, %cst {dimension_numbers = #tpu.dot_dimension_numbers<[1], [0], [0], [1], [0, 0, 1, 1], [], []>} : vector<32x128xbf16>, vector<128x256xbf16>, vector<32x256xf32> -> vector<32x256xf32>
    %c0_3 = arith.constant 0 : index
    %c0_4 = arith.constant 0 : index
    %3 = vector.load %arg4[%c0_3, %c0_4] : memref<1x256xf32, #tpu.memory_space<vmem>>, vector<1x256xf32>
    %4 = vector.broadcast %3 : vector<1x256xf32> to vector<32x256xf32>
    %5 = arith.addf %2, %4 : vector<32x256xf32>
    %6 = arith.truncf %5 : vector<32x256xf32> to vector<32x256xbf16>
    %c0_5 = arith.constant 0 : index
    %c0_6 = arith.constant 0 : index
    %7 = vector.load %arg5[%c0_5, %c0_6] : memref<32x256xbf16, #tpu.memory_space<vmem>>, vector<32x256xbf16>
    tpu.vector_store %arg5[%c0_5, %c0_6], %6 {strides = array<i32>} : memref<32x256xbf16, #tpu.memory_space<vmem>>, vector<32x256xbf16>,
    return
  }
  func.func @transform_0(%arg0: i32, %arg1: i32) -> (i32, i32) {
    %c0_i32 = arith.constant 0 : i32
    %c0_i32_0 = arith.constant 0 : i32
    return %arg1, %c0_i32 : i32, i32
  }
  func.func @transform_1(%arg0: i32, %arg1: i32) -> (i32, i32) {
    %c0_i32 = arith.constant 0 : i32
    %c0_i32_0 = arith.constant 0 : i32
    return %c0_i32, %arg0 : i32, i32
  }
  func.func @transform_2(%arg0: i32, %arg1: i32) -> (i32, i32) {
    %c0_i32 = arith.constant 0 : i32
    %c0_i32_0 = arith.constant 0 : i32
    return %c0_i32, %arg0 : i32, i32
  }
  func.func @transform_3(%arg0: i32, %arg1: i32) -> (i32, i32) {
    %c0_i32 = arith.constant 0 : i32
    return %arg1, %arg0 : i32, i32
  }
}

module attributes {stable_mosaic.version = 11 : i64} {
  func.func @_mha_kernel(%arg0: i32, %arg1: i32, %arg2: i32, %arg3: memref<1x8x128xbf16, #tpu.memory_space<vmem>>, %arg4: memref<1x16x128xbf16, #tpu.memory_space<vmem>>, %arg5: memref<1x16x128xbf16, #tpu.memory_space<vmem>>, %arg6: memref<1x8x128xbf16, #tpu.memory_space<vmem>>, %arg7: memref<4x8x1xf32, #tpu.memory_space<vmem>>, %arg8: memref<4x8x1xf32, #tpu.memory_space<vmem>>, %arg9: memref<4x8x32xf32, #tpu.memory_space<vmem>>) attributes {dimension_semantics = [#tpu.dimension_semantics<parallel>, #tpu.dimension_semantics<parallel>, #tpu.dimension_semantics<arbitrary>], iteration_bounds = array<i64: 2, 1, 1>, scalar_prefetch = 0 : i64, scratch_operands = 3 : i64, tpu.core_type = #tpu.core_type<tc>, window_params = [{transform_indices = @transform_0, window_bounds = array<i64: 1, 8, 128>}, {transform_indices = @transform_1, window_bounds = array<i64: 1, 16, 128>}, {transform_indices = @transform_2, window_bounds = array<i64: 1, 16, 128>}, {transform_indices = @transform_3, window_bounds = array<i64: 1, 8, 128>}]} {
    %c0_i32 = arith.constant 0 : i32
    %0 = arith.cmpi eq, %arg2, %c0_i32 : i32
    %1 = arith.extui %0 : i1 to i32
    %c0_i32_0 = arith.constant 0 : i32
    %2 = arith.cmpi ne, %1, %c0_i32_0 : i32
    scf.if %2 {
      %cst_99 = arith.constant -1.000000e+30 : f32
      %164 = vector.broadcast %cst_99 : f32 to vector<4x8x1xf32>
      %c0_100 = arith.constant 0 : index
      %c0_101 = arith.constant 0 : index
      %c0_102 = arith.constant 0 : index
      %165 = vector.load %arg7[%c0_100, %c0_101, %c0_102] : memref<4x8x1xf32, #tpu.memory_space<vmem>>, vector<4x8x1xf32>
      tpu.vector_store %arg7[%c0_100, %c0_101, %c0_102], %164 {strides = array<i32>} : memref<4x8x1xf32, #tpu.memory_space<vmem>>, vector<4x8x1xf32>,
      %cst_103 = arith.constant 0.000000e+00 : f32
      %166 = vector.broadcast %cst_103 : f32 to vector<4x8x1xf32>
      %c0_104 = arith.constant 0 : index
      %c0_105 = arith.constant 0 : index
      %c0_106 = arith.constant 0 : index
      %167 = vector.load %arg8[%c0_104, %c0_105, %c0_106] : memref<4x8x1xf32, #tpu.memory_space<vmem>>, vector<4x8x1xf32>
      tpu.vector_store %arg8[%c0_104, %c0_105, %c0_106], %166 {strides = array<i32>} : memref<4x8x1xf32, #tpu.memory_space<vmem>>, vector<4x8x1xf32>,
      %cst_107 = arith.constant 0.000000e+00 : f32
      %168 = vector.broadcast %cst_107 : f32 to vector<4x8x32xf32>
      %c0_108 = arith.constant 0 : index
      %c0_109 = arith.constant 0 : index
      %c0_110 = arith.constant 0 : index
      %169 = vector.load %arg9[%c0_108, %c0_109, %c0_110] : memref<4x8x32xf32, #tpu.memory_space<vmem>>, vector<4x8x32xf32>
      tpu.vector_store %arg9[%c0_108, %c0_109, %c0_110], %168 {strides = array<i32>} : memref<4x8x32xf32, #tpu.memory_space<vmem>>, vector<4x8x32xf32>,
    } else {
    }
    %c0 = arith.constant 0 : index
    %c0_1 = arith.constant 0 : index
    %c0_2 = arith.constant 0 : index
    %3 = vector.load %arg3[%c0, %c0_1, %c0_2] : memref<1x8x128xbf16, #tpu.memory_space<vmem>>, vector<1x8x128xbf16>
    %4 = vector.shape_cast %3 : vector<1x8x128xbf16> to vector<8x128xbf16>
    %c0_3 = arith.constant 0 : index
    %c0_4 = arith.constant 0 : index
    %c0_5 = arith.constant 0 : index
    %5 = vector.load %arg4[%c0_3, %c0_4, %c0_5] : memref<1x16x128xbf16, #tpu.memory_space<vmem>>, vector<1x16x128xbf16>
    %6 = vector.shape_cast %5 : vector<1x16x128xbf16> to vector<16x128xbf16>
    %c0_6 = arith.constant 0 : index
    %c0_7 = arith.constant 0 : index
    %c0_8 = arith.constant 0 : index
    %7 = vector.load %arg5[%c0_6, %c0_7, %c0_8] : memref<1x16x128xbf16, #tpu.memory_space<vmem>>, vector<1x16x128xbf16>
    %8 = vector.shape_cast %7 : vector<1x16x128xbf16> to vector<16x128xbf16>
    %9 = vector.extract_strided_slice %4 {offsets = [0, 0], sizes = [8, 32], strides = [1, 1]} : vector<8x128xbf16> to vector<8x32xbf16>
    %10 = vector.extract_strided_slice %6 {offsets = [0, 0], sizes = [16, 32], strides = [1, 1]} : vector<16x128xbf16> to vector<16x32xbf16>
    %11 = vector.extract_strided_slice %8 {offsets = [0, 0], sizes = [16, 32], strides = [1, 1]} : vector<16x128xbf16> to vector<16x32xbf16>
    %cst = arith.constant dense<0.000000e+00> : vector<8x16xf32>
    %12 = tpu.matmul %9, %10, %cst {dimension_numbers = #tpu.dot_dimension_numbers<[1], [1], [0], [0], [0, 0, 1, 0], [], []>} : vector<8x32xbf16>, vector<16x32xbf16>, vector<8x16xf32> -> vector<8x16xf32>
    %cst_9 = arith.constant 0.176776692 : f32
    %13 = vector.broadcast %cst_9 : f32 to vector<8x16xf32>
    %14 = arith.mulf %12, %13 : vector<8x16xf32>
    %c0_10 = arith.constant 0 : index
    %c0_11 = arith.constant 0 : index
    %c0_12 = arith.constant 0 : index
    %15 = vector.load %arg7[%c0_10, %c0_11, %c0_12] : memref<4x8x1xf32, #tpu.memory_space<vmem>>, vector<1x8x1xf32>
    %16 = vector.shape_cast %15 : vector<1x8x1xf32> to vector<8x1xf32>
    %cst_13 = arith.constant dense<0xFF800000> : vector<8xf32>
    %17 = vector.multi_reduction <maximumf>, %14, %cst_13 [1] : vector<8x16xf32> to vector<8xf32>
    %18 = vector.shape_cast %17 : vector<8xf32> to vector<8x1xf32>
    %19 = arith.maximumf %16, %18 : vector<8x1xf32>
    %20 = arith.subf %16, %19 : vector<8x1xf32>
    %21 = math.exp %20 : vector<8x1xf32>
    %22 = vector.broadcast %19 : vector<8x1xf32> to vector<8x16xf32>
    %23 = arith.subf %14, %22 : vector<8x16xf32>
    %24 = math.exp %23 : vector<8x16xf32>
    %c0_14 = arith.constant 0 : index
    %c0_15 = arith.constant 0 : index
    %c0_16 = arith.constant 0 : index
    %25 = vector.load %arg8[%c0_14, %c0_15, %c0_16] : memref<4x8x1xf32, #tpu.memory_space<vmem>>, vector<1x8x1xf32>
    %26 = vector.shape_cast %25 : vector<1x8x1xf32> to vector<8x1xf32>
    %27 = arith.mulf %21, %26 : vector<8x1xf32>
    %cst_17 = arith.constant dense<0.000000e+00> : vector<8xf32>
    %28 = vector.multi_reduction <add>, %24, %cst_17 [1] : vector<8x16xf32> to vector<8xf32>
    %29 = vector.shape_cast %28 : vector<8xf32> to vector<8x1xf32>
    %30 = arith.addf %27, %29 : vector<8x1xf32>
    %c0_18 = arith.constant 0 : index
    %c0_19 = arith.constant 0 : index
    %c0_20 = arith.constant 0 : index
    %31 = vector.load %arg8[%c0_18, %c0_19, %c0_20] : memref<4x8x1xf32, #tpu.memory_space<vmem>>, vector<1x8x1xf32>
    %32 = vector.shape_cast %31 : vector<1x8x1xf32> to vector<8x1xf32>
    %33 = vector.shape_cast %30 : vector<8x1xf32> to vector<1x8x1xf32>
    tpu.vector_store %arg8[%c0_18, %c0_19, %c0_20], %33 {strides = array<i32>} : memref<4x8x1xf32, #tpu.memory_space<vmem>>, vector<1x8x1xf32>,
    %34 = arith.truncf %24 : vector<8x16xf32> to vector<8x16xbf16>
    %cst_21 = arith.constant dense<0.000000e+00> : vector<8x32xf32>
    %35 = tpu.matmul %34, %11, %cst_21 {dimension_numbers = #tpu.dot_dimension_numbers<[1], [0], [0], [1], [0, 0, 1, 1], [], []>} : vector<8x16xbf16>, vector<16x32xbf16>, vector<8x32xf32> -> vector<8x32xf32>
    %c0_22 = arith.constant 0 : index
    %c0_23 = arith.constant 0 : index
    %c0_24 = arith.constant 0 : index
    %36 = vector.load %arg9[%c0_22, %c0_23, %c0_24] : memref<4x8x32xf32, #tpu.memory_space<vmem>>, vector<1x8x32xf32>
    %37 = vector.shape_cast %36 : vector<1x8x32xf32> to vector<8x32xf32>
    %38 = vector.broadcast %21 : vector<8x1xf32> to vector<8x32xf32>
    %39 = arith.mulf %38, %37 : vector<8x32xf32>
    %40 = arith.addf %39, %35 : vector<8x32xf32>
    %c0_25 = arith.constant 0 : index
    %c0_26 = arith.constant 0 : index
    %c0_27 = arith.constant 0 : index
    %41 = vector.load %arg9[%c0_25, %c0_26, %c0_27] : memref<4x8x32xf32, #tpu.memory_space<vmem>>, vector<1x8x32xf32>
    %42 = vector.shape_cast %41 : vector<1x8x32xf32> to vector<8x32xf32>
    %43 = vector.shape_cast %40 : vector<8x32xf32> to vector<1x8x32xf32>
    tpu.vector_store %arg9[%c0_25, %c0_26, %c0_27], %43 {strides = array<i32>} : memref<4x8x32xf32, #tpu.memory_space<vmem>>, vector<1x8x32xf32>,
    %c0_28 = arith.constant 0 : index
    %c0_29 = arith.constant 0 : index
    %c0_30 = arith.constant 0 : index
    %44 = vector.load %arg7[%c0_28, %c0_29, %c0_30] : memref<4x8x1xf32, #tpu.memory_space<vmem>>, vector<1x8x1xf32>
    %45 = vector.shape_cast %44 : vector<1x8x1xf32> to vector<8x1xf32>
    %46 = vector.shape_cast %19 : vector<8x1xf32> to vector<1x8x1xf32>
    tpu.vector_store %arg7[%c0_28, %c0_29, %c0_30], %46 {strides = array<i32>} : memref<4x8x1xf32, #tpu.memory_space<vmem>>, vector<1x8x1xf32>,
    %47 = vector.extract_strided_slice %4 {offsets = [0, 32], sizes = [8, 32], strides = [1, 1]} : vector<8x128xbf16> to vector<8x32xbf16>
    %48 = vector.extract_strided_slice %6 {offsets = [0, 32], sizes = [16, 32], strides = [1, 1]} : vector<16x128xbf16> to vector<16x32xbf16>
    %49 = vector.extract_strided_slice %8 {offsets = [0, 32], sizes = [16, 32], strides = [1, 1]} : vector<16x128xbf16> to vector<16x32xbf16>
    %cst_31 = arith.constant dense<0.000000e+00> : vector<8x16xf32>
    %50 = tpu.matmul %47, %48, %cst_31 {dimension_numbers = #tpu.dot_dimension_numbers<[1], [1], [0], [0], [0, 0, 1, 0], [], []>} : vector<8x32xbf16>, vector<16x32xbf16>, vector<8x16xf32> -> vector<8x16xf32>
    %cst_32 = arith.constant 0.176776692 : f32
    %51 = vector.broadcast %cst_32 : f32 to vector<8x16xf32>
    %52 = arith.mulf %50, %51 : vector<8x16xf32>
    %c1 = arith.constant 1 : index
    %c0_33 = arith.constant 0 : index
    %c0_34 = arith.constant 0 : index
    %53 = vector.load %arg7[%c1, %c0_33, %c0_34] : memref<4x8x1xf32, #tpu.memory_space<vmem>>, vector<1x8x1xf32>
    %54 = vector.shape_cast %53 : vector<1x8x1xf32> to vector<8x1xf32>
    %cst_35 = arith.constant dense<0xFF800000> : vector<8xf32>
    %55 = vector.multi_reduction <maximumf>, %52, %cst_35 [1] : vector<8x16xf32> to vector<8xf32>
    %56 = vector.shape_cast %55 : vector<8xf32> to vector<8x1xf32>
    %57 = arith.maximumf %54, %56 : vector<8x1xf32>
    %58 = arith.subf %54, %57 : vector<8x1xf32>
    %59 = math.exp %58 : vector<8x1xf32>
    %60 = vector.broadcast %57 : vector<8x1xf32> to vector<8x16xf32>
    %61 = arith.subf %52, %60 : vector<8x16xf32>
    %62 = math.exp %61 : vector<8x16xf32>
    %c1_36 = arith.constant 1 : index
    %c0_37 = arith.constant 0 : index
    %c0_38 = arith.constant 0 : index
    %63 = vector.load %arg8[%c1_36, %c0_37, %c0_38] : memref<4x8x1xf32, #tpu.memory_space<vmem>>, vector<1x8x1xf32>
    %64 = vector.shape_cast %63 : vector<1x8x1xf32> to vector<8x1xf32>
    %65 = arith.mulf %59, %64 : vector<8x1xf32>
    %cst_39 = arith.constant dense<0.000000e+00> : vector<8xf32>
    %66 = vector.multi_reduction <add>, %62, %cst_39 [1] : vector<8x16xf32> to vector<8xf32>
    %67 = vector.shape_cast %66 : vector<8xf32> to vector<8x1xf32>
    %68 = arith.addf %65, %67 : vector<8x1xf32>
    %c1_40 = arith.constant 1 : index
    %c0_41 = arith.constant 0 : index
    %c0_42 = arith.constant 0 : index
    %69 = vector.load %arg8[%c1_40, %c0_41, %c0_42] : memref<4x8x1xf32, #tpu.memory_space<vmem>>, vector<1x8x1xf32>
    %70 = vector.shape_cast %69 : vector<1x8x1xf32> to vector<8x1xf32>
    %71 = vector.shape_cast %68 : vector<8x1xf32> to vector<1x8x1xf32>
    tpu.vector_store %arg8[%c1_40, %c0_41, %c0_42], %71 {strides = array<i32>} : memref<4x8x1xf32, #tpu.memory_space<vmem>>, vector<1x8x1xf32>,
    %72 = arith.truncf %62 : vector<8x16xf32> to vector<8x16xbf16>
    %cst_43 = arith.constant dense<0.000000e+00> : vector<8x32xf32>
    %73 = tpu.matmul %72, %49, %cst_43 {dimension_numbers = #tpu.dot_dimension_numbers<[1], [0], [0], [1], [0, 0, 1, 1], [], []>} : vector<8x16xbf16>, vector<16x32xbf16>, vector<8x32xf32> -> vector<8x32xf32>
    %c1_44 = arith.constant 1 : index
    %c0_45 = arith.constant 0 : index
    %c0_46 = arith.constant 0 : index
    %74 = vector.load %arg9[%c1_44, %c0_45, %c0_46] : memref<4x8x32xf32, #tpu.memory_space<vmem>>, vector<1x8x32xf32>
    %75 = vector.shape_cast %74 : vector<1x8x32xf32> to vector<8x32xf32>
    %76 = vector.broadcast %59 : vector<8x1xf32> to vector<8x32xf32>
    %77 = arith.mulf %76, %75 : vector<8x32xf32>
    %78 = arith.addf %77, %73 : vector<8x32xf32>
    %c1_47 = arith.constant 1 : index
    %c0_48 = arith.constant 0 : index
    %c0_49 = arith.constant 0 : index
    %79 = vector.load %arg9[%c1_47, %c0_48, %c0_49] : memref<4x8x32xf32, #tpu.memory_space<vmem>>, vector<1x8x32xf32>
    %80 = vector.shape_cast %79 : vector<1x8x32xf32> to vector<8x32xf32>
    %81 = vector.shape_cast %78 : vector<8x32xf32> to vector<1x8x32xf32>
    tpu.vector_store %arg9[%c1_47, %c0_48, %c0_49], %81 {strides = array<i32>} : memref<4x8x32xf32, #tpu.memory_space<vmem>>, vector<1x8x32xf32>,
    %c1_50 = arith.constant 1 : index
    %c0_51 = arith.constant 0 : index
    %c0_52 = arith.constant 0 : index
    %82 = vector.load %arg7[%c1_50, %c0_51, %c0_52] : memref<4x8x1xf32, #tpu.memory_space<vmem>>, vector<1x8x1xf32>
    %83 = vector.shape_cast %82 : vector<1x8x1xf32> to vector<8x1xf32>
    %84 = vector.shape_cast %57 : vector<8x1xf32> to vector<1x8x1xf32>
    tpu.vector_store %arg7[%c1_50, %c0_51, %c0_52], %84 {strides = array<i32>} : memref<4x8x1xf32, #tpu.memory_space<vmem>>, vector<1x8x1xf32>,
    %85 = vector.extract_strided_slice %4 {offsets = [0, 64], sizes = [8, 32], strides = [1, 1]} : vector<8x128xbf16> to vector<8x32xbf16>
    %86 = vector.extract_strided_slice %6 {offsets = [0, 64], sizes = [16, 32], strides = [1, 1]} : vector<16x128xbf16> to vector<16x32xbf16>
    %87 = vector.extract_strided_slice %8 {offsets = [0, 64], sizes = [16, 32], strides = [1, 1]} : vector<16x128xbf16> to vector<16x32xbf16>
    %cst_53 = arith.constant dense<0.000000e+00> : vector<8x16xf32>
    %88 = tpu.matmul %85, %86, %cst_53 {dimension_numbers = #tpu.dot_dimension_numbers<[1], [1], [0], [0], [0, 0, 1, 0], [], []>} : vector<8x32xbf16>, vector<16x32xbf16>, vector<8x16xf32> -> vector<8x16xf32>
    %cst_54 = arith.constant 0.176776692 : f32
    %89 = vector.broadcast %cst_54 : f32 to vector<8x16xf32>
    %90 = arith.mulf %88, %89 : vector<8x16xf32>
    %c2 = arith.constant 2 : index
    %c0_55 = arith.constant 0 : index
    %c0_56 = arith.constant 0 : index
    %91 = vector.load %arg7[%c2, %c0_55, %c0_56] : memref<4x8x1xf32, #tpu.memory_space<vmem>>, vector<1x8x1xf32>
    %92 = vector.shape_cast %91 : vector<1x8x1xf32> to vector<8x1xf32>
    %cst_57 = arith.constant dense<0xFF800000> : vector<8xf32>
    %93 = vector.multi_reduction <maximumf>, %90, %cst_57 [1] : vector<8x16xf32> to vector<8xf32>
    %94 = vector.shape_cast %93 : vector<8xf32> to vector<8x1xf32>
    %95 = arith.maximumf %92, %94 : vector<8x1xf32>
    %96 = arith.subf %92, %95 : vector<8x1xf32>
    %97 = math.exp %96 : vector<8x1xf32>
    %98 = vector.broadcast %95 : vector<8x1xf32> to vector<8x16xf32>
    %99 = arith.subf %90, %98 : vector<8x16xf32>
    %100 = math.exp %99 : vector<8x16xf32>
    %c2_58 = arith.constant 2 : index
    %c0_59 = arith.constant 0 : index
    %c0_60 = arith.constant 0 : index
    %101 = vector.load %arg8[%c2_58, %c0_59, %c0_60] : memref<4x8x1xf32, #tpu.memory_space<vmem>>, vector<1x8x1xf32>
    %102 = vector.shape_cast %101 : vector<1x8x1xf32> to vector<8x1xf32>
    %103 = arith.mulf %97, %102 : vector<8x1xf32>
    %cst_61 = arith.constant dense<0.000000e+00> : vector<8xf32>
    %104 = vector.multi_reduction <add>, %100, %cst_61 [1] : vector<8x16xf32> to vector<8xf32>
    %105 = vector.shape_cast %104 : vector<8xf32> to vector<8x1xf32>
    %106 = arith.addf %103, %105 : vector<8x1xf32>
    %c2_62 = arith.constant 2 : index
    %c0_63 = arith.constant 0 : index
    %c0_64 = arith.constant 0 : index
    %107 = vector.load %arg8[%c2_62, %c0_63, %c0_64] : memref<4x8x1xf32, #tpu.memory_space<vmem>>, vector<1x8x1xf32>
    %108 = vector.shape_cast %107 : vector<1x8x1xf32> to vector<8x1xf32>
    %109 = vector.shape_cast %106 : vector<8x1xf32> to vector<1x8x1xf32>
    tpu.vector_store %arg8[%c2_62, %c0_63, %c0_64], %109 {strides = array<i32>} : memref<4x8x1xf32, #tpu.memory_space<vmem>>, vector<1x8x1xf32>,
    %110 = arith.truncf %100 : vector<8x16xf32> to vector<8x16xbf16>
    %cst_65 = arith.constant dense<0.000000e+00> : vector<8x32xf32>
    %111 = tpu.matmul %110, %87, %cst_65 {dimension_numbers = #tpu.dot_dimension_numbers<[1], [0], [0], [1], [0, 0, 1, 1], [], []>} : vector<8x16xbf16>, vector<16x32xbf16>, vector<8x32xf32> -> vector<8x32xf32>
    %c2_66 = arith.constant 2 : index
    %c0_67 = arith.constant 0 : index
    %c0_68 = arith.constant 0 : index
    %112 = vector.load %arg9[%c2_66, %c0_67, %c0_68] : memref<4x8x32xf32, #tpu.memory_space<vmem>>, vector<1x8x32xf32>
    %113 = vector.shape_cast %112 : vector<1x8x32xf32> to vector<8x32xf32>
    %114 = vector.broadcast %97 : vector<8x1xf32> to vector<8x32xf32>
    %115 = arith.mulf %114, %113 : vector<8x32xf32>
    %116 = arith.addf %115, %111 : vector<8x32xf32>
    %c2_69 = arith.constant 2 : index
    %c0_70 = arith.constant 0 : index
    %c0_71 = arith.constant 0 : index
    %117 = vector.load %arg9[%c2_69, %c0_70, %c0_71] : memref<4x8x32xf32, #tpu.memory_space<vmem>>, vector<1x8x32xf32>
    %118 = vector.shape_cast %117 : vector<1x8x32xf32> to vector<8x32xf32>
    %119 = vector.shape_cast %116 : vector<8x32xf32> to vector<1x8x32xf32>
    tpu.vector_store %arg9[%c2_69, %c0_70, %c0_71], %119 {strides = array<i32>} : memref<4x8x32xf32, #tpu.memory_space<vmem>>, vector<1x8x32xf32>,
    %c2_72 = arith.constant 2 : index
    %c0_73 = arith.constant 0 : index
    %c0_74 = arith.constant 0 : index
    %120 = vector.load %arg7[%c2_72, %c0_73, %c0_74] : memref<4x8x1xf32, #tpu.memory_space<vmem>>, vector<1x8x1xf32>
    %121 = vector.shape_cast %120 : vector<1x8x1xf32> to vector<8x1xf32>
    %122 = vector.shape_cast %95 : vector<8x1xf32> to vector<1x8x1xf32>
    tpu.vector_store %arg7[%c2_72, %c0_73, %c0_74], %122 {strides = array<i32>} : memref<4x8x1xf32, #tpu.memory_space<vmem>>, vector<1x8x1xf32>,
    %123 = vector.extract_strided_slice %4 {offsets = [0, 96], sizes = [8, 32], strides = [1, 1]} : vector<8x128xbf16> to vector<8x32xbf16>
    %124 = vector.extract_strided_slice %6 {offsets = [0, 96], sizes = [16, 32], strides = [1, 1]} : vector<16x128xbf16> to vector<16x32xbf16>
    %125 = vector.extract_strided_slice %8 {offsets = [0, 96], sizes = [16, 32], strides = [1, 1]} : vector<16x128xbf16> to vector<16x32xbf16>
    %cst_75 = arith.constant dense<0.000000e+00> : vector<8x16xf32>
    %126 = tpu.matmul %123, %124, %cst_75 {dimension_numbers = #tpu.dot_dimension_numbers<[1], [1], [0], [0], [0, 0, 1, 0], [], []>} : vector<8x32xbf16>, vector<16x32xbf16>, vector<8x16xf32> -> vector<8x16xf32>
    %cst_76 = arith.constant 0.176776692 : f32
    %127 = vector.broadcast %cst_76 : f32 to vector<8x16xf32>
    %128 = arith.mulf %126, %127 : vector<8x16xf32>
    %c3 = arith.constant 3 : index
    %c0_77 = arith.constant 0 : index
    %c0_78 = arith.constant 0 : index
    %129 = vector.load %arg7[%c3, %c0_77, %c0_78] : memref<4x8x1xf32, #tpu.memory_space<vmem>>, vector<1x8x1xf32>
    %130 = vector.shape_cast %129 : vector<1x8x1xf32> to vector<8x1xf32>
    %cst_79 = arith.constant dense<0xFF800000> : vector<8xf32>
    %131 = vector.multi_reduction <maximumf>, %128, %cst_79 [1] : vector<8x16xf32> to vector<8xf32>
    %132 = vector.shape_cast %131 : vector<8xf32> to vector<8x1xf32>
    %133 = arith.maximumf %130, %132 : vector<8x1xf32>
    %134 = arith.subf %130, %133 : vector<8x1xf32>
    %135 = math.exp %134 : vector<8x1xf32>
    %136 = vector.broadcast %133 : vector<8x1xf32> to vector<8x16xf32>
    %137 = arith.subf %128, %136 : vector<8x16xf32>
    %138 = math.exp %137 : vector<8x16xf32>
    %c3_80 = arith.constant 3 : index
    %c0_81 = arith.constant 0 : index
    %c0_82 = arith.constant 0 : index
    %139 = vector.load %arg8[%c3_80, %c0_81, %c0_82] : memref<4x8x1xf32, #tpu.memory_space<vmem>>, vector<1x8x1xf32>
    %140 = vector.shape_cast %139 : vector<1x8x1xf32> to vector<8x1xf32>
    %141 = arith.mulf %135, %140 : vector<8x1xf32>
    %cst_83 = arith.constant dense<0.000000e+00> : vector<8xf32>
    %142 = vector.multi_reduction <add>, %138, %cst_83 [1] : vector<8x16xf32> to vector<8xf32>
    %143 = vector.shape_cast %142 : vector<8xf32> to vector<8x1xf32>
    %144 = arith.addf %141, %143 : vector<8x1xf32>
    %c3_84 = arith.constant 3 : index
    %c0_85 = arith.constant 0 : index
    %c0_86 = arith.constant 0 : index
    %145 = vector.load %arg8[%c3_84, %c0_85, %c0_86] : memref<4x8x1xf32, #tpu.memory_space<vmem>>, vector<1x8x1xf32>
    %146 = vector.shape_cast %145 : vector<1x8x1xf32> to vector<8x1xf32>
    %147 = vector.shape_cast %144 : vector<8x1xf32> to vector<1x8x1xf32>
    tpu.vector_store %arg8[%c3_84, %c0_85, %c0_86], %147 {strides = array<i32>} : memref<4x8x1xf32, #tpu.memory_space<vmem>>, vector<1x8x1xf32>,
    %148 = arith.truncf %138 : vector<8x16xf32> to vector<8x16xbf16>
    %cst_87 = arith.constant dense<0.000000e+00> : vector<8x32xf32>
    %149 = tpu.matmul %148, %125, %cst_87 {dimension_numbers = #tpu.dot_dimension_numbers<[1], [0], [0], [1], [0, 0, 1, 1], [], []>} : vector<8x16xbf16>, vector<16x32xbf16>, vector<8x32xf32> -> vector<8x32xf32>
    %c3_88 = arith.constant 3 : index
    %c0_89 = arith.constant 0 : index
    %c0_90 = arith.constant 0 : index
    %150 = vector.load %arg9[%c3_88, %c0_89, %c0_90] : memref<4x8x32xf32, #tpu.memory_space<vmem>>, vector<1x8x32xf32>
    %151 = vector.shape_cast %150 : vector<1x8x32xf32> to vector<8x32xf32>
    %152 = vector.broadcast %135 : vector<8x1xf32> to vector<8x32xf32>
    %153 = arith.mulf %152, %151 : vector<8x32xf32>
    %154 = arith.addf %153, %149 : vector<8x32xf32>
    %c3_91 = arith.constant 3 : index
    %c0_92 = arith.constant 0 : index
    %c0_93 = arith.constant 0 : index
    %155 = vector.load %arg9[%c3_91, %c0_92, %c0_93] : memref<4x8x32xf32, #tpu.memory_space<vmem>>, vector<1x8x32xf32>
    %156 = vector.shape_cast %155 : vector<1x8x32xf32> to vector<8x32xf32>
    %157 = vector.shape_cast %154 : vector<8x32xf32> to vector<1x8x32xf32>
    tpu.vector_store %arg9[%c3_91, %c0_92, %c0_93], %157 {strides = array<i32>} : memref<4x8x32xf32, #tpu.memory_space<vmem>>, vector<1x8x32xf32>,
    %c3_94 = arith.constant 3 : index
    %c0_95 = arith.constant 0 : index
    %c0_96 = arith.constant 0 : index
    %158 = vector.load %arg7[%c3_94, %c0_95, %c0_96] : memref<4x8x1xf32, #tpu.memory_space<vmem>>, vector<1x8x1xf32>
    %159 = vector.shape_cast %158 : vector<1x8x1xf32> to vector<8x1xf32>
    %160 = vector.shape_cast %133 : vector<8x1xf32> to vector<1x8x1xf32>
    tpu.vector_store %arg7[%c3_94, %c0_95, %c0_96], %160 {strides = array<i32>} : memref<4x8x1xf32, #tpu.memory_space<vmem>>, vector<1x8x1xf32>,
    %c0_i32_97 = arith.constant 0 : i32
    %161 = arith.cmpi eq, %arg2, %c0_i32_97 : i32
    %162 = arith.extui %161 : i1 to i32
    %c0_i32_98 = arith.constant 0 : i32
    %163 = arith.cmpi ne, %162, %c0_i32_98 : i32
    scf.if %163 {
      %c0_99 = arith.constant 0 : index
      %c0_100 = arith.constant 0 : index
      %c0_101 = arith.constant 0 : index
      %164 = vector.load %arg8[%c0_99, %c0_100, %c0_101] : memref<4x8x1xf32, #tpu.memory_space<vmem>>, vector<1x8x1xf32>
      %165 = vector.shape_cast %164 : vector<1x8x1xf32> to vector<8x1xf32>
      %166 = tpu.reciprocal %165 {approx = true} : vector<8x1xf32> -> vector<8x1xf32>
      %c0_102 = arith.constant 0 : index
      %c0_103 = arith.constant 0 : index
      %c0_104 = arith.constant 0 : index
      %167 = vector.load %arg9[%c0_102, %c0_103, %c0_104] : memref<4x8x32xf32, #tpu.memory_space<vmem>>, vector<1x8x32xf32>
      %168 = vector.shape_cast %167 : vector<1x8x32xf32> to vector<8x32xf32>
      %169 = vector.broadcast %166 : vector<8x1xf32> to vector<8x32xf32>
      %170 = arith.mulf %168, %169 : vector<8x32xf32>
      %c1_105 = arith.constant 1 : index
      %c0_106 = arith.constant 0 : index
      %c0_107 = arith.constant 0 : index
      %171 = vector.load %arg8[%c1_105, %c0_106, %c0_107] : memref<4x8x1xf32, #tpu.memory_space<vmem>>, vector<1x8x1xf32>
      %172 = vector.shape_cast %171 : vector<1x8x1xf32> to vector<8x1xf32>
      %173 = tpu.reciprocal %172 {approx = true} : vector<8x1xf32> -> vector<8x1xf32>
      %c1_108 = arith.constant 1 : index
      %c0_109 = arith.constant 0 : index
      %c0_110 = arith.constant 0 : index
      %174 = vector.load %arg9[%c1_108, %c0_109, %c0_110] : memref<4x8x32xf32, #tpu.memory_space<vmem>>, vector<1x8x32xf32>
      %175 = vector.shape_cast %174 : vector<1x8x32xf32> to vector<8x32xf32>
      %176 = vector.broadcast %173 : vector<8x1xf32> to vector<8x32xf32>
      %177 = arith.mulf %175, %176 : vector<8x32xf32>
      %c2_111 = arith.constant 2 : index
      %c0_112 = arith.constant 0 : index
      %c0_113 = arith.constant 0 : index
      %178 = vector.load %arg8[%c2_111, %c0_112, %c0_113] : memref<4x8x1xf32, #tpu.memory_space<vmem>>, vector<1x8x1xf32>
      %179 = vector.shape_cast %178 : vector<1x8x1xf32> to vector<8x1xf32>
      %180 = tpu.reciprocal %179 {approx = true} : vector<8x1xf32> -> vector<8x1xf32>
      %c2_114 = arith.constant 2 : index
      %c0_115 = arith.constant 0 : index
      %c0_116 = arith.constant 0 : index
      %181 = vector.load %arg9[%c2_114, %c0_115, %c0_116] : memref<4x8x32xf32, #tpu.memory_space<vmem>>, vector<1x8x32xf32>
      %182 = vector.shape_cast %181 : vector<1x8x32xf32> to vector<8x32xf32>
      %183 = vector.broadcast %180 : vector<8x1xf32> to vector<8x32xf32>
      %184 = arith.mulf %182, %183 : vector<8x32xf32>
      %c3_117 = arith.constant 3 : index
      %c0_118 = arith.constant 0 : index
      %c0_119 = arith.constant 0 : index
      %185 = vector.load %arg8[%c3_117, %c0_118, %c0_119] : memref<4x8x1xf32, #tpu.memory_space<vmem>>, vector<1x8x1xf32>
      %186 = vector.shape_cast %185 : vector<1x8x1xf32> to vector<8x1xf32>
      %187 = tpu.reciprocal %186 {approx = true} : vector<8x1xf32> -> vector<8x1xf32>
      %c3_120 = arith.constant 3 : index
      %c0_121 = arith.constant 0 : index
      %c0_122 = arith.constant 0 : index
      %188 = vector.load %arg9[%c3_120, %c0_121, %c0_122] : memref<4x8x32xf32, #tpu.memory_space<vmem>>, vector<1x8x32xf32>
      %189 = vector.shape_cast %188 : vector<1x8x32xf32> to vector<8x32xf32>
      %190 = vector.broadcast %187 : vector<8x1xf32> to vector<8x32xf32>
      %191 = arith.mulf %189, %190 : vector<8x32xf32>
      %192 = tpu.concatenate %170, %177, %184, %191 in 1 : vector<8x32xf32>, vector<8x32xf32>, vector<8x32xf32>, vector<8x32xf32> -> vector<8x128xf32>
      %193 = arith.truncf %192 : vector<8x128xf32> to vector<8x128xbf16>
      %c0_123 = arith.constant 0 : index
      %c0_124 = arith.constant 0 : index
      %c0_125 = arith.constant 0 : index
      %194 = vector.load %arg6[%c0_123, %c0_124, %c0_125] : memref<1x8x128xbf16, #tpu.memory_space<vmem>>, vector<1x8x128xbf16>
      %195 = vector.shape_cast %194 : vector<1x8x128xbf16> to vector<8x128xbf16>
      %196 = vector.shape_cast %193 : vector<8x128xbf16> to vector<1x8x128xbf16>
      tpu.vector_store %arg6[%c0_123, %c0_124, %c0_125], %196 {strides = array<i32>} : memref<1x8x128xbf16, #tpu.memory_space<vmem>>, vector<1x8x128xbf16>,
    } else {
    }
    return
  }
  func.func @transform_0(%arg0: i32, %arg1: i32, %arg2: i32) -> (i32, i32, i32) {
    %c0_i32 = arith.constant 0 : i32
    %c0_i32_0 = arith.constant 0 : i32
    return %arg0, %arg1, %c0_i32 : i32, i32, i32
  }
  func.func @transform_1(%arg0: i32, %arg1: i32, %arg2: i32) -> (i32, i32, i32) {
    %c0_i32 = arith.constant 0 : i32
    %c0_i32_0 = arith.constant 0 : i32
    return %arg0, %arg2, %c0_i32 : i32, i32, i32
  }
  func.func @transform_2(%arg0: i32, %arg1: i32, %arg2: i32) -> (i32, i32, i32) {
    %c1_i32 = arith.constant 1 : i32
    %c0_i32 = arith.constant 0 : i32
    return %arg0, %arg2, %c1_i32 : i32, i32, i32
  }
  func.func @transform_3(%arg0: i32, %arg1: i32, %arg2: i32) -> (i32, i32, i32) {
    %c0_i32 = arith.constant 0 : i32
    %c0_i32_0 = arith.constant 0 : i32
    return %arg0, %arg1, %c0_i32 : i32, i32, i32
  }
}

module attributes {stable_mosaic.version = 11 : i64} {
  func.func @_ffn_res_ln_kernel(%arg0: i32, %arg1: i32, %arg2: memref<16x128xbf16, #tpu.memory_space<vmem>>, %arg3: memref<128x256xbf16, #tpu.memory_space<vmem>>, %arg4: memref<1x256xf32, #tpu.memory_space<vmem>>, %arg5: memref<256x128xbf16, #tpu.memory_space<vmem>>, %arg6: memref<1x128xf32, #tpu.memory_space<vmem>>, %arg7: memref<1x128xf32, #tpu.memory_space<vmem>>, %arg8: memref<1x128xf32, #tpu.memory_space<vmem>>, %arg9: memref<16x128xbf16, #tpu.memory_space<vmem>>, %arg10: memref<16x128xf32, #tpu.memory_space<vmem>>) attributes {dimension_semantics = [#tpu.dimension_semantics<parallel>, #tpu.dimension_semantics<arbitrary>], iteration_bounds = array<i64: 1, 1>, scalar_prefetch = 0 : i64, scratch_operands = 1 : i64, tpu.core_type = #tpu.core_type<tc>, window_params = [{transform_indices = @transform_0, window_bounds = array<i64: 16, 128>}, {transform_indices = @transform_1, window_bounds = array<i64: 128, 256>}, {transform_indices = @transform_2, window_bounds = array<i64: 1, 256>}, {transform_indices = @transform_3, window_bounds = array<i64: 256, 128>}, {pipeline_mode = #tpu.pipeline_mode<synchronous>, transform_indices = @transform_4, window_bounds = array<i64: 1, 128>}, {pipeline_mode = #tpu.pipeline_mode<synchronous>, transform_indices = @transform_5, window_bounds = array<i64: 1, 128>}, {pipeline_mode = #tpu.pipeline_mode<synchronous>, transform_indices = @transform_6, window_bounds = array<i64: 1, 128>}, {transform_indices = @transform_7, window_bounds = array<i64: 16, 128>}]} {
    %c0 = arith.constant 0 : index
    %c0_0 = arith.constant 0 : index
    %0 = vector.load %arg2[%c0, %c0_0] : memref<16x128xbf16, #tpu.memory_space<vmem>>, vector<16x128xbf16>
    %c0_i32 = arith.constant 0 : i32
    %1 = arith.cmpi eq, %arg1, %c0_i32 : i32
    %2 = arith.extui %1 : i1 to i32
    %c0_i32_1 = arith.constant 0 : i32
    %3 = arith.cmpi ne, %2, %c0_i32_1 : i32
    scf.if %3 {
      %20 = arith.extf %0 : vector<16x128xbf16> to vector<16x128xf32>
      %c0_16 = arith.constant 0 : index
      %c0_17 = arith.constant 0 : index
      %21 = vector.load %arg6[%c0_16, %c0_17] : memref<1x128xf32, #tpu.memory_space<vmem>>, vector<1x128xf32>
      %22 = vector.broadcast %21 : vector<1x128xf32> to vector<16x128xf32>
      %23 = arith.addf %20, %22 : vector<16x128xf32>
      %c0_18 = arith.constant 0 : index
      %c0_19 = arith.constant 0 : index
      %24 = vector.load %arg10[%c0_18, %c0_19] : memref<16x128xf32, #tpu.memory_space<vmem>>, vector<16x128xf32>
      tpu.vector_store %arg10[%c0_18, %c0_19], %23 {strides = array<i32>} : memref<16x128xf32, #tpu.memory_space<vmem>>, vector<16x128xf32>,
    } else {
    }
    %c0_2 = arith.constant 0 : index
    %c0_3 = arith.constant 0 : index
    %4 = vector.load %arg3[%c0_2, %c0_3] : memref<128x256xbf16, #tpu.memory_space<vmem>>, vector<128x256xbf16>
    %cst = arith.constant dense<0.000000e+00> : vector<16x256xf32>
    %5 = tpu.matmul %0, %4, %cst {dimension_numbers = #tpu.dot_dimension_numbers<[1], [0], [0], [1], [0, 0, 1, 1], [], []>} : vector<16x128xbf16>, vector<128x256xbf16>, vector<16x256xf32> -> vector<16x256xf32>
    %c0_4 = arith.constant 0 : index
    %c0_5 = arith.constant 0 : index
    %6 = vector.load %arg4[%c0_4, %c0_5] : memref<1x256xf32, #tpu.memory_space<vmem>>, vector<1x256xf32>
    %7 = vector.broadcast %6 : vector<1x256xf32> to vector<16x256xf32>
    %8 = arith.addf %5, %7 : vector<16x256xf32>
    %cst_6 = arith.constant 0.000000e+00 : f32
    %9 = vector.broadcast %cst_6 : f32 to vector<16x256xf32>
    %10 = arith.maximumf %8, %9 : vector<16x256xf32>
    %c0_7 = arith.constant 0 : index
    %c0_8 = arith.constant 0 : index
    %11 = vector.load %arg10[%c0_7, %c0_8] : memref<16x128xf32, #tpu.memory_space<vmem>>, vector<16x128xf32>
    %12 = arith.truncf %10 : vector<16x256xf32> to vector<16x256xbf16>
    %c0_9 = arith.constant 0 : index
    %c0_10 = arith.constant 0 : index
    %13 = vector.load %arg5[%c0_9, %c0_10] : memref<256x128xbf16, #tpu.memory_space<vmem>>, vector<256x128xbf16>
    %cst_11 = arith.constant dense<0.000000e+00> : vector<16x128xf32>
    %14 = tpu.matmul %12, %13, %cst_11 {dimension_numbers = #tpu.dot_dimension_numbers<[1], [0], [0], [1], [0, 0, 1, 1], [], []>} : vector<16x256xbf16>, vector<256x128xbf16>, vector<16x128xf32> -> vector<16x128xf32>
    %15 = arith.addf %11, %14 : vector<16x128xf32>
    %c0_12 = arith.constant 0 : index
    %c0_13 = arith.constant 0 : index
    %16 = vector.load %arg10[%c0_12, %c0_13] : memref<16x128xf32, #tpu.memory_space<vmem>>, vector<16x128xf32>
    tpu.vector_store %arg10[%c0_12, %c0_13], %15 {strides = array<i32>} : memref<16x128xf32, #tpu.memory_space<vmem>>, vector<16x128xf32>,
    %c0_i32_14 = arith.constant 0 : i32
    %17 = arith.cmpi eq, %arg1, %c0_i32_14 : i32
    %18 = arith.extui %17 : i1 to i32
    %c0_i32_15 = arith.constant 0 : i32
    %19 = arith.cmpi ne, %18, %c0_i32_15 : i32
    scf.if %19 {
      %c0_16 = arith.constant 0 : index
      %c0_17 = arith.constant 0 : index
      %20 = vector.load %arg10[%c0_16, %c0_17] : memref<16x128xf32, #tpu.memory_space<vmem>>, vector<16x128xf32>
      %cst_18 = arith.constant dense<0.000000e+00> : vector<16xf32>
      %21 = vector.multi_reduction <add>, %20, %cst_18 [1] : vector<16x128xf32> to vector<16xf32>
      %22 = vector.shape_cast %21 : vector<16xf32> to vector<16x1xf32>
      %cst_19 = arith.constant 1.280000e+02 : f32
      %23 = vector.broadcast %cst_19 : f32 to vector<16x1xf32>
      %24 = arith.divf %22, %23 : vector<16x1xf32>
      %25 = vector.broadcast %24 : vector<16x1xf32> to vector<16x128xf32>
      %26 = arith.subf %20, %25 : vector<16x128xf32>
      %27 = arith.mulf %26, %26 : vector<16x128xf32>
      %cst_20 = arith.constant dense<0.000000e+00> : vector<16xf32>
      %28 = vector.multi_reduction <add>, %27, %cst_20 [1] : vector<16x128xf32> to vector<16xf32>
      %29 = vector.shape_cast %28 : vector<16xf32> to vector<16x1xf32>
      %cst_21 = arith.constant 1.280000e+02 : f32
      %30 = vector.broadcast %cst_21 : f32 to vector<16x1xf32>
      %31 = arith.divf %29, %30 : vector<16x1xf32>
      %32 = vector.broadcast %24 : vector<16x1xf32> to vector<16x128xf32>
      %33 = arith.subf %20, %32 : vector<16x128xf32>
      %cst_22 = arith.constant 9.99999974E-6 : f32
      %34 = vector.broadcast %cst_22 : f32 to vector<16x1xf32>
      %35 = arith.addf %31, %34 : vector<16x1xf32>
      %36 = math.rsqrt %35 : vector<16x1xf32>
      %37 = vector.broadcast %36 : vector<16x1xf32> to vector<16x128xf32>
      %38 = arith.mulf %33, %37 : vector<16x128xf32>
      %c0_23 = arith.constant 0 : index
      %c0_24 = arith.constant 0 : index
      %39 = vector.load %arg7[%c0_23, %c0_24] : memref<1x128xf32, #tpu.memory_space<vmem>>, vector<1x128xf32>
      %40 = vector.broadcast %39 : vector<1x128xf32> to vector<16x128xf32>
      %41 = arith.mulf %38, %40 : vector<16x128xf32>
      %c0_25 = arith.constant 0 : index
      %c0_26 = arith.constant 0 : index
      %42 = vector.load %arg8[%c0_25, %c0_26] : memref<1x128xf32, #tpu.memory_space<vmem>>, vector<1x128xf32>
      %43 = vector.broadcast %42 : vector<1x128xf32> to vector<16x128xf32>
      %44 = arith.addf %41, %43 : vector<16x128xf32>
      %45 = arith.truncf %44 : vector<16x128xf32> to vector<16x128xbf16>
      %c0_27 = arith.constant 0 : index
      %c0_28 = arith.constant 0 : index
      %46 = vector.load %arg9[%c0_27, %c0_28] : memref<16x128xbf16, #tpu.memory_space<vmem>>, vector<16x128xbf16>
      tpu.vector_store %arg9[%c0_27, %c0_28], %45 {strides = array<i32>} : memref<16x128xbf16, #tpu.memory_space<vmem>>, vector<16x128xbf16>,
    } else {
    }
    return
  }
  func.func @transform_0(%arg0: i32, %arg1: i32) -> (i32, i32) {
    %c0_i32 = arith.constant 0 : i32
    %c0_i32_0 = arith.constant 0 : i32
    return %arg0, %c0_i32 : i32, i32
  }
  func.func @transform_1(%arg0: i32, %arg1: i32) -> (i32, i32) {
    %c0_i32 = arith.constant 0 : i32
    %c0_i32_0 = arith.constant 0 : i32
    return %c0_i32, %arg1 : i32, i32
  }
  func.func @transform_2(%arg0: i32, %arg1: i32) -> (i32, i32) {
    %c0_i32 = arith.constant 0 : i32
    %c0_i32_0 = arith.constant 0 : i32
    return %c0_i32, %arg1 : i32, i32
  }
  func.func @transform_3(%arg0: i32, %arg1: i32) -> (i32, i32) {
    %c0_i32 = arith.constant 0 : i32
    %c0_i32_0 = arith.constant 0 : i32
    return %arg1, %c0_i32 : i32, i32
  }
  func.func @transform_4(%arg0: i32, %arg1: i32) -> (i32, i32) {
    %c0_i32 = arith.constant 0 : i32
    %c0_i32_0 = arith.constant 0 : i32
    %c0_i32_1 = arith.constant 0 : i32
    return %c0_i32, %c0_i32_0 : i32, i32
  }
  func.func @transform_5(%arg0: i32, %arg1: i32) -> (i32, i32) {
    %c0_i32 = arith.constant 0 : i32
    %c0_i32_0 = arith.constant 0 : i32
    %c0_i32_1 = arith.constant 0 : i32
    return %c0_i32, %c0_i32_0 : i32, i32
  }
  func.func @transform_6(%arg0: i32, %arg1: i32) -> (i32, i32) {
    %c0_i32 = arith.constant 0 : i32
    %c0_i32_0 = arith.constant 0 : i32
    %c0_i32_1 = arith.constant 0 : i32
    return %c0_i32, %c0_i32_0 : i32, i32
  }
  func.func @transform_7(%arg0: i32, %arg1: i32) -> (i32, i32) {
    %c0_i32 = arith.constant 0 : i32
    %c0_i32_0 = arith.constant 0 : i32
    return %arg0, %c0_i32 : i32, i32
  }
}

module attributes {stable_mosaic.version = 11 : i64} {
  func.func @_linear_kernel(%arg0: i32, %arg1: i32, %arg2: memref<16x128xbf16, #tpu.memory_space<vmem>>, %arg3: memref<128x16xbf16, #tpu.memory_space<vmem>>, %arg4: memref<1x16xf32, #tpu.memory_space<vmem>>, %arg5: memref<16x16xf32, #tpu.memory_space<vmem>>) attributes {dimension_semantics = [#tpu.dimension_semantics<parallel>, #tpu.dimension_semantics<parallel>], iteration_bounds = array<i64: 1, 1>, scalar_prefetch = 0 : i64, scratch_operands = 0 : i64, tpu.core_type = #tpu.core_type<tc>, window_params = [{transform_indices = @transform_0, window_bounds = array<i64: 16, 128>}, {transform_indices = @transform_1, window_bounds = array<i64: 128, 16>}, {transform_indices = @transform_2, window_bounds = array<i64: 1, 16>}, {transform_indices = @transform_3, window_bounds = array<i64: 16, 16>}]} {
    %c0 = arith.constant 0 : index
    %c0_0 = arith.constant 0 : index
    %0 = vector.load %arg2[%c0, %c0_0] : memref<16x128xbf16, #tpu.memory_space<vmem>>, vector<16x128xbf16>
    %c0_1 = arith.constant 0 : index
    %c0_2 = arith.constant 0 : index
    %1 = vector.load %arg3[%c0_1, %c0_2] : memref<128x16xbf16, #tpu.memory_space<vmem>>, vector<128x16xbf16>
    %cst = arith.constant dense<0.000000e+00> : vector<16x16xf32>
    %2 = tpu.matmul %0, %1, %cst {dimension_numbers = #tpu.dot_dimension_numbers<[1], [0], [0], [1], [0, 0, 1, 1], [], []>} : vector<16x128xbf16>, vector<128x16xbf16>, vector<16x16xf32> -> vector<16x16xf32>
    %c0_3 = arith.constant 0 : index
    %c0_4 = arith.constant 0 : index
    %3 = vector.load %arg4[%c0_3, %c0_4] : memref<1x16xf32, #tpu.memory_space<vmem>>, vector<1x16xf32>
    %4 = vector.broadcast %3 : vector<1x16xf32> to vector<16x16xf32>
    %5 = arith.addf %2, %4 : vector<16x16xf32>
    %c0_5 = arith.constant 0 : index
    %c0_6 = arith.constant 0 : index
    %6 = vector.load %arg5[%c0_5, %c0_6] : memref<16x16xf32, #tpu.memory_space<vmem>>, vector<16x16xf32>
    tpu.vector_store %arg5[%c0_5, %c0_6], %5 {strides = array<i32>} : memref<16x16xf32, #tpu.memory_space<vmem>>, vector<16x16xf32>,
    return
  }
  func.func @transform_0(%arg0: i32, %arg1: i32) -> (i32, i32) {
    %c0_i32 = arith.constant 0 : i32
    %c0_i32_0 = arith.constant 0 : i32
    return %arg1, %c0_i32 : i32, i32
  }
  func.func @transform_1(%arg0: i32, %arg1: i32) -> (i32, i32) {
    %c0_i32 = arith.constant 0 : i32
    %c0_i32_0 = arith.constant 0 : i32
    return %c0_i32, %arg0 : i32, i32
  }
  func.func @transform_2(%arg0: i32, %arg1: i32) -> (i32, i32) {
    %c0_i32 = arith.constant 0 : i32
    %c0_i32_0 = arith.constant 0 : i32
    return %c0_i32, %arg0 : i32, i32
  }
  func.func @transform_3(%arg0: i32, %arg1: i32) -> (i32, i32) {
    %c0_i32 = arith.constant 0 : i32
    return %arg1, %arg0 : i32, i32
  }
}

</mosaic_0001>

<bundles_post_ra>
// kernel: encoder_decoder_forward.22
= control target key start
LH: loop header
LB: loop body
LE: loop exit
PB: predicated region body
PF: predicated region fallthrough
CT: control target
= control target key end

     0   :  { %v208_v0 = vmov 0.0   ;;  %vm209_vm0 = vmmov 0   ;;  %s263_s1 = inlined_call_operand.vmem [shape: bf16[128,128], index: 1, kind: input, shape index: {}]   ;;  %s264_s0 = inlined_call_operand.vmem [shape: bf16[16,128], index: 0, kind: input, shape index: {}]   ;;  %s265_s2 = inlined_call_operand.vmem [shape: f32[1,128], index: 2, kind: input, shape index: {}]   ;;  %s266_s3 = inlined_call_operand.vmem [shape: bf16[16,128], index: 3, kind: output, shape index: {}]  }
   0x1   :  { %177 = vmatprep.subr.bf16.mxu0 %v208_v0  ;;  %v199_v1 = vld [vmem:[%s263_s1] sm:$0xff]   ;;  %193 = vmatprep.mubr.msk.bf16.mxu0 %vm209_vm0, %v208_v0  ;;  %v200_v2 = vld [vmem:[%s263_s1 + $0x8] sm:$0xff]   ;;  %v201_v3 = vld [vmem:[%s263_s1 + $0x10] sm:$0xff]  }
   0x2   :  { %178 = vmatpush3.bf16.msra.mxu0 %v199_v1  ;;  %v202_v4 = vld [vmem:[%s263_s1 + $0x18] sm:$0xff]   ;;  %v203_v5 = vld [vmem:[%s263_s1 + $0x20] sm:$0xff]   ;;  %v204_v6 = vld [vmem:[%s263_s1 + $0x28] sm:$0xff]  }
   0x3   :  { %179 = vmatprep.subr.bf16.mxu0 %v208_v0  ;;  %v205_v7 = vld [vmem:[%s263_s1 + $0x30] sm:$0xff]   ;;  %v206_v8 = vld [vmem:[%s263_s1 + $0x38] sm:$0xff]   ;;  %v207_v9 = vld [vmem:[%s264_s0] sm:$0xff]  }
   0x4   :  { %v149_v10 = vld [vmem:[%s265_s2] ss:$0 sm:$0xff] }
   0x6   :  { %180 = vmatpush3.bf16.msra.mxu0 %v200_v2 }
   0x7   :  { %181 = vmatprep.subr.bf16.mxu0 %v208_v0 }
   0xa   :  { %182 = vmatpush3.bf16.msra.mxu0 %v201_v3 }
   0xb   :  { %183 = vmatprep.subr.bf16.mxu0 %v208_v0 }
   0xe   :  { %184 = vmatpush3.bf16.msra.mxu0 %v202_v4 }
   0xf   :  { %185 = vmatprep.subr.bf16.mxu0 %v208_v0 }
  0x12   :  { %186 = vmatpush3.bf16.msra.mxu0 %v203_v5 }
  0x13   :  { %187 = vmatprep.subr.bf16.mxu0 %v208_v0 }
  0x16   :  { %188 = vmatpush3.bf16.msra.mxu0 %v204_v6 }
  0x17   :  { %189 = vmatprep.subr.bf16.mxu0 %v208_v0 }
  0x1a   :  { %190 = vmatpush3.bf16.msra.mxu0 %v205_v7 }
  0x1b   :  { %191 = vmatprep.subr.bf16.mxu0 %v208_v0 }
  0x1e   :  { %192 = vmatpush3.bf16.msra.mxu0 %v206_v8 }
  0x21   :  { %194 = vmatmul.mubr.bf16.vlgmr.msra.gmra.mrb[0].mxu0 %v207_v9 }
  0xf4   :  { %v128_v11 = vpop.f32.mrb[0].mxu0 }
  0xf5   :  { %v195_v12 = vpop.f32.mrb[1].mxu0  ;;  %v129_v14 = vadd.f32 %v149_v10, %v128_v11 }
  0xf6   :  { %v131_v13 = vpop.f32.mrb[2].mxu0 }
  0xf7   :  { %v132_v15 = vadd.f32 %v149_v10, %v131_v13  ;;  %v196_v16 = vpop.f32.mrb[3].mxu0 }
  0xf9   :  { %v166_v17 = vpack.c.bf16 %v132_v15, %v129_v14 }
  0xfb   :  { %167 = vst [vmem:[%s266_s3] sm:$0xff] %v166_v17  }

// kernel: encoder_decoder_forward.19
= control target key start
LH: loop header
LB: loop body
LE: loop exit
PB: predicated region body
PF: predicated region fallthrough
CT: control target
= control target key end

     0   :  { %s769_s12 = smov 0   ;;  %s771_s13 = smov 0   ;;  %s871_s0 = inlined_call_operand.vmem [shape: bf16[16,128], index: 0, kind: input, shape index: {}]   ;;  %s872_s1 = inlined_call_operand.vmem [shape: bf16[128,384], index: 1, kind: input, shape index: {}]   ;;  %s873_s2 = inlined_call_operand.vmem [shape: f32[1,384], index: 2, kind: input, shape index: {}]   ;;  %s874_s3 = inlined_call_operand.vmem [shape: bf16[16,384], index: 3, kind: output, shape index: {}]  }
   0x1   :  { %s773_s14 = smov 0   ;;  %s775_s15 = smov 0  }
   0x2   :  { %s777_s16 = smov 0  }
   0x3 LB: > { %s25_s17 = sadd.s32 1, %s741_s15  ;;  %s594_s18 = sadd.s32 4294967295, %s745_s16   ;;  %s745_s16 = sphi %s777_s16, %s13_s16   ;;  %s741_s15 = sphi %s775_s15, %s879_s15   ;;  %s737_s14 = sphi %s773_s14, %s878_s14   ;;  %s733_s13 = sphi %s771_s13, %s877_s13   ;;  %s729_s12 = sphi %s769_s12, %s876_s12  }
   0x4   : > { %p27_p0 = scmp.ge.s32.totalorder %s25_s17, 3  ;;  %p65_p1 = scmp.ne.s32.totalorder %s733_s13, %s729_s12 }
   0x5   : > { %p66_p2 = scmp.eq.s32.totalorder %s745_s16, 0  ;;  %p123_p4 = scmp.eq.s32.totalorder %s594_s18, 2 }
   0x6   : > { %s881_s17 = smov (%p27_p0, %s25_s17), 0  ;;  %s58_s20 = sadd.s32 1, %s733_s13 }
   0x7   : > { %p67_p3 = por %p66_p2, %p65_p1  ;;  %s55_s19 = ssub.s32 %s741_s15, %s881_s17 }
   0x8   : > { %p56_p5 = scmp.eq.s32.totalorder %s55_s19, 0  ;;  %p804_p6 = por %p123_p4, %p65_p1 }
   0x9   : > { %p598_p7 = scmp.ge.s32.totalorder %s745_s16, 3 }
   0xa   : > { %s809_s22 = scalar_select %p56_p5, %s733_s13, %s58_s20  }
   0xb   : > { %154 = sbr.rel (%p598_p7) target bundleno = 32 (0x20), region = 20 }
  0x12   : > { %157 = sbr.rel (!%p67_p3) target bundleno = 32 (0x20), region = 24  ;;  %s159_s23 = sand.u32 (%p67_p3), 1, %s733_s13  }
  0x13   : > { %s600_s24 = sshll.u32 (%p67_p3), %s741_s15, 2  ;;  %s599_s25 = sshll.u32 (%p67_p3), %s159_s23, 6 }
  0x14   : > { %s817_s28 = scalar_lea.vmem (%p67_p3), %s872_s1, %s600_s24  ;;  %s161_s29 = scalar_lea.vmem (%p67_p3), [#allocation2], %s599_s25 }
  0x15   : > { %v179_v0 = vld [vmem:[%s817_s28] sm:$0xf] (%p67_p3)  ;;  %v181_v1 = vld [vmem:[%s817_s28 + $0xc] sm:$0xf] (%p67_p3)  ;;  %v183_v2 = vld [vmem:[%s817_s28 + $0x18] sm:$0xf] (%p67_p3) }
  0x16   : > { %180 = vst [vmem:[%s161_s29] sm:$0xf] (%p67_p3), %v179_v0  ;;  %182 = vst [vmem:[%s161_s29 + $0x4] sm:$0xf] (%p67_p3), %v181_v1  ;;  %v185_v3 = vld [vmem:[%s817_s28 + $0x24] sm:$0xf] (%p67_p3) }
  0x17   : > { %v187_v4 = vld [vmem:[%s817_s28 + $0x30] sm:$0xf] (%p67_p3)  ;;  %184 = vst [vmem:[%s161_s29 + $0x8] sm:$0xf] (%p67_p3), %v183_v2  ;;  %186 = vst [vmem:[%s161_s29 + $0xc] sm:$0xf] (%p67_p3), %v185_v3 }
  0x18   : > { %188 = vst [vmem:[%s161_s29 + $0x10] sm:$0xf] (%p67_p3), %v187_v4  ;;  %v189_v5 = vld [vmem:[%s817_s28 + $0x3c] sm:$0xf] (%p67_p3)  ;;  %v191_v6 = vld [vmem:[%s817_s28 + $0x48] sm:$0xf] (%p67_p3) }
  0x19   : > { %v193_v7 = vld [vmem:[%s817_s28 + $0x54] sm:$0xf]  ;;  %190 = vst [vmem:[%s161_s29 + $0x14] sm:$0xf] %v189_v5  ;;  %192 = vst [vmem:[%s161_s29 + $0x18] sm:$0xf] %v191_v6 }
  0x1a   : > { %194 = vst [vmem:[%s161_s29 + $0x1c] sm:$0xf] %v193_v7  ;;  %v195_v8 = vld [vmem:[%s817_s28 + $0x60] sm:$0xf]  ;;  %v197_v9 = vld [vmem:[%s817_s28 + $0x6c] sm:$0xf] }
  0x1b   : > { %v199_v10 = vld [vmem:[%s817_s28 + $0x78] sm:$0xf]  ;;  %196 = vst [vmem:[%s161_s29 + $0x20] sm:$0xf] %v195_v8  ;;  %198 = vst [vmem:[%s161_s29 + $0x24] sm:$0xf] %v197_v9 }
  0x1c   : > { %200 = vst [vmem:[%s161_s29 + $0x28] sm:$0xf] %v199_v10  ;;  %v201_v11 = vld [vmem:[%s817_s28 + $0x84] sm:$0xf]  ;;  %v203_v12 = vld [vmem:[%s817_s28 + $0x90] sm:$0xf] }
  0x1d   : > { %v205_v13 = vld [vmem:[%s817_s28 + $0x9c] sm:$0xf]  ;;  %202 = vst [vmem:[%s161_s29 + $0x2c] sm:$0xf] %v201_v11  ;;  %204 = vst [vmem:[%s161_s29 + $0x30] sm:$0xf] %v203_v12 }
  0x1e   : > { %206 = vst [vmem:[%s161_s29 + $0x34] sm:$0xf] %v205_v13  ;;  %v207_v14 = vld [vmem:[%s817_s28 + $0xa8] sm:$0xf]  ;;  %v209_v15 = vld [vmem:[%s817_s28 + $0xb4] sm:$0xf] }
  0x1f   : > { %208 = vst [vmem:[%s161_s29 + $0x38] sm:$0xf] %v207_v14  ;;  %210 = vst [vmem:[%s161_s29 + $0x3c] sm:$0xf] %v209_v15 }
  0x20 PF: > { %p601_p8 = scmp.ge.s32.totalorder %s745_s16, 1  ;;  %p270_p9 = scmp.lt.s32.totalorder %s745_s16, 4 }
  0x22   : > { %p271_p10 = pnand %p601_p8, %p270_p9 }
  0x23   : > { %s277_s30 = sand.u32 (!%p271_p10), 1, %s729_s12   ;;  %v747_v16 = vmov (!%p271_p10), 0.0   ;;  %vm748_vm0 = vmmov (!%p271_p10), 0   ;;  %v706_v25 = vld [vmem:[%s871_s0] sm:$0xff] (!%p271_p10)   ;;  %p313_p11 = scmp.lt.s32.totalorder (!%p271_p10), %s737_s14, 2 }
  0x24   : > { %274 = sbr.rel (%p271_p10) target bundleno = 297 (0x129), region = 69  ;;  %636 = vmatprep.subr.bf16.mxu0 (!%p271_p10), %v747_v16  ;;  %s602_s4 = sshll.u32 (!%p271_p10), %s277_s30, 6  ;;  %652 = vmatprep.mubr.msk.bf16.mxu0 (!%p271_p10), %vm748_vm0, %v747_v16 }
  0x25   : > { %s279_s5 = scalar_lea.vmem (!%p271_p10), [#allocation2], %s602_s4  ;;  %s603_s18 = sshll.u32 (!%p271_p10), %s277_s30, 3 }
  0x26   : > { %v698_v17 = vld [vmem:[%s279_s5] sm:$0xff] (!%p271_p10)   ;;  %v699_v18 = vld [vmem:[%s279_s5 + $0x8] sm:$0xff] (!%p271_p10)   ;;  %v700_v19 = vld [vmem:[%s279_s5 + $0x10] sm:$0xff] (!%p271_p10)   ;;  %s306_s19 = scalar_lea.vmem (!%p271_p10), [#allocation3], %s603_s18 }
  0x27   : > { %637 = vmatpush3.bf16.msra.mxu0 (!%p271_p10), %v698_v17  ;;  %v701_v20 = vld [vmem:[%s279_s5 + $0x18] sm:$0xff] (!%p271_p10)   ;;  %v702_v21 = vld [vmem:[%s279_s5 + $0x20] sm:$0xff] (!%p271_p10)   ;;  %v703_v22 = vld [vmem:[%s279_s5 + $0x28] sm:$0xff] (!%p271_p10)  }
  0x28   : > { %638 = vmatprep.subr.bf16.mxu0 (!%p271_p10), %v747_v16  ;;  %v704_v23 = vld [vmem:[%s279_s5 + $0x30] sm:$0xff] (!%p271_p10)   ;;  %v705_v24 = vld [vmem:[%s279_s5 + $0x38] sm:$0xff] (!%p271_p10)  }
  0x2b   : > { %639 = vmatpush3.bf16.msra.mxu0 %v699_v18  ;;  %s314_s8 = scalar_select %p313_p11, %s737_s14, 2 }
  0x2c   : > { %640 = vmatprep.subr.bf16.mxu0 %v747_v16  ;;  %s617_s20 = sshll.u32 (%p804_p6), %s737_s14, 2 }
  0x2d   : > { %s315_s11 = scalar_lea.vmem %s873_s2, %s314_s8  ;;  %s459_s25 = scalar_lea.vmem (%p804_p6), %s874_s3, %s617_s20 }
  0x2e   : > { %v604_v26 = vld [vmem:[%s315_s11] ss:$0 sm:$0xff] }
  0x2f   : > { %641 = vmatpush3.bf16.msra.mxu0 %v700_v19 }
  0x30   : > { %642 = vmatprep.subr.bf16.mxu0 %v747_v16 }
  0x33   : > { %643 = vmatpush3.bf16.msra.mxu0 %v701_v20 }
  0x34   : > { %644 = vmatprep.subr.bf16.mxu0 %v747_v16 }
  0x37   : > { %645 = vmatpush3.bf16.msra.mxu0 %v702_v21 }
  0x38   : > { %646 = vmatprep.subr.bf16.mxu0 %v747_v16 }
  0x3b   : > { %647 = vmatpush3.bf16.msra.mxu0 %v703_v22 }
  0x3c   : > { %648 = vmatprep.subr.bf16.mxu0 %v747_v16 }
  0x3f   : > { %649 = vmatpush3.bf16.msra.mxu0 %v704_v23 }
  0x40   : > { %650 = vmatprep.subr.bf16.mxu0 %v747_v16 }
  0x43   : > { %651 = vmatpush3.bf16.msra.mxu0 %v705_v24 }
  0x46   : > { %653 = vmatmul.mubr.bf16.vlgmr.msra.gmra.mrb[0].mxu0 %v706_v25 }
 0x119   : > { %v431_v27 = vpop.f32.mrb[0].mxu0 }
 0x11a   : > { %v654_v28 = vpop.f32.mrb[1].mxu0  ;;  %v432_v30 = vadd.f32 %v604_v26, %v431_v27  ;;  %454 = sbr.rel (!%p804_p6) target bundleno = 297 (0x129), region = 77 }
 0x11b   : > { %v434_v29 = vpop.f32.mrb[2].mxu0 }
 0x11c   : > { %v435_v31 = vadd.f32 %v604_v26, %v434_v29  ;;  %v655_v32 = vpop.f32.mrb[3].mxu0 }
 0x11e   : > { %v625_v33 = vpack.c.bf16 %v435_v31, %v432_v30 }
 0x120   : > { %626 = vst [vmem:[%s306_s19] sm:$0xff] %v625_v33  }
 0x127   : > { %v475_v34 = vld [vmem:[%s306_s19] sm:$0xf]  ;;  %v477_v35 = vld [vmem:[%s306_s19 + $0x4] sm:$0xf] }
 0x128   : > { %476 = vst [vmem:[%s459_s25] sm:$0xf] %v475_v34  ;;  %478 = vst [vmem:[%s459_s25 + $0xc] sm:$0xf] %v477_v35 }
 0x129 PF: > { %s13_s16 = sadd.s32 1, %s745_s16   ;;  %s876_s12 = smov %s733_s13 }
 0x12a   : > { %p10_p12 = scmp.ge.s32.totalorder %s13_s16, 5   ;;  %s877_s13 = smov %s809_s22 }
 0x12b   : > { %s878_s14 = smov %s741_s15  ;;  %s879_s15 = smov %s881_s17 }
 0x12c   :  { %12 = sbr.rel (!%p10_p12) target bundleno = 3 (0x3), region = 155 }

// kernel: encoder_decoder_forward.21
= control target key start
LH: loop header
LB: loop body
LE: loop exit
PB: predicated region body
PF: predicated region fallthrough
CT: control target
= control target key end

     0   :  { %v274_v0 = vmov 0.0   ;;  %vm275_vm0 = vmmov 0   ;;  %s353_s2 = inlined_call_operand.vmem [shape: bf16[128,128], index: 2, kind: input, shape index: {}]   ;;  %s354_s0 = inlined_call_operand.vmem [shape: bf16[16,128], index: 0, kind: input, shape index: {}]   ;;  %s355_s1 = inlined_call_operand.vmem [shape: bf16[16,128], index: 1, kind: input, shape index: {}]   ;;  %s356_s3 = inlined_call_operand.vmem [shape: f32[1,128], index: 3, kind: input, shape index: {}]   ;;  %s357_s4 = inlined_call_operand.vmem [shape: f32[1,128], index: 4, kind: input, shape index: {}]   ;;  %s358_s5 = inlined_call_operand.vmem [shape: f32[1,128], index: 5, kind: input, shape index: {}]   ;;  %s359_s6 = inlined_call_operand.vmem [shape: bf16[16,128], index: 6, kind: output, shape index: {}]  }
   0x1   :  { %239 = vmatprep.subr.bf16.mxu0 %v274_v0  ;;  %v261_v1 = vld [vmem:[%s353_s2] sm:$0xff]   ;;  %255 = vmatprep.mubr.msk.bf16.mxu0 %vm275_vm0, %v274_v0  ;;  %v262_v2 = vld [vmem:[%s353_s2 + $0x8] sm:$0xff]   ;;  %v263_v3 = vld [vmem:[%s353_s2 + $0x10] sm:$0xff]  }
   0x2   :  { %240 = vmatpush3.bf16.msra.mxu0 %v261_v1  ;;  %v264_v4 = vld [vmem:[%s353_s2 + $0x18] sm:$0xff]   ;;  %v265_v5 = vld [vmem:[%s353_s2 + $0x20] sm:$0xff]   ;;  %v266_v6 = vld [vmem:[%s353_s2 + $0x28] sm:$0xff]  }
   0x3   :  { %241 = vmatprep.subr.bf16.mxu0 %v274_v0  ;;  %v267_v7 = vld [vmem:[%s353_s2 + $0x30] sm:$0xff]   ;;  %v268_v8 = vld [vmem:[%s353_s2 + $0x38] sm:$0xff]   ;;  %v269_v9 = vld [vmem:[%s354_s0] sm:$0xff]  }
   0x4   :  { %v222_v10 = vld [vmem:[%s355_s1] sm:$0xff]  }
   0x5   :  { %v223_v11 = vunpack.c.l.bf16 %v222_v10  ;;  %v224_v12 = vunpack.c.h.bf16 %v222_v10  ;;  %v214_v14 = vld [vmem:[%s356_s3] ss:$0 sm:$0xff] }
   0x6   :  { %242 = vmatpush3.bf16.msra.mxu0 %v262_v2  ;;  %v215_v38 = vld [vmem:[%s357_s4] ss:$0 sm:$0xff] }
   0x7   :  { %243 = vmatprep.subr.bf16.mxu0 %v274_v0  ;;  %v216_v42 = vld [vmem:[%s358_s5] ss:$0 sm:$0xff] }
   0xa   :  { %244 = vmatpush3.bf16.msra.mxu0 %v263_v3 }
   0xb   :  { %245 = vmatprep.subr.bf16.mxu0 %v274_v0 }
   0xe   :  { %246 = vmatpush3.bf16.msra.mxu0 %v264_v4 }
   0xf   :  { %247 = vmatprep.subr.bf16.mxu0 %v274_v0 }
  0x12   :  { %248 = vmatpush3.bf16.msra.mxu0 %v265_v5 }
  0x13   :  { %249 = vmatprep.subr.bf16.mxu0 %v274_v0 }
  0x16   :  { %250 = vmatpush3.bf16.msra.mxu0 %v266_v6 }
  0x17   :  { %251 = vmatprep.subr.bf16.mxu0 %v274_v0 }
  0x1a   :  { %252 = vmatpush3.bf16.msra.mxu0 %v267_v7 }
  0x1b   :  { %253 = vmatprep.subr.bf16.mxu0 %v274_v0 }
  0x1e   :  { %254 = vmatpush3.bf16.msra.mxu0 %v268_v8 }
  0x21   :  { %256 = vmatmul.mubr.bf16.vlgmr.msra.gmra.mrb[0].mxu0 %v269_v9 }
  0xf4   :  { %v134_v13 = vpop.f32.mrb[0].mxu0 }
  0xf5   :  { %v135_v15 = vadd.f32 %v223_v11, %v134_v13  ;;  %v257_v16 = vpop.f32.mrb[1].mxu0 }
  0xf6   :  { %v137_v17 = vpop.f32.mrb[2].mxu0 }
  0xf7   :  { %v138_v18 = vadd.f32 %v224_v12, %v137_v17  ;;  %v258_v19 = vpop.f32.mrb[3].mxu0  ;;  %v148_v20 = vadd.f32 %v214_v14, %v135_v15 }
  0xf9   :  { %150 = vadd.xlane.f32.xlu0 %v148_v20  ;;  %v149_v21 = vadd.f32 %v214_v14, %v138_v18 }
  0xfd   :  { %152 = vadd.xlane.f32.xlu0 %v149_v21 }
 0x186   :  { %v151_v22 = vpop.xlane.xlu0 %150 }
 0x187   :  { %v155_v23 = vmul.f32 0.0078125, %v151_v22 }
 0x189   :  { %v157_v24 = vsub.f32 %v148_v20, %v155_v23 }
 0x18a   :  { %v153_v25 = vpop.xlane.xlu0 %152 }
 0x18b   :  { %v156_v26 = vmul.f32 0.0078125, %v153_v25  ;;  %v159_v27 = vmul.f32 %v157_v24, %v157_v24 }
 0x18d   :  { %v158_v28 = vsub.f32 %v149_v21, %v156_v26  ;;  %161 = vadd.xlane.f32.xlu1 %v159_v27 }
 0x18f   :  { %v160_v29 = vmul.f32 %v158_v28, %v158_v28 }
 0x191   :  { %163 = vadd.xlane.f32.xlu1 %v160_v29 }
 0x21a   :  { %v162_v30 = vpop.xlane.xlu1 %161 }
 0x21b   :  { %v165_v31 = vmul.f32 0.0078125, %v162_v30 }
 0x21d   :  { %v167_v32 = vadd.f32 1e-05, %v165_v31 }
 0x21e   :  { %v164_v33 = vpop.xlane.xlu1 %163 }
 0x21f   :  { %270 = vrsqrt.f32 %v167_v32  ;;  %v166_v34 = vmul.f32 0.0078125, %v164_v33 }
 0x221   :  { %v168_v35 = vadd.f32 1e-05, %v166_v34 }
 0x223   :  { %272 = vrsqrt.f32 %v168_v35 }
 0x229   :  { %v271_v36 = vpop.eup %270 }
 0x22a   :  { %v171_v37 = vmul.f32 %v271_v36, %v157_v24 }
 0x22c   :  { %v180_v40 = vmul.f32 %v215_v38, %v171_v37 }
 0x22d   :  { %v273_v39 = vpop.eup %272 }
 0x22e   :  { %v172_v41 = vmul.f32 %v273_v39, %v158_v28  ;;  %v189_v44 = vadd.f32 %v216_v42, %v180_v40 }
 0x230   :  { %v181_v43 = vmul.f32 %v215_v38, %v172_v41 }
 0x232   :  { %v190_v45 = vadd.f32 %v216_v42, %v181_v43 }
 0x234   :  { %v228_v46 = vpack.c.bf16 %v190_v45, %v189_v44 }
 0x236   :  { %229 = vst [vmem:[%s359_s6] sm:$0xff] %v228_v46  }

// kernel: encoder_decoder_forward.20
= control target key start
LH: loop header
LB: loop body
LE: loop exit
PB: predicated region body
PF: predicated region fallthrough
CT: control target
= control target key end

     0   :  { %s1336_s15 = smov 0   ;;  %s1338_s16 = smov 0   ;;  %s1513_s0 = inlined_call_operand.vmem [shape: bf16[2,8,384], index: 0, kind: input, shape index: {}, may-alias: {0,1,2}]   ;;  %s1514_s1 = inlined_call_operand.vmem [shape: bf16[2,8,384], index: 1, kind: input, shape index: {}, may-alias: {0,1,2}]   ;;  %s1515_s2 = inlined_call_operand.vmem [shape: bf16[2,8,384], index: 2, kind: input, shape index: {}, may-alias: {0,1,2}]   ;;  %s1516_s3 = inlined_call_operand.vmem [shape: f32[2,1,8], index: 3, kind: input, shape index: {}]   ;;  %s1517_s4 = inlined_call_operand.vmem [shape: bf16[2,8,128], index: 4, kind: output, shape index: {}]  }
   0x1   :  { %s1340_s17 = smov 0  }
   0x2 LB: > { %s33_s18 = sadd.s32 1, %s1298_s16  ;;  %p1135_p0 = scmp.ge.s32.totalorder %s1302_s17, 1  ;;  %s1302_s17 = sphi %s1340_s17, %s14_s17   ;;  %s1298_s16 = sphi %s1338_s16, %s1519_s16   ;;  %s1294_s15 = sphi %s1336_s15, %s1518_s15  }
   0x3   : > { %p35_p1 = scmp.ge.s32.totalorder %s33_s18, 2  ;;  %p236_p2 = scmp.lt.s32.totalorder %s1302_s17, 3 }
   0x5   : > { %s1521_s18 = smov (%p35_p1, %s33_s18), 0  ;;  %p237_p3 = pnand %p1135_p0, %p236_p2 }
   0x6   : > { %p294_p4 = scmp.lt.s32.totalorder (!%p237_p3), %s1294_s15, 1  ;;  %vm350_vm0 = vcmask (!%p237_p3), 261120   ;;  %v1304_v0 = vmov (!%p237_p3), 0.0   ;;  %vm1305_vm1 = vmmov (!%p237_p3), 0   ;;  %vm341_vm2 = vcmask (!%p237_p3), 7168   ;;  %s1308_s29 = smov (!%p237_p3), 96  }
   0x7   : > { %240 = sbr.rel (%p237_p3) target bundleno = 1474 (0x5c2), region = 36  ;;  %1172 = vmatprep.subr.bf16.mxu0 (!%p237_p3), %v1304_v0  ;;  %351 = vst.msk [vmem:[#allocation4] sm:$0xff] (!%p237_p3), %vm350_vm0, %v1304_v0  ;;  %352 = vst.msk [vmem:[#allocation4 + $0x8] sm:$0xff] (!%p237_p3), %vm350_vm0, %v1304_v0  ;;  %1174 = vmatprep.mubr.msk.bf16.mxu0 (!%p237_p3), %vm1305_vm1, %v1304_v0  ;;  %v1306_v4 = vmov (!%p237_p3), -1e+30   ;;  %v360_v5 = vlaneseq (!%p237_p3)  ;;  %vm428_vm4 = vcmask (!%p237_p3), 64512  }
   0x8   : > { %353 = vst.msk [vmem:[#allocation4 + $0x10] sm:$0xff] (!%p237_p3), %vm350_vm0, %v1304_v0  ;;  %354 = vst.msk [vmem:[#allocation4 + $0x18] sm:$0xff] (!%p237_p3), %vm350_vm0, %v1304_v0  ;;  %1178 = vmatprep.subr.bf16.mxu1 (!%p237_p3), %v1304_v0  ;;  %1180 = vmatprep.mubr.msk.bf16.mxu1 (!%p237_p3), %vm1305_vm1, %v1304_v0  ;;  %v1307_v18 = vmov (!%p237_p3), 0   ;;  %s1309_s30 = smov (!%p237_p3), 64   ;;  %s1310_s5 = smov (!%p237_p3), 32   ;;  %vm456_vm5 = vcmask (!%p237_p3), 1043456  }
   0x9   : > { %342 = vst.msk [vmem:[#allocation2] sm:$0xff] (!%p237_p3), %vm341_vm2, %v1306_v4  ;;  %343 = vst.msk [vmem:[#allocation2 + $0x8] sm:$0xff] (!%p237_p3), %vm341_vm2, %v1306_v4  ;;  %v361_v6 = vshrl.u32 (!%p237_p3), %v360_v5, 7  ;;  %v365_v7 = vand.u32 (!%p237_p3), 127, %v360_v5  ;;  %1252 = vset.pattern.permute.xlu0 (!%p237_p3), %v1307_v18  ;;  %1253 = vset.pattern.permute.xlu1 (!%p237_p3), %v1307_v18  ;;  %vm982_vm6 = vcmask (!%p237_p3), 523264   ;;  %vm984_vm7 = vcmask (!%p237_p3), 785408  }
   0xa   : > { %344 = vst.msk [vmem:[#allocation2 + $0x10] sm:$0xff] (!%p237_p3), %vm341_vm2, %v1306_v4  ;;  %345 = vst.msk [vmem:[#allocation2 + $0x18] sm:$0xff] (!%p237_p3), %vm341_vm2, %v1306_v4 }
   0xb   : > { %346 = vst.msk [vmem:[#allocation3] sm:$0xff] (!%p237_p3), %vm341_vm2, %v1304_v0  ;;  %347 = vst.msk [vmem:[#allocation3 + $0x8] sm:$0xff] (!%p237_p3), %vm341_vm2, %v1304_v0  ;;  %vm368_vm3 = vcmp.gt.s32.totalorder (!%p237_p3), %v365_v7, %v361_v6 }
   0xc   : > { %348 = vst.msk [vmem:[#allocation3 + $0x10] sm:$0xff] (!%p237_p3), %vm341_vm2, %v1304_v0  ;;  %349 = vst.msk [vmem:[#allocation3 + $0x18] sm:$0xff] (!%p237_p3), %vm341_vm2, %v1304_v0  ;;  %v369_v8 = vsel (!%p237_p3), %vm368_vm3, -1e+30, %v1304_v0 }
   0xe   : > { %s1523_s15 = smov (!%p294_p4, %s1294_s15), 1 }
   0xf   : > { %s1371_s19 = smul.u32 12, %s1523_s15  ;;  %s328_s28 = scalar_lea.vmem %s1516_s3, %s1523_s15 }
  0x10   : > { %v1142_v9 = vld [vmem:[%s328_s28] ss:$0 sm:$0xff]  ;;  %s1139_s9 = sshll.u32 %s1523_s15, 2 }
  0x11   : > { %s1063_s22 = scalar_lea.vmem %s1514_s1, %s1371_s19  ;;  %s302_s25 = scalar_lea.vmem %s1513_s0, %s1371_s19  ;;  %v1403_v10 = vadd.f32 %v1142_v9, %v369_v8  ;;  %v1413_v21 = vld [vmem:[#allocation2] sm:$0xff]  ;;  %v709_v7 = vld [vmem:[#allocation2 + $0x10] sm:$0xff] }
  0x12   : > { %v1140_v1 = vld [vmem:[%s1063_s22 + $0x4] sm:$0xf]  ;;  %v355_v3 = vld [vmem:[%s302_s25] sm:$0xf]  ;;  %s1069_s8 = scalar_lea.vmem %s1515_s2, %s1371_s19  ;;  %s335_s12 = scalar_lea.vmem %s1517_s4, %s1139_s9 }
  0x13   : > { %v383_v2 = vsel %vm350_vm0, %v1140_v1, 0  ;;  %v1146_v19 = vcombine.low %v1140_v1, %v1140_v1  ;;  %v1145_v20 = vcombine.low %v355_v3, %v355_v3  ;;  %v1427_v25 = vld [vmem:[%s1069_s8 + $0x8] sm:$0xf] }
  0x14   : > { %1173 = vmatpush3.bf16.xpose.msra.mxu0 %v383_v2  ;;  %v458_v26 = vsel %vm456_vm5, %v1427_v25, 0 }
  0x15   : > { %1190 = vmatprep.subr.bf16.mxu0 %v1304_v0  ;;  %518 = vrot.lane.b32.xlu1 %v1146_v19, %s1308_s29 }
  0x16   : > { %1179 = vmatpush3.bf16.msra.mxu1 %v458_v26 }
  0x17   : > { %1184 = vmatprep.subr.bf16.mxu1 %v1304_v0 }
  0x19   : > { %513 = vrot.lane.b32.xlu1 %v1145_v20, %s1308_s29 }
  0x1b   : > { %1175 = vmatmul.mubr.msk.bf16.vlgmr.msra.gmra.mrb[0].mxu0 %vm350_vm0, %v355_v3  ;;  %v569_v3 = vld [vmem:[#allocation2 + $0x8] sm:$0xff] }
  0x1c   : > { %1192 = vmatprep.mubr.msk.bf16.mxu0 %vm1305_vm1, %v1304_v0 }
  0x1d   : > { %658 = vrot.lane.b32.xlu1 %v1146_v19, %s1309_s30 }
  0x21   : > { %656 = vrot.lane.b32.xlu1 %v1145_v20, %s1309_s30 }
  0x25   : > { %795 = vrot.lane.b32.xlu1 %v1146_v19, %s1310_s5 }
  0x29   : > { %793 = vrot.lane.b32.xlu1 %v1145_v20, %s1310_s5 }
  0x87   : > { %v519_v30 = vpop.permute.xlu1 %518 }
  0x88   : > { %v524_v33 = vsel %vm350_vm0, %v519_v30, 0 }
  0x8b   : > { %v514_v31 = vpop.permute.xlu1 %513 }
  0x8f   : > { %v659_v35 = vpop.permute.xlu1 %658 }
  0x90   : > { %v664_v37 = vsel %vm350_vm0, %v659_v35, 0 }
  0x93   : > { %v657_v36 = vpop.permute.xlu1 %656 }
  0x97   : > { %v796_v38 = vpop.permute.xlu1 %795 }
  0x98   : > { %v801_v39 = vsel %vm350_vm0, %v796_v38, 0 }
  0x9b   : > { %v794_v40 = vpop.permute.xlu1 %793 }
  0xee   : > { %v419_v11 = vpop.f32.mrb[0].mxu0 }
  0xef   : > { %v425_v12 = vmul.f32 0.17677669, %v419_v11  ;;  %v1176_v13 = vpop.f32.mrb[1].mxu0 }
  0xf0   : > { %v422_v14 = vpop.f32.mrb[2].mxu0 }
  0xf1   : > { %v1177_v15 = vpop.f32.mrb[3].mxu0  ;;  %v426_v16 = vadd.f32 %v425_v12, %v1403_v10  ;;  %v846_v12 = vld [vmem:[#allocation2 + $0x18] sm:$0xff]  ;;  %v1148_v14 = vcombine.low %v1427_v25, %v1427_v25 }
  0xf3   : > { %v429_v17 = vsel %vm428_vm4, %v426_v16, -inf }
  0xf4   : > { %430 = vmax.xlane.f32.xlu0 %v429_v17 }
 0x181   : > { %v431_v22 = vpop.xlane.xlu0 %430 }
 0x182   : > { %v1416_v23 = vmax.f32 %v1413_v21, %v431_v22 }
 0x184   : > { %v433_v24 = vsub.f32 %v1413_v21, %v1416_v23  ;;  %509 = vst.msk [vmem:[#allocation2] sm:$0xff] %vm341_vm2, %v1416_v23  ;;  %438 = vperm.xlu0 %1252, %v1416_v23  }
 0x203   : > { %v439_v27 = vpop.permute.xlu0 %438 }
 0x204   : > { %v441_v28 = vsub.f32 %v426_v16, %v439_v27 }
 0x206   : > { %v442_v29 = vmul.f32 1.442695, %v441_v28 }
 0x208   : > { %1256 = vpow2.f32 %v442_v29 }
 0x212   : > { %v1432_v32 = vpop.eup %1256 }
 0x213   : > { %v452_v34 = vpack.c.bf16 %v1432_v32, %v1432_v32 }
 0x215   : > { %1181 = vmatmul.mubr.msk.bf16.vlgmr.msra.gmra.mrb[0].mxu1 %vm428_vm4, %v452_v34 }
 0x216   : > { %1185 = vmatpush3.bf16.xpose.msra.mxu1 %v524_v33  ;;  %1186 = vmatprep.mubr.msk.bf16.mxu1 %vm1305_vm1, %v1304_v0 }
 0x217   : > { %1196 = vmatprep.subr.bf16.mxu1 %v1304_v0 }
 0x21d   : > { %1187 = vmatmul.mubr.msk.bf16.vlgmr.msra.gmra.mrb[4].mxu1 %vm350_vm0, %v514_v31  ;;  %v446_v31 = vsel %vm428_vm4, %v1432_v32, 0.0 }
 0x21e   : > { %1197 = vmatpush3.bf16.xpose.msra.mxu1 %v664_v37  ;;  %1198 = vmatprep.mubr.msk.bf16.mxu1 %vm1305_vm1, %v1304_v0 }
 0x21f   : > { %1208 = vmatprep.subr.bf16.mxu1 %v1304_v0 }
 0x225   : > { %1199 = vmatmul.mubr.msk.bf16.vlgmr.msra.gmra.mrb[8].mxu1 %vm350_vm0, %v657_v36 }
 0x226   : > { %1209 = vmatpush3.bf16.xpose.msra.mxu1 %v801_v39  ;;  %1210 = vmatprep.mubr.msk.bf16.mxu1 %vm1305_vm1, %v1304_v0 }
 0x22d   : > { %1211 = vmatmul.mubr.msk.bf16.vlgmr.msra.gmra.mrb[12].mxu1 %vm350_vm0, %v794_v40 }
 0x2e8   : > { %v1451_v41 = vpop.f32.mrb[0].mxu1 }
 0x2e9   : > { %v1182_v42 = vpop.f32.mrb[1].mxu1 }
 0x2ea   : > { %v497_v43 = vpop.f32.mrb[2].mxu1 }
 0x2eb   : > { %v1183_v44 = vpop.f32.mrb[3].mxu1 }
 0x2f0   : > { %v560_v45 = vpop.f32.mrb[4].mxu1 }
 0x2f1   : > { %v566_v46 = vmul.f32 0.17677669, %v560_v45  ;;  %v1188_v47 = vpop.f32.mrb[5].mxu1 }
 0x2f2   : > { %v563_v48 = vpop.f32.mrb[6].mxu1 }
 0x2f3   : > { %v1189_v49 = vpop.f32.mrb[7].mxu1  ;;  %v567_v50 = vadd.f32 %v566_v46, %v1403_v10  ;;  %v434_v48 = vmul.f32 1.442695, %v433_v24  ;;  %v726_v24 = vld [vmem:[#allocation3 + $0x10] sm:$0xff] }
 0x2f5   : > { %v570_v51 = vsel %vm428_vm4, %v567_v50, -inf }
 0x2f6   : > { %571 = vmax.xlane.f32.xlu1 %v570_v51 }
 0x2f8   : > { %v700_v52 = vpop.f32.mrb[8].mxu1 }
 0x2f9   : > { %v706_v53 = vmul.f32 0.17677669, %v700_v52  ;;  %v1200_v54 = vpop.f32.mrb[9].mxu1 }
 0x2fa   : > { %v703_v55 = vpop.f32.mrb[10].mxu1 }
 0x2fb   : > { %v1201_v56 = vpop.f32.mrb[11].mxu1  ;;  %v707_v57 = vadd.f32 %v706_v53, %v1403_v10  ;;  %v586_v53 = vld [vmem:[#allocation3 + $0x8] sm:$0xff]  ;;  %v444_v55 = vld [vmem:[#allocation3] sm:$0xff] }
 0x2fd   : > { %v710_v58 = vsel %vm428_vm4, %v707_v57, -inf }
 0x2fe   : > { %711 = vmax.xlane.f32.xlu0 %v710_v58 }
 0x300   : > { %v837_v59 = vpop.f32.mrb[12].mxu1 }
 0x301   : > { %v843_v60 = vmul.f32 0.17677669, %v837_v59  ;;  %v1212_v61 = vpop.f32.mrb[13].mxu1 }
 0x302   : > { %v840_v62 = vpop.f32.mrb[14].mxu1 }
 0x303   : > { %v1213_v63 = vpop.f32.mrb[15].mxu1  ;;  %v844_v1 = vadd.f32 %v843_v60, %v1403_v10  ;;  %v863_v62 = vld [vmem:[#allocation3 + $0x18] sm:$0xff] }
 0x305   : > { %v847_v2 = vsel %vm428_vm4, %v844_v1, -inf }
 0x306   : > { %848 = vmax.xlane.f32.xlu1 %v847_v2 }
 0x383   : > { %v572_v4 = vpop.xlane.xlu1 %571 }
 0x384   : > { %v573_v5 = vmax.f32 %v569_v3, %v572_v4 }
 0x386   : > { %v574_v6 = vsub.f32 %v569_v3, %v573_v5  ;;  %655 = vst.msk [vmem:[#allocation2 + $0x8] sm:$0xff] %vm341_vm2, %v573_v5  ;;  %579 = vperm.xlu1 %1253, %v573_v5  }
 0x388   : > { %v575_v35 = vmul.f32 1.442695, %v574_v6  ;;  %v500_v6 = vld [vmem:[#allocation4] sm:$0xff] }
 0x38b   : > { %v712_v8 = vpop.xlane.xlu0 %711 }
 0x38c   : > { %v713_v9 = vmax.f32 %v709_v7, %v712_v8 }
 0x38e   : > { %v714_v11 = vsub.f32 %v709_v7, %v713_v9  ;;  %792 = vst.msk [vmem:[#allocation2 + $0x10] sm:$0xff] %vm341_vm2, %v713_v9  ;;  %719 = vperm.xlu0 %1252, %v713_v9  }
 0x390   : > { %v715_v32 = vmul.f32 1.442695, %v714_v11 }
 0x393   : > { %v849_v13 = vpop.xlane.xlu1 %848 }
 0x394   : > { %v850_v10 = vmax.f32 %v846_v12, %v849_v13 }
 0x396   : > { %v851_v15 = vsub.f32 %v846_v12, %v850_v10  ;;  %929 = vst.msk [vmem:[#allocation2 + $0x18] sm:$0xff] %vm341_vm2, %v850_v10  ;;  %856 = vperm.xlu1 %1253, %v850_v10  }
 0x39a   : > { %597 = vrot.lane.b32.xlu1 %v1148_v14, %s1308_s29 }
 0x39e   : > { %734 = vrot.lane.b32.xlu1 %v1148_v14, %s1309_s30 }
 0x3a2   : > { %871 = vrot.lane.b32.xlu1 %v1148_v14, %s1310_s5  ;;  %v646_v14 = vld [vmem:[#allocation4 + $0x8] sm:$0xff] }
 0x405   : > { %v580_v16 = vpop.permute.xlu1 %579 }
 0x406   : > { %v582_v17 = vsub.f32 %v567_v50, %v580_v16  ;;  %v852_v50 = vmul.f32 1.442695, %v851_v15 }
 0x408   : > { %v583_v18 = vmul.f32 1.442695, %v582_v17 }
 0x40a   : > { %1258 = vpow2.f32 %v583_v18 }
 0x40d   : > { %v720_v19 = vpop.permute.xlu0 %719 }
 0x40e   : > { %v722_v20 = vsub.f32 %v707_v57, %v720_v19 }
 0x410   : > { %v723_v22 = vmul.f32 1.442695, %v722_v20 }
 0x412   : > { %1260 = vpow2.f32 %v723_v22 }
 0x414   : > { %v1259_v26 = vpop.eup %1258 }
 0x415   : > { %v857_v25 = vpop.permute.xlu1 %856  ;;  %v588_v27 = vsel %vm428_vm4, %v1259_v26, 0.0  ;;  %v593_v36 = vpack.c.bf16 %v1259_v26, %v1259_v26  ;;  %v783_v26 = vld [vmem:[#allocation4 + $0x10] sm:$0xff] }
 0x416   : > { %v859_v28 = vsub.f32 %v844_v1, %v857_v25  ;;  %589 = vadd.xlane.f32.xlu1 %v588_v27 }
 0x418   : > { %v860_v29 = vmul.f32 1.442695, %v859_v28 }
 0x419   : > { %v598_v30 = vpop.permute.xlu1 %597 }
 0x41a   : > { %1262 = vpow2.f32 %v860_v29  ;;  %v603_v33 = vsel %vm456_vm5, %v598_v30, 0  ;;  %447 = vadd.xlane.f32.xlu1 %v446_v31 }
 0x41b   : > { %1191 = vmatpush3.bf16.msra.mxu0 %v603_v33  ;;  %1264 = vpow2.f32 %v575_v35  ;;  %v920_v33 = vld [vmem:[#allocation4 + $0x18] sm:$0xff] }
 0x41c   : > { %v1261_v34 = vpop.eup %1260  ;;  %1202 = vmatprep.subr.bf16.mxu0 %v1304_v0  ;;  %1266 = vpow2.f32 %v715_v32 }
 0x41d   : > { %v728_v37 = vsel %vm428_vm4, %v1261_v34, 0.0  ;;  %v735_v38 = vpop.permute.xlu1 %734  ;;  %v733_v43 = vpack.c.bf16 %v1261_v34, %v1261_v34  ;;  %1268 = vpow2.f32 %v434_v48 }
 0x41e   : > { %729 = vadd.xlane.f32.xlu0 %v728_v37  ;;  %1193 = vmatmul.mubr.msk.bf16.vlgmr.msra.gmra.mrb[4].mxu0 %vm428_vm4, %v593_v36  ;;  %v740_v39 = vsel %vm456_vm5, %v735_v38, 0  ;;  %1270 = vpow2.f32 %v852_v50 }
 0x41f   : > { %1203 = vmatpush3.bf16.msra.mxu0 %v740_v39  ;;  %1204 = vmatprep.mubr.msk.bf16.mxu0 %vm1305_vm1, %v1304_v0 }
 0x420   : > { %1214 = vmatprep.subr.bf16.mxu0 %v1304_v0 }
 0x421   : > { %v872_v40 = vpop.permute.xlu1 %871 }
 0x422   : > { %v877_v44 = vsel %vm456_vm5, %v872_v40, 0 }
 0x424   : > { %v1263_v42 = vpop.eup %1262 }
 0x425   : > { %v865_v45 = vsel %vm428_vm4, %v1263_v42, 0.0  ;;  %v1265_v46 = vpop.eup %1264  ;;  %v870_v47 = vpack.c.bf16 %v1263_v42, %v1263_v42 }
 0x426   : > { %866 = vadd.xlane.f32.xlu0 %v865_v45  ;;  %1205 = vmatmul.mubr.msk.bf16.vlgmr.msra.gmra.mrb[8].mxu0 %vm428_vm4, %v733_v43  ;;  %v1267_v49 = vpop.eup %1266 }
 0x427   : > { %1215 = vmatpush3.bf16.msra.mxu0 %v877_v44  ;;  %1216 = vmatprep.mubr.msk.bf16.mxu0 %vm1305_vm1, %v1304_v0  ;;  %v1269_v51 = vpop.eup %1268  ;;  %v587_v0 = vmul.f32 %v1265_v46, %v586_v53  ;;  %v727_v58 = vmul.f32 %v1267_v49, %v726_v24 }
 0x428   : > { %v1271_v52 = vpop.eup %1270  ;;  %v445_v21 = vmul.f32 %v1269_v51, %v444_v55 }
 0x429   : > { %v864_v1 = vmul.f32 %v1271_v52, %v863_v62 }
 0x42b   : > { %649 = vperm.xlu1 %1253, %v1265_v46  }
 0x42e   : > { %1217 = vmatmul.mubr.msk.bf16.vlgmr.msra.gmra.mrb[12].mxu0 %vm428_vm4, %v870_v47 }
 0x42f   : > { %786 = vperm.xlu1 %1253, %v1267_v49  }
 0x43c   : > { %503 = vperm.xlu0 %1252, %v1269_v51  }
 0x440   : > { %923 = vperm.xlu0 %1252, %v1271_v52  }
 0x4a3   : > { %v590_v54 = vpop.xlane.xlu1 %589 }
 0x4a4   : > { %v591_v56 = vadd.f32 %v590_v54, %v587_v0 }
 0x4a6   : > { %592 = vst.msk [vmem:[#allocation3 + $0x8] sm:$0xff] %vm341_vm2, %v591_v56 }
 0x4a7   : > { %v448_v23 = vpop.xlane.xlu1 %447 }
 0x4a8   : > { %v449_v57 = vadd.f32 %v448_v23, %v445_v21 }
 0x4aa   : > { %451 = vst.msk [vmem:[#allocation3] sm:$0xff] %vm341_vm2, %v449_v57 }
 0x4ab   : > { %v730_v59 = vpop.xlane.xlu0 %729  ;;  %v650_v15 = vpop.permute.xlu1 %649 }
 0x4ac   : > { %v731_v60 = vadd.f32 %v730_v59, %v727_v58  ;;  %v652_v16 = vmul.f32 %v650_v15, %v646_v14 }
 0x4ad   : > { %v942_v61 = vld [vmem:[#allocation3 + $0x8] sm:$0xff] }
 0x4ae   : > { %732 = vst.msk [vmem:[#allocation3 + $0x10] sm:$0xff] %vm341_vm2, %v731_v60  ;;  %1272 = vrcp.f32 %v942_v61 }
 0x4af   : > { %v787_v25 = vpop.permute.xlu1 %786 }
 0x4b1   : > { %v933_v63 = vld [vmem:[#allocation3] sm:$0xff] }
 0x4b2   : > { %1274 = vrcp.f32 %v933_v63 }
 0x4b3   : > { %v867_v2 = vpop.xlane.xlu0 %866 }
 0x4b4   : > { %v868_v3 = vadd.f32 %v867_v2, %v864_v1 }
 0x4b5   : > { %v951_v4 = vld [vmem:[#allocation3 + $0x10] sm:$0xff] }
 0x4b6   : > { %869 = vst.msk [vmem:[#allocation3 + $0x18] sm:$0xff] %vm341_vm2, %v868_v3  ;;  %1276 = vrcp.f32 %v951_v4 }
 0x4b8   : > { %v1273_v5 = vpop.eup %1272 }
 0x4b9   : > { %947 = vperm.xlu0 %1252, %v1273_v5  }
 0x4bb   : > { %v504_v7 = vpop.permute.xlu0 %503 }
 0x4bc   : > { %v1275_v8 = vpop.eup %1274  ;;  %v506_v9 = vmul.f32 %v504_v7, %v500_v6 }
 0x4bd   : > { %938 = vperm.xlu1 %1253, %v1275_v8   ;;  %v960_v11 = vld [vmem:[#allocation3 + $0x18] sm:$0xff] }
 0x4be   : > { %v507_v12 = vadd.f32 %v506_v9, %v1451_v41  ;;  %1278 = vrcp.f32 %v960_v11  ;;  %v789_v41 = vmul.f32 %v787_v25, %v783_v26 }
 0x4bf   : > { %v924_v34 = vpop.permute.xlu0 %923 }
 0x4c0   : > { %v1277_v13 = vpop.eup %1276  ;;  %508 = vst.msk [vmem:[#allocation4] sm:$0xff] %vm350_vm0, %v507_v12  ;;  %v926_v35 = vmul.f32 %v924_v34, %v920_v33 }
 0x4c1   : > { %956 = vperm.xlu1 %1253, %v1277_v13  }
 0x4c7   : > { %v935_v51 = vld [vmem:[#allocation4] sm:$0xff] }
 0x4c8   : > { %v1279_v10 = vpop.eup %1278 }
 0x4c9   : > { %965 = vperm.xlu0 %1252, %v1279_v10  }
 0x4f1   : > { %v639_v17 = vpop.f32.mrb[4].mxu0 }
 0x4f2   : > { %v653_v18 = vadd.f32 %v652_v16, %v639_v17  ;;  %v1194_v19 = vpop.f32.mrb[5].mxu0 }
 0x4f3   : > { %v642_v20 = vpop.f32.mrb[6].mxu0 }
 0x4f4   : > { %654 = vst.msk [vmem:[#allocation4 + $0x8] sm:$0xff] %vm350_vm0, %v653_v18  ;;  %v1195_v22 = vpop.f32.mrb[7].mxu0 }
 0x4f9   : > { %v776_v27 = vpop.f32.mrb[8].mxu0 }
 0x4fa   : > { %v790_v28 = vadd.f32 %v789_v41, %v776_v27  ;;  %v1206_v29 = vpop.f32.mrb[9].mxu0 }
 0x4fb   : > { %v779_v30 = vpop.f32.mrb[10].mxu0  ;;  %v944_v42 = vld [vmem:[#allocation4 + $0x8] sm:$0xff] }
 0x4fc   : > { %791 = vst.msk [vmem:[#allocation4 + $0x10] sm:$0xff] %vm350_vm0, %v790_v28  ;;  %v1207_v31 = vpop.f32.mrb[11].mxu0 }
 0x501   : > { %v913_v36 = vpop.f32.mrb[12].mxu0 }
 0x502   : > { %v927_v37 = vadd.f32 %v926_v35, %v913_v36  ;;  %v1218_v38 = vpop.f32.mrb[13].mxu0 }
 0x503   : > { %v916_v39 = vpop.f32.mrb[14].mxu0  ;;  %v953_v46 = vld [vmem:[#allocation4 + $0x10] sm:$0xff] }
 0x504   : > { %928 = vst.msk [vmem:[#allocation4 + $0x18] sm:$0xff] %vm350_vm0, %v927_v37  ;;  %v1219_v32 = vpop.f32.mrb[15].mxu0 }
 0x50b   : > { %v962_v49 = vld [vmem:[#allocation4 + $0x18] sm:$0xff] }
 0x538   : > { %v948_v40 = vpop.permute.xlu0 %947 }
 0x539   : > { %v950_v43 = vmul.f32 %v948_v40, %v944_v42 }
 0x53b   : > { %970 = vrot.lane.b32.xlu1 %v950_v43, %s1310_s5 }
 0x53c   : > { %v939_v44 = vpop.permute.xlu1 %938 }
 0x53d   : > { %v941_v53 = vmul.f32 %v939_v44, %v935_v51 }
 0x540   : > { %v957_v45 = vpop.permute.xlu1 %956 }
 0x541   : > { %v959_v47 = vmul.f32 %v957_v45, %v953_v46 }
 0x543   : > { %974 = vrot.lane.b32.xlu0 %v959_v47, %s1309_s30 }
 0x548   : > { %v966_v48 = vpop.permute.xlu0 %965 }
 0x549   : > { %v968_v50 = vmul.f32 %v966_v48, %v962_v49 }
 0x54b   : > { %978 = vrot.lane.b32.xlu1 %v968_v50, %s1308_s29 }
 0x5ad   : > { %v971_v52 = vpop.permute.xlu1 %970 }
 0x5ae   : > { %v981_v54 = vsel %vm350_vm0, %v941_v53, %v971_v52 }
 0x5b5   : > { %v975_v0 = vpop.permute.xlu0 %974 }
 0x5b6   : > { %v983_v55 = vsel %vm982_vm6, %v981_v54, %v975_v0 }
 0x5bd   : > { %v979_v56 = vpop.permute.xlu1 %978 }
 0x5be   : > { %v985_v21 = vsel %vm984_vm7, %v983_v55, %v979_v56 }
 0x5bf   : > { %v986_v23 = vpack.c.bf16 %v985_v21, %v985_v21 }
 0x5c1   : > { %987 = vst [vmem:[%s335_s12] sm:$0xf] %v986_v23 }
 0x5c2 PF: > { %s14_s17 = sadd.s32 1, %s1302_s17   ;;  %s1518_s15 = smov %s1298_s16 }
 0x5c3   : > { %p11_p5 = scmp.ge.s32.totalorder %s14_s17, 4   ;;  %s1519_s16 = smov %s1521_s18 }
 0x5c5   :  { %13 = sbr.rel (!%p11_p5) target bundleno = 2 (0x2), region = 92 }

// kernel: encoder_decoder_forward.15
= control target key start
LH: loop header
LB: loop body
LE: loop exit
PB: predicated region body
PF: predicated region fallthrough
CT: control target
= control target key end

     0   :  { %s812_s12 = smov 0   ;;  %s814_s13 = smov 0   ;;  %s917_s0 = inlined_call_operand.vmem [shape: bf16[32,128], index: 0, kind: input, shape index: {}]   ;;  %s918_s1 = inlined_call_operand.vmem [shape: bf16[128,384], index: 1, kind: input, shape index: {}]   ;;  %s919_s2 = inlined_call_operand.vmem [shape: f32[1,384], index: 2, kind: input, shape index: {}]   ;;  %s920_s3 = inlined_call_operand.vmem [shape: bf16[32,384], index: 3, kind: output, shape index: {}]  }
   0x1   :  { %s816_s14 = smov 0   ;;  %s818_s15 = smov 0  }
   0x2   :  { %s820_s16 = smov 0  }
   0x3 LB: > { %s25_s17 = sadd.s32 1, %s786_s15  ;;  %s628_s18 = sadd.s32 4294967295, %s790_s16   ;;  %s790_s16 = sphi %s820_s16, %s13_s16   ;;  %s786_s15 = sphi %s818_s15, %s925_s15   ;;  %s782_s14 = sphi %s816_s14, %s924_s14   ;;  %s778_s13 = sphi %s814_s13, %s923_s13   ;;  %s774_s12 = sphi %s812_s12, %s922_s12  }
   0x4   : > { %p27_p0 = scmp.ge.s32.totalorder %s25_s17, 3  ;;  %p65_p1 = scmp.ne.s32.totalorder %s778_s13, %s774_s12 }
   0x5   : > { %p66_p2 = scmp.eq.s32.totalorder %s790_s16, 0  ;;  %p123_p4 = scmp.eq.s32.totalorder %s628_s18, 2 }
   0x6   : > { %s927_s17 = smov (%p27_p0, %s25_s17), 0  ;;  %s58_s20 = sadd.s32 1, %s778_s13 }
   0x7   : > { %p67_p3 = por %p66_p2, %p65_p1  ;;  %s55_s19 = ssub.s32 %s786_s15, %s927_s17 }
   0x8   : > { %p56_p5 = scmp.eq.s32.totalorder %s55_s19, 0  ;;  %p847_p6 = por %p123_p4, %p65_p1 }
   0x9   : > { %p632_p7 = scmp.ge.s32.totalorder %s790_s16, 3 }
   0xa   : > { %s852_s22 = scalar_select %p56_p5, %s778_s13, %s58_s20  }
   0xb   : > { %154 = sbr.rel (%p632_p7) target bundleno = 32 (0x20), region = 20 }
  0x12   : > { %157 = sbr.rel (!%p67_p3) target bundleno = 32 (0x20), region = 24  ;;  %s159_s23 = sand.u32 (%p67_p3), 1, %s778_s13  }
  0x13   : > { %s634_s24 = sshll.u32 (%p67_p3), %s786_s15, 2  ;;  %s633_s25 = sshll.u32 (%p67_p3), %s159_s23, 6 }
  0x14   : > { %s860_s28 = scalar_lea.vmem (%p67_p3), %s918_s1, %s634_s24  ;;  %s161_s29 = scalar_lea.vmem (%p67_p3), [#allocation2], %s633_s25 }
  0x15   : > { %v179_v0 = vld [vmem:[%s860_s28] sm:$0xf] (%p67_p3)  ;;  %v181_v1 = vld [vmem:[%s860_s28 + $0xc] sm:$0xf] (%p67_p3)  ;;  %v183_v2 = vld [vmem:[%s860_s28 + $0x18] sm:$0xf] (%p67_p3) }
  0x16   : > { %180 = vst [vmem:[%s161_s29] sm:$0xf] (%p67_p3), %v179_v0  ;;  %182 = vst [vmem:[%s161_s29 + $0x4] sm:$0xf] (%p67_p3), %v181_v1  ;;  %v185_v3 = vld [vmem:[%s860_s28 + $0x24] sm:$0xf] (%p67_p3) }
  0x17   : > { %v187_v4 = vld [vmem:[%s860_s28 + $0x30] sm:$0xf] (%p67_p3)  ;;  %184 = vst [vmem:[%s161_s29 + $0x8] sm:$0xf] (%p67_p3), %v183_v2  ;;  %186 = vst [vmem:[%s161_s29 + $0xc] sm:$0xf] (%p67_p3), %v185_v3 }
  0x18   : > { %188 = vst [vmem:[%s161_s29 + $0x10] sm:$0xf] (%p67_p3), %v187_v4  ;;  %v189_v5 = vld [vmem:[%s860_s28 + $0x3c] sm:$0xf] (%p67_p3)  ;;  %v191_v6 = vld [vmem:[%s860_s28 + $0x48] sm:$0xf] (%p67_p3) }
  0x19   : > { %v193_v7 = vld [vmem:[%s860_s28 + $0x54] sm:$0xf]  ;;  %190 = vst [vmem:[%s161_s29 + $0x14] sm:$0xf] %v189_v5  ;;  %192 = vst [vmem:[%s161_s29 + $0x18] sm:$0xf] %v191_v6 }
  0x1a   : > { %194 = vst [vmem:[%s161_s29 + $0x1c] sm:$0xf] %v193_v7  ;;  %v195_v8 = vld [vmem:[%s860_s28 + $0x60] sm:$0xf]  ;;  %v197_v9 = vld [vmem:[%s860_s28 + $0x6c] sm:$0xf] }
  0x1b   : > { %v199_v10 = vld [vmem:[%s860_s28 + $0x78] sm:$0xf]  ;;  %196 = vst [vmem:[%s161_s29 + $0x20] sm:$0xf] %v195_v8  ;;  %198 = vst [vmem:[%s161_s29 + $0x24] sm:$0xf] %v197_v9 }
  0x1c   : > { %200 = vst [vmem:[%s161_s29 + $0x28] sm:$0xf] %v199_v10  ;;  %v201_v11 = vld [vmem:[%s860_s28 + $0x84] sm:$0xf]  ;;  %v203_v12 = vld [vmem:[%s860_s28 + $0x90] sm:$0xf] }
  0x1d   : > { %v205_v13 = vld [vmem:[%s860_s28 + $0x9c] sm:$0xf]  ;;  %202 = vst [vmem:[%s161_s29 + $0x2c] sm:$0xf] %v201_v11  ;;  %204 = vst [vmem:[%s161_s29 + $0x30] sm:$0xf] %v203_v12 }
  0x1e   : > { %206 = vst [vmem:[%s161_s29 + $0x34] sm:$0xf] %v205_v13  ;;  %v207_v14 = vld [vmem:[%s860_s28 + $0xa8] sm:$0xf]  ;;  %v209_v15 = vld [vmem:[%s860_s28 + $0xb4] sm:$0xf] }
  0x1f   : > { %208 = vst [vmem:[%s161_s29 + $0x38] sm:$0xf] %v207_v14  ;;  %210 = vst [vmem:[%s161_s29 + $0x3c] sm:$0xf] %v209_v15 }
  0x20 PF: > { %p635_p8 = scmp.ge.s32.totalorder %s790_s16, 1  ;;  %p270_p9 = scmp.lt.s32.totalorder %s790_s16, 4 }
  0x22   : > { %p271_p10 = pnand %p635_p8, %p270_p9 }
  0x23   : > { %s277_s30 = sand.u32 (!%p271_p10), 1, %s774_s12   ;;  %v750_v16 = vld [vmem:[%s917_s0] sm:$0xff] (!%p271_p10)   ;;  %v751_v25 = vld [vmem:[%s917_s0 + $0x8] sm:$0xff] (!%p271_p10)   ;;  %p313_p11 = scmp.lt.s32.totalorder (!%p271_p10), %s782_s14, 2 }
  0x24   : > { %274 = sbr.rel (%p271_p10) target bundleno = 300 (0x12c), region = 69  ;;  %s636_s6 = sshll.u32 (!%p271_p10), %s277_s30, 6  ;;  %698 = vmatprep.mubr.bf16.mxu0 (!%p271_p10), %v750_v16 }
  0x25   : > { %s279_s7 = scalar_lea.vmem (!%p271_p10), [#allocation2], %s636_s6  ;;  %s637_s20 = sshll.u32 (!%p271_p10), %s277_s30, 4 }
  0x26   : > { %v742_v17 = vld [vmem:[%s279_s7] sm:$0xff] (!%p271_p10)   ;;  %v743_v18 = vld [vmem:[%s279_s7 + $0x8] sm:$0xff] (!%p271_p10)   ;;  %v744_v19 = vld [vmem:[%s279_s7 + $0x10] sm:$0xff] (!%p271_p10)   ;;  %s306_s23 = scalar_lea.vmem (!%p271_p10), [#allocation3], %s637_s20 }
  0x27   : > { %682 = vmatprep.subr.bf16.mxu0 (!%p271_p10), %v742_v17  ;;  %v745_v20 = vld [vmem:[%s279_s7 + $0x18] sm:$0xff] (!%p271_p10)   ;;  %v746_v21 = vld [vmem:[%s279_s7 + $0x20] sm:$0xff] (!%p271_p10)   ;;  %v747_v22 = vld [vmem:[%s279_s7 + $0x28] sm:$0xff] (!%p271_p10)  }
  0x28   : > { %683 = vmatpush3.bf16.msra.mxu0 (!%p271_p10), %v742_v17  ;;  %v748_v23 = vld [vmem:[%s279_s7 + $0x30] sm:$0xff] (!%p271_p10)   ;;  %v749_v24 = vld [vmem:[%s279_s7 + $0x38] sm:$0xff] (!%p271_p10)  }
  0x29   : > { %684 = vmatprep.subr.bf16.mxu0 (!%p271_p10), %v743_v18 }
  0x2b   : > { %s314_s10 = scalar_select %p313_p11, %s782_s14, 2 }
  0x2c   : > { %685 = vmatpush3.bf16.msra.mxu0 %v743_v18  ;;  %s654_s24 = sshll.u32 (%p847_p6), %s782_s14, 2 }
  0x2d   : > { %686 = vmatprep.subr.bf16.mxu0 %v744_v19  ;;  %s315_s19 = scalar_lea.vmem %s919_s2, %s314_s10  ;;  %s485_s26 = scalar_lea.vmem (%p847_p6), %s920_s3, %s654_s24 }
  0x2e   : > { %v638_v27 = vld [vmem:[%s315_s19] ss:$0 sm:$0xff] }
  0x30   : > { %687 = vmatpush3.bf16.msra.mxu0 %v744_v19 }
  0x31   : > { %688 = vmatprep.subr.bf16.mxu0 %v745_v20 }
  0x34   : > { %689 = vmatpush3.bf16.msra.mxu0 %v745_v20 }
  0x35   : > { %690 = vmatprep.subr.bf16.mxu0 %v746_v21 }
  0x38   : > { %691 = vmatpush3.bf16.msra.mxu0 %v746_v21 }
  0x39   : > { %692 = vmatprep.subr.bf16.mxu0 %v747_v22 }
  0x3c   : > { %693 = vmatpush3.bf16.msra.mxu0 %v747_v22 }
  0x3d   : > { %694 = vmatprep.subr.bf16.mxu0 %v748_v23 }
  0x40   : > { %695 = vmatpush3.bf16.msra.mxu0 %v748_v23 }
  0x41   : > { %696 = vmatprep.subr.bf16.mxu0 %v749_v24 }
  0x44   : > { %697 = vmatpush3.bf16.msra.mxu0 %v749_v24 }
  0x47   : > { %699 = vmatmul.mubr.bf16.vlgmr.msra.gmra.mrb[0].mxu0 %v751_v25 }
 0x11a   : > { %v700_v26 = vpop.f32.mrb[0].mxu0 }
 0x11b   : > { %v439_v28 = vpop.f32.mrb[1].mxu0  ;;  %v448_v30 = vadd.f32 %v700_v26, %v638_v27 }
 0x11c   : > { %v701_v29 = vpop.f32.mrb[2].mxu0  ;;  %v440_v33 = vadd.f32 %v638_v27, %v439_v28  ;;  %480 = sbr.rel (!%p847_p6) target bundleno = 300 (0x12c), region = 77 }
 0x11d   : > { %v451_v31 = vadd.f32 %v701_v29, %v638_v27  ;;  %v442_v32 = vpop.f32.mrb[3].mxu0 }
 0x11e   : > { %v443_v34 = vadd.f32 %v638_v27, %v442_v32 }
 0x11f   : > { %v669_v35 = vpack.c.bf16 %v451_v31, %v448_v30 }
 0x120   : > { %v664_v36 = vpack.c.bf16 %v443_v34, %v440_v33 }
 0x121   : > { %671 = vst [vmem:[%s306_s23 + $0x8] sm:$0xff] %v669_v35  }
 0x122   : > { %665 = vst [vmem:[%s306_s23] sm:$0xff] %v664_v36  }
 0x128   : > { %v505_v39 = vld [vmem:[%s306_s23 + $0x8] sm:$0xf]  ;;  %v507_v40 = vld [vmem:[%s306_s23 + $0xc] sm:$0xf] }
 0x129   : > { %v501_v37 = vld [vmem:[%s306_s23] sm:$0xf]  ;;  %v503_v38 = vld [vmem:[%s306_s23 + $0x4] sm:$0xf]  ;;  %506 = vst [vmem:[%s485_s26 + $0x18] sm:$0xf] %v505_v39 }
 0x12a   : > { %502 = vst [vmem:[%s485_s26] sm:$0xf] %v501_v37  ;;  %504 = vst [vmem:[%s485_s26 + $0xc] sm:$0xf] %v503_v38 }
 0x12b   : > { %508 = vst [vmem:[%s485_s26 + $0x24] sm:$0xf] %v507_v40 }
 0x12c PF: > { %s13_s16 = sadd.s32 1, %s790_s16   ;;  %s922_s12 = smov %s778_s13 }
 0x12d   : > { %p10_p12 = scmp.ge.s32.totalorder %s13_s16, 5   ;;  %s923_s13 = smov %s852_s22 }
 0x12e   : > { %s924_s14 = smov %s786_s15  ;;  %s925_s15 = smov %s927_s17 }
 0x12f   :  { %12 = sbr.rel (!%p10_p12) target bundleno = 3 (0x3), region = 155 }

// kernel: encoder_decoder_forward.14
= control target key start
LH: loop header
LB: loop body
LE: loop exit
PB: predicated region body
PF: predicated region fallthrough
CT: control target
= control target key end

     0   :  { %vm60_vm0 = vcmask 392192   ;;  %s231_s1 = inlined_call_operand.vmem [shape: bf16[48,128], index: 1, kind: input, shape index: {}]   ;;  %s232_s0 = inlined_call_operand.vmem [shape: bf16[32,48], index: 0, kind: input, shape index: {}]   ;;  %s233_s2 = inlined_call_operand.vmem [shape: f32[1,128], index: 2, kind: input, shape index: {}]   ;;  %s234_s3 = inlined_call_operand.vmem [shape: bf16[32,128], index: 3, kind: output, shape index: {}]  }
   0x1   :  { %v182_v0 = vld [vmem:[%s231_s1] sm:$0xff]   ;;  %v183_v1 = vld [vmem:[%s231_s1 + $0x8] sm:$0xff]   ;;  %v184_v3 = vld [vmem:[%s231_s1 + $0x10] sm:$0xff]  }
   0x2   :  { %172 = vmatprep.subr.bf16.mxu0 %v182_v0  ;;  %v185_v2 = vld [vmem:[%s232_s0] sm:$0xff]   ;;  %v186_v4 = vld [vmem:[%s232_s0 + $0x8] sm:$0xff]  }
   0x3   :  { %173 = vmatpush3.bf16.msra.mxu0 %v182_v0  ;;  %178 = vmatprep.mubr.msk.bf16.mxu0 %vm60_vm0, %v185_v2  ;;  %v140_v6 = vld [vmem:[%s233_s2] ss:$0 sm:$0xff] }
   0x4   :  { %174 = vmatprep.subr.bf16.mxu0 %v183_v1 }
   0x7   :  { %175 = vmatpush3.bf16.msra.mxu0 %v183_v1 }
   0x8   :  { %176 = vmatprep.subr.bf16.mxu0 %v184_v3 }
   0xb   :  { %177 = vmatpush3.bf16.msra.mxu0 %v184_v3 }
   0xe   :  { %179 = vmatmul.mubr.msk.bf16.vlgmr.msra.gmra.mrb[0].mxu0 %vm60_vm0, %v186_v4 }
  0xe1   :  { %v180_v5 = vpop.f32.mrb[0].mxu0 }
  0xe2   :  { %v101_v7 = vpop.f32.mrb[1].mxu0  ;;  %v110_v9 = vadd.f32 %v180_v5, %v140_v6 }
  0xe3   :  { %v181_v8 = vpop.f32.mrb[2].mxu0  ;;  %v102_v12 = vadd.f32 %v140_v6, %v101_v7 }
  0xe4   :  { %v113_v10 = vadd.f32 %v181_v8, %v140_v6  ;;  %v104_v11 = vpop.f32.mrb[3].mxu0 }
  0xe5   :  { %v105_v13 = vadd.f32 %v140_v6, %v104_v11 }
  0xe6   :  { %v164_v14 = vpack.c.bf16 %v113_v10, %v110_v9 }
  0xe7   :  { %v159_v15 = vpack.c.bf16 %v105_v13, %v102_v12 }
  0xe8   :  { %166 = vst [vmem:[%s234_s3 + $0x8] sm:$0xff] %v164_v14  }
  0xe9   :  { %160 = vst [vmem:[%s234_s3] sm:$0xff] %v159_v15  }

// kernel: encoder_decoder_forward.23
= control target key start
LH: loop header
LB: loop body
LE: loop exit
PB: predicated region body
PF: predicated region fallthrough
CT: control target
= control target key end

     0   :  { %v293_v1 = vmov 0   ;;  %v37_v19 = vlaneseq  ;;  %s383_s1 = inlined_call_operand.vmem [shape: bf16[128,256], index: 1, kind: input, shape index: {}]   ;;  %s384_s0 = inlined_call_operand.vmem [shape: bf16[32,128], index: 0, kind: input, shape index: {}]   ;;  %s385_s2 = inlined_call_operand.vmem [shape: f32[1,256], index: 2, kind: input, shape index: {}]   ;;  %s386_s3 = inlined_call_operand.vmem [shape: bf16[32,256], index: 3, kind: output, shape index: {}]  }
   0x1   :  { %v267_v0 = vld [vmem:[%s383_s1 + $0x4] ss:$8 sps:$4 sm:$0xff]   ;;  %171 = vmatprep.mubr.bf16.mxu0 %v293_v1  ;;  %181 = vmatprep.mubr.bf16.mxu1 %v293_v1  ;;  %v269_v2 = vld [vmem:[%s383_s1] ss:$8 sps:$4 sm:$0xff]   ;;  %v270_v3 = vld [vmem:[%s383_s1 + $0x14] ss:$8 sps:$4 sm:$0xff]  }
   0x2   :  { %139 = vmatprep.subr.bf16.mxu0 %v267_v0  ;;  %250 = vmatprep.subr.bf16.mxu1 %v267_v0  ;;  %v272_v4 = vld [vmem:[%s383_s1 + $0x10] ss:$8 sps:$4 sm:$0xff]   ;;  %v273_v5 = vld [vmem:[%s383_s1 + $0x24] ss:$8 sps:$4 sm:$0xff]   ;;  %v275_v6 = vld [vmem:[%s383_s1 + $0x20] ss:$8 sps:$4 sm:$0xff]  }
   0x3   :  { %140 = vmatpush1.bf16.msra.mxu0 %v269_v2  ;;  %258 = vmatpush1.bf16.msra.mxu1 %v269_v2  ;;  %v276_v7 = vld [vmem:[%s383_s1 + $0x34] ss:$8 sps:$4 sm:$0xff]   ;;  %v278_v8 = vld [vmem:[%s383_s1 + $0x30] ss:$8 sps:$4 sm:$0xff]   ;;  %v279_v9 = vld [vmem:[%s383_s1 + $0x44] ss:$8 sps:$4 sm:$0xff]  }
   0x4   :  { %141 = vmatprep.subr.bf16.mxu0 %v270_v3  ;;  %251 = vmatprep.subr.bf16.mxu1 %v270_v3  ;;  %v281_v10 = vld [vmem:[%s383_s1 + $0x40] ss:$8 sps:$4 sm:$0xff]   ;;  %v282_v11 = vld [vmem:[%s383_s1 + $0x54] ss:$8 sps:$4 sm:$0xff]   ;;  %v284_v12 = vld [vmem:[%s383_s1 + $0x50] ss:$8 sps:$4 sm:$0xff]  }
   0x5   :  { %v285_v13 = vld [vmem:[%s383_s1 + $0x64] ss:$8 sps:$4 sm:$0xff]   ;;  %v287_v14 = vld [vmem:[%s383_s1 + $0x60] ss:$8 sps:$4 sm:$0xff]   ;;  %v288_v15 = vld [vmem:[%s383_s1 + $0x74] ss:$8 sps:$4 sm:$0xff]  }
   0x6   :  { %v290_v16 = vld [vmem:[%s383_s1 + $0x70] ss:$8 sps:$4 sm:$0xff]   ;;  %v291_v17 = vld [vmem:[%s384_s0] sm:$0xff]   ;;  %v292_v18 = vld [vmem:[%s384_s0 + $0x8] sm:$0xff]   ;;  %v38_v20 = vshrl.u32 %v37_v19, 7 }
   0x7   :  { %142 = vmatpush1.bf16.msra.mxu0 %v272_v4  ;;  %259 = vmatpush1.bf16.msra.mxu1 %v272_v4  ;;  %v35_v22 = vld [vmem:[%s385_s2] sm:$0x3] }
   0x8   :  { %143 = vmatprep.subr.bf16.mxu0 %v273_v5  ;;  %252 = vmatprep.subr.bf16.mxu1 %v273_v5  ;;  %v39_v21 = vsub.s32 0, %v38_v20  ;;  %v43_v23 = vsub.s32 1, %v38_v20 }
   0xa   :  { %v40_v24 = vrot.slane %v35_v22, %v39_v21  ;;  %v44_v25 = vrot.slane %v35_v22, %v43_v23 }
   0xb   :  { %144 = vmatpush1.bf16.msra.mxu0 %v275_v6  ;;  %260 = vmatpush1.bf16.msra.mxu1 %v275_v6 }
   0xc   :  { %145 = vmatprep.subr.bf16.mxu0 %v276_v7  ;;  %253 = vmatprep.subr.bf16.mxu1 %v276_v7 }
   0xf   :  { %146 = vmatpush1.bf16.msra.mxu0 %v278_v8  ;;  %261 = vmatpush1.bf16.msra.mxu1 %v278_v8 }
  0x10   :  { %147 = vmatprep.subr.bf16.mxu0 %v279_v9  ;;  %254 = vmatprep.subr.bf16.mxu1 %v279_v9 }
  0x13   :  { %148 = vmatpush1.bf16.msra.mxu0 %v281_v10  ;;  %262 = vmatpush1.bf16.msra.mxu1 %v281_v10 }
  0x14   :  { %149 = vmatprep.subr.bf16.mxu0 %v282_v11  ;;  %255 = vmatprep.subr.bf16.mxu1 %v282_v11 }
  0x17   :  { %150 = vmatpush1.bf16.msra.mxu0 %v284_v12  ;;  %263 = vmatpush1.bf16.msra.mxu1 %v284_v12 }
  0x18   :  { %151 = vmatprep.subr.bf16.mxu0 %v285_v13  ;;  %256 = vmatprep.subr.bf16.mxu1 %v285_v13 }
  0x1b   :  { %152 = vmatpush1.bf16.msra.mxu0 %v287_v14  ;;  %264 = vmatpush1.bf16.msra.mxu1 %v287_v14 }
  0x1c   :  { %153 = vmatprep.subr.bf16.mxu0 %v288_v15  ;;  %257 = vmatprep.subr.bf16.mxu1 %v288_v15 }
  0x1f   :  { %154 = vmatpush1.bf16.msra.mxu0 %v290_v16  ;;  %265 = vmatpush1.bf16.msra.mxu1 %v290_v16 }
  0x22   :  { %172 = vmatmul.mubr.bf16.vlgmr.msra.gmra.mrb[0].mxu0 %v291_v17  ;;  %182 = vmatmul.mubr.bf16.vlgmr.msra.gmra.mrb[0].mxu1 %v292_v18 }
  0xf5   :  { %v173_v26 = vpop.f32.mrb[0].mxu0  ;;  %v183_v27 = vpop.f32.mrb[0].mxu1 }
  0xf6   :  { %v174_v28 = vadd.f32 %v173_v26, %v40_v24  ;;  %v184_v29 = vadd.f32 %v183_v27, %v40_v24  ;;  %v175_v30 = vpop.f32.mrb[1].mxu0  ;;  %v185_v31 = vpop.f32.mrb[1].mxu1 }
  0xf7   :  { %v176_v32 = vadd.f32 %v175_v30, %v44_v25  ;;  %v186_v33 = vadd.f32 %v185_v31, %v44_v25  ;;  %v177_v34 = vpop.f32.mrb[2].mxu0  ;;  %v187_v35 = vpop.f32.mrb[2].mxu1 }
  0xf8   :  { %v178_v36 = vadd.f32 %v177_v34, %v40_v24  ;;  %v188_v37 = vadd.f32 %v187_v35, %v40_v24  ;;  %v179_v38 = vpop.f32.mrb[3].mxu0  ;;  %v189_v39 = vpop.f32.mrb[3].mxu1 }
  0xf9   :  { %v246_v40 = vpack.c.bf16 %v176_v32, %v174_v28  ;;  %v248_v41 = vpack.c.bf16 %v186_v33, %v184_v29  ;;  %v180_v42 = vadd.f32 %v179_v38, %v44_v25  ;;  %v190_v43 = vadd.f32 %v189_v39, %v44_v25 }
  0xfb   :  { %216 = vst [vmem:[%s386_s3] sm:$0xff] %v246_v40  ;;  %218 = vst [vmem:[%s386_s3 + $0x10] sm:$0xff] %v248_v41  ;;  %v247_v44 = vpack.c.bf16 %v180_v42, %v178_v36  ;;  %v249_v45 = vpack.c.bf16 %v190_v43, %v188_v37 }
  0xfd   :  { %217 = vst [vmem:[%s386_s3 + $0x8] sm:$0xff] %v247_v44  ;;  %219 = vst [vmem:[%s386_s3 + $0x18] sm:$0xff] %v249_v45 }

// kernel: encoder_decoder_forward.17
= control target key start
LH: loop header
LB: loop body
LE: loop exit
PB: predicated region body
PF: predicated region fallthrough
CT: control target
= control target key end

     0   :  { %s438_s2 = inlined_call_operand.vmem [shape: bf16[128,128], index: 2, kind: input, shape index: {}]   ;;  %s439_s0 = inlined_call_operand.vmem [shape: bf16[32,128], index: 0, kind: input, shape index: {}]   ;;  %s440_s1 = inlined_call_operand.vmem [shape: bf16[32,128], index: 1, kind: input, shape index: {}]   ;;  %s441_s3 = inlined_call_operand.vmem [shape: f32[1,128], index: 3, kind: input, shape index: {}]   ;;  %s442_s4 = inlined_call_operand.vmem [shape: f32[1,128], index: 4, kind: input, shape index: {}]   ;;  %s443_s5 = inlined_call_operand.vmem [shape: f32[1,128], index: 5, kind: input, shape index: {}]   ;;  %s444_s6 = inlined_call_operand.vmem [shape: bf16[32,128], index: 6, kind: output, shape index: {}]  }
   0x1   :  { %v334_v0 = vld [vmem:[%s438_s2] sm:$0xff]   ;;  %v335_v1 = vld [vmem:[%s438_s2 + $0x8] sm:$0xff]   ;;  %v336_v2 = vld [vmem:[%s438_s2 + $0x10] sm:$0xff]  }
   0x2   :  { %314 = vmatprep.subr.bf16.mxu0 %v334_v0  ;;  %v337_v3 = vld [vmem:[%s438_s2 + $0x18] sm:$0xff]   ;;  %v342_v4 = vld [vmem:[%s439_s0] sm:$0xff]   ;;  %v339_v6 = vld [vmem:[%s438_s2 + $0x28] sm:$0xff]  }
   0x3   :  { %315 = vmatpush3.bf16.msra.mxu0 %v334_v0  ;;  %330 = vmatprep.mubr.bf16.mxu0 %v342_v4  ;;  %v338_v5 = vld [vmem:[%s438_s2 + $0x20] sm:$0xff]   ;;  %v340_v7 = vld [vmem:[%s438_s2 + $0x30] sm:$0xff]   ;;  %v341_v8 = vld [vmem:[%s438_s2 + $0x38] sm:$0xff]  }
   0x4   :  { %316 = vmatprep.subr.bf16.mxu0 %v335_v1  ;;  %v343_v9 = vld [vmem:[%s439_s0 + $0x8] sm:$0xff]   ;;  %v285_v11 = vld [vmem:[%s440_s1] sm:$0xff]  }
   0x5   :  { %v302_v10 = vld [vmem:[%s440_s1 + $0x8] sm:$0xff]   ;;  %v286_v13 = vunpack.c.l.bf16 %v285_v11  ;;  %v287_v16 = vunpack.c.h.bf16 %v285_v11  ;;  %v273_v17 = vld [vmem:[%s441_s3] ss:$0 sm:$0xff] }
   0x6   :  { %v290_v12 = vunpack.c.l.bf16 %v302_v10  ;;  %v291_v14 = vunpack.c.h.bf16 %v302_v10  ;;  %v274_v59 = vld [vmem:[%s442_s4] ss:$0 sm:$0xff] }
   0x7   :  { %317 = vmatpush3.bf16.msra.mxu0 %v335_v1  ;;  %v275_v0 = vld [vmem:[%s443_s5] ss:$0 sm:$0xff] }
   0x8   :  { %318 = vmatprep.subr.bf16.mxu0 %v336_v2 }
   0xb   :  { %319 = vmatpush3.bf16.msra.mxu0 %v336_v2 }
   0xc   :  { %320 = vmatprep.subr.bf16.mxu0 %v337_v3 }
   0xf   :  { %321 = vmatpush3.bf16.msra.mxu0 %v337_v3 }
  0x10   :  { %322 = vmatprep.subr.bf16.mxu0 %v338_v5 }
  0x13   :  { %323 = vmatpush3.bf16.msra.mxu0 %v338_v5 }
  0x14   :  { %324 = vmatprep.subr.bf16.mxu0 %v339_v6 }
  0x17   :  { %325 = vmatpush3.bf16.msra.mxu0 %v339_v6 }
  0x18   :  { %326 = vmatprep.subr.bf16.mxu0 %v340_v7 }
  0x1b   :  { %327 = vmatpush3.bf16.msra.mxu0 %v340_v7 }
  0x1c   :  { %328 = vmatprep.subr.bf16.mxu0 %v341_v8 }
  0x1f   :  { %329 = vmatpush3.bf16.msra.mxu0 %v341_v8 }
  0x22   :  { %331 = vmatmul.mubr.bf16.vlgmr.msra.gmra.mrb[0].mxu0 %v343_v9 }
  0xf5   :  { %v332_v15 = vpop.f32.mrb[0].mxu0 }
  0xf6   :  { %v155_v18 = vadd.f32 %v332_v15, %v290_v12  ;;  %v146_v19 = vpop.f32.mrb[1].mxu0 }
  0xf7   :  { %v147_v20 = vadd.f32 %v286_v13, %v146_v19  ;;  %v333_v21 = vpop.f32.mrb[2].mxu0 }
  0xf8   :  { %v158_v22 = vadd.f32 %v333_v21, %v291_v14  ;;  %v149_v23 = vpop.f32.mrb[3].mxu0  ;;  %v170_v24 = vadd.f32 %v273_v17, %v155_v18 }
  0xf9   :  { %v150_v25 = vadd.f32 %v287_v16, %v149_v23  ;;  %v168_v26 = vadd.f32 %v273_v17, %v147_v20 }
  0xfa   :  { %176 = vadd.xlane.f32.xlu1 %v170_v24  ;;  %v171_v27 = vadd.f32 %v273_v17, %v158_v22 }
  0xfb   :  { %172 = vadd.xlane.f32.xlu0 %v168_v26  ;;  %v169_v28 = vadd.f32 %v273_v17, %v150_v25 }
  0xfe   :  { %178 = vadd.xlane.f32.xlu1 %v171_v27 }
  0xff   :  { %174 = vadd.xlane.f32.xlu0 %v169_v28 }
 0x187   :  { %v177_v29 = vpop.xlane.xlu1 %176 }
 0x188   :  { %v173_v30 = vpop.xlane.xlu0 %172  ;;  %v183_v31 = vmul.f32 0.0078125, %v177_v29 }
 0x189   :  { %v181_v32 = vmul.f32 0.0078125, %v173_v30 }
 0x18a   :  { %v187_v36 = vsub.f32 %v170_v24, %v183_v31 }
 0x18b   :  { %v185_v33 = vsub.f32 %v168_v26, %v181_v32  ;;  %v179_v34 = vpop.xlane.xlu1 %178 }
 0x18c   :  { %v175_v35 = vpop.xlane.xlu0 %174  ;;  %v184_v37 = vmul.f32 0.0078125, %v179_v34  ;;  %v191_v42 = vmul.f32 %v187_v36, %v187_v36 }
 0x18d   :  { %v182_v38 = vmul.f32 0.0078125, %v175_v35  ;;  %v189_v39 = vmul.f32 %v185_v33, %v185_v33 }
 0x18e   :  { %v188_v41 = vsub.f32 %v171_v27, %v184_v37 }
 0x18f   :  { %v186_v40 = vsub.f32 %v169_v28, %v182_v38  ;;  %193 = vadd.xlane.f32.xlu0 %v189_v39 }
 0x190   :  { %v192_v44 = vmul.f32 %v188_v41, %v188_v41 }
 0x191   :  { %v190_v43 = vmul.f32 %v186_v40, %v186_v40 }
 0x193   :  { %197 = vadd.xlane.f32.xlu0 %v191_v42  ;;  %195 = vadd.xlane.f32.xlu1 %v190_v43 }
 0x197   :  { %199 = vadd.xlane.f32.xlu1 %v192_v44 }
 0x21c   :  { %v194_v45 = vpop.xlane.xlu0 %193 }
 0x21d   :  { %v201_v46 = vmul.f32 0.0078125, %v194_v45 }
 0x21f   :  { %v205_v47 = vadd.f32 1e-05, %v201_v46 }
 0x220   :  { %v196_v48 = vpop.xlane.xlu1 %195  ;;  %v198_v49 = vpop.xlane.xlu0 %197 }
 0x221   :  { %344 = vrsqrt.f32 %v205_v47  ;;  %v202_v50 = vmul.f32 0.0078125, %v196_v48  ;;  %v203_v51 = vmul.f32 0.0078125, %v198_v49 }
 0x223   :  { %v206_v52 = vadd.f32 1e-05, %v202_v50  ;;  %v207_v53 = vadd.f32 1e-05, %v203_v51 }
 0x224   :  { %v200_v54 = vpop.xlane.xlu1 %199 }
 0x225   :  { %346 = vrsqrt.f32 %v206_v52  ;;  %v204_v55 = vmul.f32 0.0078125, %v200_v54 }
 0x226   :  { %348 = vrsqrt.f32 %v207_v53 }
 0x227   :  { %v208_v56 = vadd.f32 1e-05, %v204_v55 }
 0x229   :  { %350 = vrsqrt.f32 %v208_v56 }
 0x22b   :  { %v345_v57 = vpop.eup %344 }
 0x22c   :  { %v213_v58 = vmul.f32 %v345_v57, %v185_v33 }
 0x22e   :  { %v224_v62 = vmul.f32 %v274_v59, %v213_v58 }
 0x22f   :  { %v347_v60 = vpop.eup %346 }
 0x230   :  { %v349_v61 = vpop.eup %348  ;;  %v214_v63 = vmul.f32 %v347_v60, %v186_v40  ;;  %v235_v4 = vadd.f32 %v275_v0, %v224_v62 }
 0x231   :  { %v215_v1 = vmul.f32 %v349_v61, %v187_v36 }
 0x232   :  { %v225_v2 = vmul.f32 %v274_v59, %v214_v63 }
 0x233   :  { %v351_v3 = vpop.eup %350  ;;  %v226_v6 = vmul.f32 %v274_v59, %v215_v1 }
 0x234   :  { %v236_v5 = vadd.f32 %v275_v0, %v225_v2  ;;  %v216_v7 = vmul.f32 %v351_v3, %v188_v41 }
 0x235   :  { %v237_v10 = vadd.f32 %v275_v0, %v226_v6 }
 0x236   :  { %v295_v8 = vpack.c.bf16 %v236_v5, %v235_v4  ;;  %v227_v9 = vmul.f32 %v274_v59, %v216_v7 }
 0x238   :  { %296 = vst [vmem:[%s444_s6] sm:$0xff] %v295_v8   ;;  %v238_v11 = vadd.f32 %v275_v0, %v227_v9 }
 0x23a   :  { %v300_v12 = vpack.c.bf16 %v238_v11, %v237_v10 }
 0x23c   :  { %303 = vst [vmem:[%s444_s6 + $0x8] sm:$0xff] %v300_v12  }

// kernel: encoder_decoder_forward.18
= control target key start
LH: loop header
LB: loop body
LE: loop exit
PB: predicated region body
PF: predicated region fallthrough
CT: control target
= control target key end

     0   :  { %v663_v1 = vmov 0   ;;  %v72_v35 = vlaneseq  ;;  %s834_s1 = inlined_call_operand.vmem [shape: bf16[128,256], index: 1, kind: input, shape index: {}]   ;;  %s835_s3 = inlined_call_operand.vmem [shape: bf16[256,128], index: 3, kind: input, shape index: {}]   ;;  %s836_s0 = inlined_call_operand.vmem [shape: bf16[32,128], index: 0, kind: input, shape index: {}]   ;;  %s837_s2 = inlined_call_operand.vmem [shape: f32[1,256], index: 2, kind: input, shape index: {}]   ;;  %s838_s4 = inlined_call_operand.vmem [shape: f32[1,128], index: 4, kind: input, shape index: {}]   ;;  %s839_s5 = inlined_call_operand.vmem [shape: f32[1,128], index: 5, kind: input, shape index: {}]   ;;  %s840_s6 = inlined_call_operand.vmem [shape: f32[1,128], index: 6, kind: input, shape index: {}]   ;;  %s841_s7 = inlined_call_operand.vmem [shape: bf16[32,128], index: 7, kind: output, shape index: {}]  }
   0x1   :  { %v611_v0 = vld [vmem:[%s834_s1 + $0x4] ss:$8 sps:$4 sm:$0xff]   ;;  %206 = vmatprep.mubr.bf16.mxu0 %v663_v1  ;;  %v613_v2 = vld [vmem:[%s834_s1] ss:$8 sps:$4 sm:$0xff]   ;;  %v614_v3 = vld [vmem:[%s834_s1 + $0x14] ss:$8 sps:$4 sm:$0xff]  }
   0x2   :  { %174 = vmatprep.subr.bf16.mxu0 %v611_v0  ;;  %v616_v4 = vld [vmem:[%s834_s1 + $0x10] ss:$8 sps:$4 sm:$0xff]   ;;  %v617_v5 = vld [vmem:[%s834_s1 + $0x24] ss:$8 sps:$4 sm:$0xff]   ;;  %v619_v6 = vld [vmem:[%s834_s1 + $0x20] ss:$8 sps:$4 sm:$0xff]  }
   0x3   :  { %175 = vmatpush1.bf16.msra.mxu0 %v613_v2  ;;  %v620_v7 = vld [vmem:[%s834_s1 + $0x34] ss:$8 sps:$4 sm:$0xff]   ;;  %v622_v8 = vld [vmem:[%s834_s1 + $0x30] ss:$8 sps:$4 sm:$0xff]   ;;  %v623_v9 = vld [vmem:[%s834_s1 + $0x44] ss:$8 sps:$4 sm:$0xff]  }
   0x4   :  { %176 = vmatprep.subr.bf16.mxu0 %v614_v3  ;;  %v637_v10 = vld [vmem:[%s835_s3 + $0x40] sm:$0xff]   ;;  %v626_v13 = vld [vmem:[%s834_s1 + $0x54] ss:$8 sps:$4 sm:$0xff]   ;;  %v639_v14 = vld [vmem:[%s835_s3 + $0x48] sm:$0xff]   ;;  %v73_v36 = vshrl.u32 %v72_v35, 7 }
   0x5   :  { %v625_v11 = vld [vmem:[%s834_s1 + $0x40] ss:$8 sps:$4 sm:$0xff]   ;;  %582 = vmatprep.subr.bf16.mxu1 %v637_v10  ;;  %v641_v16 = vld [vmem:[%s835_s3 + $0x50] sm:$0xff]   ;;  %v629_v18 = vld [vmem:[%s834_s1 + $0x64] ss:$8 sps:$4 sm:$0xff]  }
   0x6   :  { %v638_v12 = vld [vmem:[%s835_s3] sm:$0xff]   ;;  %v640_v15 = vld [vmem:[%s835_s3 + $0x8] sm:$0xff]   ;;  %v628_v17 = vld [vmem:[%s834_s1 + $0x50] ss:$8 sps:$4 sm:$0xff]   ;;  %v74_v37 = vsub.s32 0, %v73_v36  ;;  %v78_v39 = vsub.s32 1, %v73_v36 }
   0x7   :  { %177 = vmatpush1.bf16.msra.mxu0 %v616_v4  ;;  %583 = vmatpush3.bf16.msra.mxu1 %v638_v12  ;;  %v642_v19 = vld [vmem:[%s835_s3 + $0x10] sm:$0xff]   ;;  %v643_v20 = vld [vmem:[%s835_s3 + $0x58] sm:$0xff]   ;;  %v631_v21 = vld [vmem:[%s834_s1 + $0x60] ss:$8 sps:$4 sm:$0xff]  }
   0x8   :  { %178 = vmatprep.subr.bf16.mxu0 %v617_v5  ;;  %584 = vmatprep.subr.bf16.mxu1 %v639_v14  ;;  %v632_v22 = vld [vmem:[%s834_s1 + $0x74] ss:$8 sps:$4 sm:$0xff]   ;;  %v645_v24 = vld [vmem:[%s835_s3 + $0x60] sm:$0xff]   ;;  %v634_v25 = vld [vmem:[%s834_s1 + $0x70] ss:$8 sps:$4 sm:$0xff]  }
   0x9   :  { %v644_v23 = vld [vmem:[%s835_s3 + $0x18] sm:$0xff]   ;;  %v782_v26 = vld [vmem:[%s836_s0] sm:$0xff]   ;;  %v647_v28 = vld [vmem:[%s835_s3 + $0x68] sm:$0xff]  }
   0xa   :  { %v646_v27 = vld [vmem:[%s835_s3 + $0x20] sm:$0xff]   ;;  %v794_v29 = vld [vmem:[%s836_s0 + $0x8] sm:$0xff]   ;;  %v649_v31 = vld [vmem:[%s835_s3 + $0x70] sm:$0xff]   ;;  %v36_v10 = vunpack.c.h.bf16 %v782_v26 }
   0xb   :  { %179 = vmatpush1.bf16.msra.mxu0 %v619_v6  ;;  %585 = vmatpush3.bf16.msra.mxu1 %v640_v15  ;;  %v648_v30 = vld [vmem:[%s835_s3 + $0x28] sm:$0xff]   ;;  %v650_v32 = vld [vmem:[%s835_s3 + $0x30] sm:$0xff]   ;;  %v651_v33 = vld [vmem:[%s835_s3 + $0x78] sm:$0xff]   ;;  %v35_v6 = vunpack.c.l.bf16 %v782_v26 }
   0xc   :  { %180 = vmatprep.subr.bf16.mxu0 %v620_v7  ;;  %586 = vmatprep.subr.bf16.mxu1 %v641_v16  ;;  %v652_v34 = vld [vmem:[%s835_s3 + $0x38] sm:$0xff]   ;;  %v70_v38 = vld [vmem:[%s837_s2] sm:$0x3] }
   0xd   :  { %v75_v40 = vrot.slane %v70_v38, %v74_v37  ;;  %v79_v41 = vrot.slane %v70_v38, %v78_v39  ;;  %v526_v7 = vld [vmem:[%s838_s4] ss:$0 sm:$0xff] }
   0xf   :  { %181 = vmatpush1.bf16.msra.mxu0 %v622_v8  ;;  %587 = vmatpush3.bf16.msra.mxu1 %v642_v19 }
  0x10   :  { %182 = vmatprep.subr.bf16.mxu0 %v623_v9  ;;  %588 = vmatprep.subr.bf16.mxu1 %v643_v20  ;;  %v46_v9 = vadd.f32 %v526_v7, %v35_v6 }
  0x13   :  { %183 = vmatpush1.bf16.msra.mxu0 %v625_v11  ;;  %589 = vmatpush3.bf16.msra.mxu1 %v644_v23 }
  0x14   :  { %184 = vmatprep.subr.bf16.mxu0 %v626_v13  ;;  %590 = vmatprep.subr.bf16.mxu1 %v645_v24 }
  0x17   :  { %185 = vmatpush1.bf16.msra.mxu0 %v628_v17  ;;  %591 = vmatpush3.bf16.msra.mxu1 %v646_v27  ;;  %v47_v17 = vadd.f32 %v526_v7, %v36_v10 }
  0x18   :  { %186 = vmatprep.subr.bf16.mxu0 %v629_v18  ;;  %592 = vmatprep.subr.bf16.mxu1 %v647_v28  ;;  %v37_v18 = vunpack.c.l.bf16 %v794_v29 }
  0x1b   :  { %187 = vmatpush1.bf16.msra.mxu0 %v631_v21  ;;  %593 = vmatpush3.bf16.msra.mxu1 %v648_v30  ;;  %v48_v21 = vadd.f32 %v526_v7, %v37_v18 }
  0x1c   :  { %188 = vmatprep.subr.bf16.mxu0 %v632_v22  ;;  %594 = vmatprep.subr.bf16.mxu1 %v649_v31  ;;  %v38_v22 = vunpack.c.h.bf16 %v794_v29 }
  0x1e   :  { %v49_v30 = vadd.f32 %v526_v7, %v38_v22 }
  0x1f   :  { %189 = vmatpush1.bf16.msra.mxu0 %v634_v25  ;;  %595 = vmatpush3.bf16.msra.mxu1 %v650_v32 }
  0x20   :  { %596 = vmatprep.subr.bf16.mxu1 %v651_v33 }
  0x22   :  { %207 = vmatmul.mubr.bf16.vlgmr.msra.gmra.mrb[0].mxu0 %v782_v26 }
  0x23   :  { %216 = vmatprep.mubr.bf16.mxu0 %v663_v1  ;;  %597 = vmatpush3.bf16.msra.mxu1 %v652_v34 }
  0x2a   :  { %217 = vmatmul.mubr.bf16.gmra.mrb[4].mxu0 %v794_v29 }
  0xf5   :  { %v208_v42 = vpop.f32.mrb[0].mxu0 }
  0xf6   :  { %v209_v43 = vadd.f32 %v208_v42, %v75_v40  ;;  %v210_v44 = vpop.f32.mrb[1].mxu0 }
  0xf7   :  { %v211_v45 = vadd.f32 %v210_v44, %v79_v41  ;;  %v212_v46 = vpop.f32.mrb[2].mxu0 }
  0xf8   :  { %v213_v47 = vadd.f32 %v212_v46, %v75_v40  ;;  %v214_v48 = vpop.f32.mrb[3].mxu0  ;;  %v227_v50 = vmax.f32 %v209_v43, 0.0 }
  0xf9   :  { %v215_v49 = vadd.f32 %v214_v48, %v79_v41  ;;  %v228_v52 = vmax.f32 %v211_v45, 0.0 }
  0xfa   :  { %v229_v51 = vmax.f32 %v213_v47, 0.0 }
  0xfb   :  { %v230_v53 = vmax.f32 %v215_v49, 0.0 }
  0xfc   :  { %v239_v54 = vpack.c.bf16 %v229_v51, %v227_v50 }
  0xfd   :  { %v218_v55 = vpop.f32.mrb[4].mxu0  ;;  %v240_v56 = vpack.c.bf16 %v230_v53, %v228_v52 }
  0xfe   :  { %v219_v57 = vadd.f32 %v218_v55, %v75_v40  ;;  %v220_v58 = vpop.f32.mrb[5].mxu0 }
  0xff   :  { %v221_v59 = vadd.f32 %v220_v58, %v79_v41  ;;  %v222_v60 = vpop.f32.mrb[6].mxu0  ;;  %403 = vmatprep.mubr.bf16.mxu1 %v240_v56 }
 0x100   :  { %v223_v61 = vadd.f32 %v222_v60, %v75_v40  ;;  %v224_v62 = vpop.f32.mrb[7].mxu0  ;;  %404 = vmatmul.mubr.bf16.vlgmr.msra.gmra.mrb[0].mxu1 %v239_v54  ;;  %v231_v0 = vmax.f32 %v219_v57, 0.0 }
 0x101   :  { %v225_v63 = vadd.f32 %v224_v62, %v79_v41  ;;  %v232_v2 = vmax.f32 %v221_v59, 0.0 }
 0x102   :  { %v233_v1 = vmax.f32 %v223_v61, 0.0  ;;  %v561_v61 = vld [vmem:[%s839_s5] ss:$0 sm:$0xff] }
 0x103   :  { %v234_v3 = vmax.f32 %v225_v63, 0.0 }
 0x104   :  { %v241_v4 = vpack.c.bf16 %v233_v1, %v231_v0  ;;  %v562_v1 = vld [vmem:[%s840_s6] ss:$0 sm:$0xff] }
 0x105   :  { %v242_v5 = vpack.c.bf16 %v234_v3, %v232_v2 }
 0x107   :  { %411 = vmatprep.mubr.bf16.mxu1 %v242_v5 }
 0x108   :  { %412 = vmatmul.mubr.bf16.gmra.mrb[4].mxu1 %v241_v4 }
 0x1d3   :  { %v598_v8 = vpop.f32.mrb[0].mxu1 }
 0x1d4   :  { %v599_v11 = vpop.f32.mrb[1].mxu1 }
 0x1d5   :  { %v600_v12 = vadd.f32 %v599_v11, %v598_v8  ;;  %v601_v13 = vpop.f32.mrb[2].mxu1 }
 0x1d6   :  { %v602_v14 = vpop.f32.mrb[3].mxu1 }
 0x1d7   :  { %v603_v15 = vadd.f32 %v602_v14, %v601_v13  ;;  %v420_v16 = vadd.f32 %v600_v12, %v46_v9 }
 0x1d9   :  { %435 = vadd.xlane.f32.xlu0 %v420_v16  ;;  %v421_v20 = vadd.f32 %v603_v15, %v47_v17 }
 0x1db   :  { %v604_v19 = vpop.f32.mrb[4].mxu1 }
 0x1dc   :  { %v605_v23 = vpop.f32.mrb[5].mxu1 }
 0x1dd   :  { %v606_v24 = vadd.f32 %v605_v23, %v604_v19  ;;  %v607_v25 = vpop.f32.mrb[6].mxu1  ;;  %437 = vadd.xlane.f32.xlu0 %v421_v20 }
 0x1de   :  { %v608_v26 = vpop.f32.mrb[7].mxu1 }
 0x1df   :  { %v609_v27 = vadd.f32 %v608_v26, %v607_v25  ;;  %v422_v28 = vadd.f32 %v606_v24, %v48_v21 }
 0x1e1   :  { %439 = vadd.xlane.f32.xlu1 %v422_v28  ;;  %v423_v31 = vadd.f32 %v609_v27, %v49_v30 }
 0x1e5   :  { %441 = vadd.xlane.f32.xlu1 %v423_v31 }
 0x266   :  { %v436_v32 = vpop.xlane.xlu0 %435 }
 0x267   :  { %v444_v33 = vmul.f32 0.0078125, %v436_v32 }
 0x269   :  { %v448_v34 = vsub.f32 %v420_v16, %v444_v33 }
 0x26a   :  { %v438_v35 = vpop.xlane.xlu0 %437 }
 0x26b   :  { %v445_v36 = vmul.f32 0.0078125, %v438_v35  ;;  %v452_v37 = vmul.f32 %v448_v34, %v448_v34 }
 0x26d   :  { %v449_v38 = vsub.f32 %v421_v20, %v445_v36  ;;  %456 = vadd.xlane.f32.xlu0 %v452_v37 }
 0x26e   :  { %v440_v29 = vpop.xlane.xlu1 %439 }
 0x26f   :  { %v446_v39 = vmul.f32 0.0078125, %v440_v29  ;;  %v453_v40 = vmul.f32 %v449_v38, %v449_v38 }
 0x271   :  { %v450_v41 = vsub.f32 %v422_v28, %v446_v39  ;;  %458 = vadd.xlane.f32.xlu1 %v453_v40 }
 0x272   :  { %v442_v42 = vpop.xlane.xlu1 %441 }
 0x273   :  { %v447_v43 = vmul.f32 0.0078125, %v442_v42  ;;  %v454_v44 = vmul.f32 %v450_v41, %v450_v41 }
 0x275   :  { %v451_v45 = vsub.f32 %v423_v31, %v447_v43  ;;  %460 = vadd.xlane.f32.xlu0 %v454_v44 }
 0x277   :  { %v455_v46 = vmul.f32 %v451_v45, %v451_v45 }
 0x279   :  { %462 = vadd.xlane.f32.xlu1 %v455_v46 }
 0x2fa   :  { %v457_v47 = vpop.xlane.xlu0 %456 }
 0x2fb   :  { %v464_v48 = vmul.f32 0.0078125, %v457_v47 }
 0x2fd   :  { %v468_v49 = vadd.f32 1e-05, %v464_v48 }
 0x2fe   :  { %v459_v50 = vpop.xlane.xlu1 %458 }
 0x2ff   :  { %655 = vrsqrt.f32 %v468_v49  ;;  %v465_v51 = vmul.f32 0.0078125, %v459_v50 }
 0x301   :  { %v469_v52 = vadd.f32 1e-05, %v465_v51 }
 0x302   :  { %v461_v53 = vpop.xlane.xlu0 %460 }
 0x303   :  { %657 = vrsqrt.f32 %v469_v52  ;;  %v466_v54 = vmul.f32 0.0078125, %v461_v53 }
 0x305   :  { %v470_v55 = vadd.f32 1e-05, %v466_v54 }
 0x306   :  { %v463_v56 = vpop.xlane.xlu1 %462 }
 0x307   :  { %659 = vrsqrt.f32 %v470_v55  ;;  %v467_v57 = vmul.f32 0.0078125, %v463_v56 }
 0x309   :  { %v656_v58 = vpop.eup %655  ;;  %v471_v59 = vadd.f32 1e-05, %v467_v57 }
 0x30a   :  { %v476_v60 = vmul.f32 %v656_v58, %v448_v34 }
 0x30b   :  { %661 = vrsqrt.f32 %v471_v59 }
 0x30c   :  { %v487_v63 = vmul.f32 %v561_v61, %v476_v60 }
 0x30d   :  { %v658_v62 = vpop.eup %657 }
 0x30e   :  { %v477_v0 = vmul.f32 %v658_v62, %v449_v38  ;;  %v498_v4 = vadd.f32 %v562_v1, %v487_v63 }
 0x310   :  { %v488_v2 = vmul.f32 %v561_v61, %v477_v0 }
 0x311   :  { %v660_v3 = vpop.eup %659 }
 0x312   :  { %v499_v5 = vadd.f32 %v562_v1, %v488_v2  ;;  %v478_v6 = vmul.f32 %v660_v3, %v450_v41 }
 0x314   :  { %v574_v7 = vpack.c.bf16 %v499_v5, %v498_v4  ;;  %v489_v9 = vmul.f32 %v561_v61, %v478_v6 }
 0x315   :  { %v662_v8 = vpop.eup %661 }
 0x316   :  { %575 = vst [vmem:[%s841_s7] sm:$0xff] %v574_v7   ;;  %v479_v10 = vmul.f32 %v662_v8, %v451_v45  ;;  %v500_v12 = vadd.f32 %v562_v1, %v489_v9 }
 0x318   :  { %v490_v11 = vmul.f32 %v561_v61, %v479_v10 }
 0x31a   :  { %v501_v13 = vadd.f32 %v562_v1, %v490_v11 }
 0x31c   :  { %v579_v14 = vpack.c.bf16 %v501_v13, %v500_v12 }
 0x31e   :  { %581 = vst [vmem:[%s841_s7 + $0x8] sm:$0xff] %v579_v14  }

// kernel: encoder_decoder_forward.16
= control target key start
LH: loop header
LB: loop body
LE: loop exit
PB: predicated region body
PF: predicated region fallthrough
CT: control target
= control target key end

     0   :  { %s1669_s12 = smov 0   ;;  %s1671_s13 = smov 0   ;;  %s1998_s0 = inlined_call_operand.vmem [shape: bf16[2,16,384], index: 0, kind: input, shape index: {}, may-alias: {0,1,2}]   ;;  %s1999_s1 = inlined_call_operand.vmem [shape: bf16[2,16,384], index: 1, kind: input, shape index: {}, may-alias: {0,1,2}]   ;;  %s2000_s2 = inlined_call_operand.vmem [shape: bf16[2,16,384], index: 2, kind: input, shape index: {}, may-alias: {0,1,2}]   ;;  %s2001_s3 = inlined_call_operand.vmem [shape: bf16[2,16,128], index: 3, kind: output, shape index: {}]  }
   0x1   :  { %s1673_s14 = smov 0   ;;  %s1675_s15 = smov 0  }
   0x2   :  { %s1677_s16 = smov 0  }
   0x3 LB: > { %s32_s17 = sadd.s32 1, %s1636_s15  ;;  %p48_p1 = scmp.ne.s32.totalorder %s1628_s13, %s1624_s12  ;;  %s1640_s16 = sphi %s1677_s16, %s13_s16   ;;  %s1636_s15 = sphi %s1675_s15, %s2006_s15   ;;  %s1632_s14 = sphi %s1673_s14, %s2005_s14   ;;  %s1628_s13 = sphi %s1671_s13, %s2004_s13   ;;  %s1624_s12 = sphi %s1669_s12, %s2003_s12  }
   0x4   : > { %p34_p0 = scmp.ge.s32.totalorder %s32_s17, 2  ;;  %p49_p2 = scmp.eq.s32.totalorder %s1640_s16, 0 }
   0x5   : > { %s41_s20 = sadd.s32 1, %s1628_s13  ;;  %p1382_p5 = scmp.ge.s32.totalorder %s1640_s16, 2 }
   0x6   : > { %s2008_s17 = smov (%p34_p0, %s32_s17), 0  ;;  %p1700_p3 = por %p49_p2, %p48_p1 }
   0x7   : > { %s36_s19 = ssub.s32 %s1636_s15, %s2008_s17  ;;  %158 = sbr.rel (%p1382_p5) target bundleno = 35 (0x23), region = 16 }
   0x8   : > { %p39_p4 = scmp.eq.s32.totalorder %s36_s19, 0 }
   0xa   : > { %s1708_s21 = scalar_select %p39_p4, %s1628_s13, %s41_s20  }
   0xe   : > { %161 = sbr.rel (!%p1700_p3) target bundleno = 21 (0x15), region = 20  ;;  %s163_s22 = sand.u32 (%p1700_p3), 1, %s1628_s13  }
   0xf   : > { %s1486_s23 = smul.u32 (%p1700_p3), 24, %s1636_s15  ;;  %s1383_s24 = sshll.u32 (%p1700_p3), %s163_s22, 3 }
  0x10   : > { %s165_s28 = scalar_lea.vmem (%p1700_p3), [#allocation5], %s1383_s24 }
  0x11   : > { %s171_s27 = scalar_lea.vmem (%p1700_p3), %s1998_s0, %s1486_s23 }
  0x12   : > { %v187_v0 = vld [vmem:[%s171_s27] sm:$0xf] (%p1700_p3)  ;;  %v189_v1 = vld [vmem:[%s171_s27 + $0xc] sm:$0xf] (%p1700_p3) }
  0x13   : > { %188 = vst [vmem:[%s165_s28] sm:$0xf] (%p1700_p3), %v187_v0  ;;  %190 = vst [vmem:[%s165_s28 + $0x4] sm:$0xf] (%p1700_p3), %v189_v1 }
  0x15 PF: > { %217 = sbr.rel (!%p1700_p3) target bundleno = 28 (0x1c), region = 61  ;;  %s219_s29 = sand.u32 (%p1700_p3), 1, %s1628_s13  }
  0x16   : > { %s1386_s30 = smul.u32 (%p1700_p3), 24, %s1636_s15  ;;  %s1385_s4 = sshll.u32 (%p1700_p3), %s219_s29, 3 }
  0x17   : > { %s221_s8 = scalar_lea.vmem (%p1700_p3), [#allocation6], %s1385_s4 }
  0x18   : > { %s1285_s7 = scalar_lea.vmem (%p1700_p3), %s1999_s1, %s1386_s30 }
  0x19   : > { %v1387_v2 = vld [vmem:[%s1285_s7 + $0x4] sm:$0xf] (%p1700_p3)  ;;  %v1388_v3 = vld [vmem:[%s1285_s7 + $0x10] sm:$0xf] (%p1700_p3) }
  0x1a   : > { %245 = vst [vmem:[%s221_s8] sm:$0xf] (%p1700_p3), %v1387_v2  ;;  %247 = vst [vmem:[%s221_s8 + $0x4] sm:$0xf] (%p1700_p3), %v1388_v3 }
  0x1c PF: > { %274 = sbr.rel (!%p1700_p3) target bundleno = 35 (0x23), region = 102  ;;  %s276_s9 = sand.u32 (%p1700_p3), 1, %s1628_s13  }
  0x1d   : > { %s1390_s10 = smul.u32 (%p1700_p3), 24, %s1636_s15  ;;  %s1389_s11 = sshll.u32 (%p1700_p3), %s276_s9, 3 }
  0x1e   : > { %s278_s23 = scalar_lea.vmem (%p1700_p3), [#allocation7], %s1389_s11 }
  0x1f   : > { %s1293_s22 = scalar_lea.vmem (%p1700_p3), %s2000_s2, %s1390_s10 }
  0x20   : > { %v1391_v4 = vld [vmem:[%s1293_s22 + $0x8] sm:$0xf] (%p1700_p3)  ;;  %v1392_v5 = vld [vmem:[%s1293_s22 + $0x14] sm:$0xf] (%p1700_p3) }
  0x21   : > { %302 = vst [vmem:[%s278_s23] sm:$0xf] (%p1700_p3), %v1391_v4  ;;  %304 = vst [vmem:[%s278_s23 + $0x4] sm:$0xf] (%p1700_p3), %v1392_v5 }
  0x23 PF: > { %p1393_p6 = scmp.ge.s32.totalorder %s1640_s16, 1  ;;  %p330_p7 = scmp.lt.s32.totalorder %s1640_s16, 3 }
  0x25   : > { %p331_p8 = pnand %p1393_p6, %p330_p7 }
  0x26   : > { %s337_s18 = sand.u32 (!%p331_p8), 1, %s1624_s12   ;;  %vm421_vm0 = vcmask (!%p331_p8), 261120   ;;  %v1642_v6 = vmov (!%p331_p8), 0.0   ;;  %vm1643_vm1 = vmmov (!%p331_p8), 0   ;;  %vm404_vm2 = vcmask (!%p331_p8), 7168   ;;  %s1646_s26 = smov (!%p331_p8), 96  }
  0x27   : > { %334 = sbr.rel (%p331_p8) target bundleno = 1505 (0x5e1), region = 143  ;;  %1438 = vmatprep.subr.bf16.mxu0 (!%p331_p8), %v1642_v6  ;;  %s1736_s24 = sshll.u32 (!%p331_p8), %s337_s18, 3  ;;  %422 = vst.msk [vmem:[#allocation4] sm:$0xff] (!%p331_p8), %vm421_vm0, %v1642_v6  ;;  %423 = vst.msk [vmem:[#allocation4 + $0x8] sm:$0xff] (!%p331_p8), %vm421_vm0, %v1642_v6  ;;  %1440 = vmatprep.mubr.msk.bf16.mxu0 (!%p331_p8), %vm1643_vm1, %v1642_v6  ;;  %v1644_v10 = vmov (!%p331_p8), -1e+30  }
  0x28   : > { %424 = vst.msk [vmem:[#allocation4 + $0x10] sm:$0xff] (!%p331_p8), %vm421_vm0, %v1642_v6  ;;  %425 = vst.msk [vmem:[#allocation4 + $0x18] sm:$0xff] (!%p331_p8), %vm421_vm0, %v1642_v6  ;;  %1444 = vmatprep.subr.bf16.mxu1 (!%p331_p8), %v1642_v6  ;;  %1446 = vmatprep.mubr.msk.bf16.mxu1 (!%p331_p8), %vm1643_vm1, %v1642_v6  ;;  %s346_s12 = scalar_lea.vmem (!%p331_p8), [#allocation6], %s1736_s24  ;;  %s339_s25 = scalar_lea.vmem (!%p331_p8), [#allocation5], %s1736_s24  ;;  %vm498_vm3 = vcmask (!%p331_p8), 130048   ;;  %v1645_v19 = vmov (!%p331_p8), 0  }
  0x29   : > { %426 = vst.msk [vmem:[#allocation4 + $0x20] sm:$0xff] (!%p331_p8), %vm421_vm0, %v1642_v6  ;;  %427 = vst.msk [vmem:[#allocation4 + $0x28] sm:$0xff] (!%p331_p8), %vm421_vm0, %v1642_v6  ;;  %v1551_v7 = vld [vmem:[%s346_s12] sm:$0xff] (!%p331_p8)   ;;  %v1552_v9 = vld [vmem:[%s339_s25] sm:$0xff] (!%p331_p8)   ;;  %1534 = vset.pattern.permute.xlu1 (!%p331_p8), %v1645_v19  ;;  %1535 = vset.pattern.permute.xlu0 (!%p331_p8), %v1645_v19  ;;  %s353_s27 = scalar_lea.vmem (!%p331_p8), [#allocation7], %s1736_s24  ;;  %s1647_s28 = smov (!%p331_p8), 64  }
  0x2a   : > { %428 = vst.msk [vmem:[#allocation4 + $0x30] sm:$0xff] (!%p331_p8), %vm421_vm0, %v1642_v6  ;;  %429 = vst.msk [vmem:[#allocation4 + $0x38] sm:$0xff] (!%p331_p8), %vm421_vm0, %v1642_v6  ;;  %v451_v8 = vsel (!%p331_p8), %vm421_vm0, %v1551_v7, 0  ;;  %v1815_v28 = vld [vmem:[%s353_s27] sm:$0xff] (!%p331_p8)   ;;  %s1648_s29 = smov (!%p331_p8), 32   ;;  %p390_p9 = scmp.lt.s32.totalorder (!%p331_p8), %s1632_s14, 1 }
  0x2b   : > { %1439 = vmatpush3.bf16.xpose.msra.mxu0 (!%p331_p8), %v451_v8  ;;  %405 = vst.msk [vmem:[#allocation2] sm:$0xff] (!%p331_p8), %vm404_vm2, %v1644_v10  ;;  %406 = vst.msk [vmem:[#allocation2 + $0x8] sm:$0xff] (!%p331_p8), %vm404_vm2, %v1644_v10  ;;  %1445 = vmatpush3.bf16.msra.mxu1 (!%p331_p8), %v1815_v28  ;;  %vm1226_vm4 = vcmask (!%p331_p8), 523264   ;;  %vm1229_vm5 = vcmask (!%p331_p8), 785408  }
  0x2c   : > { %1456 = vmatprep.subr.bf16.mxu0 (!%p331_p8), %v1642_v6  ;;  %407 = vst.msk [vmem:[#allocation2 + $0x10] sm:$0xff] (!%p331_p8), %vm404_vm2, %v1644_v10  ;;  %408 = vst.msk [vmem:[#allocation2 + $0x18] sm:$0xff] (!%p331_p8), %vm404_vm2, %v1644_v10  ;;  %1450 = vmatprep.subr.bf16.mxu1 (!%p331_p8), %v1642_v6 }
  0x2d   : > { %409 = vst.msk [vmem:[#allocation2 + $0x20] sm:$0xff] (!%p331_p8), %vm404_vm2, %v1644_v10  ;;  %410 = vst.msk [vmem:[#allocation2 + $0x28] sm:$0xff] (!%p331_p8), %vm404_vm2, %v1644_v10 }
  0x2e   : > { %411 = vst.msk [vmem:[#allocation2 + $0x30] sm:$0xff] %vm404_vm2, %v1644_v10  ;;  %412 = vst.msk [vmem:[#allocation2 + $0x38] sm:$0xff] %vm404_vm2, %v1644_v10  ;;  %s2010_s14 = smov (!%p390_p9, %s1632_s14), 1 }
  0x2f   : > { %413 = vst.msk [vmem:[#allocation3] sm:$0xff] %vm404_vm2, %v1642_v6  ;;  %414 = vst.msk [vmem:[#allocation3 + $0x8] sm:$0xff] %vm404_vm2, %v1642_v6  ;;  %s1414_s30 = sshll.u32 %s2010_s14, 3 }
  0x30   : > { %415 = vst.msk [vmem:[#allocation3 + $0x10] sm:$0xff] %vm404_vm2, %v1642_v6  ;;  %416 = vst.msk [vmem:[#allocation3 + $0x18] sm:$0xff] %vm404_vm2, %v1642_v6  ;;  %s397_s6 = scalar_lea.vmem %s2001_s3, %s1414_s30 }
  0x31   : > { %417 = vst.msk [vmem:[#allocation3 + $0x20] sm:$0xff] %vm404_vm2, %v1642_v6  ;;  %418 = vst.msk [vmem:[#allocation3 + $0x28] sm:$0xff] %vm404_vm2, %v1642_v6 }
  0x32   : > { %1441 = vmatmul.mubr.msk.bf16.vlgmr.msra.gmra.mrb[0].mxu0 %vm421_vm0, %v1552_v9  ;;  %419 = vst.msk [vmem:[#allocation3 + $0x30] sm:$0xff] %vm404_vm2, %v1642_v6  ;;  %420 = vst.msk [vmem:[#allocation3 + $0x38] sm:$0xff] %vm404_vm2, %v1642_v6  ;;  %v1793_v20 = vld [vmem:[#allocation2] sm:$0xff]  ;;  %v1798_v23 = vld [vmem:[#allocation2 + $0x8] sm:$0xff] }
  0x33   : > { %1458 = vmatprep.mubr.msk.bf16.mxu0 %vm1643_vm1, %v1642_v6 }
  0x34   : > { %v839_v19 = vld [vmem:[#allocation2 + $0x20] sm:$0xff] }
 0x105   : > { %v487_v11 = vpop.f32.mrb[0].mxu0 }
 0x106   : > { %v494_v12 = vmul.f32 0.17677669, %v487_v11  ;;  %v1442_v13 = vpop.f32.mrb[1].mxu0 }
 0x107   : > { %v490_v14 = vpop.f32.mrb[2].mxu0 }
 0x108   : > { %v495_v15 = vmul.f32 0.17677669, %v490_v14  ;;  %v1443_v16 = vpop.f32.mrb[3].mxu0  ;;  %v499_v17 = vsel %vm498_vm3, %v494_v12, -inf  ;;  %v670_v14 = vld [vmem:[#allocation2 + $0x18] sm:$0xff] }
 0x109   : > { %500 = vmax.xlane.f32.xlu0 %v499_v17 }
 0x10a   : > { %v502_v18 = vsel %vm498_vm3, %v495_v15, -inf }
 0x10d   : > { %503 = vmax.xlane.f32.xlu0 %v502_v18 }
 0x123   : > { %617 = vrot.lane.b32.xlu0 %v1551_v7, %s1646_s26 }
 0x196   : > { %v501_v21 = vpop.xlane.xlu0 %500 }
 0x197   : > { %v1796_v22 = vmax.f32 %v1793_v20, %v501_v21 }
 0x199   : > { %v507_v24 = vsub.f32 %v1793_v20, %v1796_v22  ;;  %613 = vst.msk [vmem:[#allocation2] sm:$0xff] %vm404_vm2, %v1796_v22  ;;  %515 = vperm.xlu1 %1534, %v1796_v22  }
 0x19a   : > { %v504_v25 = vpop.xlane.xlu0 %503 }
 0x19b   : > { %v1806_v26 = vmax.f32 %v1798_v23, %v504_v25  ;;  %v840_v25 = vld [vmem:[#allocation2 + $0x28] sm:$0xff] }
 0x19d   : > { %v508_v27 = vsub.f32 %v1798_v23, %v1806_v26  ;;  %614 = vst.msk [vmem:[#allocation2 + $0x8] sm:$0xff] %vm404_vm2, %v1806_v26  ;;  %520 = vperm.xlu1 %1534, %v1806_v26  }
 0x19e   : > { %v618_v36 = vpop.permute.xlu0 %617 }
 0x19f   : > { %v623_v39 = vsel %vm421_vm0, %v618_v36, 0 }
 0x1a1   : > { %615 = vrot.lane.b32.xlu1 %v1552_v9, %s1646_s26 }
 0x1a5   : > { %787 = vrot.lane.b32.xlu1 %v1551_v7, %s1647_s28 }
 0x1a9   : > { %785 = vrot.lane.b32.xlu1 %v1552_v9, %s1647_s28 }
 0x1ad   : > { %957 = vrot.lane.b32.xlu1 %v1551_v7, %s1648_s29 }
 0x1b1   : > { %955 = vrot.lane.b32.xlu1 %v1552_v9, %s1648_s29 }
 0x218   : > { %v516_v29 = vpop.permute.xlu1 %515 }
 0x219   : > { %v523_v30 = vsub.f32 %v494_v12, %v516_v29  ;;  %v1872_v12 = vld [vmem:[#allocation2 + $0x10] sm:$0xff] }
 0x21b   : > { %v525_v31 = vmul.f32 1.442695, %v523_v30 }
 0x21c   : > { %v521_v32 = vpop.permute.xlu1 %520 }
 0x21d   : > { %v524_v33 = vsub.f32 %v495_v15, %v521_v32  ;;  %1554 = vpow2.f32 %v525_v31  ;;  %v1009_v32 = vld [vmem:[#allocation2 + $0x30] sm:$0xff] }
 0x21f   : > { %v527_v34 = vmul.f32 1.442695, %v524_v33 }
 0x220   : > { %v616_v35 = vpop.permute.xlu1 %615 }
 0x221   : > { %1556 = vpow2.f32 %v527_v34  ;;  %v1010_v34 = vld [vmem:[#allocation2 + $0x38] sm:$0xff] }
 0x224   : > { %v788_v41 = vpop.permute.xlu1 %787 }
 0x225   : > { %v793_v43 = vsel %vm421_vm0, %v788_v41, 0  ;;  %v509_v41 = vmul.f32 1.442695, %v507_v24 }
 0x227   : > { %v1823_v37 = vpop.eup %1554  ;;  %1558 = vpow2.f32 %v509_v41 }
 0x228   : > { %v786_v42 = vpop.permute.xlu1 %785  ;;  %v533_v26 = vsel %vm498_vm3, %v1823_v37, 0.0 }
 0x22b   : > { %v1825_v38 = vpop.eup %1556 }
 0x22c   : > { %v544_v40 = vpack.c.bf16 %v1825_v38, %v1823_v37  ;;  %v958_v44 = vpop.permute.xlu1 %957 }
 0x22d   : > { %v963_v45 = vsel %vm421_vm0, %v958_v44, 0 }
 0x22e   : > { %1447 = vmatmul.mubr.msk.bf16.vlgmr.msra.gmra.mrb[0].mxu1 %vm498_vm3, %v544_v40  ;;  %v536_v40 = vsel %vm498_vm3, %v1825_v38, 0.0 }
 0x22f   : > { %1451 = vmatpush3.bf16.xpose.msra.mxu1 %v623_v39  ;;  %1452 = vmatprep.mubr.msk.bf16.mxu1 %vm1643_vm1, %v1642_v6 }
 0x230   : > { %1462 = vmatprep.subr.bf16.mxu1 %v1642_v6  ;;  %v956_v46 = vpop.permute.xlu1 %955 }
 0x236   : > { %1453 = vmatmul.mubr.msk.bf16.vlgmr.msra.gmra.mrb[4].mxu1 %vm421_vm0, %v616_v35 }
 0x237   : > { %1463 = vmatpush3.bf16.xpose.msra.mxu1 %v793_v43  ;;  %1464 = vmatprep.mubr.msk.bf16.mxu1 %vm1643_vm1, %v1642_v6 }
 0x238   : > { %1474 = vmatprep.subr.bf16.mxu1 %v1642_v6 }
 0x23e   : > { %1465 = vmatmul.mubr.msk.bf16.vlgmr.msra.gmra.mrb[8].mxu1 %vm421_vm0, %v786_v42  ;;  %v511_v42 = vmul.f32 1.442695, %v508_v27 }
 0x23f   : > { %1475 = vmatpush3.bf16.xpose.msra.mxu1 %v963_v45  ;;  %1476 = vmatprep.mubr.msk.bf16.mxu1 %vm1643_vm1, %v1642_v6 }
 0x240   : > { %1560 = vpow2.f32 %v511_v42 }
 0x246   : > { %1477 = vmatmul.mubr.msk.bf16.vlgmr.msra.gmra.mrb[12].mxu1 %vm421_vm0, %v956_v46 }
 0x301   : > { %v1844_v47 = vpop.f32.mrb[0].mxu1 }
 0x302   : > { %v1448_v48 = vpop.f32.mrb[1].mxu1 }
 0x303   : > { %v1846_v49 = vpop.f32.mrb[2].mxu1  ;;  %v1901_v48 = vpop.eup %1558 }
 0x304   : > { %v1449_v50 = vpop.f32.mrb[3].mxu1  ;;  %v1904_v22 = vpop.eup %1560 }
 0x309   : > { %v659_v51 = vpop.f32.mrb[4].mxu1 }
 0x30a   : > { %v1848_v52 = vmul.f32 0.17677669, %v659_v51  ;;  %v1454_v53 = vpop.f32.mrb[5].mxu1 }
 0x30b   : > { %v662_v54 = vpop.f32.mrb[6].mxu1 }
 0x30c   : > { %v1850_v55 = vmul.f32 0.17677669, %v662_v54  ;;  %v1455_v56 = vpop.f32.mrb[7].mxu1  ;;  %v671_v57 = vsel %vm498_vm3, %v1848_v52, -inf }
 0x30d   : > { %672 = vmax.xlane.f32.xlu1 %v671_v57 }
 0x30e   : > { %v674_v58 = vsel %vm498_vm3, %v1850_v55, -inf }
 0x30f   : > { %675 = vmax.xlane.f32.xlu0 %v674_v58 }
 0x311   : > { %v829_v59 = vpop.f32.mrb[8].mxu1 }
 0x312   : > { %v1856_v60 = vmul.f32 0.17677669, %v829_v59  ;;  %v1466_v61 = vpop.f32.mrb[9].mxu1 }
 0x313   : > { %v832_v62 = vpop.f32.mrb[10].mxu1 }
 0x314   : > { %v1858_v63 = vmul.f32 0.17677669, %v832_v62  ;;  %v1467_v0 = vpop.f32.mrb[11].mxu1  ;;  %v841_v1 = vsel %vm498_vm3, %v1856_v60, -inf }
 0x315   : > { %842 = vmax.xlane.f32.xlu0 %v841_v1 }
 0x316   : > { %v844_v2 = vsel %vm498_vm3, %v1858_v63, -inf }
 0x317   : > { %845 = vmax.xlane.f32.xlu1 %v844_v2 }
 0x319   : > { %v999_v3 = vpop.f32.mrb[12].mxu1 }
 0x31a   : > { %v1864_v4 = vmul.f32 0.17677669, %v999_v3  ;;  %v1478_v5 = vpop.f32.mrb[13].mxu1 }
 0x31b   : > { %v1002_v7 = vpop.f32.mrb[14].mxu1 }
 0x31c   : > { %v1866_v8 = vmul.f32 0.17677669, %v1002_v7  ;;  %v1479_v9 = vpop.f32.mrb[15].mxu1  ;;  %v1011_v10 = vsel %vm498_vm3, %v1864_v4, -inf }
 0x31d   : > { %1012 = vmax.xlane.f32.xlu0 %v1011_v10 }
 0x31e   : > { %v1014_v11 = vsel %vm498_vm3, %v1866_v8, -inf }
 0x31f   : > { %1015 = vmax.xlane.f32.xlu1 %v1014_v11 }
 0x39a   : > { %v673_v13 = vpop.xlane.xlu1 %672 }
 0x39b   : > { %v1875_v15 = vmax.f32 %v1872_v12, %v673_v13 }
 0x39c   : > { %v676_v16 = vpop.xlane.xlu0 %675 }
 0x39d   : > { %v679_v17 = vsub.f32 %v1872_v12, %v1875_v15  ;;  %783 = vst.msk [vmem:[#allocation2 + $0x10] sm:$0xff] %vm404_vm2, %v1875_v15  ;;  %v678_v18 = vmax.f32 %v670_v14, %v676_v16  ;;  %687 = vperm.xlu0 %1535, %v1875_v15  }
 0x39f   : > { %784 = vst.msk [vmem:[#allocation2 + $0x18] sm:$0xff] %vm404_vm2, %v678_v18  ;;  %692 = vperm.xlu1 %1534, %v678_v18   ;;  %v680_v43 = vsub.f32 %v670_v14, %v678_v18 }
 0x3a1   : > { %1057 = vrot.lane.b32.xlu0 %v1815_v28, %s1648_s29  ;;  %v683_v44 = vmul.f32 1.442695, %v680_v43 }
 0x3a2   : > { %v843_v21 = vpop.xlane.xlu0 %842 }
 0x3a3   : > { %v847_v29 = vmax.f32 %v839_v19, %v843_v21  ;;  %1562 = vpow2.f32 %v683_v44 }
 0x3a4   : > { %v846_v30 = vpop.xlane.xlu1 %845 }
 0x3a5   : > { %953 = vst.msk [vmem:[#allocation2 + $0x20] sm:$0xff] %vm404_vm2, %v847_v29  ;;  %v848_v31 = vmax.f32 %v840_v25, %v846_v30  ;;  %857 = vperm.xlu1 %1534, %v847_v29   ;;  %v849_v45 = vsub.f32 %v839_v19, %v847_v29 }
 0x3a7   : > { %954 = vst.msk [vmem:[#allocation2 + $0x28] sm:$0xff] %vm404_vm2, %v848_v31  ;;  %v851_v46 = vmul.f32 1.442695, %v849_v45  ;;  %v595_v45 = vld [vmem:[#allocation4] sm:$0xff] }
 0x3a9   : > { %862 = vperm.xlu1 %1534, %v848_v31   ;;  %1564 = vpow2.f32 %v851_v46 }
 0x3aa   : > { %v1013_v33 = vpop.xlane.xlu0 %1012 }
 0x3ab   : > { %v1017_v35 = vmax.f32 %v1009_v32, %v1013_v33 }
 0x3ac   : > { %v1016_v36 = vpop.xlane.xlu1 %1015 }
 0x3ad   : > { %1123 = vst.msk [vmem:[#allocation2 + $0x30] sm:$0xff] %vm404_vm2, %v1017_v35  ;;  %v1018_v39 = vmax.f32 %v1010_v34, %v1016_v36  ;;  %1027 = vperm.xlu1 %1534, %v1017_v35   ;;  %v1019_v20 = vsub.f32 %v1009_v32, %v1017_v35  ;;  %v1909_v27 = vpop.eup %1562  ;;  %v681_v36 = vmul.f32 1.442695, %v679_v17 }
 0x3af   : > { %1124 = vst.msk [vmem:[#allocation2 + $0x38] sm:$0xff] %vm404_vm2, %v1018_v39  ;;  %v1021_v23 = vmul.f32 1.442695, %v1019_v20  ;;  %v1020_v24 = vsub.f32 %v1010_v34, %v1018_v39 }
 0x3b1   : > { %1032 = vperm.xlu1 %1534, %v1018_v39   ;;  %v1023_v50 = vmul.f32 1.442695, %v1020_v24 }
 0x3b3   : > { %v1912_v51 = vpop.eup %1564 }
 0x3b5   : > { %717 = vrot.lane.b32.xlu1 %v1815_v28, %s1646_s26 }
 0x3b9   : > { %887 = vrot.lane.b32.xlu1 %v1815_v28, %s1647_s28  ;;  %v850_v28 = vsub.f32 %v840_v25, %v848_v31 }
 0x3bb   : > { %v853_v38 = vmul.f32 1.442695, %v850_v28  ;;  %v596_v28 = vld [vmem:[#allocation4 + $0x8] sm:$0xff] }
 0x3bd   : > { %1566 = vpow2.f32 %v853_v38 }
 0x3be   : > { %1568 = vpow2.f32 %v1021_v23  ;;  %v529_v23 = vld [vmem:[#allocation3] sm:$0xff] }
 0x3bf   : > { %1570 = vpow2.f32 %v1023_v50  ;;  %v531_v24 = vmul.f32 %v1901_v48, %v529_v23 }
 0x3c0   : > { %537 = vadd.xlane.f32.xlu0 %v536_v40  ;;  %v530_v40 = vld [vmem:[#allocation3 + $0x8] sm:$0xff] }
 0x3c1   : > { %v532_v41 = vmul.f32 %v1904_v22, %v530_v40 }
 0x3c7   : > { %v1915_v53 = vpop.eup %1566 }
 0x3c8   : > { %v1918_v54 = vpop.eup %1568 }
 0x3c9   : > { %v1921_v37 = vpop.eup %1570 }
 0x3d6   : > { %599 = vperm.xlu0 %1535, %v1901_v48  }
 0x3da   : > { %604 = vperm.xlu0 %1535, %v1904_v22  }
 0x3dd   : > { %534 = vadd.xlane.f32.xlu1 %v533_v26 }
 0x3de   : > { %774 = vperm.xlu0 %1535, %v1909_v27  }
 0x3e2   : > { %939 = vperm.xlu0 %1535, %v1912_v51  }
 0x3e6   : > { %944 = vperm.xlu0 %1535, %v1915_v53  }
 0x3ea   : > { %1109 = vperm.xlu0 %1535, %v1918_v54  }
 0x3ee   : > { %1114 = vperm.xlu0 %1535, %v1921_v37  }
 0x41c   : > { %v688_v56 = vpop.permute.xlu0 %687 }
 0x41d   : > { %v695_v57 = vsub.f32 %v1848_v52, %v688_v56 }
 0x41e   : > { %v693_v58 = vpop.permute.xlu1 %692 }
 0x41f   : > { %v697_v59 = vmul.f32 1.442695, %v695_v57  ;;  %v696_v61 = vsub.f32 %v1850_v55, %v693_v58  ;;  %v702_v57 = vld [vmem:[#allocation3 + $0x10] sm:$0xff] }
 0x420   : > { %v1058_v33 = vpop.permute.xlu0 %1057 }
 0x421   : > { %1572 = vpow2.f32 %v697_v59  ;;  %v699_v62 = vmul.f32 1.442695, %v696_v61  ;;  %v703_v61 = vld [vmem:[#allocation3 + $0x18] sm:$0xff] }
 0x423   : > { %1574 = vpow2.f32 %v699_v62  ;;  %v705_v62 = vmul.f32 %v1909_v27, %v703_v61 }
 0x424   : > { %v858_v0 = vpop.permute.xlu1 %857 }
 0x425   : > { %v865_v1 = vsub.f32 %v1856_v60, %v858_v0 }
 0x427   : > { %v867_v2 = vmul.f32 1.442695, %v865_v1  ;;  %v872_v1 = vld [vmem:[#allocation3 + $0x20] sm:$0xff] }
 0x428   : > { %v863_v3 = vpop.permute.xlu1 %862 }
 0x429   : > { %1576 = vpow2.f32 %v867_v2  ;;  %v866_v5 = vsub.f32 %v1858_v63, %v863_v3  ;;  %v874_v2 = vmul.f32 %v1912_v51, %v872_v1  ;;  %v1043_v51 = vld [vmem:[#allocation3 + $0x38] sm:$0xff] }
 0x42b   : > { %v1573_v7 = vpop.eup %1572  ;;  %v869_v9 = vmul.f32 1.442695, %v866_v5  ;;  %v873_v5 = vld [vmem:[#allocation3 + $0x28] sm:$0xff] }
 0x42c   : > { %v1028_v10 = vpop.permute.xlu1 %1027  ;;  %v706_v52 = vsel %vm498_vm3, %v1573_v7, 0.0 }
 0x42d   : > { %v1575_v11 = vpop.eup %1574  ;;  %1578 = vpow2.f32 %v869_v9  ;;  %v1035_v55 = vsub.f32 %v1864_v4, %v1028_v10  ;;  %707 = vadd.xlane.f32.xlu1 %v706_v52  ;;  %v875_v10 = vmul.f32 %v1915_v53, %v873_v5 }
 0x42e   : > { %v709_v16 = vsel %vm498_vm3, %v1575_v11, 0.0  ;;  %v716_v25 = vpack.c.bf16 %v1575_v11, %v1573_v7  ;;  %v1042_v11 = vld [vmem:[#allocation3 + $0x30] sm:$0xff] }
 0x42f   : > { %v1037_v13 = vmul.f32 1.442695, %v1035_v55 }
 0x430   : > { %v1033_v14 = vpop.permute.xlu1 %1032 }
 0x431   : > { %1580 = vpow2.f32 %v1037_v13  ;;  %v1036_v60 = vsub.f32 %v1866_v8, %v1033_v14  ;;  %710 = vadd.xlane.f32.xlu1 %v709_v16  ;;  %v1044_v13 = vmul.f32 %v1918_v54, %v1042_v11 }
 0x433   : > { %v1577_v18 = vpop.eup %1576  ;;  %v1039_v63 = vmul.f32 1.442695, %v1036_v60 }
 0x434   : > { %v718_v19 = vpop.permute.xlu1 %717  ;;  %v876_v21 = vsel %vm498_vm3, %v1577_v18, 0.0 }
 0x435   : > { %1582 = vpow2.f32 %v1039_v63  ;;  %877 = vadd.xlane.f32.xlu1 %v876_v21  ;;  %1457 = vmatpush3.bf16.msra.mxu0 %v718_v19 }
 0x436   : > { %1468 = vmatprep.subr.bf16.mxu0 %v1642_v6  ;;  %1584 = vpow2.f32 %v681_v36 }
 0x437   : > { %v1579_v4 = vpop.eup %1578 }
 0x438   : > { %1459 = vmatmul.mubr.msk.bf16.vlgmr.msra.gmra.mrb[4].mxu0 %vm498_vm3, %v716_v25  ;;  %v879_v29 = vsel %vm498_vm3, %v1579_v4, 0.0  ;;  %v888_v30 = vpop.permute.xlu1 %887  ;;  %v886_v32 = vpack.c.bf16 %v1579_v4, %v1577_v18  ;;  %v1045_v18 = vmul.f32 %v1921_v37, %v1043_v51 }
 0x439   : > { %880 = vadd.xlane.f32.xlu1 %v879_v29  ;;  %1469 = vmatpush3.bf16.msra.mxu0 %v888_v30 }
 0x43a   : > { %1470 = vmatprep.mubr.msk.bf16.mxu0 %vm1643_vm1, %v1642_v6  ;;  %1480 = vmatprep.subr.bf16.mxu0 %v1642_v6 }
 0x43b   : > { %v1581_v8 = vpop.eup %1580 }
 0x43c   : > { %v1046_v31 = vsel %vm498_vm3, %v1581_v8, 0.0 }
 0x43d   : > { %1047 = vadd.xlane.f32.xlu1 %v1046_v31 }
 0x43f   : > { %v1583_v34 = vpop.eup %1582 }
 0x440   : > { %1471 = vmatmul.mubr.msk.bf16.vlgmr.msra.gmra.mrb[8].mxu0 %vm498_vm3, %v886_v32  ;;  %v1049_v35 = vsel %vm498_vm3, %v1583_v34, 0.0  ;;  %v1056_v39 = vpack.c.bf16 %v1583_v34, %v1581_v8  ;;  %v1585_v44 = vpop.eup %1584 }
 0x441   : > { %1050 = vadd.xlane.f32.xlu1 %v1049_v35  ;;  %1481 = vmatpush3.bf16.msra.mxu0 %v1058_v33  ;;  %v704_v58 = vmul.f32 %v1585_v44, %v702_v57  ;;  %v765_v33 = vld [vmem:[#allocation4 + $0x10] sm:$0xff]  ;;  %v766_v35 = vld [vmem:[#allocation4 + $0x18] sm:$0xff] }
 0x442   : > { %1482 = vmatprep.mubr.msk.bf16.mxu0 %vm1643_vm1, %v1642_v6 }
 0x448   : > { %1483 = vmatmul.mubr.msk.bf16.vlgmr.msra.gmra.mrb[12].mxu0 %vm498_vm3, %v1056_v39 }
 0x44d   : > { %v538_v42 = vpop.xlane.xlu0 %537 }
 0x44e   : > { %v540_v43 = vadd.f32 %v538_v42, %v532_v41 }
 0x450   : > { %543 = vst.msk [vmem:[#allocation3 + $0x8] sm:$0xff] %vm404_vm2, %v540_v43 }
 0x452   : > { %769 = vperm.xlu1 %1534, %v1585_v44  }
 0x455   : > { %v600_v46 = vpop.permute.xlu0 %599 }
 0x456   : > { %v607_v6 = vmul.f32 %v600_v46, %v595_v45 }
 0x457   : > { %v1129_v38 = vld [vmem:[#allocation3 + $0x8] sm:$0xff] }
 0x458   : > { %v609_v12 = vadd.f32 %v607_v6, %v1844_v47  ;;  %1586 = vrcp.f32 %v1129_v38  ;;  %v935_v6 = vld [vmem:[#allocation4 + $0x20] sm:$0xff] }
 0x459   : > { %v605_v15 = vpop.permute.xlu0 %604 }
 0x45a   : > { %611 = vst.msk [vmem:[#allocation4] sm:$0xff] %vm421_vm0, %v609_v12  ;;  %v608_v17 = vmul.f32 %v605_v15, %v596_v28  ;;  %v936_v28 = vld [vmem:[#allocation4 + $0x28] sm:$0xff] }
 0x45c   : > { %v610_v20 = vadd.f32 %v608_v17, %v1846_v49 }
 0x45d   : > { %v775_v31 = vpop.permute.xlu0 %774 }
 0x45e   : > { %612 = vst.msk [vmem:[#allocation4 + $0x8] sm:$0xff] %vm421_vm0, %v610_v20  ;;  %v778_v40 = vmul.f32 %v775_v31, %v766_v35 }
 0x461   : > { %v940_v32 = vpop.permute.xlu0 %939  ;;  %v1132_v31 = vld [vmem:[#allocation4] sm:$0xff] }
 0x462   : > { %v1587_v22 = vpop.eup %1586  ;;  %v947_v38 = vmul.f32 %v940_v32, %v935_v6 }
 0x463   : > { %1141 = vperm.xlu0 %1535, %v1587_v22  }
 0x465   : > { %v945_v43 = vpop.permute.xlu0 %944 }
 0x466   : > { %v948_v17 = vmul.f32 %v945_v43, %v936_v28 }
 0x469   : > { %v1110_v12 = vpop.permute.xlu0 %1109 }
 0x46a   : > { %v535_v26 = vpop.xlane.xlu1 %534 }
 0x46b   : > { %v539_v50 = vadd.f32 %v535_v26, %v531_v24 }
 0x46d   : > { %542 = vst.msk [vmem:[#allocation3] sm:$0xff] %vm404_vm2, %v539_v50  ;;  %v1105_v50 = vld [vmem:[#allocation4 + $0x30] sm:$0xff] }
 0x46e   : > { %v1117_v57 = vmul.f32 %v1110_v12, %v1105_v50 }
 0x474   : > { %v1128_v56 = vld [vmem:[#allocation3] sm:$0xff] }
 0x475   : > { %1588 = vrcp.f32 %v1128_v56  ;;  %v1106_v56 = vld [vmem:[#allocation4 + $0x38] sm:$0xff] }
 0x47f   : > { %v1589_v47 = vpop.eup %1588 }
 0x480   : > { %1136 = vperm.xlu1 %1534, %v1589_v47   ;;  %v1115_v47 = vpop.permute.xlu0 %1114 }
 0x4ba   : > { %v708_v59 = vpop.xlane.xlu1 %707 }
 0x4bb   : > { %v712_v49 = vadd.f32 %v708_v59, %v704_v58  ;;  %v1118_v59 = vmul.f32 %v1115_v47, %v1106_v56 }
 0x4bd   : > { %714 = vst.msk [vmem:[#allocation3 + $0x10] sm:$0xff] %vm404_vm2, %v712_v49 }
 0x4be   : > { %v711_v0 = vpop.xlane.xlu1 %710 }
 0x4bf   : > { %v713_v48 = vadd.f32 %v711_v0, %v705_v62 }
 0x4c1   : > { %715 = vst.msk [vmem:[#allocation3 + $0x18] sm:$0xff] %vm404_vm2, %v713_v48 }
 0x4c2   : > { %v878_v3 = vpop.xlane.xlu1 %877 }
 0x4c3   : > { %v882_v7 = vadd.f32 %v878_v3, %v874_v2 }
 0x4c4   : > { %v1146_v9 = vld [vmem:[#allocation3 + $0x10] sm:$0xff] }
 0x4c5   : > { %884 = vst.msk [vmem:[#allocation3 + $0x20] sm:$0xff] %vm404_vm2, %v882_v7  ;;  %1590 = vrcp.f32 %v1146_v9 }
 0x4c6   : > { %v881_v52 = vpop.xlane.xlu1 %880 }
 0x4c7   : > { %v883_v55 = vadd.f32 %v881_v52, %v875_v10 }
 0x4c8   : > { %v1147_v27 = vld [vmem:[#allocation3 + $0x18] sm:$0xff] }
 0x4c9   : > { %885 = vst.msk [vmem:[#allocation3 + $0x28] sm:$0xff] %vm404_vm2, %v883_v55  ;;  %1592 = vrcp.f32 %v1147_v27 }
 0x4ca   : > { %v1048_v14 = vpop.xlane.xlu1 %1047 }
 0x4cb   : > { %v1052_v16 = vadd.f32 %v1048_v14, %v1044_v13 }
 0x4cc   : > { %v1164_v60 = vld [vmem:[#allocation3 + $0x20] sm:$0xff] }
 0x4cd   : > { %1054 = vst.msk [vmem:[#allocation3 + $0x30] sm:$0xff] %vm404_vm2, %v1052_v16  ;;  %1594 = vrcp.f32 %v1164_v60 }
 0x4ce   : > { %v1051_v53 = vpop.xlane.xlu1 %1050 }
 0x4cf   : > { %v1591_v63 = vpop.eup %1590  ;;  %v1053_v19 = vadd.f32 %v1051_v53, %v1045_v18 }
 0x4d0   : > { %1154 = vperm.xlu1 %1534, %v1591_v63   ;;  %v1165_v21 = vld [vmem:[#allocation3 + $0x28] sm:$0xff] }
 0x4d1   : > { %1055 = vst.msk [vmem:[#allocation3 + $0x38] sm:$0xff] %vm404_vm2, %v1053_v19  ;;  %1596 = vrcp.f32 %v1165_v21 }
 0x4d2   : > { %v770_v34 = vpop.permute.xlu1 %769 }
 0x4d3   : > { %v1593_v25 = vpop.eup %1592  ;;  %v777_v36 = vmul.f32 %v770_v34, %v765_v33 }
 0x4d4   : > { %1159 = vperm.xlu0 %1535, %v1593_v25   ;;  %v1182_v54 = vld [vmem:[#allocation3 + $0x30] sm:$0xff] }
 0x4d5   : > { %1598 = vrcp.f32 %v1182_v54 }
 0x4d7   : > { %v1595_v4 = vpop.eup %1594 }
 0x4d8   : > { %1172 = vperm.xlu1 %1534, %v1595_v4   ;;  %v1183_v29 = vld [vmem:[#allocation3 + $0x38] sm:$0xff] }
 0x4d9   : > { %1600 = vrcp.f32 %v1183_v29 }
 0x4db   : > { %v1597_v30 = vpop.eup %1596 }
 0x4dc   : > { %1177 = vperm.xlu0 %1535, %v1597_v30  }
 0x4df   : > { %v1599_v37 = vpop.eup %1598 }
 0x4e0   : > { %1190 = vperm.xlu1 %1534, %v1599_v37  }
 0x4e2   : > { %v1142_v2 = vpop.permute.xlu0 %1141 }
 0x4e3   : > { %v1601_v8 = vpop.eup %1600 }
 0x4e4   : > { %1195 = vperm.xlu0 %1535, %v1601_v8   ;;  %v1133_v8 = vld [vmem:[#allocation4 + $0x8] sm:$0xff] }
 0x4e5   : > { %v1145_v34 = vmul.f32 %v1142_v2, %v1133_v8 }
 0x4ff   : > { %v1137_v48 = vpop.permute.xlu1 %1136 }
 0x500   : > { %v1144_v35 = vmul.f32 %v1137_v48, %v1132_v31 }
 0x50b   : > { %v757_v39 = vpop.f32.mrb[4].mxu0 }
 0x50c   : > { %v779_v41 = vadd.f32 %v777_v36, %v757_v39  ;;  %v1460_v42 = vpop.f32.mrb[5].mxu0 }
 0x50d   : > { %v760_v44 = vpop.f32.mrb[6].mxu0 }
 0x50e   : > { %781 = vst.msk [vmem:[#allocation4 + $0x10] sm:$0xff] %vm421_vm0, %v779_v41  ;;  %v780_v45 = vadd.f32 %v778_v40, %v760_v44  ;;  %v1461_v46 = vpop.f32.mrb[7].mxu0 }
 0x510   : > { %782 = vst.msk [vmem:[#allocation4 + $0x18] sm:$0xff] %vm421_vm0, %v780_v45 }
 0x513   : > { %v927_v15 = vpop.f32.mrb[8].mxu0 }
 0x514   : > { %v949_v20 = vadd.f32 %v947_v38, %v927_v15  ;;  %v1472_v22 = vpop.f32.mrb[9].mxu0 }
 0x515   : > { %v930_v23 = vpop.f32.mrb[10].mxu0  ;;  %v1150_v5 = vld [vmem:[#allocation4 + $0x10] sm:$0xff] }
 0x516   : > { %951 = vst.msk [vmem:[#allocation4 + $0x20] sm:$0xff] %vm421_vm0, %v949_v20  ;;  %v950_v24 = vadd.f32 %v948_v17, %v930_v23  ;;  %v1473_v26 = vpop.f32.mrb[11].mxu0 }
 0x517   : > { %v1151_v9 = vld [vmem:[#allocation4 + $0x18] sm:$0xff] }
 0x518   : > { %952 = vst.msk [vmem:[#allocation4 + $0x28] sm:$0xff] %vm421_vm0, %v950_v24 }
 0x51b   : > { %v1097_v58 = vpop.f32.mrb[12].mxu0 }
 0x51c   : > { %v1119_v61 = vadd.f32 %v1117_v57, %v1097_v58  ;;  %v1484_v49 = vpop.f32.mrb[13].mxu0 }
 0x51d   : > { %v1100_v62 = vpop.f32.mrb[14].mxu0  ;;  %v1168_v27 = vld [vmem:[#allocation4 + $0x20] sm:$0xff] }
 0x51e   : > { %1121 = vst.msk [vmem:[#allocation4 + $0x30] sm:$0xff] %vm421_vm0, %v1119_v61  ;;  %v1120_v0 = vadd.f32 %v1118_v59, %v1100_v62  ;;  %v1485_v1 = vpop.f32.mrb[15].mxu0 }
 0x51f   : > { %v1169_v14 = vld [vmem:[#allocation4 + $0x28] sm:$0xff] }
 0x520   : > { %1122 = vst.msk [vmem:[#allocation4 + $0x38] sm:$0xff] %vm421_vm0, %v1120_v0 }
 0x525   : > { %v1186_v53 = vld [vmem:[#allocation4 + $0x30] sm:$0xff] }
 0x527   : > { %v1187_v19 = vld [vmem:[#allocation4 + $0x38] sm:$0xff] }
 0x54f   : > { %v1155_v3 = vpop.permute.xlu1 %1154 }
 0x550   : > { %v1162_v10 = vmul.f32 %v1155_v3, %v1150_v5 }
 0x553   : > { %v1160_v7 = vpop.permute.xlu0 %1159 }
 0x554   : > { %v1163_v52 = vmul.f32 %v1160_v7, %v1151_v9 }
 0x556   : > { %v1536_v11 = vpack.i.bf16 %v1163_v52, %v1162_v10 }
 0x557   : > { %v1173_v55 = vpop.permute.xlu1 %1172 }
 0x558   : > { %1537 = vrot.lane.b32.xlu1 %v1536_v11, %s1648_s29  ;;  %v1180_v51 = vmul.f32 %v1173_v55, %v1168_v27 }
 0x55b   : > { %v1178_v13 = vpop.permute.xlu0 %1177 }
 0x55c   : > { %v1181_v16 = vmul.f32 %v1178_v13, %v1169_v14 }
 0x55e   : > { %v1541_v60 = vpack.i.bf16 %v1181_v16, %v1180_v51 }
 0x55f   : > { %v1191_v18 = vpop.permute.xlu1 %1190 }
 0x560   : > { %1542 = vrot.lane.b32.xlu0 %v1541_v60, %s1647_s28  ;;  %v1198_v21 = vmul.f32 %v1191_v18, %v1186_v53 }
 0x563   : > { %v1196_v63 = vpop.permute.xlu0 %1195 }
 0x564   : > { %v1199_v25 = vmul.f32 %v1196_v63, %v1187_v19 }
 0x566   : > { %v1546_v54 = vpack.i.bf16 %v1199_v25, %v1198_v21 }
 0x568   : > { %1547 = vrot.lane.b32.xlu1 %v1546_v54, %s1646_s26 }
 0x5ca   : > { %v1538_v4 = vpop.permute.xlu1 %1537 }
 0x5cb   : > { %v1540_v30 = vunpack.i.h.bf16 %v1538_v4  ;;  %v1539_v37 = vunpack.i.l.bf16 %v1538_v4 }
 0x5cd   : > { %v1225_v39 = vsel %vm421_vm0, %v1145_v34, %v1540_v30  ;;  %v1224_v40 = vsel %vm421_vm0, %v1144_v35, %v1539_v37 }
 0x5d2   : > { %v1543_v29 = vpop.permute.xlu0 %1542 }
 0x5d3   : > { %v1545_v32 = vunpack.i.h.bf16 %v1543_v29  ;;  %v1544_v33 = vunpack.i.l.bf16 %v1543_v29 }
 0x5d5   : > { %v1228_v43 = vsel %vm1226_vm4, %v1225_v39, %v1545_v32  ;;  %v1227_v44 = vsel %vm1226_vm4, %v1224_v40, %v1544_v33 }
 0x5da   : > { %v1548_v36 = vpop.permute.xlu1 %1547 }
 0x5db   : > { %v1550_v41 = vunpack.i.h.bf16 %v1548_v36  ;;  %v1549_v42 = vunpack.i.l.bf16 %v1548_v36 }
 0x5dd   : > { %v1231_v45 = vsel %vm1229_vm5, %v1228_v43, %v1550_v41  ;;  %v1230_v46 = vsel %vm1229_vm5, %v1227_v44, %v1549_v42 }
 0x5de   : > { %v1420_v6 = vpack.c.bf16 %v1231_v45, %v1230_v46 }
 0x5e0   : > { %1421 = vst [vmem:[%s397_s6] sm:$0xff] %v1420_v6  }
 0x5e1 PF: > { %s13_s16 = sadd.s32 1, %s1640_s16   ;;  %s2003_s12 = smov %s1628_s13 }
 0x5e2   : > { %p10_p10 = scmp.ge.s32.totalorder %s13_s16, 4   ;;  %s2004_s13 = smov %s1708_s21 }
 0x5e3   : > { %s2005_s14 = smov %s1636_s15  ;;  %s2006_s15 = smov %s2008_s17 }
 0x5e4   :  { %12 = sbr.rel (!%p10_p10) target bundleno = 3 (0x3), region = 223 }

// kernel: encoder_decoder_forward.27
= control target key start
LH: loop header
LB: loop body
LE: loop exit
PB: predicated region body
PF: predicated region fallthrough
CT: control target
= control target key end

     0   :  { %v232_v1 = vmov 0.0   ;;  %vm233_vm0 = vmmov 0   ;;  %s299_s0 = inlined_call_operand.vmem [shape: bf16[16,128], index: 0, kind: input, shape index: {}]   ;;  %s300_s1 = inlined_call_operand.vmem [shape: bf16[128,16], index: 1, kind: input, shape index: {}]   ;;  %s301_s2 = inlined_call_operand.vmem [shape: f32[1,16], index: 2, kind: input, shape index: {}]   ;;  %s302_s3 = inlined_call_operand.hbm [shape: f32[16,16], index: 3, kind: output, shape index: {}]  }
   0x1   :  { %v199_v0 = vld [vmem:[%s300_s1] sm:$0xff]   ;;  %174 = vmatprep.subr.bf16.mxu0 %v232_v1  ;;  %v200_v2 = vld [vmem:[%s300_s1 + $0x8] sm:$0xff]   ;;  %190 = vmatprep.mubr.msk.bf16.mxu0 %vm233_vm0, %v232_v1  ;;  %v201_v3 = vld [vmem:[%s300_s1 + $0x10] sm:$0xff]  }
   0x2   :  { %175 = vmatpush3.bf16.msra.mxu0 %v199_v0 }
   0x3   :  { %176 = vmatprep.subr.bf16.mxu0 %v232_v1 }
   0x6   :  { %177 = vmatpush3.bf16.msra.mxu0 %v200_v2 }
   0x7   :  { %178 = vmatprep.subr.bf16.mxu0 %v232_v1 }
   0x8   :  { %8 = vsyncpa [#allocation3], 0  ;;  %v202_v4 = vld [vmem:[%s300_s1 + $0x18] sm:$0xff]   ;;  %v203_v5 = vld [vmem:[%s300_s1 + $0x20] sm:$0xff]   ;;  %s234_s5 = smov [#allocation2]   ;;  %vm136_vm1 = vcmask 130048  }
   0x9   :  { %v204_v6 = vld [vmem:[%s300_s1 + $0x28] sm:$0xff]   ;;  %v205_v7 = vld [vmem:[%s300_s1 + $0x30] sm:$0xff]   ;;  %v206_v8 = vld [vmem:[%s300_s1 + $0x38] sm:$0xff]   ;;  %s144_s6 = sshll.u32 %s234_s5, 4  ;;  %s145_s6 = int_to_ptr.vmem [resolvable:$true] %s144_s6 }
   0xa   :  { %179 = vmatpush3.bf16.msra.mxu0 %v201_v3  ;;  %v207_v9 = vld [vmem:[%s299_s0] sm:$0xff]   ;;  %s208_s1 = scalar_lea.vmem %s145_s6, 256  ;;  %p213_p1 = scmp.lt.s32.totalorder %s145_s6, %s145_s6 }
   0xb   :  { %180 = vmatprep.subr.bf16.mxu0 %v232_v1  ;;  %v155_v10 = vld [vmem:[%s301_s2] ss:$0 sm:$0xff]  ;;  %p209_p0 = scmp.ne.s32.totalorder %s145_s6, %s208_s1  ;;  %p214_p2 = scmp.lt.s32.totalorder %s208_s1, %s208_s1 }
   0xd   :  { %p215_p3 = por %p214_p2, %p213_p1 }
   0xe   :  { %181 = vmatpush3.bf16.msra.mxu0 %v202_v4 }
   0xf   :  { %182 = vmatprep.subr.bf16.mxu0 %v232_v1  ;;  %p216_p4 = pnand %p215_p3, %p209_p0 }
  0x12   :  { %183 = vmatpush3.bf16.msra.mxu0 %v203_v5 }
  0x13   :  { %184 = vmatprep.subr.bf16.mxu0 %v232_v1 }
  0x16   :  { %185 = vmatpush3.bf16.msra.mxu0 %v204_v6 }
  0x17   :  { %186 = vmatprep.subr.bf16.mxu0 %v232_v1 }
  0x1a   :  { %187 = vmatpush3.bf16.msra.mxu0 %v205_v7 }
  0x1b   :  { %188 = vmatprep.subr.bf16.mxu0 %v232_v1 }
  0x1e   :  { %189 = vmatpush3.bf16.msra.mxu0 %v206_v8 }
  0x21   :  { %191 = vmatmul.mubr.bf16.vlgmr.msra.gmra.mrb[0].mxu0 %v207_v9 }
  0xf4   :  { %v129_v11 = vpop.f32.mrb[0].mxu0 }
  0xf5   :  { %v130_v12 = vadd.f32 %v155_v10, %v129_v11  ;;  %v192_v13 = vpop.f32.mrb[1].mxu0 }
  0xf6   :  { %v132_v14 = vpop.f32.mrb[2].mxu0 }
  0xf7   :  { %137 = vst.msk [vmem:[#allocation2] sm:$0xff] %vm136_vm1, %v130_v12  ;;  %v133_v15 = vadd.f32 %v155_v10, %v132_v14  ;;  %v193_v16 = vpop.f32.mrb[3].mxu0 }
  0xf9   :  { %138 = vst.msk [vmem:[#allocation2 + $0x8] sm:$0xff] %vm136_vm1, %v133_v15 }
  0xfa   :  { %219 = shalt.err (!%p216_p4)
}
  0xfb   :  { %s220_s7 = scalar_lea.hbm %s302_s3, 256 }
  0xfc   :  { %p221_p5 = scmp.ne.s32.totalorder %s302_s3, %s220_s7  ;;  %p224_p6 = scmp.lt.u32.totalorder %s220_s7, %s302_s3 }
  0xfe   :  { %p226_p7 = pnand %p224_p6, %p221_p5 }
 0x100   :  { %229 = shalt.err (!%p226_p7)
}
 0x101   :  { %s235_s12 = smov 128   ;;  %s236_s13 = smov 8  }
 0x102   :  { %150 = dma.vmem_to_hbm [thread:$0]  %s145_s6, 256, %s302_s3, [#allocation3], %s235_s12, %s235_s12, %s236_s13  }
 0x103   :  { %230 = dma.done.wait [#allocation3], 256  }
 0x104   :  { %231 = vsyncadd [#allocation3], 4294967040 }
 0x105   :  { %154 = vsyncpa [#allocation3], 1 }

// kernel: encoder_decoder_forward.24
= control target key start
LH: loop header
LB: loop body
LE: loop exit
PB: predicated region body
PF: predicated region fallthrough
CT: control target
= control target key end

     0   :  { %s1332_s12 = smov 0   ;;  %s1334_s13 = smov 0   ;;  %s1542_s0 = inlined_call_operand.vmem [shape: bf16[2,8,128], index: 0, kind: input, shape index: {}]   ;;  %s1543_s1 = inlined_call_operand.vmem [shape: bf16[2,16,256], index: 1, kind: input, shape index: {}, may-alias: {1,2}]   ;;  %s1544_s2 = inlined_call_operand.vmem [shape: bf16[2,16,256], index: 2, kind: input, shape index: {}, may-alias: {1,2}]   ;;  %s1545_s3 = inlined_call_operand.vmem [shape: bf16[2,8,128], index: 3, kind: output, shape index: {}]  }
   0x1   :  { %s1336_s14 = smov 0   ;;  %s1338_s15 = smov 0  }
   0x2   :  { %s1340_s16 = smov 0  }
   0x3 LB: > { %s32_s17 = sadd.s32 1, %s1299_s15  ;;  %p76_p1 = scmp.ne.s32.totalorder %s1291_s13, %s1287_s12  ;;  %s1303_s16 = sphi %s1340_s16, %s13_s16   ;;  %s1299_s15 = sphi %s1338_s15, %s1550_s15   ;;  %s1295_s14 = sphi %s1336_s14, %s1549_s14   ;;  %s1291_s13 = sphi %s1334_s13, %s1548_s13   ;;  %s1287_s12 = sphi %s1332_s12, %s1547_s12  }
   0x4   : > { %p34_p0 = scmp.ge.s32.totalorder %s32_s17, 2  ;;  %p77_p2 = scmp.eq.s32.totalorder %s1303_s16, 0 }
   0x5   : > { %s69_s20 = sadd.s32 1, %s1291_s13  ;;  %p1097_p5 = scmp.ge.s32.totalorder %s1303_s16, 2 }
   0x6   : > { %s1552_s17 = smov (%p34_p0, %s32_s17), 0  ;;  %p1363_p3 = por %p77_p2, %p76_p1 }
   0x7   : > { %s64_s19 = ssub.s32 %s1299_s15, %s1552_s17  ;;  %158 = sbr.rel (%p1097_p5) target bundleno = 28 (0x1c), region = 16 }
   0x8   : > { %p67_p4 = scmp.eq.s32.totalorder %s64_s19, 0 }
   0xa   : > { %s1371_s21 = scalar_select %p67_p4, %s1291_s13, %s69_s20  }
   0xe   : > { %171 = sbr.rel (!%p1363_p3) target bundleno = 21 (0x15), region = 24  ;;  %s173_s22 = sand.u32 (%p1363_p3), 1, %s1291_s13  }
   0xf   : > { %s1124_s23 = sshll.u32 (%p1363_p3), %s1299_s15, 4  ;;  %s1098_s24 = sshll.u32 (%p1363_p3), %s173_s22, 3 }
  0x10   : > { %s181_s27 = scalar_lea.vmem (%p1363_p3), %s1543_s1, %s1124_s23  ;;  %s175_s28 = scalar_lea.vmem (%p1363_p3), [#allocation5], %s1098_s24 }
  0x11   : > { %v197_v0 = vld [vmem:[%s181_s27] sm:$0xf] (%p1363_p3)  ;;  %v199_v1 = vld [vmem:[%s181_s27 + $0x8] sm:$0xf] (%p1363_p3) }
  0x12   : > { %198 = vst [vmem:[%s175_s28] sm:$0xf] (%p1363_p3), %v197_v0  ;;  %200 = vst [vmem:[%s175_s28 + $0x4] sm:$0xf] (%p1363_p3), %v199_v1 }
  0x15 PF: > { %227 = sbr.rel (!%p1363_p3) target bundleno = 28 (0x1c), region = 65  ;;  %s229_s29 = sand.u32 (%p1363_p3), 1, %s1291_s13  }
  0x16   : > { %s1125_s30 = sshll.u32 (%p1363_p3), %s1299_s15, 4  ;;  %s1101_s4 = sshll.u32 (%p1363_p3), %s229_s29, 3 }
  0x17   : > { %s1015_s7 = scalar_lea.vmem (%p1363_p3), %s1544_s2, %s1125_s30  ;;  %s231_s8 = scalar_lea.vmem (%p1363_p3), [#allocation6], %s1101_s4 }
  0x18   : > { %v1104_v2 = vld [vmem:[%s1015_s7 + $0x4] sm:$0xf] (%p1363_p3)  ;;  %v1105_v3 = vld [vmem:[%s1015_s7 + $0xc] sm:$0xf] (%p1363_p3) }
  0x19   : > { %255 = vst [vmem:[%s231_s8] sm:$0xf] (%p1363_p3), %v1104_v2  ;;  %257 = vst [vmem:[%s231_s8 + $0x4] sm:$0xf] (%p1363_p3), %v1105_v3 }
  0x1c PF: > { %p1106_p6 = scmp.ge.s32.totalorder %s1303_s16, 1  ;;  %p283_p7 = scmp.lt.s32.totalorder %s1303_s16, 3 }
  0x1e   : > { %p284_p8 = pnand %p1106_p6, %p283_p7 }
  0x1f   : > { %s290_s9 = sand.u32 (!%p284_p8), 1, %s1287_s12   ;;  %vm363_vm0 = vcmask (!%p284_p8), 261120   ;;  %p333_p9 = scmp.lt.s32.totalorder (!%p284_p8), %s1295_s14, 1  ;;  %v1305_v4 = vmov (!%p284_p8), 0.0   ;;  %vm1306_vm1 = vmmov (!%p284_p8), 0   ;;  %vm354_vm2 = vcmask (!%p284_p8), 7168  }
  0x20   : > { %287 = sbr.rel (%p284_p8) target bundleno = 1486 (0x5ce), region = 106  ;;  %1142 = vmatprep.subr.bf16.mxu0 (!%p284_p8), %v1305_v4  ;;  %s1393_s10 = sshll.u32 (!%p284_p8), %s290_s9, 3  ;;  %364 = vst.msk [vmem:[#allocation4] sm:$0xff] (!%p284_p8), %vm363_vm0, %v1305_v4  ;;  %365 = vst.msk [vmem:[#allocation4 + $0x8] sm:$0xff] (!%p284_p8), %vm363_vm0, %v1305_v4  ;;  %1144 = vmatprep.mubr.msk.bf16.mxu0 (!%p284_p8), %vm1306_vm1, %v1305_v4  ;;  %v1307_v8 = vmov (!%p284_p8), -1e+30  }
  0x21   : > { %366 = vst.msk [vmem:[#allocation4 + $0x10] sm:$0xff] (!%p284_p8), %vm363_vm0, %v1305_v4  ;;  %367 = vst.msk [vmem:[#allocation4 + $0x18] sm:$0xff] (!%p284_p8), %vm363_vm0, %v1305_v4  ;;  %1148 = vmatprep.subr.bf16.mxu1 (!%p284_p8), %v1305_v4  ;;  %1150 = vmatprep.mubr.msk.bf16.mxu1 (!%p284_p8), %vm1306_vm1, %v1305_v4  ;;  %s292_s11 = scalar_lea.vmem (!%p284_p8), [#allocation5], %s1393_s10  ;;  %vm427_vm3 = vcmask (!%p284_p8), 130048   ;;  %v1308_v15 = vmov (!%p284_p8), 0   ;;  %s1309_s22 = smov (!%p284_p8), 96  }
  0x22   : > { %v1239_v5 = vld [vmem:[%s292_s11] sm:$0xff] (!%p284_p8)   ;;  %355 = vst.msk [vmem:[#allocation2] sm:$0xff] (!%p284_p8), %vm354_vm2, %v1307_v8  ;;  %356 = vst.msk [vmem:[#allocation2 + $0x8] sm:$0xff] (!%p284_p8), %vm354_vm2, %v1307_v8  ;;  %1237 = vset.pattern.permute.xlu0 (!%p284_p8), %v1308_v15  ;;  %1238 = vset.pattern.permute.xlu1 (!%p284_p8), %v1308_v15  ;;  %s1310_s23 = smov (!%p284_p8), 64   ;;  %s1311_s24 = smov (!%p284_p8), 32   ;;  %vm968_vm4 = vcmask (!%p284_p8), 523264  }
  0x23   : > { %v383_v6 = vsel (!%p284_p8), %vm363_vm0, %v1239_v5, 0  ;;  %357 = vst.msk [vmem:[#allocation2 + $0x10] sm:$0xff] (!%p284_p8), %vm354_vm2, %v1307_v8  ;;  %358 = vst.msk [vmem:[#allocation2 + $0x18] sm:$0xff] (!%p284_p8), %vm354_vm2, %v1307_v8  ;;  %516 = vrot.lane.b32.xlu1 (!%p284_p8), %v1239_v5, %s1309_s22  ;;  %s299_s25 = scalar_lea.vmem (!%p284_p8), [#allocation6], %s1393_s10  ;;  %vm970_vm5 = vcmask (!%p284_p8), 785408  }
  0x24   : > { %1143 = vmatpush3.bf16.xpose.msra.mxu0 (!%p284_p8), %v383_v6  ;;  %359 = vst.msk [vmem:[#allocation3] sm:$0xff] (!%p284_p8), %vm354_vm2, %v1305_v4  ;;  %360 = vst.msk [vmem:[#allocation3 + $0x8] sm:$0xff] (!%p284_p8), %vm354_vm2, %v1305_v4  ;;  %v1455_v21 = vld [vmem:[%s299_s25] sm:$0xff] (!%p284_p8)  }
  0x25   : > { %1160 = vmatprep.subr.bf16.mxu0 (!%p284_p8), %v1305_v4  ;;  %361 = vst.msk [vmem:[#allocation3 + $0x10] sm:$0xff] (!%p284_p8), %vm354_vm2, %v1305_v4  ;;  %362 = vst.msk [vmem:[#allocation3 + $0x18] sm:$0xff] (!%p284_p8), %vm354_vm2, %v1305_v4  ;;  %1149 = vmatpush3.bf16.msra.mxu1 (!%p284_p8), %v1455_v21 }
  0x26   : > { %1154 = vmatprep.subr.bf16.mxu1 (!%p284_p8), %v1305_v4 }
  0x27   : > { %s1554_s14 = smov (!%p333_p9, %s1295_s14), 1 }
  0x28   : > { %s1109_s12 = sshll.u32 %s1554_s14, 2 }
  0x29   : > { %s339_s20 = scalar_lea.vmem %s1542_s0, %s1109_s12  ;;  %v1444_v17 = vld [vmem:[#allocation2] sm:$0xff]  ;;  %v566_v58 = vld [vmem:[#allocation2 + $0x8] sm:$0xff]  ;;  %s348_s28 = scalar_lea.vmem %s1545_s3, %s1109_s12 }
  0x2a   : > { %v368_v7 = vld [vmem:[%s339_s20] sm:$0xf]  ;;  %v700_v62 = vld [vmem:[#allocation2 + $0x10] sm:$0xff]  ;;  %v834_v2 = vld [vmem:[#allocation2 + $0x18] sm:$0xff] }
  0x2b   : > { %1145 = vmatmul.mubr.msk.bf16.vlgmr.msra.gmra.mrb[0].mxu0 %vm363_vm0, %v368_v7  ;;  %v1115_v16 = vcombine.low %v368_v7, %v368_v7 }
  0x2c   : > { %1162 = vmatprep.mubr.msk.bf16.mxu0 %vm1306_vm1, %v1305_v4 }
  0x2d   : > { %514 = vrot.lane.b32.xlu1 %v1115_v16, %s1309_s22 }
  0x31   : > { %650 = vrot.lane.b32.xlu1 %v1239_v5, %s1310_s23 }
  0x35   : > { %648 = vrot.lane.b32.xlu1 %v1115_v16, %s1310_s23 }
  0x39   : > { %784 = vrot.lane.b32.xlu1 %v1239_v5, %s1311_s24 }
  0x3d   : > { %782 = vrot.lane.b32.xlu1 %v1115_v16, %s1311_s24 }
  0x95   : > { %v517_v25 = vpop.permute.xlu1 %516 }
  0x96   : > { %v522_v28 = vsel %vm363_vm0, %v517_v25, 0 }
  0x9f   : > { %v515_v26 = vpop.permute.xlu1 %514 }
  0xa3   : > { %v651_v30 = vpop.permute.xlu1 %650 }
  0xa4   : > { %v656_v32 = vsel %vm363_vm0, %v651_v30, 0 }
  0xa7   : > { %v649_v31 = vpop.permute.xlu1 %648 }
  0xab   : > { %v785_v33 = vpop.permute.xlu1 %784 }
  0xac   : > { %v790_v34 = vsel %vm363_vm0, %v785_v33, 0 }
  0xaf   : > { %v783_v35 = vpop.permute.xlu1 %782 }
  0xfe   : > { %v419_v9 = vpop.f32.mrb[0].mxu0 }
  0xff   : > { %v425_v10 = vmul.f32 0.17677669, %v419_v9  ;;  %v1146_v11 = vpop.f32.mrb[1].mxu0 }
 0x100   : > { %v422_v12 = vpop.f32.mrb[2].mxu0 }
 0x101   : > { %v1147_v13 = vpop.f32.mrb[3].mxu0  ;;  %v428_v14 = vsel %vm427_vm3, %v425_v10, -inf }
 0x102   : > { %429 = vmax.xlane.f32.xlu0 %v428_v14 }
 0x18f   : > { %v430_v18 = vpop.xlane.xlu0 %429 }
 0x190   : > { %v1447_v19 = vmax.f32 %v1444_v17, %v430_v18 }
 0x192   : > { %v432_v20 = vsub.f32 %v1444_v17, %v1447_v19  ;;  %510 = vst.msk [vmem:[#allocation2] sm:$0xff] %vm354_vm2, %v1447_v19  ;;  %437 = vperm.xlu0 %1237, %v1447_v19  }
 0x211   : > { %v438_v22 = vpop.permute.xlu0 %437 }
 0x212   : > { %v440_v23 = vsub.f32 %v425_v10, %v438_v22 }
 0x214   : > { %v441_v24 = vmul.f32 1.442695, %v440_v23 }
 0x216   : > { %1241 = vpow2.f32 %v441_v24 }
 0x220   : > { %v1459_v27 = vpop.eup %1241 }
 0x221   : > { %v451_v29 = vpack.c.bf16 %v1459_v27, %v1459_v27  ;;  %v445_v23 = vsel %vm427_vm3, %v1459_v27, 0.0 }
 0x223   : > { %1151 = vmatmul.mubr.msk.bf16.vlgmr.msra.gmra.mrb[0].mxu1 %vm427_vm3, %v451_v29 }
 0x224   : > { %1155 = vmatpush3.bf16.xpose.msra.mxu1 %v522_v28  ;;  %1156 = vmatprep.mubr.msk.bf16.mxu1 %vm1306_vm1, %v1305_v4 }
 0x225   : > { %1166 = vmatprep.subr.bf16.mxu1 %v1305_v4 }
 0x22b   : > { %1157 = vmatmul.mubr.msk.bf16.vlgmr.msra.gmra.mrb[4].mxu1 %vm363_vm0, %v515_v26 }
 0x22c   : > { %1167 = vmatpush3.bf16.xpose.msra.mxu1 %v656_v32  ;;  %1168 = vmatprep.mubr.msk.bf16.mxu1 %vm1306_vm1, %v1305_v4 }
 0x22d   : > { %1178 = vmatprep.subr.bf16.mxu1 %v1305_v4 }
 0x233   : > { %1169 = vmatmul.mubr.msk.bf16.vlgmr.msra.gmra.mrb[8].mxu1 %vm363_vm0, %v649_v31 }
 0x234   : > { %1179 = vmatpush3.bf16.xpose.msra.mxu1 %v790_v34  ;;  %1180 = vmatprep.mubr.msk.bf16.mxu1 %vm1306_vm1, %v1305_v4 }
 0x23b   : > { %1181 = vmatmul.mubr.msk.bf16.vlgmr.msra.gmra.mrb[12].mxu1 %vm363_vm0, %v783_v35  ;;  %v433_v35 = vmul.f32 1.442695, %v432_v20  ;;  %v717_v20 = vld [vmem:[#allocation3 + $0x10] sm:$0xff] }
 0x2f6   : > { %v1478_v36 = vpop.f32.mrb[0].mxu1 }
 0x2f7   : > { %v1152_v37 = vpop.f32.mrb[1].mxu1 }
 0x2f8   : > { %v498_v38 = vpop.f32.mrb[2].mxu1 }
 0x2f9   : > { %v1153_v39 = vpop.f32.mrb[3].mxu1 }
 0x2fe   : > { %v558_v40 = vpop.f32.mrb[4].mxu1 }
 0x2ff   : > { %v564_v41 = vmul.f32 0.17677669, %v558_v40  ;;  %v1158_v42 = vpop.f32.mrb[5].mxu1 }
 0x300   : > { %v561_v43 = vpop.f32.mrb[6].mxu1 }
 0x301   : > { %v1159_v44 = vpop.f32.mrb[7].mxu1  ;;  %v567_v45 = vsel %vm427_vm3, %v564_v41, -inf  ;;  %v443_v43 = vld [vmem:[#allocation3] sm:$0xff] }
 0x302   : > { %568 = vmax.xlane.f32.xlu1 %v567_v45 }
 0x306   : > { %v692_v46 = vpop.f32.mrb[8].mxu1 }
 0x307   : > { %v698_v47 = vmul.f32 0.17677669, %v692_v46  ;;  %v1170_v48 = vpop.f32.mrb[9].mxu1 }
 0x308   : > { %v695_v49 = vpop.f32.mrb[10].mxu1 }
 0x309   : > { %v1171_v50 = vpop.f32.mrb[11].mxu1  ;;  %v701_v51 = vsel %vm427_vm3, %v698_v47, -inf }
 0x30a   : > { %702 = vmax.xlane.f32.xlu0 %v701_v51  ;;  %v851_v50 = vld [vmem:[#allocation3 + $0x18] sm:$0xff] }
 0x30e   : > { %v826_v52 = vpop.f32.mrb[12].mxu1 }
 0x30f   : > { %v832_v53 = vmul.f32 0.17677669, %v826_v52  ;;  %v1182_v54 = vpop.f32.mrb[13].mxu1 }
 0x310   : > { %v829_v55 = vpop.f32.mrb[14].mxu1 }
 0x311   : > { %v1183_v56 = vpop.f32.mrb[15].mxu1  ;;  %v835_v57 = vsel %vm427_vm3, %v832_v53, -inf }
 0x312   : > { %836 = vmax.xlane.f32.xlu1 %v835_v57  ;;  %v501_v57 = vld [vmem:[#allocation4] sm:$0xff] }
 0x38f   : > { %v569_v59 = vpop.xlane.xlu1 %568 }
 0x390   : > { %v570_v60 = vmax.f32 %v566_v58, %v569_v59 }
 0x392   : > { %v571_v61 = vsub.f32 %v566_v58, %v570_v60  ;;  %647 = vst.msk [vmem:[#allocation2 + $0x8] sm:$0xff] %vm354_vm2, %v570_v60  ;;  %576 = vperm.xlu1 %1238, %v570_v60  }
 0x394   : > { %v572_v25 = vmul.f32 1.442695, %v571_v61 }
 0x397   : > { %v703_v63 = vpop.xlane.xlu0 %702 }
 0x398   : > { %v704_v0 = vmax.f32 %v700_v62, %v703_v63 }
 0x39a   : > { %v705_v1 = vsub.f32 %v700_v62, %v704_v0  ;;  %781 = vst.msk [vmem:[#allocation2 + $0x10] sm:$0xff] %vm354_vm2, %v704_v0  ;;  %710 = vperm.xlu0 %1237, %v704_v0  }
 0x39c   : > { %v706_v27 = vmul.f32 1.442695, %v705_v1  ;;  %v638_v1 = vld [vmem:[#allocation4 + $0x8] sm:$0xff] }
 0x39f   : > { %v837_v3 = vpop.xlane.xlu1 %836 }
 0x3a0   : > { %v838_v5 = vmax.f32 %v834_v2, %v837_v3 }
 0x3a2   : > { %v839_v6 = vsub.f32 %v834_v2, %v838_v5  ;;  %915 = vst.msk [vmem:[#allocation2 + $0x18] sm:$0xff] %vm354_vm2, %v838_v5  ;;  %844 = vperm.xlu1 %1238, %v838_v5  }
 0x3a4   : > { %v840_v38 = vmul.f32 1.442695, %v839_v6 }
 0x3a6   : > { %591 = vrot.lane.b32.xlu1 %v1455_v21, %s1309_s22 }
 0x3aa   : > { %725 = vrot.lane.b32.xlu1 %v1455_v21, %s1310_s23 }
 0x3ae   : > { %859 = vrot.lane.b32.xlu1 %v1455_v21, %s1311_s24 }
 0x411   : > { %v577_v7 = vpop.permute.xlu1 %576 }
 0x412   : > { %v579_v8 = vsub.f32 %v564_v41, %v577_v7  ;;  %v583_v41 = vld [vmem:[#allocation3 + $0x8] sm:$0xff] }
 0x414   : > { %v580_v9 = vmul.f32 1.442695, %v579_v8 }
 0x416   : > { %1243 = vpow2.f32 %v580_v9 }
 0x419   : > { %v711_v10 = vpop.permute.xlu0 %710 }
 0x41a   : > { %v713_v11 = vsub.f32 %v698_v47, %v711_v10  ;;  %v772_v10 = vld [vmem:[#allocation4 + $0x10] sm:$0xff] }
 0x41c   : > { %v714_v12 = vmul.f32 1.442695, %v713_v11 }
 0x41e   : > { %1245 = vpow2.f32 %v714_v12 }
 0x420   : > { %v1244_v13 = vpop.eup %1243 }
 0x421   : > { %v845_v14 = vpop.permute.xlu1 %844  ;;  %v585_v15 = vsel %vm427_vm3, %v1244_v13, 0.0  ;;  %v590_v21 = vpack.c.bf16 %v1244_v13, %v1244_v13 }
 0x422   : > { %v847_v16 = vsub.f32 %v832_v53, %v845_v14  ;;  %586 = vadd.xlane.f32.xlu1 %v585_v15 }
 0x424   : > { %v848_v18 = vmul.f32 1.442695, %v847_v16 }
 0x425   : > { %v592_v22 = vpop.permute.xlu1 %591 }
 0x426   : > { %1247 = vpow2.f32 %v848_v18  ;;  %1161 = vmatpush3.bf16.msra.mxu0 %v592_v22  ;;  %446 = vadd.xlane.f32.xlu1 %v445_v23  ;;  %v906_v18 = vld [vmem:[#allocation4 + $0x18] sm:$0xff] }
 0x427   : > { %1172 = vmatprep.subr.bf16.mxu0 %v1305_v4  ;;  %1249 = vpow2.f32 %v572_v25 }
 0x428   : > { %v1246_v24 = vpop.eup %1245  ;;  %1251 = vpow2.f32 %v706_v27 }
 0x429   : > { %1163 = vmatmul.mubr.msk.bf16.vlgmr.msra.gmra.mrb[4].mxu0 %vm427_vm3, %v590_v21  ;;  %v719_v26 = vsel %vm427_vm3, %v1246_v24, 0.0  ;;  %v726_v28 = vpop.permute.xlu1 %725  ;;  %v724_v29 = vpack.c.bf16 %v1246_v24, %v1246_v24  ;;  %1253 = vpow2.f32 %v433_v35 }
 0x42a   : > { %720 = vadd.xlane.f32.xlu0 %v719_v26  ;;  %1173 = vmatpush3.bf16.msra.mxu0 %v726_v28  ;;  %1255 = vpow2.f32 %v840_v38 }
 0x42b   : > { %1174 = vmatprep.mubr.msk.bf16.mxu0 %vm1306_vm1, %v1305_v4  ;;  %1184 = vmatprep.subr.bf16.mxu0 %v1305_v4 }
 0x42d   : > { %v860_v30 = vpop.permute.xlu1 %859 }
 0x430   : > { %v1248_v31 = vpop.eup %1247 }
 0x431   : > { %1175 = vmatmul.mubr.msk.bf16.vlgmr.msra.gmra.mrb[8].mxu0 %vm427_vm3, %v724_v29  ;;  %v853_v32 = vsel %vm427_vm3, %v1248_v31, 0.0  ;;  %v1250_v33 = vpop.eup %1249  ;;  %v858_v34 = vpack.c.bf16 %v1248_v31, %v1248_v31 }
 0x432   : > { %854 = vadd.xlane.f32.xlu0 %v853_v32  ;;  %1185 = vmatpush3.bf16.msra.mxu0 %v860_v30  ;;  %v1252_v37 = vpop.eup %1251 }
 0x433   : > { %1186 = vmatprep.mubr.msk.bf16.mxu0 %vm1306_vm1, %v1305_v4  ;;  %v1254_v39 = vpop.eup %1253  ;;  %v584_v4 = vmul.f32 %v1250_v33, %v583_v41  ;;  %v718_v46 = vmul.f32 %v1252_v37, %v717_v20 }
 0x434   : > { %v1256_v40 = vpop.eup %1255  ;;  %v444_v17 = vmul.f32 %v1254_v39, %v443_v43 }
 0x435   : > { %v852_v52 = vmul.f32 %v1256_v40, %v851_v50 }
 0x437   : > { %641 = vperm.xlu1 %1238, %v1250_v33  }
 0x439   : > { %1187 = vmatmul.mubr.msk.bf16.vlgmr.msra.gmra.mrb[12].mxu0 %vm427_vm3, %v858_v34 }
 0x43b   : > { %775 = vperm.xlu1 %1238, %v1252_v37  }
 0x448   : > { %504 = vperm.xlu0 %1237, %v1254_v39  }
 0x44c   : > { %909 = vperm.xlu0 %1237, %v1256_v40  }
 0x4af   : > { %v587_v42 = vpop.xlane.xlu1 %586 }
 0x4b0   : > { %v588_v44 = vadd.f32 %v587_v42, %v584_v4 }
 0x4b2   : > { %589 = vst.msk [vmem:[#allocation3 + $0x8] sm:$0xff] %vm354_vm2, %v588_v44 }
 0x4b3   : > { %v447_v19 = vpop.xlane.xlu1 %446 }
 0x4b4   : > { %v448_v45 = vadd.f32 %v447_v19, %v444_v17 }
 0x4b6   : > { %450 = vst.msk [vmem:[#allocation3] sm:$0xff] %vm354_vm2, %v448_v45 }
 0x4b7   : > { %v721_v47 = vpop.xlane.xlu0 %720  ;;  %v642_v2 = vpop.permute.xlu1 %641 }
 0x4b8   : > { %v722_v48 = vadd.f32 %v721_v47, %v718_v46  ;;  %v644_v3 = vmul.f32 %v642_v2, %v638_v1 }
 0x4b9   : > { %v928_v49 = vld [vmem:[#allocation3 + $0x8] sm:$0xff] }
 0x4ba   : > { %723 = vst.msk [vmem:[#allocation3 + $0x10] sm:$0xff] %vm354_vm2, %v722_v48  ;;  %1257 = vrcp.f32 %v928_v49 }
 0x4bb   : > { %v776_v11 = vpop.permute.xlu1 %775 }
 0x4bd   : > { %v919_v51 = vld [vmem:[#allocation3] sm:$0xff] }
 0x4be   : > { %1259 = vrcp.f32 %v919_v51 }
 0x4bf   : > { %v855_v53 = vpop.xlane.xlu0 %854 }
 0x4c0   : > { %v856_v54 = vadd.f32 %v855_v53, %v852_v52 }
 0x4c1   : > { %v937_v55 = vld [vmem:[#allocation3 + $0x10] sm:$0xff] }
 0x4c2   : > { %857 = vst.msk [vmem:[#allocation3 + $0x18] sm:$0xff] %vm354_vm2, %v856_v54  ;;  %1261 = vrcp.f32 %v937_v55 }
 0x4c4   : > { %v1258_v56 = vpop.eup %1257 }
 0x4c5   : > { %933 = vperm.xlu0 %1237, %v1258_v56  }
 0x4c7   : > { %v505_v58 = vpop.permute.xlu0 %504 }
 0x4c8   : > { %v1260_v59 = vpop.eup %1259  ;;  %v507_v60 = vmul.f32 %v505_v58, %v501_v57 }
 0x4c9   : > { %924 = vperm.xlu1 %1238, %v1260_v59   ;;  %v946_v61 = vld [vmem:[#allocation3 + $0x18] sm:$0xff] }
 0x4ca   : > { %v508_v62 = vadd.f32 %v507_v60, %v1478_v36  ;;  %1263 = vrcp.f32 %v946_v61  ;;  %v778_v36 = vmul.f32 %v776_v11, %v772_v10 }
 0x4cb   : > { %v910_v22 = vpop.permute.xlu0 %909 }
 0x4cc   : > { %v1262_v63 = vpop.eup %1261  ;;  %509 = vst.msk [vmem:[#allocation4] sm:$0xff] %vm363_vm0, %v508_v62  ;;  %v912_v23 = vmul.f32 %v910_v22, %v906_v18 }
 0x4cd   : > { %942 = vperm.xlu1 %1238, %v1262_v63  }
 0x4d3   : > { %v921_v39 = vld [vmem:[#allocation4] sm:$0xff] }
 0x4d4   : > { %v1264_v0 = vpop.eup %1263 }
 0x4d5   : > { %951 = vperm.xlu0 %1237, %v1264_v0  }
 0x4fc   : > { %v631_v5 = vpop.f32.mrb[4].mxu0 }
 0x4fd   : > { %v645_v6 = vadd.f32 %v644_v3, %v631_v5  ;;  %v1164_v7 = vpop.f32.mrb[5].mxu0 }
 0x4fe   : > { %v634_v8 = vpop.f32.mrb[6].mxu0 }
 0x4ff   : > { %646 = vst.msk [vmem:[#allocation4 + $0x8] sm:$0xff] %vm363_vm0, %v645_v6  ;;  %v1165_v9 = vpop.f32.mrb[7].mxu0 }
 0x504   : > { %v765_v12 = vpop.f32.mrb[8].mxu0 }
 0x505   : > { %v779_v13 = vadd.f32 %v778_v36, %v765_v12  ;;  %v1176_v14 = vpop.f32.mrb[9].mxu0 }
 0x506   : > { %v768_v15 = vpop.f32.mrb[10].mxu0  ;;  %v930_v29 = vld [vmem:[#allocation4 + $0x8] sm:$0xff] }
 0x507   : > { %780 = vst.msk [vmem:[#allocation4 + $0x10] sm:$0xff] %vm363_vm0, %v779_v13  ;;  %v1177_v16 = vpop.f32.mrb[11].mxu0 }
 0x50c   : > { %v899_v21 = vpop.f32.mrb[12].mxu0 }
 0x50d   : > { %v913_v24 = vadd.f32 %v912_v23, %v899_v21  ;;  %v1188_v25 = vpop.f32.mrb[13].mxu0 }
 0x50e   : > { %v902_v26 = vpop.f32.mrb[14].mxu0  ;;  %v939_v33 = vld [vmem:[#allocation4 + $0x10] sm:$0xff] }
 0x50f   : > { %914 = vst.msk [vmem:[#allocation4 + $0x18] sm:$0xff] %vm363_vm0, %v913_v24  ;;  %v1189_v28 = vpop.f32.mrb[15].mxu0 }
 0x516   : > { %v948_v37 = vld [vmem:[#allocation4 + $0x18] sm:$0xff] }
 0x544   : > { %v934_v27 = vpop.permute.xlu0 %933 }
 0x545   : > { %v936_v30 = vmul.f32 %v934_v27, %v930_v29 }
 0x547   : > { %956 = vrot.lane.b32.xlu1 %v936_v30, %s1311_s24 }
 0x548   : > { %v925_v31 = vpop.permute.xlu1 %924 }
 0x549   : > { %v927_v41 = vmul.f32 %v925_v31, %v921_v39 }
 0x54c   : > { %v943_v32 = vpop.permute.xlu1 %942 }
 0x54d   : > { %v945_v34 = vmul.f32 %v943_v32, %v939_v33 }
 0x54f   : > { %960 = vrot.lane.b32.xlu0 %v945_v34, %s1310_s23 }
 0x554   : > { %v952_v35 = vpop.permute.xlu0 %951 }
 0x555   : > { %v954_v38 = vmul.f32 %v952_v35, %v948_v37 }
 0x557   : > { %964 = vrot.lane.b32.xlu1 %v954_v38, %s1309_s22 }
 0x5b9   : > { %v957_v40 = vpop.permute.xlu1 %956 }
 0x5ba   : > { %v967_v42 = vsel %vm363_vm0, %v927_v41, %v957_v40 }
 0x5c1   : > { %v961_v4 = vpop.permute.xlu0 %960 }
 0x5c2   : > { %v969_v43 = vsel %vm968_vm4, %v967_v42, %v961_v4 }
 0x5c9   : > { %v965_v44 = vpop.permute.xlu1 %964 }
 0x5ca   : > { %v971_v17 = vsel %vm970_vm5, %v969_v43, %v965_v44 }
 0x5cb   : > { %v972_v19 = vpack.c.bf16 %v971_v17, %v971_v17 }
 0x5cd   : > { %973 = vst [vmem:[%s348_s28] sm:$0xf] %v972_v19 }
 0x5ce PF: > { %s13_s16 = sadd.s32 1, %s1303_s16   ;;  %s1547_s12 = smov %s1291_s13 }
 0x5cf   : > { %p10_p10 = scmp.ge.s32.totalorder %s13_s16, 4   ;;  %s1548_s13 = smov %s1371_s21 }
 0x5d0   : > { %s1549_s14 = smov %s1299_s15  ;;  %s1550_s15 = smov %s1552_s17 }
 0x5d1   :  { %12 = sbr.rel (!%p10_p10) target bundleno = 3 (0x3), region = 177 }

// kernel: encoder_decoder_forward.26
= control target key start
LH: loop header
LB: loop body
LE: loop exit
PB: predicated region body
PF: predicated region fallthrough
CT: control target
= control target key end

     0   :  { %v558_v1 = vmov 0   ;;  %v64_v34 = vlaneseq  ;;  %s713_s1 = inlined_call_operand.vmem [shape: bf16[128,256], index: 1, kind: input, shape index: {}]   ;;  %s714_s3 = inlined_call_operand.vmem [shape: bf16[256,128], index: 3, kind: input, shape index: {}]   ;;  %s715_s0 = inlined_call_operand.vmem [shape: bf16[16,128], index: 0, kind: input, shape index: {}]   ;;  %s716_s2 = inlined_call_operand.vmem [shape: f32[1,256], index: 2, kind: input, shape index: {}]   ;;  %s717_s4 = inlined_call_operand.vmem [shape: f32[1,128], index: 4, kind: input, shape index: {}]   ;;  %s718_s5 = inlined_call_operand.vmem [shape: f32[1,128], index: 5, kind: input, shape index: {}]   ;;  %s719_s6 = inlined_call_operand.vmem [shape: f32[1,128], index: 6, kind: input, shape index: {}]   ;;  %s720_s7 = inlined_call_operand.vmem [shape: bf16[16,128], index: 7, kind: output, shape index: {}]  }
   0x1   :  { %v512_v0 = vld [vmem:[%s713_s1 + $0x4] ss:$8 sps:$4 sm:$0xff]   ;;  %192 = vmatprep.mubr.bf16.mxu0 %v558_v1  ;;  %v514_v2 = vld [vmem:[%s713_s1] ss:$8 sps:$4 sm:$0xff]   ;;  %v515_v3 = vld [vmem:[%s713_s1 + $0x14] ss:$8 sps:$4 sm:$0xff]  }
   0x2   :  { %160 = vmatprep.subr.bf16.mxu0 %v512_v0  ;;  %v517_v4 = vld [vmem:[%s713_s1 + $0x10] ss:$8 sps:$4 sm:$0xff]   ;;  %v518_v5 = vld [vmem:[%s713_s1 + $0x24] ss:$8 sps:$4 sm:$0xff]   ;;  %v520_v6 = vld [vmem:[%s713_s1 + $0x20] ss:$8 sps:$4 sm:$0xff]  }
   0x3   :  { %161 = vmatpush1.bf16.msra.mxu0 %v514_v2  ;;  %v521_v7 = vld [vmem:[%s713_s1 + $0x34] ss:$8 sps:$4 sm:$0xff]   ;;  %v523_v8 = vld [vmem:[%s713_s1 + $0x30] ss:$8 sps:$4 sm:$0xff]   ;;  %v524_v9 = vld [vmem:[%s713_s1 + $0x44] ss:$8 sps:$4 sm:$0xff]  }
   0x4   :  { %162 = vmatprep.subr.bf16.mxu0 %v515_v3  ;;  %v537_v10 = vld [vmem:[%s714_s3 + $0x40] sm:$0xff]   ;;  %v539_v13 = vld [vmem:[%s714_s3 + $0x48] sm:$0xff]   ;;  %v541_v15 = vld [vmem:[%s714_s3 + $0x50] sm:$0xff]   ;;  %v65_v35 = vshrl.u32 %v64_v34, 7 }
   0x5   :  { %v538_v11 = vld [vmem:[%s714_s3] sm:$0xff]   ;;  %489 = vmatprep.subr.bf16.mxu1 %v537_v10  ;;  %v540_v14 = vld [vmem:[%s714_s3 + $0x8] sm:$0xff]   ;;  %v527_v16 = vld [vmem:[%s713_s1 + $0x54] ss:$8 sps:$4 sm:$0xff]  }
   0x6   :  { %v526_v12 = vld [vmem:[%s713_s1 + $0x40] ss:$8 sps:$4 sm:$0xff]   ;;  %490 = vmatpush3.bf16.msra.mxu1 %v538_v11  ;;  %v529_v17 = vld [vmem:[%s713_s1 + $0x50] ss:$8 sps:$4 sm:$0xff]   ;;  %v530_v20 = vld [vmem:[%s713_s1 + $0x64] ss:$8 sps:$4 sm:$0xff]  }
   0x7   :  { %163 = vmatpush1.bf16.msra.mxu0 %v517_v4  ;;  %491 = vmatprep.subr.bf16.mxu1 %v539_v13  ;;  %v542_v18 = vld [vmem:[%s714_s3 + $0x10] sm:$0xff]   ;;  %v543_v19 = vld [vmem:[%s714_s3 + $0x58] sm:$0xff]   ;;  %v532_v21 = vld [vmem:[%s713_s1 + $0x60] ss:$8 sps:$4 sm:$0xff]   ;;  %v66_v36 = vsub.s32 0, %v65_v35  ;;  %v70_v38 = vsub.s32 1, %v65_v35 }
   0x8   :  { %164 = vmatprep.subr.bf16.mxu0 %v518_v5  ;;  %v544_v22 = vld [vmem:[%s714_s3 + $0x18] sm:$0xff]   ;;  %v545_v24 = vld [vmem:[%s714_s3 + $0x60] sm:$0xff]   ;;  %v547_v28 = vld [vmem:[%s714_s3 + $0x68] sm:$0xff]  }
   0x9   :  { %v533_v23 = vld [vmem:[%s713_s1 + $0x74] ss:$8 sps:$4 sm:$0xff]   ;;  %v546_v25 = vld [vmem:[%s714_s3 + $0x20] sm:$0xff]   ;;  %v535_v26 = vld [vmem:[%s713_s1 + $0x70] ss:$8 sps:$4 sm:$0xff]  }
   0xa   :  { %492 = vmatpush3.bf16.msra.mxu1 %v540_v14  ;;  %v27_v27 = vld [vmem:[%s715_s0] sm:$0xff]   ;;  %v548_v29 = vld [vmem:[%s714_s3 + $0x28] sm:$0xff]   ;;  %v549_v30 = vld [vmem:[%s714_s3 + $0x70] sm:$0xff]  }
   0xb   :  { %165 = vmatpush1.bf16.msra.mxu0 %v520_v6  ;;  %493 = vmatprep.subr.bf16.mxu1 %v541_v15  ;;  %v550_v31 = vld [vmem:[%s714_s3 + $0x30] sm:$0xff]   ;;  %v551_v32 = vld [vmem:[%s714_s3 + $0x78] sm:$0xff]   ;;  %v62_v37 = vld [vmem:[%s716_s2] sm:$0x3]  ;;  %v33_v55 = vunpack.c.l.bf16 %v27_v27  ;;  %v34_v59 = vunpack.c.h.bf16 %v27_v27 }
   0xc   :  { %166 = vmatprep.subr.bf16.mxu0 %v521_v7  ;;  %v552_v33 = vld [vmem:[%s714_s3 + $0x38] sm:$0xff]   ;;  %v67_v39 = vrot.slane %v62_v37, %v66_v36  ;;  %v71_v40 = vrot.slane %v62_v37, %v70_v38  ;;  %v444_v56 = vld [vmem:[%s717_s4] ss:$0 sm:$0xff] }
   0xd   :  { %v42_v58 = vadd.f32 %v444_v56, %v33_v55  ;;  %v43_v2 = vadd.f32 %v444_v56, %v34_v59 }
   0xe   :  { %494 = vmatpush3.bf16.msra.mxu1 %v542_v18 }
   0xf   :  { %167 = vmatpush1.bf16.msra.mxu0 %v523_v8  ;;  %495 = vmatprep.subr.bf16.mxu1 %v543_v19 }
  0x10   :  { %168 = vmatprep.subr.bf16.mxu0 %v524_v9 }
  0x12   :  { %496 = vmatpush3.bf16.msra.mxu1 %v544_v22 }
  0x13   :  { %169 = vmatpush1.bf16.msra.mxu0 %v526_v12  ;;  %497 = vmatprep.subr.bf16.mxu1 %v545_v24  ;;  %v479_v24 = vld [vmem:[%s719_s6] ss:$0 sm:$0xff] }
  0x14   :  { %170 = vmatprep.subr.bf16.mxu0 %v527_v16 }
  0x16   :  { %498 = vmatpush3.bf16.msra.mxu1 %v546_v25 }
  0x17   :  { %171 = vmatpush1.bf16.msra.mxu0 %v529_v17  ;;  %499 = vmatprep.subr.bf16.mxu1 %v547_v28 }
  0x18   :  { %172 = vmatprep.subr.bf16.mxu0 %v530_v20  ;;  %v478_v20 = vld [vmem:[%s718_s5] ss:$0 sm:$0xff] }
  0x1a   :  { %500 = vmatpush3.bf16.msra.mxu1 %v548_v29 }
  0x1b   :  { %173 = vmatpush1.bf16.msra.mxu0 %v532_v21  ;;  %501 = vmatprep.subr.bf16.mxu1 %v549_v30 }
  0x1c   :  { %174 = vmatprep.subr.bf16.mxu0 %v533_v23 }
  0x1e   :  { %502 = vmatpush3.bf16.msra.mxu1 %v550_v31 }
  0x1f   :  { %175 = vmatpush1.bf16.msra.mxu0 %v535_v26  ;;  %503 = vmatprep.subr.bf16.mxu1 %v551_v32 }
  0x22   :  { %193 = vmatmul.mubr.bf16.vlgmr.msra.gmra.mrb[0].mxu0 %v27_v27  ;;  %504 = vmatpush3.bf16.msra.mxu1 %v552_v33 }
  0xf5   :  { %v194_v41 = vpop.f32.mrb[0].mxu0 }
  0xf6   :  { %v195_v42 = vadd.f32 %v194_v41, %v67_v39  ;;  %v196_v43 = vpop.f32.mrb[1].mxu0 }
  0xf7   :  { %v197_v44 = vadd.f32 %v196_v43, %v71_v40  ;;  %v198_v45 = vpop.f32.mrb[2].mxu0 }
  0xf8   :  { %v199_v46 = vadd.f32 %v198_v45, %v67_v39  ;;  %v200_v47 = vpop.f32.mrb[3].mxu0  ;;  %v203_v49 = vmax.f32 %v195_v42, 0.0 }
  0xf9   :  { %v201_v48 = vadd.f32 %v200_v47, %v71_v40  ;;  %v204_v51 = vmax.f32 %v197_v44, 0.0 }
  0xfa   :  { %v205_v50 = vmax.f32 %v199_v46, 0.0 }
  0xfb   :  { %v206_v52 = vmax.f32 %v201_v48, 0.0 }
  0xfc   :  { %v209_v53 = vpack.c.bf16 %v205_v50, %v203_v49 }
  0xfd   :  { %v210_v54 = vpack.c.bf16 %v206_v52, %v204_v51 }
  0xff   :  { %371 = vmatprep.mubr.bf16.mxu1 %v210_v54 }
 0x100   :  { %372 = vmatmul.mubr.bf16.vlgmr.msra.gmra.mrb[0].mxu1 %v209_v53 }
 0x1d3   :  { %v505_v57 = vpop.f32.mrb[0].mxu1 }
 0x1d4   :  { %v506_v60 = vpop.f32.mrb[1].mxu1 }
 0x1d5   :  { %v507_v61 = vadd.f32 %v506_v60, %v505_v57  ;;  %v508_v62 = vpop.f32.mrb[2].mxu1 }
 0x1d6   :  { %v509_v63 = vpop.f32.mrb[3].mxu1 }
 0x1d7   :  { %v510_v0 = vadd.f32 %v509_v63, %v508_v62  ;;  %v380_v1 = vadd.f32 %v507_v61, %v42_v58 }
 0x1d9   :  { %389 = vadd.xlane.f32.xlu0 %v380_v1  ;;  %v381_v3 = vadd.f32 %v510_v0, %v43_v2 }
 0x1dd   :  { %391 = vadd.xlane.f32.xlu0 %v381_v3 }
 0x266   :  { %v390_v4 = vpop.xlane.xlu0 %389 }
 0x267   :  { %v394_v5 = vmul.f32 0.0078125, %v390_v4 }
 0x269   :  { %v396_v6 = vsub.f32 %v380_v1, %v394_v5 }
 0x26a   :  { %v392_v7 = vpop.xlane.xlu0 %391 }
 0x26b   :  { %v395_v8 = vmul.f32 0.0078125, %v392_v7  ;;  %v398_v9 = vmul.f32 %v396_v6, %v396_v6 }
 0x26d   :  { %v397_v10 = vsub.f32 %v381_v3, %v395_v8  ;;  %400 = vadd.xlane.f32.xlu1 %v398_v9 }
 0x26f   :  { %v399_v11 = vmul.f32 %v397_v10, %v397_v10 }
 0x271   :  { %402 = vadd.xlane.f32.xlu1 %v399_v11 }
 0x2fa   :  { %v401_v12 = vpop.xlane.xlu1 %400 }
 0x2fb   :  { %v404_v13 = vmul.f32 0.0078125, %v401_v12 }
 0x2fd   :  { %v406_v14 = vadd.f32 1e-05, %v404_v13 }
 0x2fe   :  { %v403_v15 = vpop.xlane.xlu1 %402 }
 0x2ff   :  { %554 = vrsqrt.f32 %v406_v14  ;;  %v405_v16 = vmul.f32 0.0078125, %v403_v15 }
 0x301   :  { %v407_v17 = vadd.f32 1e-05, %v405_v16 }
 0x303   :  { %556 = vrsqrt.f32 %v407_v17 }
 0x309   :  { %v555_v18 = vpop.eup %554 }
 0x30a   :  { %v410_v19 = vmul.f32 %v555_v18, %v396_v6 }
 0x30c   :  { %v419_v22 = vmul.f32 %v478_v20, %v410_v19 }
 0x30d   :  { %v557_v21 = vpop.eup %556 }
 0x30e   :  { %v411_v23 = vmul.f32 %v557_v21, %v397_v10  ;;  %v428_v26 = vadd.f32 %v479_v24, %v419_v22 }
 0x310   :  { %v420_v25 = vmul.f32 %v478_v20, %v411_v23 }
 0x312   :  { %v429_v27 = vadd.f32 %v479_v24, %v420_v25 }
 0x314   :  { %v487_v28 = vpack.c.bf16 %v429_v27, %v428_v26 }
 0x316   :  { %488 = vst [vmem:[%s720_s7] sm:$0xff] %v487_v28  }

</bundles_post_ra>
